<compile_context>
chip_gen: v6e
topology: v6e:2x2x1
jax: 0.10.0
libtpu: 0.0.40
codegen_flags: <defaults>
</compile_context>

<pallas_src>
import jax
import jax.numpy as jnp
import numpy as np
from jax.experimental import pallas as pl
from jax.experimental.pallas import tpu as pltpu

K_NB = 27          # 3x3x3 neighbourhood
K3 = 3 * K_NB      # 81 neighbourhood-coordinate channels


# -----------------------------------------------------------------------------
# small helpers
# -----------------------------------------------------------------------------
def _round_up(x, m):
    return ((x + m - 1) // m) * m


def _dtype_bytes(dtype):
    return jnp.dtype(dtype).itemsize


def _tile_bytes(rows, cols, dtype):
    """f32/bf16 VMEM footprint of a (rows, cols) tile after (sublane, 128) padding."""
    isz = _dtype_bytes(dtype)
    sub = max(8, 32 // isz)                       # 8 sublanes for f32, 16 for bf16
    return _round_up(max(int(rows), 1), sub) * _round_up(max(int(cols), 1), 128) * isz


def _vmem_budget_bytes():
    """Generation-aware VMEM budget (review: ~48 MiB on v7x, 64-96 MiB on v5e/v6e)."""
    try:
        cap = int(pltpu.get_tpu_info().vmem_capacity_bytes)
    except Exception:
        cap = 64 << 20                            # conservative: v7x per-TensorCore VMEM
    return int(min(max(cap * 3 // 4, 16 << 20), 96 << 20))


def _choose_tile_n(n, batch, stream_row_bytes, fixed_bytes, budget, max_tile=1024):
    """Largest multiple-of-8 vertex tile whose double-buffered streams + resident weights
    fit the VMEM budget; keep >= 2 grid steps so both v7x TensorCores get work."""
    cap = max(budget - fixed_bytes, 1 << 20)
    tn = cap // (2 * max(stream_row_bytes, 1))
    tn = int(min(tn, max_tile, _round_up(n, 8)))
    tn = max(8, (tn // 8) * 8)
    if batch * ((n + tn - 1) // tn) < 2 and n >= 16:
        tn = max(8, _round_up((n + 1) // 2, 8))
    return tn


def _vmem_limit(need, budget):
    return int(max(min(budget, 2 * need + (4 << 20)), need + (4 << 20)))


# -----------------------------------------------------------------------------
# Plain-JAX glue: trilinear grid_sample, padding_mode='border', align_corners=True.
# Channels-last so the gather lands directly in (B, M, C); the 8 trilinear corners are
# stacked into ONE gather + one weighted reduction (perf review item).
# -----------------------------------------------------------------------------
def grid_sample_3d_cl(vol_cl, grid, out_dtype=jnp.float32):
    """vol_cl: (B, D, H, W, C); grid: (B, M, 3) with (x, y, z) ~[-1, 1]. Returns (B, M, C)."""
    B, D, H, W, C = vol_cl.shape
    M = grid.shape[1]
    g = grid.astype(jnp.float32)
    x, y, z = g[..., 0], g[..., 1], g[..., 2]
    ix = jnp.clip((x + 1.0) * 0.5 * (W - 1), 0.0, W - 1)
    iy = jnp.clip((y + 1.0) * 0.5 * (H - 1), 0.0, H - 1)
    iz = jnp.clip((z + 1.0) * 0.5 * (D - 1), 0.0, D - 1)
    x0f, y0f, z0f = jnp.floor(ix), jnp.floor(iy), jnp.floor(iz)
    tx, ty, tz = ix - x0f, iy - y0f, iz - z0f
    x0 = x0f.astype(jnp.int32)
    y0 = y0f.astype(jnp.int32)
    z0 = z0f.astype(jnp.int32)
    x1 = jnp.minimum(x0 + 1, W - 1)
    y1 = jnp.minimum(y0 + 1, H - 1)
    z1 = jnp.minimum(z0 + 1, D - 1)

    xc = jnp.stack([x0, x1], -1)                  # (B, M, 2)
    yc = jnp.stack([y0, y1], -1)
    zc = jnp.stack([z0, z1], -1)
    wx = jnp.stack([1.0 - tx, tx], -1)
    wy = jnp.stack([1.0 - ty, ty], -1)
    wz = jnp.stack([1.0 - tz, tz], -1)

    flat = ((zc[..., :, None, None] * H + yc[..., None, :, None]) * W
            + xc[..., None, None, :]).reshape(B, M * 8)                       # (B, 8M)
    wgt = (wz[..., :, None, None] * wy[..., None, :, None]
           * wx[..., None, None, :]).reshape(B, M, 8)                         # (B, M, 8)

    vol_flat = vol_cl.reshape(B, D * H * W, C)
    gathered = jax.vmap(lambda vf, fi: jnp.take(vf, fi, axis=0))(vol_flat, flat)
    gathered = gathered.reshape(B, M, 8, C).astype(jnp.float32)
    out = (gathered * wgt[..., None]).sum(axis=2)                             # (B, M, C)
    return out.astype(out_dtype)


# -----------------------------------------------------------------------------
# Pallas kernel 1: fused shift_delta (Conv1d k=1) + zero neighbour-0 + add verts
#   nb81[n, 3k+d] = v[n, d] + delta[n, 3k+d]   (delta for k=0 zeroed via the weights)
# -----------------------------------------------------------------------------
def nb_coords_kernel(feat_ref, v_ref, wsd_ref, wb_ref, bsd_ref, o_ref):
    # feat: (TN, C), v: (TN, 3) f32, wsd: (C, 81), wb: (3, 81) f32, bsd: (1, 81) f32
    nb = jnp.dot(feat_ref[...], wsd_ref[...], preferred_element_type=jnp.float32)
    v = v_ref[...]
    wb = wb_ref[...]
    # vertex broadcast as three exact f32 rank-1 VPU updates (no matmul rounding on coords)
    nb = nb + v[:, 0:1] * wb[0:1, :]
    nb = nb + v[:, 1:2] * wb[1:2, :]
    nb = nb + v[:, 2:3] * wb[2:3, :]
    o_ref[...] = (nb + bsd_ref[...]).astype(o_ref.dtype)


def nb_coords_pallas(feat_c, v, kp, tn, budget):
    B, Np, C = feat_c.shape
    grid = (B, Np // tn)
    need = (2 * (_tile_bytes(tn, C, feat_c.dtype)
                 + _tile_bytes(tn, 3, jnp.float32)
                 + _tile_bytes(tn, K3, jnp.float32))
            + 2 * (_tile_bytes(C, K3, kp["w_sd"].dtype)
                   + _tile_bytes(3, K3, jnp.float32)
                   + _tile_bytes(1, K3, jnp.float32)))
    grid_spec = pltpu.PrefetchScalarGridSpec(
        num_scalar_prefetch=0,
        grid=grid,
        in_specs=[
            pl.BlockSpec((None, tn, C), lambda b, i: (b, i, 0)),
            pl.BlockSpec((None, tn, 3), lambda b, i: (b, i, 0)),
            pl.BlockSpec((C, K3), lambda b, i: (0, 0)),
            pl.BlockSpec((3, K3), lambda b, i: (0, 0)),
            pl.BlockSpec((1, K3), lambda b, i: (0, 0)),
        ],
        # NOTE: stays 81-wide (not lane-padded): downstream reshape (B, N*27, 3) needs the
        # contiguous 81-column layout and this kernel's traffic is negligible.
        out_specs=pl.BlockSpec((None, tn, K3), lambda b, i: (b, i, 0)),
    )
    return pl.pallas_call(
        nb_coords_kernel,
        out_shape=jax.ShapeDtypeStruct((B, Np, K3), jnp.float32),
        grid_spec=grid_spec,
        compiler_params=pltpu.CompilerParams(
            dimension_semantics=("parallel", "parallel"),
            vmem_limit_bytes=_vmem_limit(need, budget),
        ),
    )(feat_c, v, kp["w_sd"], kp["w_bcast"], kp["b_sd"])


# -----------------------------------------------------------------------------
# Pallas kernel 2: the entire affine tail (feature_diff_1/2 + sum_neighbourhood
# + feature_center_1/2 + add) as two MXU contractions with pre-composed weights.
# -----------------------------------------------------------------------------
def gproj_main_kernel(feat_ref, nb_ref, wf_ref, wc_ref, b_ref, o_ref):
    # feat: (TN, 27C) bf16/f32, nb: (TN, 81) f32, wf: (27C, Cp), wc: (81, Cp), b: (1, Cp)
    acc = jnp.dot(feat_ref[...], wf_ref[...], preferred_element_type=jnp.float32)
    acc = acc + jnp.dot(nb_ref[...], wc_ref[...], preferred_element_type=jnp.float32)
    o_ref[...] = (acc + b_ref[...]).astype(o_ref.dtype)


def gproj_main_pallas(feat_flat, nb81, kp, tn, budget):
    B, Np, KC = feat_flat.shape
    Cp = kp["w_feat"].shape[1]
    grid = (B, Np // tn)
    need = (2 * (_tile_bytes(tn, KC, feat_flat.dtype)
                 + _tile_bytes(tn, K3, jnp.float32)
                 + _tile_bytes(tn, Cp, jnp.float32))
            + 2 * (_tile_bytes(KC, Cp, kp["w_feat"].dtype)
                   + _tile_bytes(K3, Cp, jnp.float32)
                   + _tile_bytes(1, Cp, jnp.float32)))
    grid_spec = pltpu.PrefetchScalarGridSpec(
        num_scalar_prefetch=0,
        grid=grid,
        in_specs=[
            pl.BlockSpec((None, tn, KC), lambda b, i: (b, i, 0)),
            pl.BlockSpec((None, tn, K3), lambda b, i: (b, i, 0)),
            pl.BlockSpec((KC, Cp), lambda b, i: (0, 0)),
            pl.BlockSpec((K3, Cp), lambda b, i: (0, 0)),
            pl.BlockSpec((1, Cp), lambda b, i: (0, 0)),
        ],
        out_specs=pl.BlockSpec((None, tn, Cp), lambda b, i: (b, i, 0)),
    )
    return pl.pallas_call(
        gproj_main_kernel,
        out_shape=jax.ShapeDtypeStruct((B, Np, Cp), jnp.float32),
        grid_spec=grid_spec,
        compiler_params=pltpu.CompilerParams(
            dimension_semantics=("parallel", "parallel"),
            vmem_limit_bytes=_vmem_limit(need, budget),
        ),
    )(feat_flat, nb81, kp["w_feat"], kp["w_coord"], kp["b_total"])


# -----------------------------------------------------------------------------
# Parameters: PyTorch-style raw params + host-side pre-composition
# -----------------------------------------------------------------------------
def init_params(C, keys):
    s = 0.05
    return {
        "w_sum": jax.random.normal(keys[0], (C, C, 1, K_NB), jnp.float32) * s,
        "b_sum": jax.random.normal(keys[1], (C,), jnp.float32) * s,
        "wd1": jax.random.normal(keys[2], (C, C + 3), jnp.float32) * s,
        "bd1": jax.random.normal(keys[3], (C,), jnp.float32) * s,
        "wd2": jax.random.normal(keys[4], (C, C), jnp.float32) * s,
        "bd2": jax.random.normal(keys[5], (C,), jnp.float32) * s,
        "wc1": jax.random.normal(keys[6], (C, C + 3), jnp.float32) * s,
        "bc1": jax.random.normal(keys[7], (C,), jnp.float32) * s,
        "wc2": jax.random.normal(keys[8], (C, C), jnp.float32) * s,
        "bc2": jax.random.normal(keys[9], (C,), jnp.float32) * s,
        # shift_delta is zero-initialised in the PyTorch module
        "w_sd": jnp.zeros((K3, C, 1), jnp.float32),
        "b_sd": jnp.zeros((K3,), jnp.float32),
    }


def compose_params(p, C):
    """Pre-compose the (purely affine, activation-free) post-sampling path (f32)."""
    # Row-vector convention: y = x @ W with W = torch_weight.T
    A1f = p["wd1"][:, :C].T        # (C, C)  feature_diff_1, image-feature part
    A1c = p["wd1"][:, C:].T        # (3, C)  feature_diff_1, coord part
    A2 = p["wd2"].T                # (C, C)  feature_diff_2
    # sum_neighbourhood Conv2d(C, C, (1, 27)): S[k] = w[:, :, 0, k].T  (Cin, Cout)
    S = jnp.transpose(p["w_sum"][:, :, 0, :], (2, 1, 0))    # (27, Cin, Cout)
    S_tot = S.sum(axis=0)                                    # (C, C)

    A1f_A2 = A1f @ A2
    A1c_A2 = A1c @ A2
    Mf = jnp.einsum("ij,kjl->kil", A1f_A2, S)    # (27, C, C): A1f A2 S_k
    Mc = jnp.einsum("ij,kjl->kil", A1c_A2, S)    # (27, 3, C): A1c A2 S_k
    # fold the "minus value at neighbour 0" subtraction into slot 0
    Mf = Mf.at[0].add(-(A1f_A2 @ S_tot))
    Mc = Mc.at[0].add(-(A1c_A2 @ S_tot))
    b_total = (p["bd1"] @ A2 + p["bd2"]) @ S_tot + p["b_sum"]

    # centre path (neighbour 13), feature_center_1/2 folded together
    B1f = p["wc1"][:, :C].T
    B1c = p["wc1"][:, C:].T
    B2 = p["wc2"].T
    Mf = Mf.at[13].add(B1f @ B2)
    Mc = Mc.at[13].add(B1c @ B2)
    b_total = b_total + p["bc1"] @ B2 + p["bc2"]

    # shift_delta Conv1d(C, 81, 1): (81, C, 1) -> (C, 81); bake "zero neighbour-0 delta"
    # into the weights (output channels 0..2 belong to k=0).
    wsd = p["w_sd"][:, :, 0].T
    wsd = wsd.at[:, 0:3].set(0.0)
    bsd = p["b_sd"].at[0:3].set(0.0)
    # nb[:, 3k+d] = v[:, d] + delta[:, 3k+d]  ->  tiled-identity broadcast matrix
    w_bcast = jnp.tile(jnp.eye(3, dtype=jnp.float32), (1, K_NB))     # (3, 81)

    return {
        "w_feat": Mf.reshape(K_NB * C, C),   # row k*C + c  <-> feat_flat[:, k*C + c]
        "w_coord": Mc.reshape(K3, C),        # row 3k + d   <-> nb81[:, 3k + d]
        "b_total": b_total.reshape(1, C),
        "w_sd": wsd,
        "b_sd": bsd.reshape(1, K3),
        "w_bcast": w_bcast,
    }


def prepare_kernel_params(p, C, feat_dtype):
    """Compose in f32, then (a) zero-pad the output columns to a multiple of 128 so the
    main kernel stores are lane-dense (gated on C < 128), (b) cast feature-side weights
    to the feature stream dtype (bf16 in production)."""
    kp = compose_params(p, C)
    Cp = _round_up(C, 128)
    if Cp != C:
        kp["w_feat"] = jnp.pad(kp["w_feat"], ((0, 0), (0, Cp - C)))
        kp["w_coord"] = jnp.pad(kp["w_coord"], ((0, 0), (0, Cp - C)))
        kp["b_total"] = jnp.pad(kp["b_total"], ((0, 0), (0, Cp - C)))
    kp["w_feat"] = kp["w_feat"].astype(feat_dtype)
    kp["w_sd"] = kp["w_sd"].astype(feat_dtype)
    return kp


# -----------------------------------------------------------------------------
# Full forward (glue + Pallas kernels)
# -----------------------------------------------------------------------------
def gprojection3d_forward(images, verts, params, *, feat_dtype=jnp.bfloat16, max_tile_n=1024):
    B, N, _ = verts.shape
    C = images.shape[1]
    KC = K_NB * C
    kp = prepare_kernel_params(params, C, feat_dtype)
    Cp = kp["w_feat"].shape[1]
    budget = _vmem_budget_bytes()

    # ---- tile selection for the main (affine-tail) kernel, from the VMEM budget ----
    row2 = (_round_up(KC, 128) * _dtype_bytes(feat_dtype)     # feat_flat stream
            + _round_up(K3, 128) * 4                          # nb81 stream
            + _round_up(Cp, 128) * 4)                         # output stream
    fixed2 = 2 * (_tile_bytes(KC, Cp, feat_dtype)
                  + _tile_bytes(K3, Cp, jnp.float32)
                  + _tile_bytes(1, Cp, jnp.float32))
    tn2 = _choose_tile_n(N, B, row2, fixed2, budget, max_tile_n)
    n_pad = _round_up(N, tn2)
    # nb_coords moves very little data per vertex -> one big tile when it fits
    tn1 = n_pad if n_pad <= 2048 else tn2

    # channels-last, bf16 volume so gathers land directly in (B, M, C) bf16
    images_cl = jnp.transpose(images, (0, 2, 3, 4, 1)).astype(feat_dtype)
    v = jnp.clip(verts.astype(jnp.float32), -1.0, 1.0)               # (B, N, 3)
    if n_pad != N:
        v = jnp.pad(v, ((0, 0), (0, n_pad - N), (0, 0)))

    # 1) sample image features at the (clamped) vertex centres
    feat_c = grid_sample_3d_cl(images_cl, v, out_dtype=feat_dtype)   # (B, Np, C)

    # 2) fused shift_delta + zero-k0 + add-verts -> neighbourhood coords (B, Np, 81) f32
    nb81 = nb_coords_pallas(feat_c, v, kp, tn1, budget)

    # 3) sample features at all 27 neighbourhood points (one stacked 8-corner gather)
    #    reshapes below are contiguous views.
    feat_nb = grid_sample_3d_cl(images_cl, nb81.reshape(B, n_pad * K_NB, 3),
                                out_dtype=feat_dtype)
    feat_flat = feat_nb.reshape(B, n_pad, KC)                        # (B, Np, 27*C)

    # 4) the entire affine tail as two MXU contractions (lane-dense Cp output)
    out = gproj_main_pallas(feat_flat, nb81, kp, tn2, budget)        # (B, Np, Cp) f32
    return out[:, :N, :C]


# -----------------------------------------------------------------------------
# Pure-JAX f32 reference mirroring the PyTorch math step-by-step (un-composed weights)
# -----------------------------------------------------------------------------
def reference_forward(images, verts, p):
    B, N, _ = verts.shape
    C = images.shape[1]
    images_cl = jnp.transpose(images, (0, 2, 3, 4, 1))
    v = jnp.clip(verts, -1.0, 1.0)
    feat_c = grid_sample_3d_cl(images_cl, v)                              # (B, N, C)
    delta = feat_c @ p["w_sd"][:, :, 0].T + p["b_sd"]                     # (B, N, 81)
    delta = delta.reshape(B, N, K_NB, 3).at[:, :, 0, :].set(0.0)
    nb = v[:, :, None, :] + delta                                         # (B, N, 27, 3)
    feat_nb = grid_sample_3d_cl(images_cl, nb.reshape(B, N * K_NB, 3))
    feat_nb = feat_nb.reshape(B, N, K_NB, C)
    full = jnp.concatenate([feat_nb, nb], axis=-1)                        # (B, N, 27, C+3)
    diff = full - full[:, :, 0:1, :]
    h = diff @ p["wd1"].T + p["bd1"]
    h = h @ p["wd2"].T + p["bd2"]                                         # (B, N, 27, C)
    nbsum = jnp.einsum("bnkc,ock->bno", h, p["w_sum"][:, :, 0, :]) + p["b_sum"]
    center = full[:, :, 13, :]                                            # (B, N, C+3)
    cf = center @ p["wc1"].T + p["bc1"]
    cf = cf @ p["wc2"].T + p["bc2"]
    return cf + nbsum


if __name__ == "__main__":
    B, C, D, H, W, N = 2, 32, 8, 8, 8, 80
    key = jax.random.PRNGKey(0)
    k_img, k_verts, k_sdw, k_sdb, *wkeys = jax.random.split(key, 14)
    images = jax.random.normal(k_img, (B, C, D, H, W), jnp.float32)
    verts = jax.random.uniform(k_verts, (B, N, 3), jnp.float32, minval=-1.2, maxval=1.2)

    # module-faithful params (shift_delta zero-init) and a non-zero-shift variant so the
    # neighbourhood / diff path is genuinely exercised
    params = init_params(C, wkeys)
    params_nz = dict(params)
    params_nz["w_sd"] = jax.random.normal(k_sdw, (K3, C, 1), jnp.float32) * 0.02
    params_nz["b_sd"] = jax.random.normal(k_sdb, (K3,), jnp.float32) * 0.02

    with jax.default_matmul_precision("highest"):
        fwd = jax.jit(gprojection3d_forward, static_argnames=("feat_dtype",))

        # (a) f32 streams: strict check of the weight composition / layout / kernels
        out32 = jax.block_until_ready(fwd(images, verts, params_nz, feat_dtype=jnp.float32))
        assert out32.shape == (B, N, C), out32.shape
        ref = jax.block_until_ready(reference_forward(images, verts, params_nz))
        np.testing.assert_allclose(np.asarray(out32), np.asarray(ref), rtol=2e-3, atol=2e-3)

        # (b) zero-init shift_delta (exact PyTorch init), f32 streams
        out0 = jax.block_until_ready(fwd(images, verts, params, feat_dtype=jnp.float32))
        ref0 = reference_forward(images, verts, params)
        np.testing.assert_allclose(np.asarray(out0), np.asarray(ref0), rtol=2e-3, atol=2e-3)

        # (c) production config: bf16 feature streams (coords stay f32), looser tolerance
        outbf = jax.block_until_ready(fwd(images, verts, params_nz, feat_dtype=jnp.bfloat16))
        np.testing.assert_allclose(np.asarray(outbf), np.asarray(ref), rtol=3e-2, atol=3e-2)

    print("KERNEL_OK")
</pallas_src>

<mosaic_0001>
module attributes {stable_mosaic.version = 11 : i64} {
  func.func @nb_coords_kernel(%arg0: i32, %arg1: i32, %arg2: memref<1x80x32xf32, #tpu.memory_space<vmem>>, %arg3: memref<1x80x3xf32, #tpu.memory_space<vmem>>, %arg4: memref<32x81xf32, #tpu.memory_space<vmem>>, %arg5: memref<3x81xf32, #tpu.memory_space<vmem>>, %arg6: memref<1x81xf32, #tpu.memory_space<vmem>>, %arg7: memref<1x80x81xf32, #tpu.memory_space<vmem>>) attributes {dimension_semantics = [#tpu.dimension_semantics<parallel>, #tpu.dimension_semantics<parallel>], iteration_bounds = array<i64: 2, 1>, scalar_prefetch = 0 : i64, scratch_operands = 0 : i64, tpu.core_type = #tpu.core_type<tc>, window_params = [{transform_indices = @transform_0, window_bounds = array<i64: 1, 80, 32>}, {transform_indices = @transform_1, window_bounds = array<i64: 1, 80, 3>}, {pipeline_mode = #tpu.pipeline_mode<synchronous>, transform_indices = @transform_2, window_bounds = array<i64: 32, 81>}, {pipeline_mode = #tpu.pipeline_mode<synchronous>, transform_indices = @transform_3, window_bounds = array<i64: 3, 81>}, {pipeline_mode = #tpu.pipeline_mode<synchronous>, transform_indices = @transform_4, window_bounds = array<i64: 1, 81>}, {transform_indices = @transform_5, window_bounds = array<i64: 1, 80, 81>}]} {
    %c0 = arith.constant 0 : index
    %c0_0 = arith.constant 0 : index
    %c0_1 = arith.constant 0 : index
    %0 = vector.load %arg2[%c0, %c0_0, %c0_1] : memref<1x80x32xf32, #tpu.memory_space<vmem>>, vector<1x80x32xf32>
    %1 = vector.shape_cast %0 : vector<1x80x32xf32> to vector<80x32xf32>
    %c0_2 = arith.constant 0 : index
    %c0_3 = arith.constant 0 : index
    %2 = vector.load %arg4[%c0_2, %c0_3] : memref<32x81xf32, #tpu.memory_space<vmem>>, vector<32x81xf32>
    %cst = arith.constant dense<0.000000e+00> : vector<80x81xf32>
    %3 = tpu.matmul %1, %2, %cst {dimension_numbers = #tpu.dot_dimension_numbers<[1], [0], [0], [1], [0, 0, 1, 1], [], []>, precision = #tpu.contract_precision<fp32>} : vector<80x32xf32>, vector<32x81xf32>, vector<80x81xf32> -> vector<80x81xf32>
    %c0_4 = arith.constant 0 : index
    %c0_5 = arith.constant 0 : index
    %c0_6 = arith.constant 0 : index
    %4 = vector.load %arg3[%c0_4, %c0_5, %c0_6] : memref<1x80x3xf32, #tpu.memory_space<vmem>>, vector<1x80x3xf32>
    %5 = vector.shape_cast %4 : vector<1x80x3xf32> to vector<80x3xf32>
    %c0_7 = arith.constant 0 : index
    %c0_8 = arith.constant 0 : index
    %6 = vector.load %arg5[%c0_7, %c0_8] : memref<3x81xf32, #tpu.memory_space<vmem>>, vector<3x81xf32>
    %7 = vector.extract_strided_slice %5 {offsets = [0, 0], sizes = [80, 1], strides = [1, 1]} : vector<80x3xf32> to vector<80x1xf32>
    %8 = vector.extract_strided_slice %6 {offsets = [0, 0], sizes = [1, 81], strides = [1, 1]} : vector<3x81xf32> to vector<1x81xf32>
    %9 = vector.broadcast %7 : vector<80x1xf32> to vector<80x81xf32>
    %10 = vector.broadcast %8 : vector<1x81xf32> to vector<80x81xf32>
    %11 = arith.mulf %9, %10 : vector<80x81xf32>
    %12 = arith.addf %3, %11 : vector<80x81xf32>
    %13 = vector.extract_strided_slice %5 {offsets = [0, 1], sizes = [80, 1], strides = [1, 1]} : vector<80x3xf32> to vector<80x1xf32>
    %14 = vector.extract_strided_slice %6 {offsets = [1, 0], sizes = [1, 81], strides = [1, 1]} : vector<3x81xf32> to vector<1x81xf32>
    %15 = vector.broadcast %13 : vector<80x1xf32> to vector<80x81xf32>
    %16 = vector.broadcast %14 : vector<1x81xf32> to vector<80x81xf32>
    %17 = arith.mulf %15, %16 : vector<80x81xf32>
    %18 = arith.addf %12, %17 : vector<80x81xf32>
    %19 = vector.extract_strided_slice %5 {offsets = [0, 2], sizes = [80, 1], strides = [1, 1]} : vector<80x3xf32> to vector<80x1xf32>
    %20 = vector.extract_strided_slice %6 {offsets = [2, 0], sizes = [1, 81], strides = [1, 1]} : vector<3x81xf32> to vector<1x81xf32>
    %21 = vector.broadcast %19 : vector<80x1xf32> to vector<80x81xf32>
    %22 = vector.broadcast %20 : vector<1x81xf32> to vector<80x81xf32>
    %23 = arith.mulf %21, %22 : vector<80x81xf32>
    %24 = arith.addf %18, %23 : vector<80x81xf32>
    %c0_9 = arith.constant 0 : index
    %c0_10 = arith.constant 0 : index
    %25 = vector.load %arg6[%c0_9, %c0_10] : memref<1x81xf32, #tpu.memory_space<vmem>>, vector<1x81xf32>
    %26 = vector.broadcast %25 : vector<1x81xf32> to vector<80x81xf32>
    %27 = arith.addf %24, %26 : vector<80x81xf32>
    %c0_11 = arith.constant 0 : index
    %c0_12 = arith.constant 0 : index
    %c0_13 = arith.constant 0 : index
    %28 = vector.load %arg7[%c0_11, %c0_12, %c0_13] : memref<1x80x81xf32, #tpu.memory_space<vmem>>, vector<1x80x81xf32>
    %29 = vector.shape_cast %28 : vector<1x80x81xf32> to vector<80x81xf32>
    %30 = vector.shape_cast %27 : vector<80x81xf32> to vector<1x80x81xf32>
    tpu.vector_store %arg7[%c0_11, %c0_12, %c0_13], %30 {strides = array<i32>} : memref<1x80x81xf32, #tpu.memory_space<vmem>>, vector<1x80x81xf32>,
    return
  }
  func.func @transform_0(%arg0: i32, %arg1: i32) -> (i32, i32, i32) {
    %c0_i32 = arith.constant 0 : i32
    %c0_i32_0 = arith.constant 0 : i32
    return %arg0, %arg1, %c0_i32 : i32, i32, i32
  }
  func.func @transform_1(%arg0: i32, %arg1: i32) -> (i32, i32, i32) {
    %c0_i32 = arith.constant 0 : i32
    %c0_i32_0 = arith.constant 0 : i32
    return %arg0, %arg1, %c0_i32 : i32, i32, i32
  }
  func.func @transform_2(%arg0: i32, %arg1: i32) -> (i32, i32) {
    %c0_i32 = arith.constant 0 : i32
    %c0_i32_0 = arith.constant 0 : i32
    %c0_i32_1 = arith.constant 0 : i32
    return %c0_i32, %c0_i32_0 : i32, i32
  }
  func.func @transform_3(%arg0: i32, %arg1: i32) -> (i32, i32) {
    %c0_i32 = arith.constant 0 : i32
    %c0_i32_0 = arith.constant 0 : i32
    %c0_i32_1 = arith.constant 0 : i32
    return %c0_i32, %c0_i32_0 : i32, i32
  }
  func.func @transform_4(%arg0: i32, %arg1: i32) -> (i32, i32) {
    %c0_i32 = arith.constant 0 : i32
    %c0_i32_0 = arith.constant 0 : i32
    %c0_i32_1 = arith.constant 0 : i32
    return %c0_i32, %c0_i32_0 : i32, i32
  }
  func.func @transform_5(%arg0: i32, %arg1: i32) -> (i32, i32, i32) {
    %c0_i32 = arith.constant 0 : i32
    %c0_i32_0 = arith.constant 0 : i32
    return %arg0, %arg1, %c0_i32 : i32, i32, i32
  }
}

module attributes {stable_mosaic.version = 11 : i64} {
  func.func @gproj_main_kernel(%arg0: i32, %arg1: i32, %arg2: memref<1x80x864xf32, #tpu.memory_space<vmem>>, %arg3: memref<1x80x81xf32, #tpu.memory_space<vmem>>, %arg4: memref<864x128xf32, #tpu.memory_space<vmem>>, %arg5: memref<81x128xf32, #tpu.memory_space<vmem>>, %arg6: memref<1x128xf32, #tpu.memory_space<vmem>>, %arg7: memref<1x80x128xf32, #tpu.memory_space<vmem>>) attributes {dimension_semantics = [#tpu.dimension_semantics<parallel>, #tpu.dimension_semantics<parallel>], iteration_bounds = array<i64: 2, 1>, scalar_prefetch = 0 : i64, scratch_operands = 0 : i64, tpu.core_type = #tpu.core_type<tc>, window_params = [{transform_indices = @transform_0, window_bounds = array<i64: 1, 80, 864>}, {transform_indices = @transform_1, window_bounds = array<i64: 1, 80, 81>}, {pipeline_mode = #tpu.pipeline_mode<synchronous>, transform_indices = @transform_2, window_bounds = array<i64: 864, 128>}, {pipeline_mode = #tpu.pipeline_mode<synchronous>, transform_indices = @transform_3, window_bounds = array<i64: 81, 128>}, {pipeline_mode = #tpu.pipeline_mode<synchronous>, transform_indices = @transform_4, window_bounds = array<i64: 1, 128>}, {transform_indices = @transform_5, window_bounds = array<i64: 1, 80, 128>}]} {
    %c0 = arith.constant 0 : index
    %c0_0 = arith.constant 0 : index
    %c0_1 = arith.constant 0 : index
    %0 = vector.load %arg2[%c0, %c0_0, %c0_1] : memref<1x80x864xf32, #tpu.memory_space<vmem>>, vector<1x80x864xf32>
    %1 = vector.shape_cast %0 : vector<1x80x864xf32> to vector<80x864xf32>
    %c0_2 = arith.constant 0 : index
    %c0_3 = arith.constant 0 : index
    %2 = vector.load %arg4[%c0_2, %c0_3] : memref<864x128xf32, #tpu.memory_space<vmem>>, vector<864x128xf32>
    %cst = arith.constant dense<0.000000e+00> : vector<80x128xf32>
    %3 = tpu.matmul %1, %2, %cst {dimension_numbers = #tpu.dot_dimension_numbers<[1], [0], [0], [1], [0, 0, 1, 1], [], []>, precision = #tpu.contract_precision<fp32>} : vector<80x864xf32>, vector<864x128xf32>, vector<80x128xf32> -> vector<80x128xf32>
    %c0_4 = arith.constant 0 : index
    %c0_5 = arith.constant 0 : index
    %c0_6 = arith.constant 0 : index
    %4 = vector.load %arg3[%c0_4, %c0_5, %c0_6] : memref<1x80x81xf32, #tpu.memory_space<vmem>>, vector<1x80x81xf32>
    %5 = vector.shape_cast %4 : vector<1x80x81xf32> to vector<80x81xf32>
    %c0_7 = arith.constant 0 : index
    %c0_8 = arith.constant 0 : index
    %6 = vector.load %arg5[%c0_7, %c0_8] : memref<81x128xf32, #tpu.memory_space<vmem>>, vector<81x128xf32>
    %cst_9 = arith.constant dense<0.000000e+00> : vector<80x128xf32>
    %7 = tpu.matmul %5, %6, %cst_9 {dimension_numbers = #tpu.dot_dimension_numbers<[1], [0], [0], [1], [0, 0, 1, 1], [], []>, precision = #tpu.contract_precision<fp32>} : vector<80x81xf32>, vector<81x128xf32>, vector<80x128xf32> -> vector<80x128xf32>
    %8 = arith.addf %3, %7 : vector<80x128xf32>
    %c0_10 = arith.constant 0 : index
    %c0_11 = arith.constant 0 : index
    %9 = vector.load %arg6[%c0_10, %c0_11] : memref<1x128xf32, #tpu.memory_space<vmem>>, vector<1x128xf32>
    %10 = vector.broadcast %9 : vector<1x128xf32> to vector<80x128xf32>
    %11 = arith.addf %8, %10 : vector<80x128xf32>
    %c0_12 = arith.constant 0 : index
    %c0_13 = arith.constant 0 : index
    %c0_14 = arith.constant 0 : index
    %12 = vector.load %arg7[%c0_12, %c0_13, %c0_14] : memref<1x80x128xf32, #tpu.memory_space<vmem>>, vector<1x80x128xf32>
    %13 = vector.shape_cast %12 : vector<1x80x128xf32> to vector<80x128xf32>
    %14 = vector.shape_cast %11 : vector<80x128xf32> to vector<1x80x128xf32>
    tpu.vector_store %arg7[%c0_12, %c0_13, %c0_14], %14 {strides = array<i32>} : memref<1x80x128xf32, #tpu.memory_space<vmem>>, vector<1x80x128xf32>,
    return
  }
  func.func @transform_0(%arg0: i32, %arg1: i32) -> (i32, i32, i32) {
    %c0_i32 = arith.constant 0 : i32
    %c0_i32_0 = arith.constant 0 : i32
    return %arg0, %arg1, %c0_i32 : i32, i32, i32
  }
  func.func @transform_1(%arg0: i32, %arg1: i32) -> (i32, i32, i32) {
    %c0_i32 = arith.constant 0 : i32
    %c0_i32_0 = arith.constant 0 : i32
    return %arg0, %arg1, %c0_i32 : i32, i32, i32
  }
  func.func @transform_2(%arg0: i32, %arg1: i32) -> (i32, i32) {
    %c0_i32 = arith.constant 0 : i32
    %c0_i32_0 = arith.constant 0 : i32
    %c0_i32_1 = arith.constant 0 : i32
    return %c0_i32, %c0_i32_0 : i32, i32
  }
  func.func @transform_3(%arg0: i32, %arg1: i32) -> (i32, i32) {
    %c0_i32 = arith.constant 0 : i32
    %c0_i32_0 = arith.constant 0 : i32
    %c0_i32_1 = arith.constant 0 : i32
    return %c0_i32, %c0_i32_0 : i32, i32
  }
  func.func @transform_4(%arg0: i32, %arg1: i32) -> (i32, i32) {
    %c0_i32 = arith.constant 0 : i32
    %c0_i32_0 = arith.constant 0 : i32
    %c0_i32_1 = arith.constant 0 : i32
    return %c0_i32, %c0_i32_0 : i32, i32
  }
  func.func @transform_5(%arg0: i32, %arg1: i32) -> (i32, i32, i32) {
    %c0_i32 = arith.constant 0 : i32
    %c0_i32_0 = arith.constant 0 : i32
    return %arg0, %arg1, %c0_i32 : i32, i32, i32
  }
}

</mosaic_0001>

<bundles_post_ra>
// kernel: tile.9
= control target key start
LH: loop header
LB: loop body
LE: loop exit
PB: predicated region body
PF: predicated region fallthrough
CT: control target
= control target key end

     0   :  { %vm5_vm0 = vcmask 1041409   ;;  %vm9_vm1 = vcmask 1042434   ;;  %s491_s20 = smov 78   ;;  %s492_s2 = smov 72   ;;  %vm11_vm2 = vcmask 23552   ;;  %vm25_vm3 = vcmask 663152   ;;  %s827_s0 = inlined_call_operand.vmem [shape: f32[3,27,3], index: 0, kind: input, shape index: {}]   ;;  %s828_s1 = inlined_call_operand.vmem [shape: f32[3,81], index: 1, kind: output, shape index: {}]  }
   0x1   :  { %v387_v0 = vld [vmem:[%s827_s0 + $0x1a] sm:$0x1]   ;;  %v393_v4 = vld [vmem:[%s827_s0 + $0x18] sm:$0x1]   ;;  %v390_v8 = vld [vmem:[%s827_s0 + $0x19] sm:$0x1]  }
   0x2   :  { %v388_v1 = vld [vmem:[%s827_s0 + $0x39] sm:$0x2]   ;;  %v394_v6 = vld [vmem:[%s827_s0 + $0x37] sm:$0x2]   ;;  %v391_v10 = vld [vmem:[%s827_s0 + $0x38] sm:$0x2]  }
   0x3   :  { %v18_v2 = vsel %vm5_vm0, %v388_v1, %v387_v0  ;;  %v389_v3 = vld [vmem:[%s827_s0 + $0x58] sm:$0x4]   ;;  %v395_v7 = vld [vmem:[%s827_s0 + $0x56] sm:$0x4]   ;;  %v46_v9 = vsel %vm5_vm0, %v394_v6, %v393_v4  ;;  %v392_v11 = vld [vmem:[%s827_s0 + $0x57] sm:$0x4]   ;;  %v32_v13 = vsel %vm5_vm0, %v391_v10, %v390_v8 }
   0x4   :  { %v22_v5 = vsel %vm9_vm1, %v389_v3, %v18_v2  ;;  %v50_v12 = vsel %vm9_vm1, %v395_v7, %v46_v9  ;;  %v396_v14 = vld [vmem:[%s827_s0 + $0x17] sm:$0x1]   ;;  %v36_v17 = vsel %vm9_vm1, %v392_v11, %v32_v13  ;;  %v399_v19 = vld [vmem:[%s827_s0 + $0x16] sm:$0x1]   ;;  %v402_v24 = vld [vmem:[%s827_s0 + $0x15] sm:$0x1]  }
   0x5   :  { %23 = vrot.lane.b32.xlu0 %v22_v5, %s491_s20  ;;  %v397_v15 = vld [vmem:[%s827_s0 + $0x36] sm:$0x2]   ;;  %51 = vrot.lane.b32.xlu1 %v50_v12, %s492_s2  ;;  %v400_v20 = vld [vmem:[%s827_s0 + $0x35] sm:$0x2]   ;;  %s493_s13 = smov 75   ;;  %s494_s22 = smov 69  }
   0x6   :  { %v398_v16 = vld [vmem:[%s827_s0 + $0x55] sm:$0x4]   ;;  %v60_v18 = vsel %vm5_vm0, %v397_v15, %v396_v14  ;;  %v401_v21 = vld [vmem:[%s827_s0 + $0x54] sm:$0x4]   ;;  %v74_v23 = vsel %vm5_vm0, %v400_v20, %v399_v19  ;;  %v403_v25 = vld [vmem:[%s827_s0 + $0x34] sm:$0x2]  }
   0x7   :  { %v64_v22 = vsel %vm9_vm1, %v398_v16, %v60_v18  ;;  %v88_v26 = vsel %vm5_vm0, %v403_v25, %v402_v24  ;;  %v404_v27 = vld [vmem:[%s827_s0 + $0x53] sm:$0x4]   ;;  %v405_v28 = vld [vmem:[%s827_s0 + $0x14] sm:$0x1]   ;;  %v78_v30 = vsel %vm9_vm1, %v401_v21, %v74_v23  ;;  %v408_v31 = vld [vmem:[%s827_s0 + $0x13] sm:$0x1]  }
   0x8   :  { %v406_v29 = vld [vmem:[%s827_s0 + $0x33] sm:$0x2]   ;;  %v409_v34 = vld [vmem:[%s827_s0 + $0x32] sm:$0x2]   ;;  %v92_v35 = vsel %vm9_vm1, %v404_v27, %v88_v26  ;;  %v411_v36 = vld [vmem:[%s827_s0 + $0x12] sm:$0x1]  }
   0x9   :  { %37 = vrot.lane.b32.xlu0 %v36_v17, %s493_s13  ;;  %65 = vrot.lane.b32.xlu1 %v64_v22, %s494_s22  ;;  %v102_v32 = vsel %vm5_vm0, %v406_v29, %v405_v28  ;;  %v407_v33 = vld [vmem:[%s827_s0 + $0x52] sm:$0x4]   ;;  %v412_v37 = vld [vmem:[%s827_s0 + $0x31] sm:$0x2]   ;;  %s495_s2 = smov 66   ;;  %v116_v38 = vsel %vm5_vm0, %v409_v34, %v408_v31  ;;  %s496_s9 = smov 63  }
   0xa   :  { %v410_v39 = vld [vmem:[%s827_s0 + $0x51] sm:$0x4]   ;;  %v106_v40 = vsel %vm9_vm1, %v407_v33, %v102_v32  ;;  %v414_v41 = vld [vmem:[%s827_s0 + $0x11] sm:$0x1]   ;;  %v130_v43 = vsel %vm5_vm0, %v412_v37, %v411_v36  ;;  %v413_v44 = vld [vmem:[%s827_s0 + $0x50] sm:$0x4]  }
   0xb   :  { %v415_v42 = vld [vmem:[%s827_s0 + $0x30] sm:$0x2]   ;;  %v120_v45 = vsel %vm9_vm1, %v410_v39, %v116_v38  ;;  %v417_v46 = vld [vmem:[%s827_s0 + $0x10] sm:$0x1]   ;;  %s497_s16 = smov 60   ;;  %v134_v50 = vsel %vm9_vm1, %v413_v44, %v130_v43  ;;  %s498_s23 = smov 57  }
   0xc   :  { %v418_v47 = vld [vmem:[%s827_s0 + $0x2f] sm:$0x2]   ;;  %v144_v48 = vsel %vm5_vm0, %v415_v42, %v414_v41  ;;  %v416_v49 = vld [vmem:[%s827_s0 + $0x4f] sm:$0x4]   ;;  %v420_v51 = vld [vmem:[%s827_s0 + $0xf] sm:$0x1]  }
   0xd   :  { %79 = vrot.lane.b32.xlu0 %v78_v30, %s495_s2  ;;  %93 = vrot.lane.b32.xlu1 %v92_v35, %s496_s9  ;;  %v421_v52 = vld [vmem:[%s827_s0 + $0x2e] sm:$0x2]   ;;  %v158_v53 = vsel %vm5_vm0, %v418_v47, %v417_v46  ;;  %v419_v54 = vld [vmem:[%s827_s0 + $0x4e] sm:$0x4]   ;;  %v148_v55 = vsel %vm9_vm1, %v416_v49, %v144_v48  ;;  %s499_s30 = smov 54   ;;  %s500_s8 = smov 51  }
   0xe   :  { %v423_v56 = vld [vmem:[%s827_s0 + $0xe] sm:$0x1]   ;;  %v172_v58 = vsel %vm5_vm0, %v421_v52, %v420_v51  ;;  %v422_v59 = vld [vmem:[%s827_s0 + $0x4d] sm:$0x4]   ;;  %v162_v60 = vsel %vm9_vm1, %v419_v54, %v158_v53  ;;  %v426_v61 = vld [vmem:[%s827_s0 + $0xd] sm:$0x1]  }
   0xf   :  { %v424_v57 = vld [vmem:[%s827_s0 + $0x2d] sm:$0x2]   ;;  %v427_v62 = vld [vmem:[%s827_s0 + $0x2c] sm:$0x2]   ;;  %v176_v1 = vsel %vm9_vm1, %v422_v59, %v172_v58  ;;  %v429_v2 = vld [vmem:[%s827_s0 + $0xc] sm:$0x1]  }
  0x10   :  { %v186_v63 = vsel %vm5_vm0, %v424_v57, %v423_v56  ;;  %v425_v0 = vld [vmem:[%s827_s0 + $0x4c] sm:$0x4]   ;;  %v430_v3 = vld [vmem:[%s827_s0 + $0x2b] sm:$0x2]   ;;  %s501_s15 = smov 48   ;;  %v200_v4 = vsel %vm5_vm0, %v427_v62, %v426_v61  ;;  %s502_s22 = smov 45  }
  0x11   :  { %107 = vrot.lane.b32.xlu0 %v106_v40, %s497_s16  ;;  %121 = vrot.lane.b32.xlu1 %v120_v45, %s498_s23  ;;  %v428_v5 = vld [vmem:[%s827_s0 + $0x4b] sm:$0x4]   ;;  %v190_v6 = vsel %vm9_vm1, %v425_v0, %v186_v63  ;;  %v432_v7 = vld [vmem:[%s827_s0 + $0xb] sm:$0x1]   ;;  %v214_v9 = vsel %vm5_vm0, %v430_v3, %v429_v2  ;;  %s503_s29 = smov 42   ;;  %s504_s7 = smov 39  }
  0x12   :  { %v433_v8 = vld [vmem:[%s827_s0 + $0x2a] sm:$0x2]   ;;  %v431_v10 = vld [vmem:[%s827_s0 + $0x4a] sm:$0x4]   ;;  %v204_v11 = vsel %vm9_vm1, %v428_v5, %v200_v4  ;;  %v435_v12 = vld [vmem:[%s827_s0 + $0xa] sm:$0x1]  }
  0x13   :  { %v436_v13 = vld [vmem:[%s827_s0 + $0x29] sm:$0x2]   ;;  %v228_v14 = vsel %vm5_vm0, %v433_v8, %v432_v7  ;;  %v434_v15 = vld [vmem:[%s827_s0 + $0x49] sm:$0x4]   ;;  %v218_v16 = vsel %vm9_vm1, %v431_v10, %v214_v9  ;;  %v438_v17 = vld [vmem:[%s827_s0 + $0x9] sm:$0x1]  }
  0x14   :  { %v439_v18 = vld [vmem:[%s827_s0 + $0x28] sm:$0x2]   ;;  %v242_v19 = vsel %vm5_vm0, %v436_v13, %v435_v12  ;;  %v437_v20 = vld [vmem:[%s827_s0 + $0x48] sm:$0x4]   ;;  %v232_v22 = vsel %vm9_vm1, %v434_v15, %v228_v14  ;;  %v441_v23 = vld [vmem:[%s827_s0 + $0x8] sm:$0x1]  }
  0x15   :  { %135 = vrot.lane.b32.xlu0 %v134_v50, %s499_s30  ;;  %149 = vrot.lane.b32.xlu1 %v148_v55, %s500_s8  ;;  %v440_v21 = vld [vmem:[%s827_s0 + $0x47] sm:$0x4]   ;;  %v442_v24 = vld [vmem:[%s827_s0 + $0x27] sm:$0x2]   ;;  %s505_s18 = smov 36   ;;  %v256_v26 = vsel %vm5_vm0, %v439_v18, %v438_v17  ;;  %v246_v29 = vsel %vm9_vm1, %v437_v20, %v242_v19  ;;  %s506_s27 = smov 33  }
  0x16   :  { %v386_v25 = vld [vmem:[%s827_s0 + $0x3e] sm:$0x4]   ;;  %v444_v30 = vld [vmem:[%s827_s0 + $0x7] sm:$0x1]   ;;  %v270_v33 = vsel %vm5_vm0, %v442_v24, %v441_v23  ;;  %v443_v34 = vld [vmem:[%s827_s0 + $0x46] sm:$0x4]   ;;  %v260_v36 = vsel %vm9_vm1, %v440_v21, %v256_v26 }
  0x17   :  { %v2_v27 = vld [vmem:[%s827_s0] sm:$0x1]   ;;  %v445_v31 = vld [vmem:[%s827_s0 + $0x26] sm:$0x2]   ;;  %v447_v37 = vld [vmem:[%s827_s0 + $0x6] sm:$0x1]   ;;  %v274_v41 = vsel %vm9_vm1, %v443_v34, %v270_v33 }
  0x18   :  { %v385_v28 = vld [vmem:[%s827_s0 + $0x1f] sm:$0x2]   ;;  %v448_v38 = vld [vmem:[%s827_s0 + $0x25] sm:$0x2]   ;;  %s507_s5 = smov 30   ;;  %v284_v39 = vsel %vm5_vm0, %v445_v31, %v444_v30  ;;  %s508_s12 = smov 27  }
  0x19   :  { %163 = vrot.lane.b32.xlu0 %v162_v60, %s501_s15  ;;  %177 = vrot.lane.b32.xlu1 %v176_v1, %s502_s22  ;;  %v6_v32 = vsel %vm5_vm0, %v385_v28, %v2_v27  ;;  %v446_v40 = vld [vmem:[%s827_s0 + $0x45] sm:$0x4]   ;;  %v450_v42 = vld [vmem:[%s827_s0 + $0x5] sm:$0x1]   ;;  %v298_v44 = vsel %vm5_vm0, %v448_v38, %v447_v37  ;;  %s509_s19 = smov 24   ;;  %s510_s26 = smov 21  }
  0x1a   :  { %v10_v35 = vsel %vm9_vm1, %v386_v25, %v6_v32  ;;  %v451_v43 = vld [vmem:[%s827_s0 + $0x24] sm:$0x2]   ;;  %v449_v45 = vld [vmem:[%s827_s0 + $0x44] sm:$0x4]   ;;  %v288_v46 = vsel %vm9_vm1, %v446_v40, %v284_v39  ;;  %v453_v47 = vld [vmem:[%s827_s0 + $0x4] sm:$0x1]  }
  0x1b   :  { %12 = vst.msk [vmem:[#allocation0] sm:$0x7] %vm11_vm2, %v10_v35   ;;  %v454_v48 = vld [vmem:[%s827_s0 + $0x23] sm:$0x2]   ;;  %v312_v49 = vsel %vm5_vm0, %v451_v43, %v450_v42  ;;  %v452_v50 = vld [vmem:[%s827_s0 + $0x43] sm:$0x4]   ;;  %v302_v51 = vsel %vm9_vm1, %v449_v45, %v298_v44 }
  0x1c   :  { %v456_v52 = vld [vmem:[%s827_s0 + $0x3] sm:$0x1]   ;;  %v326_v54 = vsel %vm5_vm0, %v454_v48, %v453_v47  ;;  %v455_v55 = vld [vmem:[%s827_s0 + $0x42] sm:$0x4]   ;;  %v316_v56 = vsel %vm9_vm1, %v452_v50, %v312_v49  ;;  %v459_v57 = vld [vmem:[%s827_s0 + $0x2] sm:$0x1]  }
  0x1d   :  { %191 = vrot.lane.b32.xlu0 %v190_v6, %s503_s29  ;;  %205 = vrot.lane.b32.xlu1 %v204_v11, %s504_s7  ;;  %v457_v53 = vld [vmem:[%s827_s0 + $0x22] sm:$0x2]   ;;  %v460_v58 = vld [vmem:[%s827_s0 + $0x21] sm:$0x2]   ;;  %s511_s4 = smov 18   ;;  %v330_v61 = vsel %vm9_vm1, %v455_v55, %v326_v54  ;;  %s512_s11 = smov 15  }
  0x1e   :  { %v340_v59 = vsel %vm5_vm0, %v457_v53, %v456_v52  ;;  %v458_v60 = vld [vmem:[%s827_s0 + $0x41] sm:$0x4]   ;;  %v462_v62 = vld [vmem:[%s827_s0 + $0x1] sm:$0x1]   ;;  %v354_v0 = vsel %vm5_vm0, %v460_v58, %v459_v57  ;;  %v461_v1 = vld [vmem:[%s827_s0 + $0x40] sm:$0x4]  }
  0x1f   :  { %v463_v63 = vld [vmem:[%s827_s0 + $0x20] sm:$0x2]   ;;  %v344_v2 = vsel %vm9_vm1, %v458_v60, %v340_v59  ;;  %s513_s14 = smov 12   ;;  %v358_v5 = vsel %vm9_vm1, %v461_v1, %v354_v0  ;;  %s515_s17 = smov 6   ;;  %vm39_vm4 = vcmask 638552   ;;  %vm53_vm5 = vcmask 613952  }
  0x20   :  { %v368_v3 = vsel %vm5_vm0, %v463_v63, %v462_v62  ;;  %v464_v4 = vld [vmem:[%s827_s0 + $0x3f] sm:$0x4]   ;;  %s514_s0 = smov 9   ;;  %vm67_vm6 = vcmask 589352   ;;  %vm81_vm7 = vcmask 564752   ;;  %vm95_vm8 = vcmask 540152  }
  0x21   :  { %219 = vrot.lane.b32.xlu0 %v218_v16, %s505_s18  ;;  %233 = vrot.lane.b32.xlu1 %v232_v22, %s506_s27  ;;  %v372_v6 = vsel %vm9_vm1, %v464_v4, %v368_v3  ;;  %s516_s18 = smov 3   ;;  %vm109_vm9 = vcmask 515552   ;;  %vm123_vm10 = vcmask 490952   ;;  %vm137_vm11 = vcmask 466352  }
  0x22   :  { %vm151_vm12 = vcmask 441752   ;;  %vm165_vm13 = vcmask 417152   ;;  %vm179_vm14 = vcmask 392552   ;;  %vm193_vm15 = vcmask 367952  }
  0x23   :  { %vm207_vm0 = vcmask 343352   ;;  %vm221_vm1 = vcmask 318752   ;;  %vm235_vm2 = vcmask 294152  }
  0x25   :  { %247 = vrot.lane.b32.xlu0 %v246_v29, %s507_s5  ;;  %261 = vrot.lane.b32.xlu1 %v260_v36, %s508_s12 }
  0x29   :  { %275 = vrot.lane.b32.xlu0 %v274_v41, %s509_s19  ;;  %289 = vrot.lane.b32.xlu1 %v288_v46, %s510_s26 }
  0x2d   :  { %303 = vrot.lane.b32.xlu0 %v302_v51, %s511_s4  ;;  %317 = vrot.lane.b32.xlu1 %v316_v56, %s512_s11 }
  0x31   :  { %331 = vrot.lane.b32.xlu0 %v330_v61, %s513_s14  ;;  %345 = vrot.lane.b32.xlu1 %v344_v2, %s514_s0 }
  0x35   :  { %359 = vrot.lane.b32.xlu0 %v358_v5, %s515_s17  ;;  %373 = vrot.lane.b32.xlu1 %v372_v6, %s516_s18 }
  0x77   :  { %v24_v7 = vpop.permute.xlu0 %23   ;;  %v52_v8 = vpop.permute.xlu1 %51  }
  0x78   :  { %26 = vst.msk [vmem:[#allocation0] sm:$0x7] %vm25_vm3, %v24_v7   ;;  %vm249_vm3 = vcmask 269552  }
  0x7b   :  { %v38_v9 = vpop.permute.xlu0 %37   ;;  %v66_v10 = vpop.permute.xlu1 %65  }
  0x7c   :  { %40 = vst.msk [vmem:[#allocation0] sm:$0x7] %vm39_vm4, %v38_v9   ;;  %vm263_vm4 = vcmask 244952  }
  0x7d   :  { %54 = vst.msk [vmem:[#allocation0] sm:$0x7] %vm53_vm5, %v52_v8   ;;  %vm277_vm5 = vcmask 220352  }
  0x7e   :  { %68 = vst.msk [vmem:[#allocation0] sm:$0x7] %vm67_vm6, %v66_v10   ;;  %vm291_vm6 = vcmask 195752  }
  0x7f   :  { %v80_v11 = vpop.permute.xlu0 %79   ;;  %v94_v12 = vpop.permute.xlu1 %93  }
  0x80   :  { %82 = vst.msk [vmem:[#allocation0] sm:$0x7] %vm81_vm7, %v80_v11   ;;  %vm305_vm7 = vcmask 171152  }
  0x81   :  { %96 = vst.msk [vmem:[#allocation0] sm:$0x7] %vm95_vm8, %v94_v12   ;;  %vm319_vm8 = vcmask 146552  }
  0x83   :  { %v108_v13 = vpop.permute.xlu0 %107   ;;  %v122_v14 = vpop.permute.xlu1 %121  }
  0x84   :  { %110 = vst.msk [vmem:[#allocation0] sm:$0x7] %vm109_vm9, %v108_v13   ;;  %vm333_vm9 = vcmask 121952  }
  0x85   :  { %124 = vst.msk [vmem:[#allocation0] sm:$0x7] %vm123_vm10, %v122_v14   ;;  %vm347_vm10 = vcmask 97352  }
  0x87   :  { %v136_v15 = vpop.permute.xlu0 %135   ;;  %v150_v16 = vpop.permute.xlu1 %149  }
  0x88   :  { %138 = vst.msk [vmem:[#allocation0] sm:$0x7] %vm137_vm11, %v136_v15   ;;  %vm361_vm11 = vcmask 72752  }
  0x89   :  { %152 = vst.msk [vmem:[#allocation0] sm:$0x7] %vm151_vm12, %v150_v16   ;;  %vm375_vm12 = vcmask 48152  }
  0x8b   :  { %v164_v17 = vpop.permute.xlu0 %163   ;;  %v178_v18 = vpop.permute.xlu1 %177  }
  0x8c   :  { %166 = vst.msk [vmem:[#allocation0] sm:$0x7] %vm165_vm13, %v164_v17  }
  0x8d   :  { %180 = vst.msk [vmem:[#allocation0] sm:$0x7] %vm179_vm14, %v178_v18  }
  0x8f   :  { %v192_v19 = vpop.permute.xlu0 %191   ;;  %v206_v20 = vpop.permute.xlu1 %205  }
  0x90   :  { %194 = vst.msk [vmem:[#allocation0] sm:$0x7] %vm193_vm15, %v192_v19  }
  0x91   :  { %208 = vst.msk [vmem:[#allocation0] sm:$0x7] %vm207_vm0, %v206_v20  }
  0x93   :  { %v220_v21 = vpop.permute.xlu0 %219   ;;  %v234_v22 = vpop.permute.xlu1 %233  }
  0x94   :  { %222 = vst.msk [vmem:[#allocation0] sm:$0x7] %vm221_vm1, %v220_v21  }
  0x95   :  { %236 = vst.msk [vmem:[#allocation0] sm:$0x7] %vm235_vm2, %v234_v22  }
  0x97   :  { %v248_v23 = vpop.permute.xlu0 %247   ;;  %v262_v24 = vpop.permute.xlu1 %261  }
  0x98   :  { %250 = vst.msk [vmem:[#allocation0] sm:$0x7] %vm249_vm3, %v248_v23  }
  0x99   :  { %264 = vst.msk [vmem:[#allocation0] sm:$0x7] %vm263_vm4, %v262_v24  }
  0x9b   :  { %v276_v25 = vpop.permute.xlu0 %275   ;;  %v290_v26 = vpop.permute.xlu1 %289  }
  0x9c   :  { %278 = vst.msk [vmem:[#allocation0] sm:$0x7] %vm277_vm5, %v276_v25  }
  0x9d   :  { %292 = vst.msk [vmem:[#allocation0] sm:$0x7] %vm291_vm6, %v290_v26  }
  0x9f   :  { %v304_v27 = vpop.permute.xlu0 %303   ;;  %v318_v28 = vpop.permute.xlu1 %317  }
  0xa0   :  { %306 = vst.msk [vmem:[#allocation0] sm:$0x7] %vm305_vm7, %v304_v27  }
  0xa1   :  { %320 = vst.msk [vmem:[#allocation0] sm:$0x7] %vm319_vm8, %v318_v28  }
  0xa3   :  { %v332_v29 = vpop.permute.xlu0 %331   ;;  %v346_v30 = vpop.permute.xlu1 %345  }
  0xa4   :  { %334 = vst.msk [vmem:[#allocation0] sm:$0x7] %vm333_vm9, %v332_v29  }
  0xa5   :  { %348 = vst.msk [vmem:[#allocation0] sm:$0x7] %vm347_vm10, %v346_v30  }
  0xa7   :  { %v360_v31 = vpop.permute.xlu0 %359   ;;  %v374_v32 = vpop.permute.xlu1 %373  }
  0xa8   :  { %362 = vst.msk [vmem:[#allocation0] sm:$0x7] %vm361_vm11, %v360_v31  }
  0xa9   :  { %376 = vst.msk [vmem:[#allocation0] sm:$0x7] %vm375_vm12, %v374_v32  }
  0xb0   :  { %v381_v33 = vld [vmem:[#allocation0] sm:$0xf] }
  0xb1   :  { %384 = vst [vmem:[%s828_s1] sm:$0xf] %v381_v33 }

// kernel: gprojection3d_forward.2
= control target key start
LH: loop header
LB: loop body
LE: loop exit
PB: predicated region body
PF: predicated region fallthrough
CT: control target
= control target key end

     0   :  { %s1877_s18 = smov 0   ;;  %s1879_s19 = smov 0   ;;  %s2443_s0 = inlined_call_operand.vmem [shape: f32[2,80,32], index: 0, kind: input, shape index: {}]   ;;  %s2444_s1 = inlined_call_operand.vmem [shape: f32[2,80,3], index: 1, kind: input, shape index: {}]   ;;  %s2445_s2 = inlined_call_operand.vmem [shape: f32[32,81], index: 2, kind: input, shape index: {}]   ;;  %s2446_s3 = inlined_call_operand.vmem [shape: f32[3,81], index: 3, kind: input, shape index: {}]   ;;  %s2447_s4 = inlined_call_operand.vmem [shape: f32[1,81], index: 4, kind: input, shape index: {}]   ;;  %s2448_s5 = inlined_call_operand.vmem [shape: f32[2,80,81], index: 5, kind: output, shape index: {}]  }
   0x1   :  { %s1881_s20 = smov 0  }
   0x2 LB: > { %s27_s21 = sadd.s32 1, %s1838_s19  ;;  %p1557_p0 = scmp.ge.s32.totalorder %s1842_s20, 1  ;;  %s1842_s20 = sphi %s1881_s20, %s15_s20   ;;  %s1838_s19 = sphi %s1879_s19, %s2458_s19   ;;  %s1834_s18 = sphi %s1877_s18, %s2457_s18  }
   0x3   : > { %p29_p1 = scmp.ge.s32.totalorder %s27_s21, 2  ;;  %p225_p2 = scmp.lt.s32.totalorder %s1842_s20, 3 }
   0x5   : > { %s2460_s21 = smov (%p29_p1, %s27_s21), 0  ;;  %p226_p3 = pnand %p1557_p0, %p225_p2 }
   0x7   : > { %229 = sbr.rel (%p226_p3) target bundleno = 295 (0x127), region = 40 }
   0xc   : > { %v313_v0 = vld [vmem:[%s2445_s2 + $0x18] sm:$0xff]  ;;  %v312_v1 = vld [vmem:[%s2445_s2 + $0x10] sm:$0xff]  ;;  %v311_v2 = vld [vmem:[%s2445_s2 + $0x8] sm:$0xff]  ;;  %p271_p4 = scmp.lt.s32.totalorder %s1834_s18, 1  ;;  %v1844_v7 = vmov 0   ;;  %vm389_vm0 = vcmask 261120  }
   0xd   : > { %v1904_v3 = vand.u32 4294901760, %v313_v0  ;;  %v1906_v4 = vand.u32 4294901760, %v312_v1  ;;  %v1908_v5 = vand.u32 4294901760, %v311_v2  ;;  %v310_v6 = vld [vmem:[%s2445_s2] sm:$0xff]  ;;  %1815 = vset.pattern.permute.xlu1 %v1844_v7  ;;  %1814 = vset.pattern.permute.xlu0 %v1844_v7  ;;  %vm1437_vm1 = vcmask 662528  }
   0xe   : > { %v1913_v8 = vand.u32 4294901760, %v310_v6  ;;  %s2462_s18 = smov (!%p271_p4, %s1834_s18), 1 }
   0xf   : > { %1648 = vmatprep.subr.mxu0 %v1904_v3  ;;  %v1917_v9 = vsub.f32 %v313_v0, %v1904_v3  ;;  %v1920_v10 = vsub.f32 %v312_v1, %v1906_v4  ;;  %v1923_v11 = vsub.f32 %v311_v2, %v1908_v5  ;;  %s1929_s30 = smul.u32 80, %s2462_s18 }
  0x10   : > { %1649 = vmatpush3.msra.mxu0 %v1904_v3  ;;  %v1927_v12 = vsub.f32 %v310_v6, %v1913_v8 }
  0x11   : > { %v1932_v13 = vand.u32 4294901760, %v1917_v9  ;;  %1650 = vmatprep.subr.mxu0 %v1906_v4  ;;  %v1936_v14 = vand.u32 4294901760, %v1920_v10  ;;  %v1939_v15 = vand.u32 4294901760, %v1923_v11  ;;  %s1949_s8 = scalar_lea.vmem %s2443_s0, %s1929_s30  ;;  %s1974_s11 = scalar_lea.vmem %s2444_s1, %s1929_s30 }
  0x12   : > { %1651 = vmatpush3.msra.mxu0 %v1906_v4  ;;  %v1943_v16 = vand.u32 4294901760, %v1927_v12  ;;  %v300_v20 = vld [vmem:[%s1949_s8] sm:$0xff]  ;;  %v301_v21 = vld [vmem:[%s1949_s8 + $0x8] sm:$0xff]  ;;  %v302_v22 = vld [vmem:[%s1949_s8 + $0x10] sm:$0xff]  ;;  %s2377_s18 = scalar_lea.vmem %s2448_s5, %s1929_s30 }
  0x13   : > { %v617_v17 = vsub.f32 %v1917_v9, %v1932_v13  ;;  %v624_v18 = vsub.f32 %v1920_v10, %v1936_v14  ;;  %1652 = vmatprep.subr.mxu0 %v1908_v5  ;;  %v631_v19 = vsub.f32 %v1923_v11, %v1939_v15  ;;  %v391_v24 = vsel %vm389_vm0, %v300_v20, 0  ;;  %v303_v27 = vld [vmem:[%s1949_s8 + $0x18] sm:$0xff]  ;;  %v304_v28 = vld [vmem:[%s1949_s8 + $0x20] sm:$0xff]  ;;  %v305_v29 = vld [vmem:[%s1949_s8 + $0x28] sm:$0xff] }
  0x14   : > { %1653 = vmatpush3.msra.mxu0 %v1908_v5  ;;  %v638_v23 = vsub.f32 %v1927_v12, %v1943_v16  ;;  %v394_v25 = vsel %vm389_vm0, %v301_v21, 0  ;;  %v397_v26 = vsel %vm389_vm0, %v302_v22, 0  ;;  %v1977_v33 = vand.u32 4294901760, %v391_v24  ;;  %v306_v38 = vld [vmem:[%s1949_s8 + $0x30] sm:$0xff]  ;;  %v307_v39 = vld [vmem:[%s1949_s8 + $0x38] sm:$0xff]  ;;  %v2010_v49 = vld [vmem:[%s1974_s11] sm:$0xff] }
  0x15   : > { %v618_v30 = vand.u32 4294901760, %v617_v17  ;;  %v625_v31 = vand.u32 4294901760, %v624_v18  ;;  %v632_v32 = vand.u32 4294901760, %v631_v19  ;;  %1654 = vmatprep.subr.mxu0 %v1913_v8  ;;  %v1980_v35 = vand.u32 4294901760, %v394_v25  ;;  %v1996_v44 = vld [vmem:[%s1974_s11 + $0x10] sm:$0xff]  ;;  %v2028_v58 = vld [vmem:[%s1974_s11 + $0x18] sm:$0xff]  ;;  %327 = vperm.xlu0 %1814, %v2010_v49  }
  0x16   : > { %1655 = vmatpush3.msra.mxu0 %v1913_v8  ;;  %v639_v34 = vand.u32 4294901760, %v638_v23  ;;  %v1982_v36 = vand.u32 4294901760, %v397_v26  ;;  %v400_v37 = vsel %vm389_vm0, %v303_v27, 0  ;;  %v1988_v40 = vsub.f32 %v391_v24, %v1977_v33  ;;  %1679 = vmatprep.mubr.f32.mxu1 %v1977_v33  ;;  %v2040_v63 = vld [vmem:[%s1974_s11 + $0x8] sm:$0xff]  ;;  %v308_v7 = vld [vmem:[%s1949_s8 + $0x40] sm:$0xff] }
  0x17   : > { %1671 = vmatprep.subr.mxu1 %v618_v30  ;;  %v1991_v41 = vand.u32 4294901760, %v400_v37  ;;  %v403_v42 = vsel %vm389_vm0, %v304_v28, 0  ;;  %v406_v43 = vsel %vm389_vm0, %v305_v29, 0  ;;  %1694 = vmatprep.subr.mxu0 %v1917_v9  ;;  %v2000_v45 = vsub.f32 %v394_v25, %v1980_v35  ;;  %v309_v21 = vld [vmem:[%s1949_s8 + $0x48] sm:$0xff] }
  0x18   : > { %1672 = vmatpush3.msra.mxu1 %v618_v30  ;;  %v2003_v46 = vsub.f32 %v397_v26, %v1982_v36  ;;  %v2005_v47 = vand.u32 4294901760, %v403_v42  ;;  %v2007_v48 = vand.u32 4294901760, %v406_v43  ;;  %v491_v50 = vand.u32 4294901760, %v1988_v40  ;;  %337 = vperm.xlu1 %1815, %v1996_v44  }
  0x19   : > { %1673 = vmatprep.subr.mxu1 %v625_v31  ;;  %v2014_v51 = vsub.f32 %v400_v37, %v1991_v41  ;;  %v409_v52 = vsel %vm389_vm0, %v306_v38, 0  ;;  %v412_v53 = vsel %vm389_vm0, %v307_v39, 0  ;;  %v501_v54 = vand.u32 4294901760, %v2000_v45  ;;  %332 = vperm.xlu0 %1814, %v2040_v63  }
  0x1a   : > { %1674 = vmatpush3.msra.mxu1 %v625_v31  ;;  %v511_v55 = vand.u32 4294901760, %v2003_v46  ;;  %v2022_v56 = vsub.f32 %v403_v42, %v2005_v47  ;;  %v2025_v57 = vsub.f32 %v406_v43, %v2007_v48  ;;  %v492_v59 = vsub.f32 %v1988_v40, %v491_v50 }
  0x1b   : > { %1675 = vmatprep.subr.mxu1 %v632_v32  ;;  %v521_v60 = vand.u32 4294901760, %v2014_v51  ;;  %v2035_v61 = vand.u32 4294901760, %v409_v52  ;;  %v2037_v62 = vand.u32 4294901760, %v412_v53  ;;  %v502_v0 = vsub.f32 %v2000_v45, %v501_v54 }
  0x1c   : > { %1676 = vmatpush3.msra.mxu1 %v632_v32  ;;  %v512_v1 = vsub.f32 %v2003_v46, %v511_v55  ;;  %v531_v2 = vand.u32 4294901760, %v2022_v56  ;;  %v541_v6 = vand.u32 4294901760, %v2025_v57  ;;  %v493_v17 = vand.u32 4294901760, %v492_v59  ;;  %342 = vperm.xlu1 %1815, %v2028_v58  }
  0x1d   : > { %1677 = vmatprep.subr.mxu1 %v639_v34  ;;  %v522_v18 = vsub.f32 %v2014_v51, %v521_v60  ;;  %v2055_v19 = vsub.f32 %v409_v52, %v2035_v61  ;;  %v2058_v20 = vsub.f32 %v412_v53, %v2037_v62  ;;  %v503_v22 = vand.u32 4294901760, %v502_v0 }
  0x1e   : > { %1678 = vmatpush3.msra.mxu1 %v639_v34  ;;  %v513_v23 = vand.u32 4294901760, %v512_v1  ;;  %v532_v24 = vsub.f32 %v2022_v56, %v531_v2  ;;  %1656 = vmatprep.mubr.f32.mxu0 %v493_v17  ;;  %v542_v25 = vsub.f32 %v2025_v57, %v541_v6  ;;  %v415_v27 = vsel %vm389_vm0, %v308_v7, 0  ;;  %v2118_v17 = vld [vmem:[%s1974_s11 + $0x28] sm:$0xff] }
  0x1f   : > { %1680 = vmatmul.mubr.f32.vlgmr.msra.gmra.mxu1 %v1980_v35  ;;  %v551_v26 = vand.u32 4294901760, %v2055_v19  ;;  %1657 = vmatmul.mubr.f32.vlgmr.msra.gmra.mxu0 %v503_v22  ;;  %v523_v28 = vand.u32 4294901760, %v522_v18  ;;  %v561_v29 = vand.u32 4294901760, %v2058_v20  ;;  %v2074_v30 = vand.u32 4294901760, %v415_v27 }
  0x20   : > { %1717 = vmatprep.subr.mxu1 %v1904_v3  ;;  %v418_v31 = vsel %vm389_vm0, %v309_v21, 0  ;;  %1695 = vmatpush3.msra.mxu0 %v1917_v9  ;;  %v533_v32 = vand.u32 4294901760, %v532_v24  ;;  %v543_v39 = vand.u32 4294901760, %v542_v25 }
  0x21   : > { %1718 = vmatpush3.msra.mxu1 %v1904_v3  ;;  %v552_v34 = vsub.f32 %v2055_v19, %v551_v26  ;;  %v2082_v37 = vand.u32 4294901760, %v418_v31  ;;  %1659 = vmatprep.mubr.f32.mxu0 %v513_v23  ;;  %v2086_v38 = vsub.f32 %v415_v27, %v2074_v30  ;;  %v562_v42 = vsub.f32 %v2058_v20, %v561_v29 }
  0x22   : > { %1682 = vmatprep.mubr.f32.mxu1 %v1982_v36  ;;  %1696 = vmatprep.subr.mxu0 %v1920_v10 }
  0x23   : > { %1683 = vmatmul.mubr.f32.gmra.mxu1 %v1991_v41  ;;  %v2091_v9 = vsub.f32 %v418_v31, %v2082_v37  ;;  %1660 = vmatmul.mubr.f32.gmra.mxu0 %v523_v28  ;;  %v571_v43 = vand.u32 4294901760, %v2086_v38  ;;  %v553_v52 = vand.u32 4294901760, %v552_v34  ;;  %v324_v28 = vld [vmem:[%s2446_s3] sm:$0x7] }
  0x24   : > { %1719 = vmatprep.subr.mxu1 %v1906_v4  ;;  %1697 = vmatpush3.msra.mxu0 %v1920_v10  ;;  %v563_v10 = vand.u32 4294901760, %v562_v42 }
  0x25   : > { %1662 = vmatprep.mubr.f32.mxu0 %v533_v32  ;;  %v581_v53 = vand.u32 4294901760, %v2091_v9  ;;  %1685 = vmatprep.mubr.f32.mxu1 %v2005_v47  ;;  %v572_v59 = vsub.f32 %v2086_v38, %v571_v43 }
  0x26   : > { %1720 = vmatpush3.msra.mxu1 %v1906_v4  ;;  %1698 = vmatprep.subr.mxu0 %v1923_v11 }
  0x27   : > { %1686 = vmatmul.mubr.f32.gmra.mxu1 %v2007_v48  ;;  %1663 = vmatmul.mubr.f32.gmra.mxu0 %v543_v39  ;;  %v582_v0 = vsub.f32 %v2091_v9, %v581_v53  ;;  %v573_v1 = vand.u32 4294901760, %v572_v59 }
  0x28   : > { %1688 = vmatprep.mubr.f32.mxu1 %v2035_v61  ;;  %1699 = vmatpush3.msra.mxu0 %v1923_v11  ;;  %v2126_v11 = vld [vmem:[%s1974_s11 + $0x20] sm:$0xff] }
  0x29   : > { %1665 = vmatprep.mubr.f32.mxu0 %v553_v52  ;;  %1721 = vmatprep.subr.mxu1 %v1908_v5  ;;  %v583_v7 = vand.u32 4294901760, %v582_v0 }
  0x2a   : > { %1700 = vmatprep.subr.mxu0 %v1927_v12  ;;  %1722 = vmatpush3.msra.mxu1 %v1908_v5 }
  0x2b   : > { %1689 = vmatmul.mubr.f32.gmra.mxu1 %v2037_v62  ;;  %1701 = vmatpush3.msra.mxu0 %v1927_v12  ;;  %v2130_v12 = vld [vmem:[%s1974_s11 + $0x38] sm:$0xff] }
  0x2c   : > { %1666 = vmatmul.mubr.f32.gmra.mxu0 %v563_v10  ;;  %1691 = vmatprep.mubr.f32.mxu1 %v2074_v30 }
  0x2d   : > { %1668 = vmatprep.mubr.f32.mxu0 %v573_v1  ;;  %1723 = vmatprep.subr.mxu1 %v1913_v8 }
  0x2e   : > { %1740 = vmatprep.subr.mxu0 %v1932_v13  ;;  %352 = vperm.xlu1 %1815, %v2118_v17  }
  0x2f   : > { %1692 = vmatmul.mubr.f32.gmra.mxu1 %v2082_v37  ;;  %347 = vperm.xlu0 %1814, %v2126_v11  }
  0x30   : > { %1669 = vmatmul.mubr.f32.gmra.mxu0 %v583_v7  ;;  %1724 = vmatpush3.msra.mxu1 %v1913_v8 }
  0x31   : > { %1702 = vmatprep.mubr.f32.mxu0 %v1988_v40  ;;  %1725 = vmatprep.mubr.f32.mxu1 %v491_v50 }
  0x32   : > { %1763 = vmatprep.subr.mxu1 %v1904_v3  ;;  %362 = vperm.xlu1 %1815, %v2130_v12  }
  0x33   : > { %1726 = vmatmul.mubr.f32.vlgmr.msra.gmra.mxu1 %v501_v54 }
  0x34   : > { %1703 = vmatmul.mubr.f32.vlgmr.msra.gmra.mxu0 %v2000_v45  ;;  %1764 = vmatpush3.msra.mxu1 %v1904_v3  ;;  %v323_v3 = vld [vmem:[%s1974_s11 + $0x48] sm:$0xff] }
  0x35   : > { %1741 = vmatpush3.msra.mxu0 %v1932_v13  ;;  %1705 = vmatprep.mubr.f32.mxu0 %v2003_v46  ;;  %v322_v13 = vld [vmem:[%s1974_s11 + $0x40] sm:$0xff] }
  0x36   : > { %1728 = vmatprep.mubr.f32.mxu1 %v511_v55  ;;  %1742 = vmatprep.subr.mxu0 %v1936_v14 }
  0x37   : > { %1729 = vmatmul.mubr.f32.gmra.mxu1 %v521_v60  ;;  %1743 = vmatpush3.msra.mxu0 %v1936_v14 }
  0x38   : > { %1706 = vmatmul.mubr.f32.gmra.mxu0 %v2014_v51  ;;  %1765 = vmatprep.subr.mxu1 %v1906_v4 }
  0x39   : > { %1708 = vmatprep.mubr.f32.mxu0 %v2022_v56  ;;  %1731 = vmatprep.mubr.f32.mxu1 %v531_v2 }
  0x3a   : > { %1766 = vmatpush3.msra.mxu1 %v1906_v4  ;;  %1744 = vmatprep.subr.mxu0 %v1939_v15  ;;  %v320_v4 = vld [vmem:[%s1974_s11 + $0x30] sm:$0xff] }
  0x3b   : > { %1732 = vmatmul.mubr.f32.gmra.mxu1 %v541_v6  ;;  %1745 = vmatpush3.msra.mxu0 %v1939_v15 }
  0x3c   : > { %1709 = vmatmul.mubr.f32.gmra.mxu0 %v2025_v57  ;;  %1734 = vmatprep.mubr.f32.mxu1 %v551_v26 }
  0x3d   : > { %1711 = vmatprep.mubr.f32.mxu0 %v2055_v19  ;;  %1767 = vmatprep.subr.mxu1 %v1908_v5 }
  0x3e   : > { %1768 = vmatpush3.msra.mxu1 %v1908_v5  ;;  %1746 = vmatprep.subr.mxu0 %v1943_v16  ;;  %v1845_v5 = vmov 1  }
  0x3f   : > { %1735 = vmatmul.mubr.f32.gmra.mxu1 %v561_v29  ;;  %1747 = vmatpush3.msra.mxu0 %v1943_v16 }
  0x40   : > { %1712 = vmatmul.mubr.f32.gmra.mxu0 %v2058_v20  ;;  %1737 = vmatprep.mubr.f32.mxu1 %v571_v43 }
  0x41   : > { %1714 = vmatprep.mubr.f32.mxu0 %v2086_v38  ;;  %1769 = vmatprep.subr.mxu1 %v1913_v8 }
  0x42   : > { %1770 = vmatpush3.msra.mxu1 %v1913_v8  ;;  %372 = vperm.xlu1 %1815, %v323_v3   ;;  %v1846_v8 = vmov 2  }
  0x43   : > { %1738 = vmatmul.mubr.f32.gmra.mxu1 %v581_v53  ;;  %357 = vperm.xlu0 %1814, %v320_v4  }
  0x44   : > { %1715 = vmatmul.mubr.f32.gmra.mxu0 %v2091_v9  ;;  %1771 = vmatprep.mubr.f32.mxu1 %v1977_v33 }
  0x45   : > { %1748 = vmatprep.mubr.f32.mxu0 %v1977_v33 }
  0x46   : > { %1817 = vset.pattern.permute.xlu1 %v1845_v5 }
  0x47   : > { %1772 = vmatmul.mubr.f32.vlgmr.msra.gmra.mxu1 %v1980_v35  ;;  %1297 = vperm.xlu1 %1817, %v2040_v63  }
  0x48   : > { %1749 = vmatmul.mubr.f32.vlgmr.msra.gmra.mxu0 %v1980_v35  ;;  %1774 = vmatprep.mubr.f32.mxu1 %v1982_v36 }
  0x49   : > { %1751 = vmatprep.mubr.f32.mxu0 %v1982_v36  ;;  %367 = vperm.xlu0 %1814, %v322_v13  }
  0x4b   : > { %1775 = vmatmul.mubr.f32.gmra.mxu1 %v1991_v41  ;;  %1301 = vperm.xlu1 %1817, %v1996_v44  }
  0x4c   : > { %1752 = vmatmul.mubr.f32.gmra.mxu0 %v1991_v41  ;;  %1777 = vmatprep.mubr.f32.mxu1 %v2005_v47 }
  0x4d   : > { %1754 = vmatprep.mubr.f32.mxu0 %v2005_v47  ;;  %1816 = vset.pattern.permute.xlu0 %v1845_v5 }
  0x4e   : > { %1293 = vperm.xlu0 %1816, %v2010_v49  }
  0x4f   : > { %1778 = vmatmul.mubr.f32.gmra.mxu1 %v2007_v48  ;;  %1309 = vperm.xlu1 %1817, %v2126_v11  }
  0x50   : > { %1755 = vmatmul.mubr.f32.gmra.mxu0 %v2007_v48  ;;  %1780 = vmatprep.mubr.f32.mxu1 %v2035_v61 }
  0x51   : > { %1757 = vmatprep.mubr.f32.mxu0 %v2035_v61  ;;  %v375_v61 = vlaneseq }
  0x52   : > { %1305 = vperm.xlu0 %1816, %v2028_v58  }
  0x53   : > { %1781 = vmatmul.mubr.f32.gmra.mxu1 %v2037_v62  ;;  %1317 = vperm.xlu1 %1817, %v320_v4   ;;  %v376_v19 = vshrl.u32 %v375_v61, 7 }
  0x54   : > { %1758 = vmatmul.mubr.f32.gmra.mxu0 %v2037_v62  ;;  %1783 = vmatprep.mubr.f32.mxu1 %v2074_v30 }
  0x55   : > { %1760 = vmatprep.mubr.f32.mxu0 %v2074_v30  ;;  %v377_v26 = vsub.s32 0, %v376_v19 }
  0x56   : > { %1313 = vperm.xlu0 %1816, %v2118_v17  }
  0x57   : > { %1784 = vmatmul.mubr.f32.gmra.mxu1 %v2082_v37  ;;  %1325 = vperm.xlu1 %1817, %v322_v13   ;;  %v378_v34 = vrot.slane %v324_v28, %v377_v26 }
  0x58   : > { %1761 = vmatmul.mubr.f32.gmra.mxu0 %v2082_v37 }
  0x5a   : > { %1321 = vperm.xlu0 %1816, %v2130_v12  }
  0x5b   : > { %1818 = vset.pattern.permute.xlu1 %v1846_v8 }
  0x5c   : > { %1357 = vperm.xlu1 %1818, %v2010_v49  }
  0x5e   : > { %1329 = vperm.xlu0 %1816, %v323_v3  }
  0x60   : > { %1365 = vperm.xlu1 %1818, %v1996_v44  }
  0x62   : > { %1819 = vset.pattern.permute.xlu0 %v1846_v8  ;;  %v1398_v8 = vsub.s32 2, %v376_v19 }
  0x63   : > { %1361 = vperm.xlu0 %1819, %v2040_v63  }
  0x64   : > { %1369 = vperm.xlu1 %1818, %v2028_v58  }
  0x67   : > { %1373 = vperm.xlu0 %1819, %v2126_v11   ;;  %v1334_v11 = vsub.s32 1, %v376_v19 }
  0x68   : > { %1377 = vperm.xlu1 %1818, %v2118_v17  }
  0x6b   : > { %1381 = vperm.xlu0 %1819, %v320_v4  }
  0x6c   : > { %1385 = vperm.xlu1 %1818, %v2130_v12  }
  0x6f   : > { %1389 = vperm.xlu0 %1819, %v322_v13  }
  0x70   : > { %1393 = vperm.xlu1 %1818, %v323_v3  }
  0x90   : > { %v328_v33 = vpop.permute.xlu0 %327 }
  0x91   : > { %v379_v10 = vmul.f32 %v378_v34, %v328_v33 }
  0x93   : > { %v2216_v14 = vpop.permute.xlu1 %337 }
  0x94   : > { %v333_v36 = vpop.permute.xlu0 %332  ;;  %v381_v33 = vmul.f32 %v378_v34, %v2216_v14 }
  0x95   : > { %v380_v43 = vmul.f32 %v378_v34, %v333_v36 }
  0x97   : > { %v343_v15 = vpop.permute.xlu1 %342 }
  0x98   : > { %v382_v4 = vmul.f32 %v378_v34, %v343_v15 }
  0xa9   : > { %v2218_v16 = vpop.permute.xlu1 %352 }
  0xaa   : > { %v2224_v41 = vpop.permute.xlu0 %347  ;;  %v384_v14 = vmul.f32 %v378_v34, %v2218_v16 }
  0xad   : > { %v2220_v35 = vpop.permute.xlu1 %362 }
  0xbd   : > { %v2222_v40 = vpop.permute.xlu1 %372 }
  0xbe   : > { %v2230_v49 = vpop.permute.xlu0 %357 }
  0xc2   : > { %v2226_v44 = vpop.permute.xlu1 %1297 }
  0xc4   : > { %v2240_v58 = vpop.permute.xlu0 %367 }
  0xc6   : > { %v2234_v54 = vpop.permute.xlu1 %1301 }
  0xc9   : > { %v2256_v21 = vpop.permute.xlu0 %1293 }
  0xca   : > { %v2246_v63 = vpop.permute.xlu1 %1309 }
  0xcd   : > { %v1306_v31 = vpop.permute.xlu0 %1305 }
  0xce   : > { %v2262_v24 = vpop.permute.xlu1 %1317 }
  0xcf   : > { %2449 = vst [vmem:[#allocation2_spill] sm:$0xff] %v2262_v24 }
  0xd1   : > { %v1314_v53 = vpop.permute.xlu0 %1313 }
  0xd2   : > { %v2275_v38 = vpop.permute.xlu1 %1325 }
  0xd3   : > { %2451 = vst [vmem:[#allocation4_spill] sm:$0xff] %v2275_v38  ;;  %v2296_v38 = vrot.slane %v324_v28, %v1334_v11 }
  0xd5   : > { %v1322_v36 = vpop.permute.xlu0 %1321  ;;  %v2323_v16 = vmul.f32 %v2296_v38, %v2234_v54  ;;  %v2337_v54 = vmul.f32 %v2296_v38, %v2246_v63 }
  0xd7   : > { %v2283_v1 = vpop.permute.xlu1 %1357 }
  0xdf   : > { %v1681_v45 = vpop.f32.mrf.mxu1  ;;  %v1658_v46 = vpop.f32.mrf.mxu0 }
  0xe0   : > { %v506_v17 = vadd.f32 %v1658_v46, %v380_v43  ;;  %v383_v43 = vmul.f32 %v378_v34, %v2224_v41  ;;  %v1337_v41 = vmul.f32 %v2296_v38, %v2226_v44 }
  0xe1   : > { %v2228_v47 = vpop.f32.mrf.mxu1  ;;  %v495_v48 = vpop.f32.mrf.mxu0 }
  0xe2   : > { %v496_v5 = vadd.f32 %v495_v48, %v379_v10  ;;  %v683_v26 = vadd.f32 %v1681_v45, %v506_v17  ;;  %v386_v45 = vmul.f32 %v378_v34, %v2220_v35  ;;  %v2311_v17 = vrot.slane %v324_v28, %v1398_v8 }
  0xe3   : > { %v2232_v50 = vpop.f32.mrf.mxu1  ;;  %v1661_v51 = vpop.f32.mrf.mxu0  ;;  %v387_v35 = vmul.f32 %v378_v34, %v2240_v58 }
  0xe4   : > { %v526_v24 = vadd.f32 %v1661_v51, %v382_v4  ;;  %v677_v48 = vadd.f32 %v2228_v47, %v496_v5  ;;  %v388_v51 = vmul.f32 %v378_v34, %v2222_v40  ;;  %v385_v4 = vmul.f32 %v378_v34, %v2230_v49  ;;  %v2328_v5 = vpop.permute.xlu0 %1329 }
  0xe5   : > { %v2236_v55 = vpop.f32.mrf.mxu1  ;;  %v515_v56 = vpop.f32.mrf.mxu0 }
  0xe6   : > { %v516_v19 = vadd.f32 %v515_v56, %v381_v33  ;;  %v695_v47 = vadd.f32 %v2232_v50, %v526_v24  ;;  %v1336_v50 = vmul.f32 %v2296_v38, %v2256_v21  ;;  %v2346_v21 = vmul.f32 %v2296_v38, %v1322_v36 }
  0xe7   : > { %v2238_v57 = vpop.f32.mrf.mxu1  ;;  %v2242_v60 = vpop.f32.mrf.mxu0 }
  0xe8   : > { %v546_v40 = vadd.f32 %v2242_v60, %v384_v14  ;;  %v689_v49 = vadd.f32 %v2236_v55, %v516_v19  ;;  %v1339_v60 = vmul.f32 %v2296_v38, %v1306_v31 }
  0xe9   : > { %v2244_v62 = vpop.f32.mrf.mxu1  ;;  %v2248_v2 = vpop.f32.mrf.mxu0 }
  0xea   : > { %v536_v28 = vadd.f32 %v2248_v2, %v383_v43  ;;  %v2342_v2 = vmul.f32 %v2296_v38, %v1314_v53  ;;  %v707_v63 = vadd.f32 %v2238_v57, %v546_v40  ;;  %v1362_v43 = vpop.permute.xlu0 %1361  ;;  %v1400_v57 = vmul.f32 %v2311_v17, %v2283_v1 }
  0xeb   : > { %v2250_v6 = vpop.f32.mrf.mxu1 }
  0xec   : > { %v2252_v18 = vpop.f32.mrf.mxu0 }
  0xed   : > { %v2254_v20 = vpop.f32.mrf.mxu1  ;;  %v566_v58 = vadd.f32 %v2252_v18, %v386_v45  ;;  %v701_v18 = vadd.f32 %v2244_v62, %v536_v28 }
  0xee   : > { %v2258_v22 = vpop.f32.mrf.mxu0 }
  0xef   : > { %v2260_v23 = vpop.f32.mrf.mxu1  ;;  %v556_v31 = vadd.f32 %v2258_v22, %v385_v4 }
  0xf0   : > { %v2264_v25 = vpop.f32.mrf.mxu0 }
  0xf1   : > { %v2266_v27 = vpop.f32.mrf.mxu1  ;;  %v586_v53 = vadd.f32 %v2264_v25, %v388_v51 }
  0xf2   : > { %2450 = vst [vmem:[#allocation3_spill] sm:$0xff] %v2266_v27  ;;  %v2271_v29 = vpop.f32.mrf.mxu0  ;;  %v2301_v27 = vpop.permute.xlu1 %1365 }
  0xf3   : > { %v1727_v30 = vpop.f32.mrf.mxu1  ;;  %v731_v40 = vadd.f32 %v2260_v23, %v586_v53 }
  0xf4   : > { %v1704_v32 = vpop.f32.mrf.mxu0 }
  0xf5   : > { %v2273_v37 = vpop.f32.mrf.mxu1  ;;  %v818_v10 = vadd.f32 %v1704_v32, %v683_v26 }
  0xf6   : > { %v810_v9 = vpop.f32.mrf.mxu0  ;;  %v1370_v34 = vpop.permute.xlu1 %1369 }
  0xf7   : > { %v2277_v39 = vpop.f32.mrf.mxu1  ;;  %v811_v56 = vadd.f32 %v810_v9, %v677_v48  ;;  %v959_v24 = vadd.f32 %v1727_v30, %v818_v10 }
  0xf8   : > { %v1707_v42 = vpop.f32.mrf.mxu0 }
  0xf9   : > { %v2279_v52 = vpop.f32.mrf.mxu1  ;;  %v832_v9 = vadd.f32 %v1707_v42, %v695_v47  ;;  %v951_v55 = vadd.f32 %v2273_v37, %v811_v56  ;;  %v1401_v37 = vmul.f32 %v2311_v17, %v1362_v43  ;;  %v713_v56 = vadd.f32 %v2254_v20, %v556_v31  ;;  %v2454_v43 = vld [vmem:[#allocation3_spill] sm:$0xff] }
  0xfa   : > { %v824_v59 = vpop.f32.mrf.mxu0  ;;  %v1378_v28 = vpop.permute.xlu1 %1377  ;;  %v576_v20 = vadd.f32 %v2271_v29, %v387_v35 }
  0xfb   : > { %v2281_v0 = vpop.f32.mrf.mxu1  ;;  %v825_v30 = vadd.f32 %v824_v59, %v689_v49  ;;  %v975_v19 = vadd.f32 %v2277_v39, %v832_v9  ;;  %v719_v59 = vadd.f32 %v2250_v6, %v566_v58  ;;  %v1403_v6 = vmul.f32 %v2311_v17, %v1370_v34  ;;  %v1374_v34 = vpop.permute.xlu0 %1373 }
  0xfc   : > { %v2285_v7 = vpop.f32.mrf.mxu0 }
  0xfd   : > { %v2287_v12 = vpop.f32.mrf.mxu1  ;;  %v846_v62 = vadd.f32 %v2285_v7, %v707_v63  ;;  %v967_v25 = vadd.f32 %v2279_v52, %v825_v30  ;;  %v2367_v7 = vld [vmem:[%s2447_s4] ss:$0 sm:$0xff] }
  0xfe   : > { %v2289_v3 = vpop.f32.mrf.mxu0 }
  0xff   : > { %v2291_v13 = vpop.f32.mrf.mxu1  ;;  %v839_v22 = vadd.f32 %v2289_v3, %v701_v18  ;;  %v991_v23 = vadd.f32 %v2281_v0, %v846_v62  ;;  %v1402_v0 = vmul.f32 %v2311_v17, %v2301_v27  ;;  %v1405_v62 = vmul.f32 %v2311_v17, %v1378_v28 }
 0x100   : > { %2452 = vst [vmem:[#allocation5_spill] sm:$0xff] %v2291_v13  ;;  %v2293_v61 = vpop.f32.mrf.mxu0 }
 0x101   : > { %v2298_v46 = vpop.f32.mrf.mxu1  ;;  %v860_v1 = vadd.f32 %v2293_v61, %v719_v59 }
 0x102   : > { %v2303_v15 = vpop.f32.mrf.mxu0 }
 0x103   : > { %v2306_v13 = vpop.f32.mrf.mxu1  ;;  %v853_v61 = vadd.f32 %v2303_v15, %v713_v56 }
 0x104   : > { %v2313_v11 = vpop.f32.mrf.mxu0 }
 0x105   : > { %v2319_v32 = vpop.f32.mrf.mxu1  ;;  %v874_v15 = vadd.f32 %v2313_v11, %v731_v40  ;;  %v999_v27 = vadd.f32 %v2298_v46, %v853_v61  ;;  %v2455_v40 = vld [vmem:[#allocation2_spill] sm:$0xff] }
 0x106   : > { %v2330_v44 = vpop.f32.mrf.mxu0 }
 0x107   : > { %v1773_v8 = vpop.f32.mrf.mxu1 }
 0x108   : > { %v1750_v33 = vpop.f32.mrf.mxu0 }
 0x109   : > { %v1112_v42 = vadd.f32 %v1750_v33, %v959_v24  ;;  %v1234_v26 = vpop.f32.mrf.mxu1 }
 0x10a   : > { %v1105_v48 = vpop.f32.mrf.mxu0 }
 0x10b   : > { %v1241_v10 = vadd.f32 %v1773_v8, %v1112_v42  ;;  %v1106_v36 = vadd.f32 %v1105_v48, %v951_v55  ;;  %v1776_v14 = vpop.f32.mrf.mxu1  ;;  %v983_v8 = vadd.f32 %v2287_v12, %v839_v22  ;;  %v2453_v12 = vld [vmem:[#allocation5_spill] sm:$0xff]  ;;  %v725_v48 = vadd.f32 %v2454_v43, %v576_v20 }
 0x10c   : > { %v1753_v45 = vpop.f32.mrf.mxu0  ;;  %v1007_v35 = vadd.f32 %v2453_v12, %v860_v1  ;;  %v1023_v22 = vadd.f32 %v2306_v13, %v874_v15 }
 0x10d   : > { %v1347_v51 = vadd.f32 %v1337_v41, %v1241_v10  ;;  %v1235_v4 = vadd.f32 %v1234_v26, %v1106_v36  ;;  %v1124_v39 = vadd.f32 %v1753_v45, %v975_v19  ;;  %v1246_v47 = vpop.f32.mrf.mxu1  ;;  %v1386_v19 = vpop.permute.xlu1 %1385  ;;  %v867_v46 = vadd.f32 %v2330_v44, %v725_v48 }
 0x10e   : > { %v1117_v52 = vpop.f32.mrf.mxu0  ;;  %v1407_v1 = vmul.f32 %v2311_v17, %v1386_v19 }
 0x10f   : > { %v1411_v3 = vadd.f32 %v1401_v37, %v1347_v51  ;;  %v1346_v41 = vadd.f32 %v1336_v50, %v1235_v4  ;;  %v1253_v49 = vadd.f32 %v1776_v14, %v1124_v39  ;;  %v1118_v24 = vadd.f32 %v1117_v52, %v967_v25  ;;  %v1779_v9 = vpop.f32.mrf.mxu1  ;;  %v1382_v51 = vpop.permute.xlu0 %1381 }
 0x110   : > { %v1756_v58 = vpop.f32.mrf.mxu0  ;;  %v1404_v37 = vmul.f32 %v2311_v17, %v1374_v34 }
 0x111   : > { %v1428_v50 = vadd.f32 %v2367_v7, %v1411_v3  ;;  %v1410_v33 = vadd.f32 %v1400_v57, %v1346_v41  ;;  %v1349_v55 = vadd.f32 %v1339_v60, %v1253_v49  ;;  %v1247_v30 = vadd.f32 %v1246_v47, %v1118_v24  ;;  %v1258_v29 = vpop.f32.mrf.mxu1  ;;  %v1394_v24 = vpop.permute.xlu1 %1393 }
 0x112   : > { %v1136_v42 = vadd.f32 %v1756_v58, %v991_v23  ;;  %v1129_v26 = vpop.f32.mrf.mxu0  ;;  %v1015_v49 = vadd.f32 %v2319_v32, %v867_v46 }
 0x113   : > { %1439 = vst.msk [vmem:[%s2377_s18 + $0x8] sm:$0xff] %vm1437_vm1, %v1428_v50  ;;  %v1427_v63 = vadd.f32 %v2367_v7, %v1410_v33  ;;  %v1413_v18 = vadd.f32 %v1403_v6, %v1349_v55  ;;  %v1348_v31 = vadd.f32 %v2323_v16, %v1247_v30  ;;  %v1130_v60 = vadd.f32 %v1129_v26, %v983_v8  ;;  %v1782_v53 = vpop.f32.mrf.mxu1  ;;  %v1390_v34 = vpop.permute.xlu0 %1389 }
 0x114   : > { %v1265_v11 = vadd.f32 %v1779_v9, %v1136_v42  ;;  %v1759_v10 = vpop.f32.mrf.mxu0  ;;  %v1342_v6 = vmul.f32 %v2296_v38, %v2455_v40  ;;  %v1406_v9 = vmul.f32 %v2311_v17, %v1382_v51  ;;  %v1408_v42 = vmul.f32 %v2311_v17, %v1390_v34 }
 0x115   : > { %1438 = vst.msk [vmem:[%s2377_s18] sm:$0xff] %vm1437_vm1, %v1427_v63  ;;  %v1430_v36 = vadd.f32 %v2367_v7, %v1413_v18  ;;  %v1412_v14 = vadd.f32 %v1402_v0, %v1348_v31  ;;  %v1259_v59 = vadd.f32 %v1258_v29, %v1130_v60  ;;  %v1148_v57 = vadd.f32 %v1759_v10, %v1007_v35  ;;  %v1270_v16 = vpop.f32.mrf.mxu1  ;;  %v2456_v29 = vld [vmem:[#allocation4_spill] sm:$0xff] }
 0x116   : > { %v1351_v45 = vadd.f32 %v2342_v2, %v1265_v11  ;;  %v1141_v25 = vpop.f32.mrf.mxu0  ;;  %v1344_v0 = vmul.f32 %v2296_v38, %v2456_v29 }
 0x117   : > { %1441 = vst.msk [vmem:[%s2377_s18 + $0x18] sm:$0xff] %vm1437_vm1, %v1430_v36  ;;  %v1429_v4 = vadd.f32 %v2367_v7, %v1412_v14  ;;  %v1350_v39 = vadd.f32 %v2337_v54, %v1259_v59  ;;  %v1277_v47 = vadd.f32 %v1782_v53, %v1148_v57  ;;  %v1142_v56 = vadd.f32 %v1141_v25, %v999_v27  ;;  %v1785_v41 = vpop.f32.mrf.mxu1 }
 0x118   : > { %v1415_v13 = vadd.f32 %v1405_v62, %v1351_v45  ;;  %v1762_v28 = vpop.f32.mrf.mxu0  ;;  %v1345_v54 = vmul.f32 %v2296_v38, %v2328_v5  ;;  %v1409_v5 = vmul.f32 %v2311_v17, %v1394_v24 }
 0x119   : > { %1440 = vst.msk [vmem:[%s2377_s18 + $0x10] sm:$0xff] %vm1437_vm1, %v1429_v4  ;;  %v1414_v44 = vadd.f32 %v1404_v37, %v1350_v39  ;;  %v1353_v2 = vadd.f32 %v2346_v21, %v1277_v47  ;;  %v1271_v52 = vadd.f32 %v1270_v16, %v1142_v56  ;;  %v1160_v3 = vadd.f32 %v1762_v28, %v1023_v22  ;;  %v1282_v30 = vpop.f32.mrf.mxu1 }
 0x11a   : > { %v1432_v20 = vadd.f32 %v2367_v7, %v1415_v13  ;;  %v1153_v23 = vpop.f32.mrf.mxu0 }
 0x11b   : > { %v1431_v8 = vadd.f32 %v2367_v7, %v1414_v44  ;;  %v1417_v61 = vadd.f32 %v1407_v1, %v1353_v2  ;;  %v1352_v21 = vadd.f32 %v1342_v6, %v1271_v52  ;;  %v1289_v58 = vadd.f32 %v1785_v41, %v1160_v3 }
 0x11c   : > { %1443 = vst.msk [vmem:[%s2377_s18 + $0x28] sm:$0xff] %vm1437_vm1, %v1432_v20  ;;  %v1154_v50 = vadd.f32 %v1153_v23, %v1015_v49 }
 0x11d   : > { %1442 = vst.msk [vmem:[%s2377_s18 + $0x20] sm:$0xff] %vm1437_vm1, %v1431_v8  ;;  %v1434_v32 = vadd.f32 %v2367_v7, %v1417_v61  ;;  %v1416_v33 = vadd.f32 %v1406_v9, %v1352_v21  ;;  %v1355_v55 = vadd.f32 %v1345_v54, %v1289_v58 }
 0x11e   : > { %v1283_v12 = vadd.f32 %v1282_v30, %v1154_v50 }
 0x11f   : > { %1445 = vst.msk [vmem:[%s2377_s18 + $0x38] sm:$0xff] %vm1437_vm1, %v1434_v32  ;;  %v1433_v35 = vadd.f32 %v2367_v7, %v1416_v33  ;;  %v1419_v15 = vadd.f32 %v1409_v5, %v1355_v55 }
 0x120   : > { %v1354_v26 = vadd.f32 %v1344_v0, %v1283_v12 }
 0x121   : > { %1444 = vst.msk [vmem:[%s2377_s18 + $0x30] sm:$0xff] %vm1437_vm1, %v1433_v35  ;;  %v1436_v63 = vadd.f32 %v2367_v7, %v1419_v15 }
 0x122   : > { %v1418_v18 = vadd.f32 %v1408_v42, %v1354_v26 }
 0x123   : > { %1447 = vst.msk [vmem:[%s2377_s18 + $0x48] sm:$0xff] %vm1437_vm1, %v1436_v63 }
 0x124   : > { %v1435_v31 = vadd.f32 %v2367_v7, %v1418_v18 }
 0x126   : > { %1446 = vst.msk [vmem:[%s2377_s18 + $0x40] sm:$0xff] %vm1437_vm1, %v1435_v31 }
 0x127 PF: > { %s15_s20 = sadd.s32 1, %s1842_s20   ;;  %s2457_s18 = smov %s1838_s19 }
 0x128   : > { %p12_p5 = scmp.ge.s32.totalorder %s15_s20, 4   ;;  %s2458_s19 = smov %s2460_s21 }
 0x12a   :  { %14 = sbr.rel (!%p12_p5) target bundleno = 2 (0x2), region = 73 }

// kernel: gprojection3d_forward.3
= control target key start
LH: loop header
LB: loop body
LE: loop exit
PB: predicated region body
PF: predicated region fallthrough
CT: control target
= control target key end

     0   :  { %s8661_s18 = smov 0   ;;  %s8663_s19 = smov 0   ;;  %s13260_s0 = inlined_call_operand.vmem [shape: f32[2,80,864], index: 0, kind: input, shape index: {}]   ;;  %s13261_s1 = inlined_call_operand.vmem [shape: f32[2,80,81], index: 1, kind: input, shape index: {}]   ;;  %s13262_s2 = inlined_call_operand.vmem [shape: f32[864,128], index: 2, kind: input, shape index: {}]   ;;  %s13263_s3 = inlined_call_operand.vmem [shape: f32[81,128], index: 3, kind: input, shape index: {}]   ;;  %s13264_s4 = inlined_call_operand.vmem [shape: f32[1,128], index: 4, kind: input, shape index: {}]   ;;  %s13265_s5 = inlined_call_operand.vmem [shape: f32[2,80,128], index: 5, kind: output, shape index: {}]  }
   0x1   :  { %s8665_s20 = smov 0  }
   0x2 LB: > { %s27_s21 = sadd.s32 1, %s8625_s19  ;;  %p6744_p0 = scmp.ge.s32.totalorder %s8629_s20, 1  ;;  %s8629_s20 = sphi %s8665_s20, %s15_s20   ;;  %s8625_s19 = sphi %s8663_s19, %s14864_s19   ;;  %s8621_s18 = sphi %s8661_s18, %s14863_s18  }
   0x3   : > { %p29_p1 = scmp.ge.s32.totalorder %s27_s21, 2  ;;  %p226_p2 = scmp.lt.s32.totalorder %s8629_s20, 3 }
   0x5   : > { %s14866_s21 = smov (%p29_p1, %s27_s21), 0  ;;  %p227_p3 = pnand %p6744_p0, %p226_p2 }
   0x7   : > { %230 = sbr.rel (%p227_p3) target bundleno = 902 (0x386), region = 40 }
   0xc   : > { %v501_v0 = vld [vmem:[%s13263_s3 + $0x50] sm:$0x1]  ;;  %vm533_vm0 = vcmask 1040384   ;;  %v500_v1 = vld [vmem:[%s13263_s3 + $0x48] sm:$0xff]  ;;  %v499_v2 = vld [vmem:[%s13263_s3 + $0x40] sm:$0xff]  ;;  %p273_p4 = scmp.lt.s32.totalorder %s8621_s18, 1 }
   0xd   : > { %v535_v3 = vsel %vm533_vm0, %v501_v0, 0  ;;  %v8688_v4 = vand.u32 4294901760, %v500_v1  ;;  %v8690_v5 = vand.u32 4294901760, %v499_v2  ;;  %v498_v6 = vld [vmem:[%s13263_s3 + $0x38] sm:$0xff]  ;;  %v497_v7 = vld [vmem:[%s13263_s3 + $0x30] sm:$0xff]  ;;  %v496_v8 = vld [vmem:[%s13263_s3 + $0x28] sm:$0xff] }
   0xe   : > { %v8701_v9 = vand.u32 4294901760, %v535_v3  ;;  %v8703_v10 = vand.u32 4294901760, %v498_v6  ;;  %v8705_v11 = vand.u32 4294901760, %v497_v7  ;;  %v8707_v12 = vand.u32 4294901760, %v496_v8  ;;  %v495_v13 = vld [vmem:[%s13263_s3 + $0x20] sm:$0xff]  ;;  %s14868_s18 = smov (!%p273_p4, %s8621_s18), 1 }
   0xf   : > { %v8713_v14 = vsub.f32 %v500_v1, %v8688_v4  ;;  %v8716_v15 = vsub.f32 %v499_v2, %v8690_v5  ;;  %v8725_v17 = vand.u32 4294901760, %v495_v13  ;;  %v494_v18 = vld [vmem:[%s13263_s3 + $0x18] sm:$0xff]  ;;  %v493_v23 = vld [vmem:[%s13263_s3 + $0x10] sm:$0xff]  ;;  %v492_v28 = vld [vmem:[%s13263_s3 + $0x8] sm:$0xff]  ;;  %s8582_s17 = smul.u32 80, %s14868_s18  ;;  %vm502_vm1 = vcmask 662528  }
  0x10   : > { %8125 = vmatprep.subr.mxu0 %v8701_v9  ;;  %v8723_v16 = vsub.f32 %v535_v3, %v8701_v9  ;;  %v8731_v19 = vsub.f32 %v498_v6, %v8703_v10  ;;  %v8734_v20 = vsub.f32 %v497_v7, %v8705_v11  ;;  %v8747_v24 = vsub.f32 %v496_v8, %v8707_v12  ;;  %v8778_v34 = vld [vmem:[%s13263_s3] sm:$0xff]  ;;  %s8581_s6 = smul.u32 560, %s14868_s18 }
  0x11   : > { %8126 = vmatpush3.msra.mxu0 %v8701_v9  ;;  %v8738_v21 = vand.u32 4294901760, %v8713_v14  ;;  %v8741_v22 = vand.u32 4294901760, %v8716_v15  ;;  %v8768_v31 = vand.u32 4294901760, %v494_v18  ;;  %v8773_v33 = vand.u32 4294901760, %v493_v23  ;;  %s8788_s26 = scalar_lea.vmem %s13261_s1, %s8582_s17  ;;  %s13210_s13 = scalar_lea.vmem %s13265_s5, %s8582_s17 }
  0x12   : > { %8127 = vmatprep.subr.mxu0 %v8688_v4  ;;  %v8751_v25 = vand.u32 4294901760, %v8723_v16  ;;  %v8754_v26 = vand.u32 4294901760, %v8731_v19  ;;  %v8757_v27 = vand.u32 4294901760, %v8734_v20  ;;  %v8781_v35 = vsub.f32 %v495_v13, %v8725_v17  ;;  %v481_v39 = vld [vmem:[%s8788_s26] sm:$0xff]  ;;  %v482_v40 = vld [vmem:[%s8788_s26 + $0x8] sm:$0xff]  ;;  %v483_v41 = vld [vmem:[%s8788_s26 + $0x10] sm:$0xff]  ;;  %s9384_s15 = scalar_lea.vmem %s13260_s0, %s8581_s6 }
  0x13   : > { %8128 = vmatpush3.msra.mxu0 %v8688_v4  ;;  %v734_v29 = vsub.f32 %v8713_v14, %v8738_v21  ;;  %v741_v30 = vsub.f32 %v8716_v15, %v8741_v22  ;;  %v8793_v37 = vand.u32 4294901760, %v492_v28  ;;  %v8796_v38 = vand.u32 4294901760, %v8747_v24  ;;  %v484_v50 = vld [vmem:[%s8788_s26 + $0x18] sm:$0xff]  ;;  %v485_v59 = vld [vmem:[%s8788_s26 + $0x20] sm:$0xff] }
  0x14   : > { %8129 = vmatprep.subr.mxu0 %v8690_v5  ;;  %v727_v32 = vsub.f32 %v8723_v16, %v8751_v25  ;;  %v748_v36 = vsub.f32 %v8731_v19, %v8754_v26  ;;  %v755_v44 = vsub.f32 %v8734_v20, %v8757_v27  ;;  %v504_v45 = vsel %vm502_vm1, %v481_v39, 0  ;;  %v487_v39 = vld [vmem:[%s8788_s26 + $0x30] sm:$0xff] }
  0x15   : > { %8130 = vmatpush3.msra.mxu0 %v8690_v5  ;;  %v735_v43 = vand.u32 4294901760, %v734_v29  ;;  %v742_v46 = vand.u32 4294901760, %v741_v30  ;;  %v8807_v47 = vand.u32 4294901760, %v8778_v34  ;;  %v8809_v48 = vand.u32 4294901760, %v504_v45 }
  0x16   : > { %8131 = vmatprep.subr.mxu0 %v8703_v10  ;;  %v728_v42 = vand.u32 4294901760, %v727_v32  ;;  %v8812_v49 = vsub.f32 %v494_v18, %v8768_v31  ;;  %v8817_v51 = vand.u32 4294901760, %v8781_v35  ;;  %v507_v52 = vsel %vm502_vm1, %v482_v40, 0 }
  0x17   : > { %8132 = vmatpush3.msra.mxu0 %v8703_v10  ;;  %v8821_v53 = vsub.f32 %v493_v23, %v8773_v33  ;;  %v510_v54 = vsel %vm502_vm1, %v483_v41, 0  ;;  %v762_v55 = vsub.f32 %v8747_v24, %v8796_v38  ;;  %v8828_v56 = vsub.f32 %v504_v45, %v8809_v48  ;;  %8184 = vmatprep.mubr.f32.mxu1 %v8809_v48 }
  0x18   : > { %8133 = vmatprep.subr.mxu0 %v8705_v11  ;;  %8162 = vmatprep.subr.mxu1 %v728_v42  ;;  %v8831_v57 = vand.u32 4294901760, %v8812_v49  ;;  %v8833_v58 = vand.u32 4294901760, %v507_v52  ;;  %v749_v60 = vand.u32 4294901760, %v748_v36  ;;  %v756_v61 = vand.u32 4294901760, %v755_v44 }
  0x19   : > { %8134 = vmatpush3.msra.mxu0 %v8705_v11  ;;  %8163 = vmatpush3.msra.mxu1 %v728_v42  ;;  %v8837_v62 = vand.u32 4294901760, %v510_v54  ;;  %v513_v63 = vsel %vm502_vm1, %v484_v50, 0  ;;  %v13268_v0 = vand.u32 4294901760, %v8828_v56  ;;  %v8846_v2 = vsub.f32 %v492_v28, %v8793_v37  ;;  %v486_v28 = vld [vmem:[%s8788_s26 + $0x28] sm:$0xff] }
  0x1a   : > { %8135 = vmatprep.subr.mxu0 %v8707_v12  ;;  %8164 = vmatprep.subr.mxu1 %v735_v43  ;;  %v8843_v1 = vsub.f32 %v507_v52, %v8833_v58  ;;  %v8848_v3 = vand.u32 4294901760, %v513_v63  ;;  %v769_v6 = vsub.f32 %v8781_v35, %v8817_v51  ;;  %v8854_v7 = vand.u32 4294901760, %v8821_v53 }
  0x1b   : > { %8136 = vmatpush3.msra.mxu0 %v8707_v12  ;;  %8165 = vmatpush3.msra.mxu1 %v735_v43  ;;  %v8857_v8 = vsub.f32 %v510_v54, %v8837_v62  ;;  %v516_v13 = vsel %vm502_vm1, %v485_v59, 0  ;;  %v776_v18 = vsub.f32 %v8812_v49, %v8831_v57  ;;  %v763_v29 = vand.u32 4294901760, %v762_v55  ;;  %v488_v43 = vld [vmem:[%s8788_s26 + $0x38] sm:$0xff] }
  0x1c   : > { %8137 = vmatprep.subr.mxu0 %v8725_v17  ;;  %8166 = vmatprep.subr.mxu1 %v742_v46  ;;  %v13266_v23 = vand.u32 4294901760, %v8843_v1  ;;  %v616_v30 = vsub.f32 %v8828_v56, %v13268_v0  ;;  %v8870_v32 = vsub.f32 %v513_v63, %v8848_v3  ;;  %v8874_v36 = vsub.f32 %v8778_v34, %v8807_v47 }
  0x1d   : > { %8138 = vmatpush3.msra.mxu0 %v8725_v17  ;;  %8167 = vmatpush3.msra.mxu1 %v742_v46  ;;  %v8882_v41 = vand.u32 4294901760, %v8846_v2  ;;  %v8884_v42 = vand.u32 4294901760, %v516_v13  ;;  %v770_v44 = vand.u32 4294901760, %v769_v6  ;;  %v783_v34 = vsub.f32 %v8821_v53, %v8854_v7 }
  0x1e   : > { %8139 = vmatprep.subr.mxu0 %v8768_v31  ;;  %8168 = vmatprep.subr.mxu1 %v749_v60  ;;  %v626_v40 = vsub.f32 %v8843_v1, %v13266_v23  ;;  %v13267_v45 = vand.u32 4294901760, %v8857_v8  ;;  %v519_v46 = vsel %vm502_vm1, %v486_v28, 0  ;;  %v777_v50 = vand.u32 4294901760, %v776_v18 }
  0x1f   : > { %8140 = vmatpush3.msra.mxu0 %v8768_v31  ;;  %8169 = vmatpush3.msra.mxu1 %v749_v60  ;;  %13841 = vst [vmem:[#allocation2_spill] sm:$0xff] %v8882_v41  ;;  %v8894_v52 = vand.u32 4294901760, %v8874_v36  ;;  %v8896_v54 = vand.u32 4294901760, %v519_v46  ;;  %v522_v55 = vsel %vm502_vm1, %v487_v39, 0  ;;  %v617_v59 = vand.u32 4294901760, %v616_v30  ;;  %v489_v39 = vld [vmem:[%s8788_s26 + $0x40] sm:$0xff] }
  0x20   : > { %8141 = vmatprep.subr.mxu0 %v8773_v33  ;;  %8170 = vmatprep.subr.mxu1 %v756_v61  ;;  %v13273_v60 = vand.u32 4294901760, %v8870_v32  ;;  %v8902_v63 = vsub.f32 %v516_v13, %v8884_v42  ;;  %v627_v6 = vand.u32 4294901760, %v626_v40  ;;  %v790_v18 = vsub.f32 %v8846_v2, %v8882_v41 }
  0x21   : > { %8142 = vmatpush3.msra.mxu0 %v8773_v33  ;;  %8171 = vmatpush3.msra.mxu1 %v756_v61  ;;  %13842 = vst [vmem:[#allocation3_spill] sm:$0xff] %v8894_v52  ;;  %v525_v61 = vsel %vm502_vm1, %v488_v43, 0  ;;  %v8909_v28 = vsub.f32 %v519_v46, %v8896_v54  ;;  %v636_v13 = vsub.f32 %v8857_v8, %v13267_v45  ;;  %v8915_v30 = vand.u32 4294901760, %v522_v55  ;;  %v490_v46 = vld [vmem:[%s8788_s26 + $0x48] sm:$0xff] }
  0x22   : > { %8143 = vmatprep.subr.mxu0 %v8793_v37  ;;  %8172 = vmatprep.subr.mxu1 %v763_v29  ;;  %v797_v40 = vsub.f32 %v8874_v36, %v8894_v52  ;;  %v8921_v43 = vand.u32 4294901760, %v525_v61  ;;  %v646_v23 = vsub.f32 %v8870_v32, %v13273_v60  ;;  %v655_v45 = vand.u32 4294901760, %v8902_v63 }
  0x23   : > { %8144 = vmatpush3.msra.mxu0 %v8793_v37  ;;  %8173 = vmatpush3.msra.mxu1 %v763_v29  ;;  %v784_v29 = vand.u32 4294901760, %v783_v34  ;;  %v791_v0 = vand.u32 4294901760, %v790_v18  ;;  %v528_v34 = vsel %vm502_vm1, %v489_v39, 0  ;;  %v637_v52 = vand.u32 4294901760, %v636_v13 }
  0x24   : > { %8145 = vmatprep.subr.mxu0 %v8807_v47  ;;  %8174 = vmatprep.subr.mxu1 %v770_v44  ;;  %v531_v41 = vsel %vm502_vm1, %v490_v46, 0  ;;  %v798_v60 = vand.u32 4294901760, %v797_v40  ;;  %v647_v18 = vand.u32 4294901760, %v646_v23  ;;  %vm1500_vm2 = vcmask 785408  }
  0x25   : > { %8146 = vmatpush3.msra.mxu0 %v8807_v47  ;;  %8175 = vmatpush3.msra.mxu1 %v770_v44  ;;  %v665_v44 = vand.u32 4294901760, %v8909_v28  ;;  %v8950_v13 = vand.u32 4294901760, %v531_v41 }
  0x26   : > { %8147 = vmatprep.mubr.f32.mxu0 %v617_v59  ;;  %8176 = vmatprep.subr.mxu1 %v777_v50  ;;  %v8933_v59 = vsub.f32 %v522_v55, %v8915_v30 }
  0x27   : > { %8199 = vmatprep.subr.mxu0 %v8723_v16  ;;  %8148 = vmatmul.mubr.f32.vlgmr.msra.gmra.mxu0 %v627_v6  ;;  %v8938_v6 = vsub.f32 %v525_v61, %v8921_v43  ;;  %v666_v55 = vsub.f32 %v8909_v28, %v665_v44 }
  0x28   : > { %8177 = vmatpush3.msra.mxu1 %v777_v50  ;;  %8200 = vmatpush3.msra.mxu0 %v8723_v16  ;;  %v656_v16 = vsub.f32 %v8902_v63, %v655_v45  ;;  %v8944_v50 = vand.u32 4294901760, %v528_v34 }
  0x29   : > { %8178 = vmatprep.subr.mxu1 %v784_v29  ;;  %8201 = vmatprep.subr.mxu0 %v8713_v14  ;;  %v685_v23 = vand.u32 4294901760, %v8938_v6 }
  0x2a   : > { %8179 = vmatpush3.msra.mxu1 %v784_v29  ;;  %8202 = vmatpush3.msra.mxu0 %v8713_v14  ;;  %v675_v14 = vand.u32 4294901760, %v8933_v59  ;;  %v657_v61 = vand.u32 4294901760, %v656_v16  ;;  %v8957_v39 = vsub.f32 %v528_v34, %v8944_v50  ;;  %v667_v29 = vand.u32 4294901760, %v666_v55  ;;  %v400_v16 = vld [vmem:[%s13262_s2 + $0xd8] sm:$0xff] }
  0x2b   : > { %8180 = vmatprep.subr.mxu1 %v791_v0  ;;  %8203 = vmatprep.subr.mxu0 %v8716_v15 }
  0x2c   : > { %8150 = vmatprep.mubr.f32.mxu0 %v637_v52  ;;  %8181 = vmatpush3.msra.mxu1 %v791_v0  ;;  %v8961_v0 = vsub.f32 %v531_v41, %v8950_v13  ;;  %v686_v52 = vsub.f32 %v8938_v6, %v685_v23  ;;  %v695_v41 = vand.u32 4294901760, %v8957_v39 }
  0x2d   : > { %8204 = vmatpush3.msra.mxu0 %v8716_v15  ;;  %8182 = vmatprep.subr.mxu1 %v798_v60  ;;  %v676_v15 = vsub.f32 %v8933_v59, %v675_v14 }
  0x2e   : > { %8151 = vmatmul.mubr.f32.gmra.mxu0 %v647_v18  ;;  %8205 = vmatprep.subr.mxu0 %v8731_v19  ;;  %v687_v40 = vand.u32 4294901760, %v686_v52  ;;  %v13853_v18 = vld [vmem:[#allocation3_spill] sm:$0xff] }
  0x2f   : > { %8183 = vmatpush3.msra.mxu1 %v798_v60  ;;  %8206 = vmatpush3.msra.mxu0 %v8731_v19  ;;  %v705_v19 = vand.u32 4294901760, %v8961_v0  ;;  %v677_v60 = vand.u32 4294901760, %v676_v15 }
  0x30   : > { %8185 = vmatmul.mubr.f32.vlgmr.msra.gmra.mxu1 %v8833_v58  ;;  %8207 = vmatprep.subr.mxu0 %v8734_v20 }
  0x31   : > { %8236 = vmatprep.subr.mxu1 %v8701_v9  ;;  %8153 = vmatprep.mubr.f32.mxu0 %v657_v61  ;;  %v706_v46 = vsub.f32 %v8961_v0, %v705_v19 }
  0x32   : > { %8208 = vmatpush3.msra.mxu0 %v8734_v20  ;;  %8237 = vmatpush3.msra.mxu1 %v8701_v9  ;;  %v696_v20 = vsub.f32 %v8957_v39, %v695_v41 }
  0x33   : > { %8154 = vmatmul.mubr.f32.gmra.mxu0 %v667_v29  ;;  %8209 = vmatprep.subr.mxu0 %v8747_v24  ;;  %v707_v34 = vand.u32 4294901760, %v706_v46  ;;  %v399_v29 = vld [vmem:[%s13262_s2 + $0xd0] sm:$0xff] }
  0x34   : > { %8238 = vmatprep.subr.mxu1 %v8688_v4  ;;  %8187 = vmatprep.mubr.f32.mxu1 %v8837_v62 }
  0x35   : > { %8210 = vmatpush3.msra.mxu0 %v8747_v24  ;;  %8239 = vmatpush3.msra.mxu1 %v8688_v4  ;;  %v697_v24 = vand.u32 4294901760, %v696_v20  ;;  %v398_v20 = vld [vmem:[%s13262_s2 + $0xc8] sm:$0xff] }
  0x36   : > { %8211 = vmatprep.subr.mxu0 %v8781_v35  ;;  %8188 = vmatmul.mubr.f32.gmra.mxu1 %v8848_v3 }
  0x37   : > { %8240 = vmatprep.subr.mxu1 %v8690_v5  ;;  %8156 = vmatprep.mubr.f32.mxu0 %v677_v60  ;;  %v9170_v60 = vand.u32 4294901760, %v400_v16 }
  0x38   : > { %8212 = vmatpush3.msra.mxu0 %v8781_v35  ;;  %8241 = vmatpush3.msra.mxu1 %v8690_v5 }
  0x39   : > { %8157 = vmatmul.mubr.f32.gmra.mxu0 %v687_v40  ;;  %8213 = vmatprep.subr.mxu0 %v8812_v49  ;;  %13857 = vst [vmem:[#allocation10_spill] sm:$0xff] %v9170_v60 }
  0x3a   : > { %8242 = vmatprep.subr.mxu1 %v8703_v10  ;;  %8190 = vmatprep.mubr.f32.mxu1 %v8884_v42 }
  0x3b   : > { %8214 = vmatpush3.msra.mxu0 %v8812_v49  ;;  %8243 = vmatpush3.msra.mxu1 %v8703_v10  ;;  %v402_v49 = vld [vmem:[%s13262_s2 + $0xe8] sm:$0xff] }
  0x3c   : > { %8215 = vmatprep.subr.mxu0 %v8821_v53  ;;  %8191 = vmatmul.mubr.f32.gmra.mxu1 %v8896_v54 }
  0x3d   : > { %8244 = vmatprep.subr.mxu1 %v8705_v11  ;;  %8159 = vmatprep.mubr.f32.mxu0 %v697_v24  ;;  %v9186_v24 = vand.u32 4294901760, %v399_v29 }
  0x3e   : > { %8216 = vmatpush3.msra.mxu0 %v8821_v53  ;;  %8245 = vmatpush3.msra.mxu1 %v8705_v11 }
  0x3f   : > { %8160 = vmatmul.mubr.f32.gmra.mxu0 %v707_v34  ;;  %8217 = vmatprep.subr.mxu0 %v8846_v2  ;;  %13859 = vst [vmem:[#allocation12_spill] sm:$0xff] %v9186_v24 }
  0x40   : > { %8246 = vmatprep.subr.mxu1 %v8707_v12  ;;  %8193 = vmatprep.mubr.f32.mxu1 %v8915_v30 }
  0x41   : > { %8218 = vmatpush3.msra.mxu0 %v8846_v2  ;;  %8247 = vmatpush3.msra.mxu1 %v8707_v12  ;;  %v9100_v2 = vand.u32 4294901760, %v402_v49 }
  0x42   : > { %8219 = vmatprep.subr.mxu0 %v8874_v36  ;;  %8194 = vmatmul.mubr.f32.gmra.mxu1 %v8921_v43 }
  0x43   : > { %8248 = vmatprep.subr.mxu1 %v8725_v17  ;;  %8220 = vmatpush3.msra.mxu0 %v8874_v36  ;;  %13848 = vst [vmem:[#allocation5_spill] sm:$0xff] %v9100_v2  ;;  %v13850_v36 = vld [vmem:[#allocation2_spill] sm:$0xff] }
  0x44   : > { %8221 = vmatprep.mubr.f32.mxu0 %v8828_v56  ;;  %8249 = vmatpush3.msra.mxu1 %v8725_v17 }
  0x45   : > { %8222 = vmatmul.mubr.f32.vlgmr.msra.gmra.mxu0 %v8843_v1  ;;  %8250 = vmatprep.subr.mxu1 %v8768_v31 }
  0x46   : > { %8273 = vmatprep.subr.mxu0 %v8751_v25  ;;  %8196 = vmatprep.mubr.f32.mxu1 %v8944_v50 }
  0x47   : > { %8251 = vmatpush3.msra.mxu1 %v8768_v31  ;;  %8274 = vmatpush3.msra.mxu0 %v8751_v25  ;;  %v13844_v25 = vand.u32 4294901760, %v8843_v1 }
  0x48   : > { %8197 = vmatmul.mubr.f32.gmra.mxu1 %v8950_v13  ;;  %8252 = vmatprep.subr.mxu1 %v8773_v33 }
  0x49   : > { %8275 = vmatprep.subr.mxu0 %v8738_v21  ;;  %8224 = vmatprep.mubr.f32.mxu0 %v8857_v8 }
  0x4a   : > { %8253 = vmatpush3.msra.mxu1 %v8773_v33  ;;  %8276 = vmatpush3.msra.mxu0 %v8738_v21  ;;  %v13843_v21 = vand.u32 4294901760, %v8828_v56 }
  0x4b   : > { %8254 = vmatprep.subr.mxu1 %v8793_v37  ;;  %8225 = vmatmul.mubr.f32.gmra.mxu0 %v8870_v32 }
  0x4c   : > { %8277 = vmatprep.subr.mxu0 %v8741_v22  ;;  %8255 = vmatpush3.msra.mxu1 %v8793_v37 }
  0x4d   : > { %8278 = vmatpush3.msra.mxu0 %v8741_v22  ;;  %8256 = vmatprep.subr.mxu1 %v8807_v47  ;;  %v13845_v22 = vand.u32 4294901760, %v8857_v8  ;;  %v385_v8 = vld [vmem:[%s13262_s2 + $0x60] sm:$0xff] }
  0x4e   : > { %8279 = vmatprep.subr.mxu0 %v8754_v26  ;;  %8227 = vmatprep.mubr.f32.mxu0 %v8902_v63 }
  0x4f   : > { %8257 = vmatpush3.msra.mxu1 %v8807_v47  ;;  %8258 = vmatprep.mubr.f32.mxu1 %v13843_v21 }
  0x50   : > { %8280 = vmatpush3.msra.mxu0 %v8754_v26  ;;  %8259 = vmatmul.mubr.f32.vlgmr.msra.gmra.mxu1 %v13844_v25  ;;  %v13846_v26 = vand.u32 4294901760, %v8870_v32 }
  0x51   : > { %8228 = vmatmul.mubr.f32.gmra.mxu0 %v8909_v28  ;;  %8281 = vmatprep.subr.mxu0 %v8757_v27  ;;  %v9131_v28 = vand.u32 4294901760, %v385_v8 }
  0x52   : > { %8310 = vmatprep.subr.mxu1 %v8701_v9  ;;  %8282 = vmatpush3.msra.mxu0 %v8757_v27  ;;  %v404_v27 = vld [vmem:[%s13262_s2 + $0xf8] sm:$0xff] }
  0x53   : > { %8311 = vmatpush3.msra.mxu1 %v8701_v9  ;;  %8283 = vmatprep.subr.mxu0 %v8796_v38  ;;  %v388_v9 = vld [vmem:[%s13262_s2 + $0x78] sm:$0xff]  ;;  %13852 = vst [vmem:[#allocation7_spill] sm:$0xff] %v9131_v28 }
  0x54   : > { %8312 = vmatprep.subr.mxu1 %v8688_v4  ;;  %8230 = vmatprep.mubr.f32.mxu0 %v8933_v59  ;;  %v9070_v35 = vand.u32 4294901760, %v388_v9 }
  0x55   : > { %8261 = vmatprep.mubr.f32.mxu1 %v13845_v22  ;;  %8284 = vmatpush3.msra.mxu0 %v8796_v38  ;;  %v387_v38 = vld [vmem:[%s13262_s2 + $0x70] sm:$0xff] }
  0x56   : > { %8313 = vmatpush3.msra.mxu1 %v8688_v4  ;;  %8231 = vmatmul.mubr.f32.gmra.mxu0 %v8938_v6  ;;  %v403_v4 = vld [vmem:[%s13262_s2 + $0xf0] sm:$0xff]  ;;  %v9093_v56 = vand.u32 4294901760, %v387_v38  ;;  %v9098_v1 = vsub.f32 %v388_v9, %v9070_v35  ;;  %v382_v6 = vld [vmem:[%s13262_s2 + $0x48] sm:$0xff]  ;;  %v397_v9 = vld [vmem:[%s13262_s2 + $0xc0] sm:$0xff] }
  0x57   : > { %8262 = vmatmul.mubr.f32.gmra.mxu1 %v13846_v26  ;;  %8285 = vmatprep.subr.mxu0 %v8817_v51  ;;  %v9088_v53 = vand.u32 4294901760, %v403_v4  ;;  %v9201_v26 = vand.u32 4294901760, %v382_v6 }
  0x58   : > { %8314 = vmatprep.subr.mxu1 %v8690_v5  ;;  %8286 = vmatpush3.msra.mxu0 %v8817_v51  ;;  %v386_v51 = vld [vmem:[%s13262_s2 + $0x68] sm:$0xff]  ;;  %13847 = vst [vmem:[#allocation4_spill] sm:$0xff] %v9093_v56  ;;  %v13280_v55 = vand.u32 4294901760, %v9098_v1 }
  0x59   : > { %8315 = vmatpush3.msra.mxu1 %v8690_v5  ;;  %8287 = vmatprep.subr.mxu0 %v8831_v57  ;;  %v9078_v5 = vand.u32 4294901760, %v404_v27  ;;  %v9121_v63 = vsub.f32 %v403_v4, %v9088_v53  ;;  %13861 = vst [vmem:[#allocation14_spill] sm:$0xff] %v9201_v26 }
  0x5a   : > { %8316 = vmatprep.subr.mxu1 %v8703_v10  ;;  %8233 = vmatprep.mubr.f32.mxu0 %v8957_v39 }
  0x5b   : > { %8264 = vmatprep.mubr.f32.mxu1 %v655_v45  ;;  %8288 = vmatpush3.msra.mxu0 %v8831_v57  ;;  %v9102_v57 = vand.u32 4294901760, %v386_v51  ;;  %v9113_v32 = vsub.f32 %v404_v27, %v9078_v5  ;;  %v384_v45 = vld [vmem:[%s13262_s2 + $0x58] sm:$0xff]  ;;  %v13279_v15 = vand.u32 4294901760, %v9121_v63  ;;  %v381_v27 = vld [vmem:[%s13262_s2 + $0x40] sm:$0xff] }
  0x5c   : > { %8317 = vmatpush3.msra.mxu1 %v8703_v10  ;;  %8234 = vmatmul.mubr.f32.gmra.mxu0 %v8961_v0  ;;  %v401_v10 = vld [vmem:[%s13262_s2 + $0xe0] sm:$0xff]  ;;  %v9152_v61 = vand.u32 4294901760, %v384_v45 }
  0x5d   : > { %8265 = vmatmul.mubr.f32.gmra.mxu1 %v665_v44  ;;  %8289 = vmatprep.subr.mxu0 %v8854_v7  ;;  %13849 = vst [vmem:[#allocation6_spill] sm:$0xff] %v9102_v57  ;;  %v383_v44 = vld [vmem:[%s13262_s2 + $0x50] sm:$0xff]  ;;  %v9139_v59 = vsub.f32 %v386_v51, %v9102_v57  ;;  %v9209_v39 = vsub.f32 %v9121_v63, %v13279_v15 }
  0x5e   : > { %8318 = vmatprep.subr.mxu1 %v8705_v11  ;;  %8290 = vmatpush3.msra.mxu0 %v8854_v7  ;;  %v9129_v7 = vand.u32 4294901760, %v401_v10  ;;  %13854 = vst [vmem:[#allocation3_spill] sm:$0xff] %v9152_v61  ;;  %v9160_v52 = vand.u32 4294901760, %v383_v44  ;;  %v9199_v22 = vsub.f32 %v384_v45, %v9152_v61  ;;  %v9257_v45 = vsub.f32 %v382_v6, %v9201_v26  ;;  %v379_v15 = vld [vmem:[%s13262_s2 + $0x30] sm:$0xff] }
  0x5f   : > { %8319 = vmatpush3.msra.mxu1 %v8705_v11  ;;  %8291 = vmatprep.subr.mxu0 %v13850_v36  ;;  %v9127_v11 = vsub.f32 %v387_v38, %v9093_v56  ;;  %v13274_v21 = vand.u32 4294901760, %v9139_v59  ;;  %v9232_v38 = vsub.f32 %v400_v16, %v9170_v60 }
  0x60   : > { %8320 = vmatprep.subr.mxu1 %v8707_v12  ;;  %8267 = vmatprep.mubr.f32.mxu1 %v675_v14  ;;  %13851 = vst [vmem:[#allocation2_spill] sm:$0xff] %v9129_v7  ;;  %v9146_v14 = vsub.f32 %v402_v49, %v9100_v2  ;;  %13855 = vst [vmem:[#allocation8_spill] sm:$0xff] %v9160_v52  ;;  %v9177_v46 = vsub.f32 %v401_v10, %v9129_v7  ;;  %v380_v49 = vld [vmem:[%s13262_s2 + $0x38] sm:$0xff]  ;;  %v13282_v16 = vand.u32 4294901760, %v9199_v22 }
  0x61   : > { %8292 = vmatpush3.msra.mxu0 %v13850_v36  ;;  %8321 = vmatpush3.msra.mxu1 %v8707_v12  ;;  %v13281_v12 = vand.u32 4294901760, %v9113_v32  ;;  %v13276_v40 = vand.u32 4294901760, %v9127_v11  ;;  %13860 = vst [vmem:[#allocation13_spill] sm:$0xff] %v9199_v22  ;;  %13864 = vst [vmem:[#allocation17_spill] sm:$0xff] %v9232_v38  ;;  %v9251_v36 = vsub.f32 %v399_v29, %v9186_v24  ;;  %v1902_v29 = vand.u32 4294901760, %v9209_v39 }
  0x62   : > { %8293 = vmatprep.subr.mxu0 %v13853_v18  ;;  %8268 = vmatmul.mubr.f32.gmra.mxu1 %v685_v23  ;;  %v9168_v23 = vsub.f32 %v385_v8, %v9131_v28  ;;  %13858 = vst [vmem:[#allocation11_spill] sm:$0xff] %v9177_v46  ;;  %v13275_v34 = vand.u32 4294901760, %v9146_v14  ;;  %v9248_v8 = vsub.f32 %v9139_v59, %v13274_v21  ;;  %13866 = vst [vmem:[#allocation19_spill] sm:$0xff] %v9257_v45 }
  0x63   : > { %8322 = vmatprep.subr.mxu1 %v8725_v17  ;;  %8294 = vmatpush3.msra.mxu0 %v13853_v18  ;;  %v9196_v25 = vsub.f32 %v9113_v32, %v13281_v12  ;;  %v9224_v0 = vsub.f32 %v9127_v11, %v13276_v40  ;;  %13865 = vst [vmem:[#allocation18_spill] sm:$0xff] %v9251_v36  ;;  %v396_v18 = vld [vmem:[%s13262_s2 + $0xb8] sm:$0xff] }
  0x64   : > { %8295 = vmatprep.mubr.f32.mxu0 %v8809_v48  ;;  %8323 = vmatpush3.msra.mxu1 %v8725_v17  ;;  %13856 = vst [vmem:[#allocation9_spill] sm:$0xff] %v9168_v23  ;;  %v9184_v17 = vsub.f32 %v9098_v1, %v13280_v55  ;;  %v13278_v4 = vand.u32 4294901760, %v9168_v23  ;;  %v9243_v10 = vsub.f32 %v9146_v14, %v13275_v34 }
  0x65   : > { %8296 = vmatmul.mubr.f32.vlgmr.msra.gmra.mxu0 %v8833_v58  ;;  %8324 = vmatprep.subr.mxu1 %v8768_v31  ;;  %v1790_v21 = vand.u32 4294901760, %v9224_v0  ;;  %v9307_v55 = vsub.f32 %v9199_v22, %v13282_v16  ;;  %v9313_v0 = vld [vmem:[%s13262_s2 + $0xa8] sm:$0xff] }
  0x66   : > { %6877 = vmatprep.subr.mxu0 %v9078_v5  ;;  %8270 = vmatprep.mubr.f32.mxu1 %v695_v41  ;;  %v9214_v41 = vand.u32 4294901760, %v398_v20  ;;  %v1783_v51 = vand.u32 4294901760, %v9184_v17  ;;  %v9268_v17 = vand.u32 4294901760, %v381_v27  ;;  %v9286_v39 = vsub.f32 %v9168_v23, %v13278_v4  ;;  %v9398_v23 = vld [vmem:[%s13262_s2 + $0x98] sm:$0xff] }
  0x67   : > { %8325 = vmatpush3.msra.mxu1 %v8768_v31  ;;  %6878 = vmatpush3.msra.mxu0 %v9070_v35  ;;  %v9212_v31 = vsub.f32 %v383_v44, %v9160_v52  ;;  %v9259_v44 = vand.u32 4294901760, %v397_v9  ;;  %v13876_v4 = vand.u32 4294901760, %v9232_v38 }
  0x68   : > { %8271 = vmatmul.mubr.f32.gmra.mxu1 %v705_v19  ;;  %13863 = vst [vmem:[#allocation16_spill] sm:$0xff] %v9214_v41  ;;  %8326 = vmatprep.subr.mxu1 %v8773_v33  ;;  %v13277_v19 = vand.u32 4294901760, %v9177_v46  ;;  %13868 = vst [vmem:[#allocation21_spill] sm:$0xff] %v9268_v17  ;;  %v9273_v6 = vsub.f32 %v398_v20, %v9214_v41  ;;  %v378_v20 = vld [vmem:[%s13262_s2 + $0x28] sm:$0xff]  ;;  %v9326_v16 = vsub.f32 %v381_v27, %v9268_v17 }
  0x69   : > { %13862 = vst [vmem:[#allocation15_spill] sm:$0xff] %v9212_v31  ;;  %6879 = vmatprep.subr.mxu0 %v9088_v53  ;;  %8298 = vmatprep.mubr.f32.mxu0 %v8837_v62  ;;  %13867 = vst [vmem:[#allocation20_spill] sm:$0xff] %v9259_v44  ;;  %v9341_v27 = vsub.f32 %v9232_v38, %v13876_v4  ;;  %v9357_v22 = vand.u32 4294901760, %v378_v20 }
  0x6a   : > { %8327 = vmatpush3.msra.mxu1 %v8773_v33  ;;  %6880 = vmatpush3.msra.mxu0 %v9093_v56  ;;  %v1895_v33 = vand.u32 4294901760, %v9196_v25  ;;  %v9270_v25 = vand.u32 4294901760, %v380_v49  ;;  %13870 = vst [vmem:[#allocation23_spill] sm:$0xff] %v9273_v6  ;;  %v9281_v34 = vsub.f32 %v9177_v46, %v13277_v19  ;;  %v9296_v19 = vand.u32 4294901760, %v396_v18  ;;  %13873 = vst [vmem:[#allocation26_spill] sm:$0xff] %v9326_v16 }
  0x6b   : > { %8328 = vmatprep.subr.mxu1 %v8793_v37  ;;  %8299 = vmatmul.mubr.f32.gmra.mxu0 %v8848_v3  ;;  %v13903_v56 = vand.u32 4294901760, %v9307_v55 }
  0x6c   : > { %6881 = vmatprep.subr.mxu0 %v9100_v2  ;;  %13869 = vst [vmem:[#allocation22_spill] sm:$0xff] %v9270_v25  ;;  %8329 = vmatpush3.msra.mxu1 %v8793_v37  ;;  %v395_v37 = vld [vmem:[%s13262_s2 + $0xb0] sm:$0xff]  ;;  %13871 = vst [vmem:[#allocation24_spill] sm:$0xff] %v9296_v19  ;;  %v9329_v12 = vsub.f32 %v380_v49, %v9270_v25  ;;  %v377_v49 = vld [vmem:[%s13262_s2 + $0x20] sm:$0xff]  ;;  %v9360_v4 = vsub.f32 %v396_v18, %v9296_v19 }
  0x6d   : > { %6882 = vmatpush3.msra.mxu0 %v9102_v57  ;;  %8330 = vmatprep.subr.mxu1 %v8807_v47  ;;  %v9331_v40 = vand.u32 4294901760, %v395_v37  ;;  %v393_v18 = vld [vmem:[%s13262_s2 + $0xa0] sm:$0xff]  ;;  %v310_v2 = vld [vmem:[%s9384_s15 + $0x38] sm:$0xff] }
  0x6e   : > { %6883 = vmatprep.subr.mxu0 %v9129_v7  ;;  %8301 = vmatprep.mubr.f32.mxu0 %v8884_v42  ;;  %13874 = vst [vmem:[#allocation27_spill] sm:$0xff] %v9329_v12  ;;  %13880 = vst [vmem:[#allocation31_spill] sm:$0xff] %v9360_v4  ;;  %v376_v7 = vld [vmem:[%s13262_s2 + $0x18] sm:$0xff] }
  0x6f   : > { %8331 = vmatpush3.msra.mxu1 %v8807_v47  ;;  %v9320_v47 = vsub.f32 %v397_v9, %v9259_v44  ;;  %8332 = vmatprep.mubr.f32.mxu1 %v8809_v48  ;;  %13875 = vst [vmem:[#allocation28_spill] sm:$0xff] %v9331_v40  ;;  %v9355_v48 = vand.u32 4294901760, %v9313_v0 }
  0x70   : > { %6884 = vmatpush3.msra.mxu0 %v9131_v28  ;;  %8333 = vmatmul.mubr.f32.vlgmr.msra.gmra.mxu1 %v8833_v58  ;;  %v9343_v28 = vand.u32 4294901760, %v379_v15  ;;  %v13878_v58 = vand.u32 4294901760, %v9251_v36 }
  0x71   : > { %13872 = vst [vmem:[#allocation25_spill] sm:$0xff] %v9320_v47  ;;  %8302 = vmatmul.mubr.f32.gmra.mxu0 %v8896_v54  ;;  %6885 = vmatprep.subr.mxu0 %v9170_v60  ;;  %13879 = vst [vmem:[#allocation30_spill] sm:$0xff] %v9355_v48 }
  0x72   : > { %13877 = vst [vmem:[#allocation29_spill] sm:$0xff] %v9343_v28  ;;  %6939 = vmatprep.subr.mxu1 %v1895_v33  ;;  %v9352_v9 = vsub.f32 %v9251_v36, %v13878_v58  ;;  %6886 = vmatpush3.msra.mxu0 %v9152_v61  ;;  %v13881_v58 = vand.u32 4294901760, %v9212_v31  ;;  %v13882_v36 = vand.u32 4294901760, %v9257_v45  ;;  %v9410_v33 = vsub.f32 %v395_v37, %v9331_v40  ;;  %v304_v61 = vld [vmem:[%s9384_s15 + $0x8] sm:$0xff] }
  0x73   : > { %6940 = vmatpush3.msra.mxu1 %v1783_v51  ;;  %6887 = vmatprep.subr.mxu0 %v9186_v24  ;;  %v13883_v51 = vand.u32 4294901760, %v9273_v6  ;;  %v9407_v24 = vand.u32 4294901760, %v376_v7 }
  0x74   : > { %v9370_v60 = vsub.f32 %v9212_v31, %v13881_v58  ;;  %v9375_v38 = vsub.f32 %v9257_v45, %v13882_v36  ;;  %6941 = vmatprep.subr.mxu1 %v1902_v29  ;;  %v9392_v36 = vand.u32 4294901760, %v377_v49  ;;  %8304 = vmatprep.mubr.f32.mxu0 %v8915_v30  ;;  %v1923_v29 = vand.u32 4294901760, %v9341_v27  ;;  %13885 = vst [vmem:[#allocation33_spill] sm:$0xff] %v9410_v33 }
  0x75   : > { %v9390_v58 = vsub.f32 %v9273_v6, %v13883_v51  ;;  %8335 = vmatprep.mubr.f32.mxu1 %v8837_v62  ;;  %v9405_v51 = vsub.f32 %v379_v15, %v9343_v28  ;;  %13884 = vst [vmem:[#allocation32_spill] sm:$0xff] %v9407_v24  ;;  %6888 = vmatpush3.msra.mxu0 %v9160_v52  ;;  %v9417_v62 = vand.u32 4294901760, %v393_v18  ;;  %v375_v15 = vld [vmem:[%s13262_s2 + $0x10] sm:$0xff]  ;;  %v9433_v27 = vand.u32 4294901760, %v9398_v23 }
  0x76   : > { %6942 = vmatpush3.msra.mxu1 %v1790_v21  ;;  %v9415_v6 = vsub.f32 %v378_v20, %v9357_v22  ;;  %8305 = vmatmul.mubr.f32.gmra.mxu0 %v8921_v43  ;;  %v13887_v20 = vand.u32 4294901760, %v9320_v47  ;;  %v9438_v52 = vld [vmem:[%s13262_s2 + $0x90] sm:$0xff]  ;;  %v9446_v21 = vsub.f32 %v377_v49, %v9392_v36  ;;  %v13890_v31 = vand.u32 4294901760, %v9329_v12 }
  0x77   : > { %8336 = vmatmul.mubr.f32.gmra.mxu1 %v8848_v3  ;;  %6889 = vmatprep.subr.mxu0 %v9214_v41  ;;  %v13888_v3 = vand.u32 4294901760, %v9243_v10  ;;  %v303_v41 = vld [vmem:[%s9384_s15] sm:$0xff]  ;;  %v13891_v10 = vand.u32 4294901760, %v9248_v8  ;;  %v9463_v49 = vsub.f32 %v376_v7, %v9407_v24  ;;  %v9466_v37 = vand.u32 4294901760, %v375_v15  ;;  %v374_v8 = vld [vmem:[%s13262_s2 + $0x8] sm:$0xff] }
  0x78   : > { %13886 = vst [vmem:[#allocation34_spill] sm:$0xff] %v9415_v6  ;;  %v9430_v45 = vsub.f32 %v9320_v47, %v13887_v20  ;;  %v13889_v20 = vand.u32 4294901760, %v9326_v16  ;;  %v9456_v57 = vsub.f32 %v9329_v12, %v13890_v31  ;;  %6890 = vmatpush3.msra.mxu0 %v9201_v26  ;;  %v9475_v31 = vsub.f32 %v9313_v0, %v9355_v48 }
  0x79   : > { %6943 = vmatprep.subr.mxu1 %v13888_v3  ;;  %6891 = vmatprep.subr.mxu0 %v9259_v44  ;;  %v13892_v7 = vand.u32 4294901760, %v9281_v34  ;;  %v9489_v12 = vand.u32 4294901760, %v9438_v52  ;;  %v9492_v0 = vsub.f32 %v393_v18, %v9417_v62  ;;  %v9494_v26 = vand.u32 4294901760, %v304_v61 }
  0x7a   : > { %v9451_v47 = vsub.f32 %v9326_v16, %v13889_v20  ;;  %6944 = vmatpush3.msra.mxu1 %v13891_v10  ;;  %v9471_v20 = vld [vmem:[%s13262_s2 + $0x88] sm:$0xff]  ;;  %v13893_v10 = vand.u32 4294901760, %v9360_v4  ;;  %v311_v16 = vld [vmem:[%s9384_s15 + $0x40] sm:$0xff]  ;;  %8307 = vmatprep.mubr.f32.mxu0 %v8944_v50  ;;  %v9502_v44 = vand.u32 4294901760, %v303_v41  ;;  %v13897_v18 = vand.u32 4294901760, %v9286_v39 }
  0x7b   : > { %6945 = vmatprep.subr.mxu1 %v13892_v7  ;;  %13894 = vst [vmem:[#allocation35_spill] sm:$0xff] %v9489_v12  ;;  %13895 = vst [vmem:[#allocation36_spill] sm:$0xff] %v9494_v26  ;;  %8338 = vmatprep.mubr.f32.mxu1 %v8884_v42  ;;  %v9510_v42 = vand.u32 4294901760, %v9471_v20  ;;  %v9512_v34 = vand.u32 4294901760, %v374_v8  ;;  %v13900_v39 = vand.u32 4294901760, %v9410_v33  ;;  %v9525_v46 = vsub.f32 %v375_v15, %v9466_v37  ;;  %v9531_v7 = vld [vmem:[%s13262_s2 + $0x80] sm:$0xff] }
  0x7c   : > { %v9486_v3 = vsub.f32 %v9360_v4, %v13893_v10  ;;  %13896 = vst [vmem:[#allocation37_spill] sm:$0xff] %v9502_v44  ;;  %6892 = vmatpush3.msra.mxu0 %v9268_v17  ;;  %6946 = vmatpush3.msra.mxu1 %v13897_v18  ;;  %v373_v10 = vld [vmem:[%s13262_s2] sm:$0xff]  ;;  %v9533_v17 = vand.u32 4294901760, %v311_v16  ;;  %v9540_v15 = vsub.f32 %v304_v61, %v9494_v26 }
  0x7d   : > { %13898 = vst [vmem:[#allocation38_spill] sm:$0xff] %v9510_v42  ;;  %13899 = vst [vmem:[#allocation39_spill] sm:$0xff] %v9512_v34  ;;  %8308 = vmatmul.mubr.f32.gmra.mxu0 %v8950_v13  ;;  %8339 = vmatmul.mubr.f32.gmra.mxu1 %v8896_v54  ;;  %v9522_v18 = vsub.f32 %v9410_v33, %v13900_v39  ;;  %v9544_v4 = vsub.f32 %v9398_v23, %v9433_v27  ;;  %v318_v33 = vld [vmem:[%s9384_s15 + $0x78] sm:$0xff]  ;;  %v9560_v39 = vand.u32 4294901760, %v373_v10 }
  0x7e   : > { %13901 = vst [vmem:[#allocation40_spill] sm:$0xff] %v9533_v17  ;;  %6893 = vmatprep.subr.mxu0 %v9296_v19  ;;  %6947 = vmatprep.subr.mxu1 %v1923_v29  ;;  %v1951_v54 = vand.u32 4294901760, %v9486_v3  ;;  %13902 = vst [vmem:[#allocation41_spill] sm:$0xff] %v9540_v15  ;;  %v13904_v19 = vand.u32 4294901760, %v9405_v51  ;;  %v13905_v3 = vand.u32 4294901760, %v9415_v6  ;;  %v9563_v23 = vsub.f32 %v303_v41, %v9502_v44 }
  0x7f   : > { %6894 = vmatpush3.msra.mxu0 %v9270_v25  ;;  %6948 = vmatpush3.msra.mxu1 %v13903_v56  ;;  %13906 = vst [vmem:[#allocation42_spill] sm:$0xff] %v9560_v39  ;;  %v13908_v56 = vand.u32 4294901760, %v9352_v9  ;;  %v9569_v55 = vsub.f32 %v374_v8, %v9512_v34  ;;  %v1958_v41 = vand.u32 4294901760, %v9522_v18  ;;  %v9586_v8 = vsub.f32 %v311_v16, %v9533_v17 }
  0x80   : > { %v9553_v29 = vsub.f32 %v9405_v51, %v13904_v19  ;;  %v9558_v61 = vsub.f32 %v9415_v6, %v13905_v3  ;;  %13907 = vst [vmem:[#allocation43_spill] sm:$0xff] %v9563_v23  ;;  %6895 = vmatprep.subr.mxu0 %v9331_v40  ;;  %v9572_v19 = vand.u32 4294901760, %v9531_v7  ;;  %v9575_v3 = vand.u32 4294901760, %v310_v2  ;;  %8341 = vmatprep.mubr.f32.mxu1 %v8915_v30  ;;  %v317_v6 = vld [vmem:[%s9384_s15 + $0x70] sm:$0xff] }
  0x81   : > { %6949 = vmatprep.subr.mxu1 %v13908_v56  ;;  %6896 = vmatpush3.msra.mxu0 %v9343_v28  ;;  %v13911_v40 = vand.u32 4294901760, %v9475_v31  ;;  %13912 = vst [vmem:[#allocation46_spill] sm:$0xff] %v9586_v8  ;;  %v9588_v56 = vand.u32 4294901760, %v318_v33  ;;  %v13914_v25 = vand.u32 4294901760, %v9370_v60  ;;  %v13915_v30 = vand.u32 4294901760, %v9492_v0 }
  0x82   : > { %13909 = vst [vmem:[#allocation44_spill] sm:$0xff] %v9572_v19  ;;  %13910 = vst [vmem:[#allocation45_spill] sm:$0xff] %v9575_v3  ;;  %6897 = vmatprep.subr.mxu0 %v9355_v48  ;;  %v9603_v16 = vsub.f32 %v9438_v52, %v9489_v12  ;;  %8342 = vmatmul.mubr.f32.gmra.mxu1 %v8921_v43  ;;  %v13916_v60 = vand.u32 4294901760, %v9390_v58  ;;  %v1853_v48 = vand.u32 4294901760, %v9558_v61  ;;  %v13917_v28 = vand.u32 4294901760, %v9375_v38  ;;  %v325_v61 = vld [vmem:[%s9384_s15 + $0xb0] sm:$0xff] }
  0x83   : > { %v9583_v9 = vsub.f32 %v9475_v31, %v13911_v40  ;;  %13913 = vst [vmem:[#allocation47_spill] sm:$0xff] %v9588_v56  ;;  %6950 = vmatpush3.msra.mxu1 %v13914_v25  ;;  %v9597_v18 = vsub.f32 %v9492_v0, %v13915_v30  ;;  %v1846_v25 = vand.u32 4294901760, %v9553_v29  ;;  %v9611_v30 = vsub.f32 %v373_v10, %v9560_v39  ;;  %v324_v40 = vld [vmem:[%s9384_s15 + $0xa8] sm:$0xff] }
  0x84   : > { %6951 = vmatprep.subr.mxu1 %v13916_v60  ;;  %6898 = vmatpush3.msra.mxu0 %v9357_v22  ;;  %v13918_v52 = vand.u32 4294901760, %v9446_v21  ;;  %v9624_v29 = vsub.f32 %v310_v2, %v9575_v3  ;;  %v9626_v10 = vand.u32 4294901760, %v317_v6  ;;  %v13920_v60 = vand.u32 4294901760, %v9430_v45 }
  0x85   : > { %6952 = vmatpush3.msra.mxu1 %v13917_v28  ;;  %6899 = vmatprep.subr.mxu0 %v9417_v62  ;;  %v1965_v28 = vand.u32 4294901760, %v9583_v9  ;;  %v9639_v58 = vsub.f32 %v318_v33, %v9588_v56  ;;  %v1972_v2 = vand.u32 4294901760, %v9597_v18  ;;  %v13922_v45 = vand.u32 4294901760, %v9540_v15 }
  0x86   : > { %v9620_v43 = vsub.f32 %v9446_v21, %v13918_v52  ;;  %13919 = vst [vmem:[#allocation48_spill] sm:$0xff] %v9626_v10  ;;  %6953 = vmatprep.subr.mxu1 %v13920_v60  ;;  %v9636_v52 = vsub.f32 %v9471_v20, %v9510_v42  ;;  %8344 = vmatprep.mubr.f32.mxu1 %v8944_v50  ;;  %v13923_v9 = vand.u32 4294901760, %v9544_v4  ;;  %v13924_v33 = vand.u32 4294901760, %v9451_v47 }
  0x87   : > { %13921 = vst [vmem:[#allocation49_spill] sm:$0xff] %v9639_v58  ;;  %6900 = vmatpush3.msra.mxu0 %v9392_v36  ;;  %v1630_v60 = vsub.f32 %v9540_v15, %v13922_v45  ;;  %v13925_v50 = vand.u32 4294901760, %v9563_v23  ;;  %v9663_v15 = vsub.f32 %v9531_v7, %v9572_v19  ;;  %8345 = vmatmul.mubr.f32.gmra.mxu1 %v8950_v13  ;;  %v13928_v7 = vand.u32 4294901760, %v9456_v57 }
  0x88   : > { %v9650_v38 = vsub.f32 %v9544_v4, %v13923_v9  ;;  %6954 = vmatpush3.msra.mxu1 %v13924_v33  ;;  %6901 = vmatprep.subr.mxu0 %v9433_v27  ;;  %v9665_v9 = vand.u32 4294901760, %v325_v61  ;;  %v1860_v47 = vand.u32 4294901760, %v9620_v43  ;;  %v13927_v33 = vand.u32 4294901760, %v9463_v49 }
  0x89   : > { %v1636_v18 = vsub.f32 %v9563_v23, %v13925_v50  ;;  %6955 = vmatprep.subr.mxu1 %v1951_v54  ;;  %v9674_v23 = vsub.f32 %v317_v6, %v9626_v10  ;;  %6902 = vmatpush3.msra.mxu0 %v9407_v24  ;;  %v13929_v45 = vand.u32 4294901760, %v9586_v8  ;;  %v332_v50 = vld [vmem:[%s9384_s15 + $0xe8] sm:$0xff]  ;;  %v1631_v6 = vand.u32 4294901760, %v1630_v60 }
  0x8a   : > { %13926 = vst [vmem:[#allocation50_spill] sm:$0xff] %v9665_v9  ;;  %v1866_v20 = vsub.f32 %v9463_v49, %v13927_v33  ;;  %6956 = vmatpush3.msra.mxu1 %v13928_v7  ;;  %v9684_v33 = vand.u32 4294901760, %v324_v40  ;;  %6903 = vmatprep.subr.mxu0 %v9489_v12  ;;  %v1979_v24 = vand.u32 4294901760, %v9650_v38  ;;  %v13931_v57 = vand.u32 4294901760, %v9603_v16  ;;  %v331_v38 = vld [vmem:[%s9384_s15 + $0xe0] sm:$0xff] }
  0x8b   : > { %v1645_v13 = vsub.f32 %v9586_v8, %v13929_v45  ;;  %6957 = vmatprep.subr.mxu1 %v1958_v41  ;;  %6904 = vmatpush3.msra.mxu0 %v9466_v37  ;;  %v1637_v54 = vand.u32 4294901760, %v1636_v18  ;;  %v13932_v43 = vand.u32 4294901760, %v9525_v46  ;;  %v9699_v41 = vsub.f32 %v325_v61, %v9665_v9 }
  0x8c   : > { %13930 = vst [vmem:[#allocation51_spill] sm:$0xff] %v9684_v33  ;;  %v1985_v7 = vsub.f32 %v9603_v16, %v13931_v57  ;;  %6958 = vmatpush3.msra.mxu1 %v1846_v25  ;;  %6905 = vmatprep.subr.mxu0 %v9510_v42  ;;  %v13933_v60 = vand.u32 4294901760, %v9624_v29  ;;  %v9708_v45 = vand.u32 4294901760, %v332_v50  ;;  %v1867_v18 = vand.u32 4294901760, %v1866_v20 }
  0x8d   : > { %v1873_v8 = vsub.f32 %v9525_v46, %v13932_v43  ;;  %6959 = vmatprep.subr.mxu1 %v1965_v28  ;;  %6906 = vmatpush3.msra.mxu0 %v9512_v34  ;;  %v1646_v61 = vand.u32 4294901760, %v1645_v13  ;;  %v13935_v43 = vand.u32 4294901760, %v9636_v52  ;;  %v13936_v28 = vand.u32 4294901760, %v9639_v58 }
  0x8e   : > { %v1651_v57 = vsub.f32 %v9624_v29, %v13933_v60  ;;  %13934 = vst [vmem:[#allocation52_spill] sm:$0xff] %v9708_v45  ;;  %6960 = vmatpush3.msra.mxu1 %v1853_v48  ;;  %v9718_v60 = vsub.f32 %v324_v40, %v9684_v33  ;;  %6907 = vmatprep.subr.mxu0 %v9572_v19  ;;  %v13937_v25 = vand.u32 4294901760, %v9569_v55  ;;  %v9724_v13 = vand.u32 4294901760, %v331_v38 }
  0x8f   : > { %v1992_v12 = vsub.f32 %v9636_v52, %v13935_v43  ;;  %v1660_v42 = vsub.f32 %v9639_v58, %v13936_v28  ;;  %6961 = vmatprep.subr.mxu1 %v1972_v2  ;;  %6908 = vmatpush3.msra.mxu0 %v9560_v39  ;;  %v1986_v43 = vand.u32 4294901760, %v1985_v7  ;;  %v1874_v34 = vand.u32 4294901760, %v1873_v8  ;;  %v339_v2 = vld [vmem:[%s9384_s15 + $0x120] sm:$0xff] }
  0x90   : > { %v1880_v48 = vsub.f32 %v9569_v55, %v13937_v25  ;;  %13938 = vst [vmem:[#allocation53_spill] sm:$0xff] %v9724_v13  ;;  %1632 = vmatprep.mubr.f32.mxu0 %v1631_v6  ;;  %v13939_v28 = vand.u32 4294901760, %v9663_v15  ;;  %6962 = vmatpush3.msra.mxu1 %v1860_v47  ;;  %v1652_v20 = vand.u32 4294901760, %v1651_v57  ;;  %v13940_v25 = vand.u32 4294901760, %v9611_v30  ;;  %v338_v47 = vld [vmem:[%s9384_s15 + $0x118] sm:$0xff] }
  0x91   : > { %1638 = vmatmul.mubr.f32.vlgmr.msra.gmra.mxu0 %v1637_v54  ;;  %v13941_v39 = vand.u32 4294901760, %v9674_v23  ;;  %v9739_v8 = vsub.f32 %v332_v50, %v9708_v45  ;;  %6963 = vmatprep.subr.mxu1 %v1979_v24  ;;  %v1993_v7 = vand.u32 4294901760, %v1992_v12  ;;  %v13369_v19 = vand.u32 4294901760, %v9718_v60 }
  0x92   : > { %v1999_v40 = vsub.f32 %v9663_v15, %v13939_v28  ;;  %v1887_v58 = vsub.f32 %v9611_v30, %v13940_v25  ;;  %1647 = vmatprep.mubr.f32.mxu0 %v1646_v61  ;;  %v1661_v28 = vand.u32 4294901760, %v1660_v42  ;;  %6964 = vmatpush3.msra.mxu1 %v1867_v18  ;;  %v1881_v54 = vand.u32 4294901760, %v1880_v48 }
  0x93   : > { %v1666_v6 = vsub.f32 %v9674_v23, %v13941_v39  ;;  %13942 = vst [vmem:[#allocation54_spill] sm:$0xff] %v9739_v8  ;;  %7001 = vmatprep.subr.mxu0 %v9113_v32  ;;  %v9745_v57 = vsub.f32 %v331_v38, %v9724_v13  ;;  %v9747_v25 = vand.u32 4294901760, %v339_v2  ;;  %6965 = vmatprep.subr.mxu1 %v1986_v43  ;;  %v13945_v12 = vand.u32 4294901760, %v9699_v41  ;;  %v346_v38 = vld [vmem:[%s9384_s15 + $0x158] sm:$0xff] }
  0x94   : > { %v2000_v39 = vand.u32 4294901760, %v1999_v40  ;;  %2003 = vmatprep.mubr.f32.mxu1 %v9494_v26  ;;  %6966 = vmatpush3.msra.mxu1 %v1874_v34  ;;  %v1888_v42 = vand.u32 4294901760, %v1887_v58  ;;  %v13368_v18 = vand.u32 4294901760, %v9739_v8  ;;  %v9754_v61 = vand.u32 4294901760, %v338_v47  ;;  %v345_v58 = vld [vmem:[%s9384_s15 + $0x150] sm:$0xff] }
  0x95   : > { %13943 = vst [vmem:[#allocation55_spill] sm:$0xff] %v9745_v57  ;;  %13944 = vst [vmem:[#allocation56_spill] sm:$0xff] %v9747_v25  ;;  %v1675_v24 = vsub.f32 %v9699_v41, %v13945_v12  ;;  %1653 = vmatmul.mubr.f32.gmra.mxu0 %v1652_v20  ;;  %v1667_v50 = vand.u32 4294901760, %v1666_v6  ;;  %6967 = vmatprep.subr.mxu1 %v1993_v7  ;;  %v1681_v48 = vsub.f32 %v9718_v60, %v13369_v19  ;;  %v359_v19 = vld [vmem:[%s9384_s15 + $0x1c0] sm:$0xff] }
  0x96   : > { %13946 = vst [vmem:[#allocation57_spill] sm:$0xff] %v9754_v61  ;;  %1662 = vmatprep.mubr.f32.mxu0 %v1661_v28  ;;  %6968 = vmatpush3.msra.mxu1 %v1881_v54  ;;  %v13367_v43 = vand.u32 4294901760, %v9745_v57  ;;  %v9763_v34 = vsub.f32 %v339_v2, %v9747_v25  ;;  %v9767_v20 = vand.u32 4294901760, %v346_v38  ;;  %v1690_v6 = vsub.f32 %v9739_v8, %v13368_v18  ;;  %v13955_v18 = vld [vmem:[#allocation5_spill] sm:$0xff] }
  0x97   : > { %7002 = vmatpush3.msra.mxu0 %v9098_v1  ;;  %6969 = vmatprep.subr.mxu1 %v2000_v39  ;;  %v1676_v40 = vand.u32 4294901760, %v1675_v24  ;;  %v9773_v7 = vsub.f32 %v338_v47, %v9754_v61  ;;  %v1682_v2 = vand.u32 4294901760, %v1681_v48  ;;  %v9777_v28 = vand.u32 4294901760, %v345_v58  ;;  %v353_v47 = vld [vmem:[%s9384_s15 + $0x190] sm:$0xff] }
  0x98   : > { %13947 = vst [vmem:[#allocation58_spill] sm:$0xff] %v9763_v34  ;;  %7003 = vmatprep.subr.mxu0 %v9121_v63  ;;  %13948 = vst [vmem:[#allocation59_spill] sm:$0xff] %v9767_v20  ;;  %6970 = vmatpush3.msra.mxu1 %v1888_v42  ;;  %v1696_v54 = vsub.f32 %v9745_v57, %v13367_v43  ;;  %v13376_v39 = vand.u32 4294901760, %v9763_v34  ;;  %v9788_v12 = vsub.f32 %v346_v38, %v9767_v20  ;;  %v13954_v38 = vld [vmem:[#allocation4_spill] sm:$0xff]  ;;  %v360_v42 = vld [vmem:[%s9384_s15 + $0x1c8] sm:$0xff] }
  0x99   : > { %1668 = vmatmul.mubr.f32.gmra.mxu0 %v1667_v50  ;;  %13949 = vst [vmem:[#allocation60_spill] sm:$0xff] %v9773_v7  ;;  %2005 = vmatmul.mubr.f32.vlgmr.msra.gmra.mxu1 %v9502_v44  ;;  %13950 = vst [vmem:[#allocation61_spill] sm:$0xff] %v9777_v28  ;;  %v1691_v24 = vand.u32 4294901760, %v1690_v6  ;;  %v352_v50 = vld [vmem:[%s9384_s15 + $0x188] sm:$0xff]  ;;  %v9796_v48 = vsub.f32 %v345_v58, %v9777_v28  ;;  %v13960_v44 = vld [vmem:[#allocation9_spill] sm:$0xff] }
  0x9a   : > { %7063 = vmatprep.subr.mxu1 %v9078_v5  ;;  %7004 = vmatpush3.msra.mxu0 %v9127_v11  ;;  %13951 = vst [vmem:[#allocation62_spill] sm:$0xff] %v9788_v12  ;;  %v1697_v43 = vand.u32 4294901760, %v1696_v54  ;;  %v1705_v6 = vsub.f32 %v9763_v34, %v13376_v39  ;;  %v9808_v58 = vand.u32 4294901760, %v352_v50  ;;  %v13963_v57 = vld [vmem:[#allocation17_spill] sm:$0xff] }
  0x9b   : > { %7064 = vmatpush3.msra.mxu1 %v9070_v35  ;;  %1677 = vmatprep.mubr.f32.mxu0 %v1676_v40  ;;  %13952 = vst [vmem:[#allocation63_spill] sm:$0xff] %v9796_v48  ;;  %v9798_v40 = vand.u32 4294901760, %v353_v47 }
  0x9c   : > { %2010 = vmatprep.mubr.f32.mxu1 %v9533_v17  ;;  %7005 = vmatprep.subr.mxu0 %v9146_v14  ;;  %13957 = vst [vmem:[#allocation4_spill] sm:$0xff] %v9808_v58  ;;  %v13959_v17 = vand.u32 4294901760, %v9773_v7  ;;  %v1706_v34 = vand.u32 4294901760, %v1705_v6  ;;  %v9831_v39 = vsub.f32 %v352_v50, %v9808_v58  ;;  %v9835_v6 = vand.u32 4294901760, %v359_v19  ;;  %v367_v50 = vld [vmem:[%s9384_s15 + $0x200] sm:$0xff] }
  0x9d   : > { %7065 = vmatprep.subr.mxu1 %v9088_v53  ;;  %1683 = vmatmul.mubr.f32.gmra.mxu0 %v1682_v2  ;;  %13953 = vst [vmem:[#allocation64_spill] sm:$0xff] %v9798_v40  ;;  %v13956_v2 = vld [vmem:[#allocation11_spill] sm:$0xff]  ;;  %v9819_v26 = vsub.f32 %v353_v47, %v9798_v40  ;;  %v13967_v47 = vld [vmem:[#allocation13_spill] sm:$0xff] }
  0x9e   : > { %2012 = vmatmul.mubr.f32.gmra.mxu1 %v9575_v3  ;;  %7006 = vmatpush3.msra.mxu0 %v9139_v59  ;;  %v13958_v3 = vld [vmem:[#allocation6_spill] sm:$0xff]  ;;  %v1711_v54 = vsub.f32 %v9773_v7, %v13959_v17  ;;  %13969 = vst [vmem:[#allocation65_spill] sm:$0xff] %v9835_v6 }
  0x9f   : > { %7066 = vmatpush3.msra.mxu1 %v13954_v38  ;;  %7007 = vmatprep.subr.mxu0 %v13956_v2  ;;  %13961 = vst [vmem:[#allocation5_spill] sm:$0xff] %v9819_v26  ;;  %v13964_v17 = vld [vmem:[#allocation2_spill] sm:$0xff]  ;;  %13966 = vst [vmem:[#allocation6_spill] sm:$0xff] %v9831_v39 }
  0xa0   : > { %7067 = vmatprep.subr.mxu1 %v13955_v18  ;;  %1692 = vmatprep.mubr.f32.mxu0 %v1691_v24  ;;  %v9823_v24 = vand.u32 4294901760, %v360_v42 }
  0xa1   : > { %7068 = vmatpush3.msra.mxu1 %v13958_v3  ;;  %2017 = vmatprep.mubr.f32.mxu1 %v9588_v56  ;;  %v13965_v56 = vand.u32 4294901760, %v9788_v12 }
  0xa2   : > { %7008 = vmatpush3.msra.mxu0 %v13960_v44  ;;  %2019 = vmatmul.mubr.f32.gmra.mxu1 %v9626_v10  ;;  %13962 = vst [vmem:[#allocation11_spill] sm:$0xff] %v9823_v24  ;;  %v1712_v10 = vand.u32 4294901760, %v1711_v54  ;;  %v13970_v44 = vld [vmem:[#allocation18_spill] sm:$0xff]  ;;  %v13974_v54 = vld [vmem:[#allocation15_spill] sm:$0xff] }
  0xa3   : > { %1698 = vmatmul.mubr.f32.gmra.mxu0 %v1697_v43  ;;  %7009 = vmatprep.subr.mxu0 %v13963_v57  ;;  %v1720_v7 = vsub.f32 %v9788_v12, %v13965_v56  ;;  %v13968_v43 = vld [vmem:[#allocation7_spill] sm:$0xff]  ;;  %v13971_v57 = vld [vmem:[#allocation10_spill] sm:$0xff]  ;;  %v9846_v12 = vsub.f32 %v360_v42, %v9823_v24  ;;  %v13979_v42 = vld [vmem:[#allocation12_spill] sm:$0xff] }
  0xa4   : > { %7069 = vmatprep.subr.mxu1 %v13964_v17  ;;  %7010 = vmatpush3.msra.mxu0 %v13967_v47  ;;  %v13972_v17 = vand.u32 4294901760, %v9796_v48  ;;  %v366_v47 = vld [vmem:[%s9384_s15 + $0x1f8] sm:$0xff]  ;;  %v13978_v56 = vld [vmem:[#allocation23_spill] sm:$0xff] }
  0xa5   : > { %7070 = vmatpush3.msra.mxu1 %v13968_v43  ;;  %7011 = vmatprep.subr.mxu0 %v13970_v44  ;;  %13973 = vst [vmem:[#allocation66_spill] sm:$0xff] %v9846_v12  ;;  %v13975_v43 = vld [vmem:[#allocation3_spill] sm:$0xff]  ;;  %v1721_v44 = vand.u32 4294901760, %v1720_v7 }
  0xa6   : > { %7071 = vmatprep.subr.mxu1 %v13971_v57  ;;  %v1726_v8 = vsub.f32 %v9796_v48, %v13972_v17  ;;  %1707 = vmatprep.mubr.f32.mxu0 %v1706_v34  ;;  %v9854_v17 = vsub.f32 %v359_v19, %v9835_v6  ;;  %v9856_v34 = vand.u32 4294901760, %v367_v50  ;;  %v13980_v48 = vand.u32 4294901760, %v9819_v26  ;;  %v13982_v57 = vld [vmem:[#allocation8_spill] sm:$0xff]  ;;  %v13983_v19 = vld [vmem:[#allocation25_spill] sm:$0xff] }
  0xa7   : > { %2024 = vmatprep.mubr.f32.mxu1 %v9665_v9  ;;  %7012 = vmatpush3.msra.mxu0 %v13974_v54 }
  0xa8   : > { %7072 = vmatpush3.msra.mxu1 %v13975_v43  ;;  %1713 = vmatmul.mubr.f32.gmra.mxu0 %v1712_v10  ;;  %13976 = vst [vmem:[#allocation15_spill] sm:$0xff] %v9854_v17  ;;  %13977 = vst [vmem:[#allocation67_spill] sm:$0xff] %v9856_v34  ;;  %v1727_v9 = vand.u32 4294901760, %v1726_v8  ;;  %v1735_v7 = vsub.f32 %v9819_v26, %v13980_v48  ;;  %v13981_v43 = vld [vmem:[#allocation19_spill] sm:$0xff]  ;;  %v13985_v8 = vld [vmem:[#allocation26_spill] sm:$0xff]  ;;  %v9876_v26 = vsub.f32 %v367_v50, %v9856_v34 }
  0xa9   : > { %2026 = vmatmul.mubr.f32.gmra.mxu1 %v9684_v33  ;;  %7013 = vmatprep.subr.mxu0 %v13978_v56  ;;  %v9866_v33 = vand.u32 4294901760, %v366_v47  ;;  %v13984_v56 = vand.u32 4294901760, %v9831_v39  ;;  %v13990_v48 = vld [vmem:[#allocation27_spill] sm:$0xff] }
  0xaa   : > { %7073 = vmatprep.subr.mxu1 %v13979_v42  ;;  %7014 = vmatpush3.msra.mxu0 %v13981_v43  ;;  %v1736_v10 = vand.u32 4294901760, %v1735_v7  ;;  %v13993_v7 = vand.u32 4294901760, %v9854_v17 }
  0xab   : > { %7074 = vmatpush3.msra.mxu1 %v13982_v57  ;;  %7015 = vmatprep.subr.mxu0 %v13983_v19  ;;  %v1741_v42 = vsub.f32 %v9831_v39, %v13984_v56  ;;  %v13986_v57 = vld [vmem:[#allocation16_spill] sm:$0xff]  ;;  %v13988_v19 = vand.u32 4294901760, %v9846_v12  ;;  %v13989_v39 = vld [vmem:[#allocation14_spill] sm:$0xff] }
  0xac   : > { %1722 = vmatprep.mubr.f32.mxu0 %v1721_v44  ;;  %2031 = vmatprep.mubr.f32.mxu1 %v9708_v45  ;;  %v13987_v44 = vld [vmem:[#allocation31_spill] sm:$0xff]  ;;  %v9885_v45 = vsub.f32 %v366_v47, %v9866_v33  ;;  %v13994_v47 = vld [vmem:[#allocation21_spill] sm:$0xff] }
  0xad   : > { %7016 = vmatpush3.msra.mxu0 %v13985_v8  ;;  %7075 = vmatprep.subr.mxu1 %v13986_v57  ;;  %v1750_v56 = vsub.f32 %v9846_v12, %v13988_v19  ;;  %v1742_v50 = vand.u32 4294901760, %v1741_v42  ;;  %v13991_v8 = vld [vmem:[#allocation33_spill] sm:$0xff]  ;;  %v13995_v12 = vld [vmem:[#allocation24_spill] sm:$0xff] }
  0xae   : > { %1728 = vmatmul.mubr.f32.gmra.mxu0 %v1727_v9  ;;  %2033 = vmatmul.mubr.f32.gmra.mxu1 %v9724_v13  ;;  %v13992_v9 = vld [vmem:[#allocation20_spill] sm:$0xff]  ;;  %v1756_v13 = vsub.f32 %v9854_v17, %v13993_v7  ;;  %v13416_v42 = vand.u32 4294901760, %v9885_v45  ;;  %v13997_v17 = vld [vmem:[#allocation22_spill] sm:$0xff] }
  0xaf   : > { %7017 = vmatprep.subr.mxu0 %v13987_v44  ;;  %7076 = vmatpush3.msra.mxu1 %v13989_v39  ;;  %v13413_v44 = vand.u32 4294901760, %v9876_v26  ;;  %v1751_v19 = vand.u32 4294901760, %v1750_v56 }
  0xb0   : > { %7018 = vmatpush3.msra.mxu0 %v13990_v48  ;;  %7077 = vmatprep.subr.mxu1 %v13992_v9  ;;  %v1757_v7 = vand.u32 4294901760, %v1756_v13  ;;  %v1771_v56 = vsub.f32 %v9885_v45, %v13416_v42  ;;  %v13998_v13 = vld [vmem:[#allocation28_spill] sm:$0xff]  ;;  %v14006_v42 = vld [vmem:[#allocation38_spill] sm:$0xff] }
  0xb1   : > { %7019 = vmatprep.subr.mxu0 %v13991_v8  ;;  %1737 = vmatprep.mubr.f32.mxu0 %v1736_v10  ;;  %v1765_v10 = vsub.f32 %v9876_v26, %v13413_v44  ;;  %v13999_v44 = vld [vmem:[#allocation29_spill] sm:$0xff] }
  0xb2   : > { %2038 = vmatprep.mubr.f32.mxu1 %v9747_v25  ;;  %7020 = vmatpush3.msra.mxu0 %v9405_v51  ;;  %v13996_v25 = vld [vmem:[#allocation34_spill] sm:$0xff] }
  0xb3   : > { %7078 = vmatpush3.msra.mxu1 %v13994_v47  ;;  %1743 = vmatmul.mubr.f32.gmra.mxu0 %v1742_v50  ;;  %v1766_v50 = vand.u32 4294901760, %v1765_v10  ;;  %v14002_v10 = vld [vmem:[#allocation32_spill] sm:$0xff] }
  0xb4   : > { %2040 = vmatmul.mubr.f32.gmra.mxu1 %v9754_v61  ;;  %7021 = vmatprep.subr.mxu0 %v9475_v31  ;;  %v14000_v61 = vld [vmem:[#allocation30_spill] sm:$0xff] }
  0xb5   : > { %7079 = vmatprep.subr.mxu1 %v13995_v12  ;;  %7022 = vmatpush3.msra.mxu0 %v13996_v25 }
  0xb6   : > { %7080 = vmatpush3.msra.mxu1 %v13997_v17  ;;  %7023 = vmatprep.subr.mxu0 %v9492_v0 }
  0xb7   : > { %1752 = vmatprep.mubr.f32.mxu0 %v1751_v19  ;;  %2045 = vmatprep.mubr.f32.mxu1 %v9767_v20  ;;  %v1772_v19 = vand.u32 4294901760, %v1771_v56  ;;  %v14003_v56 = vld [vmem:[#allocation43_spill] sm:$0xff]  ;;  %v14013_v20 = vand.u32 4294901760, %v9098_v1 }
  0xb8   : > { %7024 = vmatpush3.msra.mxu0 %v9446_v21  ;;  %7081 = vmatprep.subr.mxu1 %v13998_v13 }
  0xb9   : > { %1758 = vmatmul.mubr.f32.gmra.mxu0 %v1757_v7  ;;  %2047 = vmatmul.mubr.f32.gmra.mxu1 %v9777_v28  ;;  %v14001_v7 = vld [vmem:[#allocation41_spill] sm:$0xff]  ;;  %v14012_v28 = vld [vmem:[#allocation42_spill] sm:$0xff] }
  0xba   : > { %7025 = vmatprep.subr.mxu0 %v9544_v4  ;;  %7082 = vmatpush3.msra.mxu1 %v13999_v44 }
  0xbb   : > { %7026 = vmatpush3.msra.mxu0 %v9463_v49  ;;  %7083 = vmatprep.subr.mxu1 %v14000_v61 }
  0xbc   : > { %7027 = vmatprep.subr.mxu0 %v9603_v16  ;;  %7084 = vmatpush3.msra.mxu1 %v9357_v22 }
  0xbd   : > { %1767 = vmatprep.mubr.f32.mxu0 %v1766_v50  ;;  %2052 = vmatprep.mubr.f32.mxu1 %v9798_v40  ;;  %v14004_v50 = vld [vmem:[#allocation35_spill] sm:$0xff]  ;;  %v14010_v40 = vld [vmem:[#allocation44_spill] sm:$0xff] }
  0xbe   : > { %7028 = vmatpush3.msra.mxu0 %v9525_v46  ;;  %2054 = vmatmul.mubr.f32.gmra.mxu1 %v9808_v58  ;;  %v14009_v58 = vld [vmem:[#allocation49_spill] sm:$0xff] }
  0xbf   : > { %1773 = vmatmul.mubr.f32.gmra.mxu0 %v1772_v19  ;;  %7029 = vmatprep.subr.mxu0 %v9636_v52  ;;  %v14005_v19 = vld [vmem:[#allocation46_spill] sm:$0xff] }
  0xc0   : > { %7085 = vmatprep.subr.mxu1 %v9417_v62  ;;  %7030 = vmatpush3.msra.mxu0 %v9569_v55  ;;  %v14017_v1 = vand.u32 4294901760, %v14005_v19 }
  0xc1   : > { %7086 = vmatpush3.msra.mxu1 %v9392_v36  ;;  %7031 = vmatprep.subr.mxu0 %v9663_v15 }
  0xc2   : > { %7087 = vmatprep.subr.mxu1 %v9433_v27  ;;  %2059 = vmatprep.mubr.f32.mxu1 %v9823_v24  ;;  %v14007_v24 = vand.u32 4294901760, %v9113_v32  ;;  %v14014_v32 = vand.u32 4294901760, %v14003_v56 }
  0xc3   : > { %7032 = vmatpush3.msra.mxu0 %v9611_v30  ;;  %2203 = vmatprep.mubr.f32.mxu0 %v14001_v7 }
  0xc4   : > { %7088 = vmatpush3.msra.mxu1 %v14002_v10  ;;  %2206 = vmatmul.mubr.f32.vlgmr.msra.gmra.mxu0 %v14003_v56  ;;  %v14031_v56 = vld [vmem:[#allocation13_spill] sm:$0xff] }
  0xc5   : > { %2061 = vmatmul.mubr.f32.gmra.mxu1 %v9835_v6  ;;  %7089 = vmatprep.subr.mxu1 %v14004_v50  ;;  %v14008_v6 = vld [vmem:[#allocation39_spill] sm:$0xff] }
  0xc6   : > { %2066 = vmatprep.mubr.f32.mxu1 %v9856_v34  ;;  %7090 = vmatpush3.msra.mxu1 %v9466_v37  ;;  %v14011_v34 = vand.u32 4294901760, %v14001_v7  ;;  %v14016_v7 = vand.u32 4294901760, %v9127_v11  ;;  %v14022_v11 = vld [vmem:[#allocation54_spill] sm:$0xff] }
  0xc7   : > { %2212 = vmatprep.mubr.f32.mxu0 %v14005_v19  ;;  %7091 = vmatprep.subr.mxu1 %v14006_v42  ;;  %v14033_v19 = vld [vmem:[#allocation7_spill] sm:$0xff] }
  0xc8   : > { %7125 = vmatprep.subr.mxu0 %v14007_v24  ;;  %2215 = vmatmul.mubr.f32.gmra.mxu0 %v9624_v29  ;;  %v14015_v24 = vand.u32 4294901760, %v9121_v63  ;;  %v14021_v63 = vand.u32 4294901760, %v13956_v2  ;;  %v14030_v2 = vld [vmem:[#allocation2_spill] sm:$0xff] }
  0xc9   : > { %2068 = vmatmul.mubr.f32.gmra.mxu1 %v9866_v33  ;;  %2221 = vmatprep.mubr.f32.mxu0 %v14009_v58 }
  0xca   : > { %7092 = vmatpush3.msra.mxu1 %v14008_v6  ;;  %2391 = vmatprep.mubr.f32.mxu1 %v14011_v34  ;;  %v14026_v34 = vld [vmem:[#allocation55_spill] sm:$0xff] }
  0xcb   : > { %7093 = vmatprep.subr.mxu1 %v14010_v40  ;;  %7126 = vmatpush3.msra.mxu0 %v14013_v20  ;;  %v14018_v20 = vand.u32 4294901760, %v9146_v14  ;;  %v14024_v14 = vld [vmem:[#allocation9_spill] sm:$0xff] }
  0xcc   : > { %7094 = vmatpush3.msra.mxu1 %v14012_v28  ;;  %2224 = vmatmul.mubr.f32.gmra.mxu0 %v9674_v23 }
  0xcd   : > { %2395 = vmatmul.mubr.f32.vlgmr.msra.gmra.mxu1 %v14014_v32  ;;  %7187 = vmatprep.subr.mxu1 %v9078_v5  ;;  %v14019_v5 = vand.u32 4294901760, %v9624_v29  ;;  %v14025_v29 = vand.u32 4294901760, %v14024_v14  ;;  %v14045_v14 = vld [vmem:[#allocation12_spill] sm:$0xff] }
  0xce   : > { %7127 = vmatprep.subr.mxu0 %v14015_v24  ;;  %7188 = vmatpush3.msra.mxu1 %v9070_v35  ;;  %v14020_v35 = vand.u32 4294901760, %v9139_v59  ;;  %v14027_v59 = vand.u32 4294901760, %v9674_v23  ;;  %v14036_v24 = vld [vmem:[#allocation10_spill] sm:$0xff]  ;;  %v14038_v23 = vand.u32 4294901760, %v9699_v41 }
  0xcf   : > { %7128 = vmatpush3.msra.mxu0 %v14016_v7  ;;  %2230 = vmatprep.mubr.f32.mxu0 %v9699_v41  ;;  %v14037_v7 = vld [vmem:[#allocation58_spill] sm:$0xff]  ;;  %v14047_v41 = vld [vmem:[#allocation8_spill] sm:$0xff] }
  0xd0   : > { %2402 = vmatprep.mubr.f32.mxu1 %v14017_v1  ;;  %7129 = vmatprep.subr.mxu0 %v14018_v20  ;;  %v14039_v1 = vand.u32 4294901760, %v13974_v54  ;;  %v14040_v20 = vld [vmem:[#allocation3_spill] sm:$0xff] }
  0xd1   : > { %7189 = vmatprep.subr.mxu1 %v9088_v53  ;;  %2233 = vmatmul.mubr.f32.gmra.mxu0 %v9718_v60  ;;  %v14023_v53 = vand.u32 4294901760, %v14009_v58  ;;  %v14034_v58 = vld [vmem:[#allocation18_spill] sm:$0xff] }
  0xd2   : > { %2406 = vmatmul.mubr.f32.gmra.mxu1 %v14019_v5  ;;  %7130 = vmatpush3.msra.mxu0 %v14020_v35  ;;  %v14035_v32 = vand.u32 4294901760, %v14034_v58  ;;  %v14041_v5 = vld [vmem:[#allocation60_spill] sm:$0xff]  ;;  %v14042_v35 = vand.u32 4294901760, %v9718_v60  ;;  %v14052_v60 = vld [vmem:[#allocation26_spill] sm:$0xff]  ;;  %v14058_v58 = vand.u32 4294901760, %v13990_v48 }
  0xd3   : > { %7190 = vmatpush3.msra.mxu1 %v13954_v38  ;;  %7131 = vmatprep.subr.mxu0 %v14021_v63  ;;  %v14028_v38 = vld [vmem:[#allocation17_spill] sm:$0xff]  ;;  %v14043_v63 = vld [vmem:[#allocation23_spill] sm:$0xff] }
  0xd4   : > { %7191 = vmatprep.subr.mxu1 %v13955_v18  ;;  %2239 = vmatprep.mubr.f32.mxu0 %v14022_v11  ;;  %v14029_v18 = vand.u32 4294901760, %v14028_v38  ;;  %v14050_v38 = vld [vmem:[#allocation62_spill] sm:$0xff] }
  0xd5   : > { %7192 = vmatpush3.msra.mxu1 %v13958_v3  ;;  %2413 = vmatprep.mubr.f32.mxu1 %v14023_v53  ;;  %v14032_v3 = vand.u32 4294901760, %v14031_v56  ;;  %v14044_v53 = vand.u32 4294901760, %v14043_v63  ;;  %v14054_v56 = vld [vmem:[#allocation63_spill] sm:$0xff] }
  0xd6   : > { %7132 = vmatpush3.msra.mxu0 %v14025_v29  ;;  %2417 = vmatmul.mubr.f32.gmra.mxu1 %v14027_v59  ;;  %v14046_v29 = vand.u32 4294901760, %v13981_v43  ;;  %v14048_v59 = vld [vmem:[#allocation25_spill] sm:$0xff]  ;;  %v14055_v43 = vand.u32 4294901760, %v14026_v34  ;;  %v434_v63 = vld [vmem:[%s13262_s2 + $0x1e8] sm:$0xff] }
  0xd7   : > { %2242 = vmatmul.mubr.f32.gmra.mxu0 %v14026_v34  ;;  %7133 = vmatprep.subr.mxu0 %v14029_v18  ;;  %v14049_v54 = vand.u32 4294901760, %v14048_v59  ;;  %v14051_v18 = vand.u32 4294901760, %v14022_v11  ;;  %v14059_v11 = vand.u32 4294901760, %v13991_v8  ;;  %v14062_v34 = vand.u32 4294901760, %v9405_v51  ;;  %v436_v51 = vld [vmem:[%s13262_s2 + $0x1f8] sm:$0xff] }
  0xd8   : > { %7193 = vmatprep.subr.mxu1 %v14030_v2  ;;  %7134 = vmatpush3.msra.mxu0 %v14032_v3  ;;  %v14053_v2 = vand.u32 4294901760, %v14052_v60  ;;  %v14056_v3 = vld [vmem:[#allocation31_spill] sm:$0xff]  ;;  %v14065_v8 = vand.u32 4294901760, %v9475_v31  ;;  %v14068_v31 = vld [vmem:[#allocation66_spill] sm:$0xff] }
  0xd9   : > { %7194 = vmatpush3.msra.mxu1 %v14033_v19  ;;  %7135 = vmatprep.subr.mxu0 %v14035_v32  ;;  %v14057_v19 = vand.u32 4294901760, %v14056_v3  ;;  %v14060_v32 = vld [vmem:[#allocation5_spill] sm:$0xff] }
  0xda   : > { %7195 = vmatprep.subr.mxu1 %v14036_v24  ;;  %2248 = vmatprep.mubr.f32.mxu0 %v14037_v7  ;;  %v14063_v24 = vld [vmem:[#allocation6_spill] sm:$0xff] }
  0xdb   : > { %2424 = vmatprep.mubr.f32.mxu1 %v14038_v23  ;;  %7136 = vmatpush3.msra.mxu0 %v14039_v1  ;;  %v10061_v1 = vand.u32 4294901760, %v436_v51  ;;  %v14081_v60 = vand.u32 4294901760, %v14063_v24 }
  0xdc   : > { %7196 = vmatpush3.msra.mxu1 %v14040_v20  ;;  %2251 = vmatmul.mubr.f32.gmra.mxu0 %v14041_v5 }
  0xdd   : > { %2428 = vmatmul.mubr.f32.gmra.mxu1 %v14042_v35  ;;  %7137 = vmatprep.subr.mxu0 %v14044_v53  ;;  %v435_v35 = vld [vmem:[%s13262_s2 + $0x1f0] sm:$0xff] }
  0xde   : > { %7197 = vmatprep.subr.mxu1 %v14045_v14  ;;  %7138 = vmatpush3.msra.mxu0 %v14046_v29  ;;  %v10093_v14 = vsub.f32 %v436_v51, %v10061_v1  ;;  %v10095_v29 = vand.u32 4294901760, %v435_v35 }
  0xdf   : > { %7198 = vmatpush3.msra.mxu1 %v14047_v41  ;;  %7139 = vmatprep.subr.mxu0 %v14049_v54  ;;  %v10105_v54 = vand.u32 4294901760, %v434_v63 }
  0xe0   : > { %2257 = vmatprep.mubr.f32.mxu0 %v14050_v38  ;;  %2435 = vmatprep.mubr.f32.mxu1 %v14051_v18 }
  0xe1   : > { %7140 = vmatpush3.msra.mxu0 %v14053_v2  ;;  %7199 = vmatprep.subr.mxu1 %v13986_v57  ;;  %v14061_v57 = vand.u32 4294901760, %v14037_v7  ;;  %v14067_v7 = vand.u32 4294901760, %v9492_v0  ;;  %v14073_v0 = vand.u32 4294901760, %v14054_v56  ;;  %v433_v2 = vld [vmem:[%s13262_s2 + $0x1e0] sm:$0xff] }
  0xe2   : > { %2260 = vmatmul.mubr.f32.gmra.mxu0 %v14054_v56  ;;  %2439 = vmatmul.mubr.f32.gmra.mxu1 %v14055_v43  ;;  %v417_v56 = vld [vmem:[%s13262_s2 + $0x160] sm:$0xff]  ;;  %v432_v43 = vld [vmem:[%s13262_s2 + $0x1d8] sm:$0xff] }
  0xe3   : > { %7141 = vmatprep.subr.mxu0 %v14057_v19  ;;  %7200 = vmatpush3.msra.mxu1 %v13989_v39  ;;  %v14064_v39 = vand.u32 4294901760, %v14041_v5  ;;  %v14074_v5 = vand.u32 4294901760, %v9544_v4  ;;  %v418_v4 = vld [vmem:[%s13262_s2 + $0x168] sm:$0xff] }
  0xe4   : > { %7142 = vmatpush3.msra.mxu0 %v14058_v58  ;;  %7201 = vmatprep.subr.mxu1 %v13992_v9  ;;  %v14066_v9 = vand.u32 4294901760, %v13996_v25  ;;  %v14070_v25 = vand.u32 4294901760, %v14050_v38  ;;  %v10107_v38 = vand.u32 4294901760, %v418_v4  ;;  %v14084_v58 = vand.u32 4294901760, %v9569_v55 }
  0xe5   : > { %7143 = vmatprep.subr.mxu0 %v14059_v11  ;;  %2266 = vmatprep.mubr.f32.mxu0 %v14060_v32  ;;  %v10136_v11 = vsub.f32 %v435_v35, %v10095_v29 }
  0xe6   : > { %2446 = vmatprep.mubr.f32.mxu1 %v14061_v57  ;;  %7144 = vmatpush3.msra.mxu0 %v14062_v34  ;;  %14080 = vst [vmem:[#allocation14_spill] sm:$0xff] %v10107_v38  ;;  %v10145_v55 = vsub.f32 %v418_v4, %v10107_v38  ;;  %v10150_v34 = vand.u32 4294901760, %v433_v2  ;;  %v14098_v4 = vld [vmem:[#allocation40_spill] sm:$0xff] }
  0xe7   : > { %7202 = vmatpush3.msra.mxu1 %v13994_v47  ;;  %2269 = vmatmul.mubr.f32.gmra.mxu0 %v14063_v24  ;;  %v8149_v48 = vpop.f32.mrf.mxu0  ;;  %v420_v47 = vld [vmem:[%s13262_s2 + $0x178] sm:$0xff] }
  0xe8   : > { %2450 = vmatmul.mubr.f32.gmra.mxu1 %v14064_v39  ;;  %7145 = vmatprep.subr.mxu0 %v14065_v8  ;;  %v10063_v20 = vand.u32 4294901760, %v420_v47  ;;  %14086 = vst [vmem:[#allocation33_spill] sm:$0xff] %v10150_v34  ;;  %v14088_v39 = vand.u32 4294901760, %v14068_v31  ;;  %v14092_v8 = vld [vmem:[#allocation36_spill] sm:$0xff]  ;;  %v13432_v35 = vand.u32 4294901760, %v10145_v55 }
  0xe9   : > { %7203 = vmatprep.subr.mxu1 %v13995_v12  ;;  %7146 = vmatpush3.msra.mxu0 %v14066_v9  ;;  %v10053_v23 = vpop.f32.mrf.mxu0  ;;  %v14071_v12 = vand.u32 4294901760, %v9446_v21  ;;  %v14075_v21 = vand.u32 4294901760, %v9463_v49 }
  0xea   : > { %7204 = vmatpush3.msra.mxu1 %v13997_v17  ;;  %7147 = vmatprep.subr.mxu0 %v14067_v7  ;;  %14069 = vst [vmem:[#allocation19_spill] sm:$0xff] %v10053_v23  ;;  %v14072_v17 = vld [vmem:[#allocation15_spill] sm:$0xff]  ;;  %v10090_v49 = vsub.f32 %v420_v47, %v10063_v20  ;;  %v14094_v47 = vld [vmem:[#allocation37_spill] sm:$0xff] }
  0xeb   : > { %2275 = vmatprep.mubr.f32.mxu0 %v14068_v31  ;;  %2457 = vmatprep.mubr.f32.mxu1 %v14070_v25  ;;  %v14093_v51 = vand.u32 4294901760, %v14072_v17  ;;  %v13436_v31 = vand.u32 4294901760, %v10136_v11  ;;  %v431_v25 = vld [vmem:[%s13262_s2 + $0x1d0] sm:$0xff]  ;;  %v14135_v23 = vld [vmem:[#allocation53_spill] sm:$0xff] }
  0xec   : > { %7148 = vmatpush3.msra.mxu0 %v14071_v12  ;;  %7205 = vmatprep.subr.mxu1 %v13998_v13  ;;  %v419_v13 = vld [vmem:[%s13262_s2 + $0x170] sm:$0xff] }
  0xed   : > { %2278 = vmatmul.mubr.f32.gmra.mxu0 %v14072_v17  ;;  %2461 = vmatmul.mubr.f32.gmra.mxu1 %v14073_v0  ;;  %v14095_v17 = vand.u32 4294901760, %v9876_v26 }
  0xee   : > { %7149 = vmatprep.subr.mxu0 %v14074_v5  ;;  %7206 = vmatpush3.msra.mxu1 %v13999_v44  ;;  %v8152_v53 = vpop.f32.mrf.mxu0  ;;  %v14076_v44 = vand.u32 4294901760, %v9603_v16  ;;  %v14079_v16 = vand.u32 4294901760, %v9525_v46  ;;  %v14082_v46 = vand.u32 4294901760, %v9636_v52  ;;  %v13439_v52 = vand.u32 4294901760, %v10093_v14 }
  0xef   : > { %7150 = vmatpush3.msra.mxu0 %v14075_v21  ;;  %7207 = vmatprep.subr.mxu1 %v14000_v61  ;;  %v14078_v61 = vand.u32 4294901760, %v14060_v32  ;;  %v14085_v32 = vand.u32 4294901760, %v9663_v15  ;;  %v14089_v15 = vand.u32 4294901760, %v9611_v30  ;;  %v10189_v21 = vsub.f32 %v433_v2, %v10150_v34 }
  0xf0   : > { %7151 = vmatprep.subr.mxu0 %v14076_v44  ;;  %7208 = vmatpush3.msra.mxu1 %v9357_v22  ;;  %v10097_v41 = vpop.f32.mrf.mxu0  ;;  %v8186_v59 = vpop.f32.mrf.mxu1  ;;  %v10103_v22 = vand.u32 4294901760, %v419_v13  ;;  %v3260_v7 = vsub.f32 %v10093_v14, %v13439_v52  ;;  %v10207_v44 = vand.u32 4294901760, %v431_v25 }
  0xf1   : > { %2284 = vmatprep.mubr.f32.mxu0 %v9876_v26  ;;  %14077 = vst [vmem:[#allocation16_spill] sm:$0xff] %v10097_v41  ;;  %2468 = vmatprep.mubr.f32.mxu1 %v14078_v61  ;;  %v10109_v18 = vadd.f32 %v8186_v59, %v8149_v48  ;;  %v10160_v48 = vand.u32 4294901760, %v432_v43  ;;  %14096 = vst [vmem:[#allocation34_spill] sm:$0xff] %v10189_v21  ;;  %v14104_v61 = vand.u32 4294901760, %v9885_v45 }
  0xf2   : > { %7152 = vmatpush3.msra.mxu0 %v14079_v16  ;;  %2472 = vmatmul.mubr.f32.gmra.mxu1 %v14081_v60  ;;  %v10128_v19 = vpop.f32.mrf.mxu1  ;;  %v10142_v57 = vsub.f32 %v419_v13, %v10103_v22  ;;  %14102 = vst [vmem:[#allocation41_spill] sm:$0xff] %v10207_v44  ;;  %v14105_v16 = vld [vmem:[#allocation45_spill] sm:$0xff]  ;;  %v3261_v60 = vand.u32 4294901760, %v3260_v7 }
  0xf3   : > { %2287 = vmatmul.mubr.f32.gmra.mxu0 %v9885_v45  ;;  %7153 = vmatprep.subr.mxu0 %v14082_v46  ;;  %v10126_v3 = vpop.f32.mrf.mxu0  ;;  %14083 = vst [vmem:[#allocation27_spill] sm:$0xff] %v10128_v19  ;;  %14091 = vst [vmem:[#allocation24_spill] sm:$0xff] %v10160_v48  ;;  %v430_v46 = vld [vmem:[%s13262_s2 + $0x1c8] sm:$0xff] }
  0xf4   : > { %7209 = vmatprep.subr.mxu1 %v9417_v62  ;;  %7154 = vmatpush3.msra.mxu0 %v14084_v58  ;;  %v13438_v62 = vand.u32 4294901760, %v10090_v49  ;;  %v13434_v0 = vand.u32 4294901760, %v10142_v57  ;;  %v10236_v58 = vsub.f32 %v10145_v55, %v13432_v35 }
  0xf5   : > { %7210 = vmatpush3.msra.mxu1 %v9392_v36  ;;  %7155 = vmatprep.subr.mxu0 %v14085_v32  ;;  %v10148_v36 = vsub.f32 %v434_v63, %v10105_v54  ;;  %v10152_v24 = vpop.f32.mrf.mxu0  ;;  %v13431_v32 = vand.u32 4294901760, %v10189_v21 }
  0xf6   : > { %7211 = vmatprep.subr.mxu1 %v9433_v27  ;;  %14087 = vst [vmem:[#allocation20_spill] sm:$0xff] %v10152_v24  ;;  %2479 = vmatprep.mubr.f32.mxu1 %v14088_v39  ;;  %v10158_v27 = vand.u32 4294901760, %v417_v56  ;;  %v8189_v9 = vpop.f32.mrf.mxu1  ;;  %v3148_v30 = vsub.f32 %v10090_v49, %v13438_v62  ;;  %v3155_v45 = vsub.f32 %v10142_v57, %v13434_v0  ;;  %v14115_v0 = vld [vmem:[#allocation50_spill] sm:$0xff] }
  0xf7   : > { %7156 = vmatpush3.msra.mxu0 %v14089_v15  ;;  %2660 = vmatprep.mubr.f32.mxu0 %v14092_v8  ;;  %v10180_v12 = vadd.f32 %v8189_v9, %v8152_v53  ;;  %v13433_v5 = vand.u32 4294901760, %v10148_v36 }
  0xf8   : > { %14090 = vst [vmem:[#allocation21_spill] sm:$0xff] %v10158_v27  ;;  %7212 = vmatpush3.msra.mxu1 %v14002_v10  ;;  %2662 = vmatmul.mubr.f32.vlgmr.msra.gmra.mxu0 %v14094_v47  ;;  %v416_v10 = vld [vmem:[%s13262_s2 + $0x158] sm:$0xff]  ;;  %v10193_v63 = vpop.f32.mrf.mxu1  ;;  %v10198_v26 = vsub.f32 %v417_v56, %v10158_v27  ;;  %v3149_v2 = vand.u32 4294901760, %v3148_v30  ;;  %v14106_v56 = vld [vmem:[#allocation47_spill] sm:$0xff]  ;;  %v10253_v30 = vand.u32 4294901760, %v430_v46 }
  0xf9   : > { %2483 = vmatmul.mubr.f32.gmra.mxu1 %v14093_v51  ;;  %7213 = vmatprep.subr.mxu1 %v14004_v50  ;;  %v10191_v13 = vpop.f32.mrf.mxu0  ;;  %14097 = vst [vmem:[#allocation22_spill] sm:$0xff] %v10193_v63  ;;  %v10201_v50 = vsub.f32 %v432_v43, %v10160_v48  ;;  %v10205_v53 = vand.u32 4294901760, %v416_v10  ;;  %v10231_v43 = vsub.f32 %v10148_v36, %v13433_v5 }
  0xfa   : > { %2490 = vmatprep.mubr.f32.mxu1 %v14095_v17  ;;  %7214 = vmatpush3.msra.mxu1 %v9466_v37  ;;  %14099 = vst [vmem:[#allocation28_spill] sm:$0xff] %v10198_v26  ;;  %v415_v37 = vld [vmem:[%s13262_s2 + $0x150] sm:$0xff]  ;;  %14109 = vst [vmem:[#allocation46_spill] sm:$0xff] %v10253_v30 }
  0xfb   : > { %2667 = vmatprep.mubr.f32.mxu0 %v14098_v4  ;;  %14100 = vst [vmem:[#allocation29_spill] sm:$0xff] %v10201_v50  ;;  %7215 = vmatprep.subr.mxu1 %v14006_v42  ;;  %14101 = vst [vmem:[#allocation30_spill] sm:$0xff] %v10205_v53  ;;  %v10212_v59 = vpop.f32.mrf.mxu0  ;;  %v3267_v42 = vsub.f32 %v10136_v11, %v13436_v31  ;;  %v13437_v15 = vand.u32 4294901760, %v10201_v50  ;;  %v10243_v9 = vand.u32 4294901760, %v415_v37 }
  0xfc   : > { %7249 = vmatprep.subr.mxu0 %v10061_v1  ;;  %14103 = vst [vmem:[#allocation32_spill] sm:$0xff] %v10212_v59  ;;  %2669 = vmatmul.mubr.f32.gmra.mxu0 %v14105_v16  ;;  %v8192_v39 = vpop.f32.mrf.mxu1  ;;  %v10251_v7 = vsub.f32 %v416_v10, %v10205_v53  ;;  %v3156_v10 = vand.u32 4294901760, %v3155_v45 }
  0xfd   : > { %2494 = vmatmul.mubr.f32.gmra.mxu1 %v14104_v61  ;;  %2674 = vmatprep.mubr.f32.mxu0 %v14106_v56  ;;  %14107 = vst [vmem:[#allocation43_spill] sm:$0xff] %v10243_v9  ;;  %v10246_v51 = vadd.f32 %v8192_v39, %v10126_v3  ;;  %v14112_v61 = vld [vmem:[#allocation48_spill] sm:$0xff]  ;;  %v3268_v3 = vand.u32 4294901760, %v3267_v42  ;;  %v10272_v39 = vsub.f32 %v10189_v21, %v13431_v32  ;;  %v413_v42 = vld [vmem:[%s13262_s2 + $0x140] sm:$0xff] }
  0xfe   : > { %7216 = vmatpush3.msra.mxu1 %v14008_v6  ;;  %2827 = vmatprep.mubr.f32.mxu1 %v14092_v8  ;;  %v13435_v6 = vand.u32 4294901760, %v10198_v26  ;;  %14108 = vst [vmem:[#allocation35_spill] sm:$0xff] %v10251_v7  ;;  %v10260_v17 = vpop.f32.mrf.mxu1  ;;  %v10295_v35 = vsub.f32 %v10201_v50, %v13437_v15  ;;  %v10298_v5 = vsub.f32 %v415_v37, %v10243_v9  ;;  %v10315_v52 = vand.u32 4294901760, %v413_v42 }
  0xff   : > { %7217 = vmatprep.subr.mxu1 %v14010_v40  ;;  %7250 = vmatpush3.msra.mxu0 %v10063_v20  ;;  %v10256_v40 = vsub.f32 %v431_v25, %v10207_v44  ;;  %v10258_v8 = vpop.f32.mrf.mxu0  ;;  %14111 = vst [vmem:[#allocation39_spill] sm:$0xff] %v10260_v17  ;;  %v3275_v25 = vand.u32 4294901760, %v10231_v43  ;;  %v3163_v43 = vand.u32 4294901760, %v10236_v58  ;;  %v10310_v15 = vsub.f32 %v430_v46, %v10253_v30  ;;  %v14121_v58 = vld [vmem:[#allocation51_spill] sm:$0xff] }
 0x100   : > { %7218 = vmatpush3.msra.mxu1 %v14012_v28  ;;  %2676 = vmatmul.mubr.f32.gmra.mxu0 %v14112_v61  ;;  %v414_v28 = vld [vmem:[%s13262_s2 + $0x148] sm:$0xff]  ;;  %v10290_v32 = vsub.f32 %v10198_v26, %v13435_v6  ;;  %14114 = vst [vmem:[#allocation44_spill] sm:$0xff] %v10298_v5  ;;  %14119 = vst [vmem:[#allocation55_spill] sm:$0xff] %v10315_v52 }
 0x101   : > { %14110 = vst [vmem:[#allocation38_spill] sm:$0xff] %v10256_v40  ;;  %2829 = vmatmul.mubr.f32.vlgmr.msra.gmra.mxu1 %v14094_v47  ;;  %7311 = vmatprep.subr.mxu1 %v3261_v60  ;;  %v429_v47 = vld [vmem:[%s13262_s2 + $0x1c0] sm:$0xff]  ;;  %v428_v60 = vld [vmem:[%s13262_s2 + $0x1b8] sm:$0xff]  ;;  %v10283_v45 = vpop.f32.mrf.mxu0  ;;  %v10306_v6 = vand.u32 4294901760, %v414_v28  ;;  %14117 = vst [vmem:[#allocation54_spill] sm:$0xff] %v10310_v15  ;;  %v14126_v24 = vand.u32 4294901760, %v10256_v40 }
 0x102   : > { %7251 = vmatprep.subr.mxu0 %v10095_v29  ;;  %14113 = vst [vmem:[#allocation49_spill] sm:$0xff] %v10283_v45  ;;  %7312 = vmatpush3.msra.mxu1 %v3149_v2  ;;  %v412_v2 = vld [vmem:[%s13262_s2 + $0x138] sm:$0xff]  ;;  %v8195_v62 = vpop.f32.mrf.mxu1  ;;  %v10313_v37 = vand.u32 4294901760, %v429_v47  ;;  %v10317_v45 = vand.u32 4294901760, %v428_v60  ;;  %v3170_v17 = vand.u32 4294901760, %v10290_v32 }
 0x103   : > { %7252 = vmatpush3.msra.mxu0 %v10103_v22  ;;  %2681 = vmatprep.mubr.f32.mxu0 %v14115_v0  ;;  %14116 = vst [vmem:[#allocation42_spill] sm:$0xff] %v10306_v6  ;;  %v10324_v31 = vand.u32 4294901760, %v412_v2 }
 0x104   : > { %2834 = vmatprep.mubr.f32.mxu1 %v14098_v4  ;;  %7253 = vmatprep.subr.mxu0 %v10105_v54  ;;  %14118 = vst [vmem:[#allocation9_spill] sm:$0xff] %v10313_v37  ;;  %14120 = vst [vmem:[#allocation17_spill] sm:$0xff] %v10317_v45  ;;  %v10320_v4 = vadd.f32 %v8195_v62, %v10191_v13  ;;  %v10326_v46 = vpop.f32.mrf.mxu1  ;;  %v427_v62 = vld [vmem:[%s13262_s2 + $0x1b0] sm:$0xff]  ;;  %v10369_v63 = vsub.f32 %v428_v60, %v10317_v45  ;;  %v14136_v60 = vand.u32 4294901760, %v10298_v5 }
 0x105   : > { %7313 = vmatprep.subr.mxu1 %v3268_v3  ;;  %2683 = vmatmul.mubr.f32.gmra.mxu0 %v14121_v58  ;;  %14122 = vst [vmem:[#allocation2_spill] sm:$0xff] %v10324_v31  ;;  %14123 = vst [vmem:[#allocation13_spill] sm:$0xff] %v10326_v46  ;;  %v8223_v59 = vpop.f32.mrf.mxu0  ;;  %v3282_v3 = vand.u32 4294901760, %v10272_v39  ;;  %v411_v13 = vld [vmem:[%s13262_s2 + $0x130] sm:$0xff]  ;;  %v10346_v39 = vsub.f32 %v414_v28, %v10306_v6  ;;  %v10351_v46 = vsub.f32 %v10256_v40, %v14126_v24 }
 0x106   : > { %2836 = vmatmul.mubr.f32.gmra.mxu1 %v14105_v16  ;;  %7254 = vmatpush3.msra.mxu0 %v10107_v38  ;;  %v10339_v16 = vadd.f32 %v8223_v59, %v10109_v18  ;;  %v426_v18 = vld [vmem:[%s13262_s2 + $0x1a8] sm:$0xff]  ;;  %v3289_v28 = vand.u32 4294901760, %v10295_v35  ;;  %v10366_v24 = vsub.f32 %v429_v47, %v10313_v37  ;;  %14130 = vst [vmem:[#allocation58_spill] sm:$0xff] %v10369_v63  ;;  %v10378_v35 = vand.u32 4294901760, %v427_v62 }
 0x107   : > { %7314 = vmatpush3.msra.mxu1 %v3156_v10  ;;  %7255 = vmatprep.subr.mxu0 %v10150_v34  ;;  %v14124_v10 = vand.u32 4294901760, %v10251_v7  ;;  %14125 = vst [vmem:[#allocation7_spill] sm:$0xff] %v10346_v39  ;;  %v410_v59 = vld [vmem:[%s13262_s2 + $0x128] sm:$0xff]  ;;  %v10371_v19 = vpop.f32.mrf.mxu0 }
 0x108   : > { %7315 = vmatprep.subr.mxu1 %v3275_v25  ;;  %v14127_v25 = vld [vmem:[#allocation52_spill] sm:$0xff]  ;;  %14129 = vst [vmem:[#allocation10_spill] sm:$0xff] %v10366_v24  ;;  %v8198_v41 = vpop.f32.mrf.mxu1  ;;  %14131 = vst [vmem:[#allocation3_spill] sm:$0xff] %v10371_v19  ;;  %2841 = vmatprep.mubr.f32.mxu1 %v14106_v56  ;;  %v3183_v56 = vsub.f32 %v10298_v5, %v14136_v60  ;;  %v10390_v19 = vand.u32 4294901760, %v426_v18  ;;  %v10392_v40 = vand.u32 4294901760, %v410_v59  ;;  %v14189_v38 = vld [vmem:[#allocation11_spill] sm:$0xff] }
 0x109   : > { %v3176_v32 = vsub.f32 %v10251_v7, %v14124_v10  ;;  %7316 = vmatpush3.msra.mxu1 %v3163_v43  ;;  %2688 = vmatprep.mubr.f32.mxu0 %v14127_v25  ;;  %v10363_v10 = vsub.f32 %v413_v42, %v10315_v52  ;;  %v10376_v43 = vsub.f32 %v412_v2, %v10324_v31  ;;  %v10380_v42 = vand.u32 4294901760, %v411_v13  ;;  %v14142_v60 = vld [vmem:[#allocation56_spill] sm:$0xff]  ;;  %v320_v7 = vld [vmem:[%s9384_s15 + $0x88] sm:$0xff] }
 0x10a   : > { %7256 = vmatpush3.msra.mxu0 %v10158_v27  ;;  %14133 = vst [vmem:[#allocation23_spill] sm:$0xff] %v10378_v35  ;;  %v10383_v47 = vadd.f32 %v8198_v41, %v10258_v8  ;;  %2843 = vmatmul.mubr.f32.gmra.mxu1 %v14112_v61  ;;  %14137 = vst [vmem:[#allocation8_spill] sm:$0xff] %v10390_v19  ;;  %v14139_v27 = vand.u32 4294901760, %v10310_v15  ;;  %v3296_v61 = vand.u32 4294901760, %v10351_v46  ;;  %v409_v46 = vld [vmem:[%s13262_s2 + $0x120] sm:$0xff]  ;;  %v10631_v26 = vand.u32 4294901760, %v320_v7 }
 0x10b   : > { %14128 = vst [vmem:[#allocation18_spill] sm:$0xff] %v10363_v10  ;;  %14132 = vst [vmem:[#allocation60_spill] sm:$0xff] %v10376_v43  ;;  %2690 = vmatmul.mubr.f32.gmra.mxu0 %v14135_v23  ;;  %7257 = vmatprep.subr.mxu0 %v10160_v48  ;;  %v3177_v2 = vand.u32 4294901760, %v3176_v32  ;;  %v8226_v32 = vpop.f32.mrf.mxu0  ;;  %v10418_v5 = vsub.f32 %v427_v62, %v10378_v35  ;;  %v10432_v8 = vsub.f32 %v426_v18, %v10390_v19 }
 0x10c   : > { %14134 = vst [vmem:[#allocation12_spill] sm:$0xff] %v10380_v42  ;;  %14138 = vst [vmem:[#allocation25_spill] sm:$0xff] %v10392_v40  ;;  %7317 = vmatprep.subr.mxu1 %v3282_v3  ;;  %v10398_v41 = vsub.f32 %v10310_v15, %v14139_v27  ;;  %7258 = vmatpush3.msra.mxu0 %v10205_v53  ;;  %v425_v3 = vld [vmem:[%s13262_s2 + $0x1a0] sm:$0xff]  ;;  %v10411_v27 = vsub.f32 %v411_v13, %v10380_v42  ;;  %v14150_v18 = vand.u32 4294901760, %v10366_v24 }
 0x10d   : > { %7318 = vmatpush3.msra.mxu1 %v3170_v17  ;;  %7259 = vmatprep.subr.mxu0 %v10207_v44  ;;  %14141 = vst [vmem:[#allocation26_spill] sm:$0xff] %v10418_v5  ;;  %v10421_v48 = vadd.f32 %v8226_v32, %v10180_v12  ;;  %v10426_v13 = vsub.f32 %v410_v59, %v10392_v40  ;;  %v424_v17 = vld [vmem:[%s13262_s2 + $0x198] sm:$0xff]  ;;  %14144 = vst [vmem:[#allocation31_spill] sm:$0xff] %v10432_v8  ;;  %v10434_v62 = vpop.f32.mrf.mxu0  ;;  %v10443_v32 = vpop.f32.mrf.mxu1 }
 0x10e   : > { %7319 = vmatprep.subr.mxu1 %v3289_v28  ;;  %14140 = vst [vmem:[#allocation62_spill] sm:$0xff] %v10411_v27  ;;  %2695 = vmatprep.mubr.f32.mxu0 %v14142_v60  ;;  %v3184_v28 = vand.u32 4294901760, %v3183_v56  ;;  %14145 = vst [vmem:[#allocation5_spill] sm:$0xff] %v10434_v62  ;;  %v3303_v12 = vand.u32 4294901760, %v10398_v41  ;;  %v10441_v56 = vand.u32 4294901760, %v425_v3  ;;  %v14149_v44 = vld [vmem:[#allocation57_spill] sm:$0xff]  ;;  %v3309_v62 = vsub.f32 %v10366_v24, %v14150_v18 }
 0x10f   : > { %2848 = vmatprep.mubr.f32.mxu1 %v14115_v0  ;;  %14143 = vst [vmem:[#allocation63_spill] sm:$0xff] %v10426_v13  ;;  %7260 = vmatpush3.msra.mxu0 %v10243_v9  ;;  %v14146_v0 = vand.u32 4294901760, %v10346_v39  ;;  %14148 = vst [vmem:[#allocation66_spill] sm:$0xff] %v10443_v32  ;;  %v14152_v9 = vand.u32 4294901760, %v10369_v63  ;;  %v306_v32 = vld [vmem:[%s9384_s15 + $0x18] sm:$0xff] }
 0x110   : > { %7320 = vmatpush3.msra.mxu1 %v3177_v2  ;;  %14147 = vst [vmem:[#allocation6_spill] sm:$0xff] %v10441_v56  ;;  %2697 = vmatmul.mubr.f32.gmra.mxu0 %v14149_v44  ;;  %v14151_v2 = vand.u32 4294901760, %v10363_v10  ;;  %14188 = vst [vmem:[#allocation74_spill] sm:$0xff] %v10631_v26 }
 0x111   : > { %v3190_v59 = vsub.f32 %v10346_v39, %v14146_v0  ;;  %2850 = vmatmul.mubr.f32.gmra.mxu1 %v14121_v58  ;;  %v10458_v0 = vsub.f32 %v10369_v63, %v14152_v9  ;;  %v10460_v39 = vand.u32 4294901760, %v409_v46  ;;  %7261 = vmatprep.subr.mxu0 %v10253_v30  ;;  %v14154_v58 = vand.u32 4294901760, %v10376_v43  ;;  %v8229_v15 = vpop.f32.mrf.mxu0  ;;  %v8260_v9 = vpop.f32.mrf.mxu1 }
 0x112   : > { %v10453_v41 = vsub.f32 %v10363_v10, %v14151_v2  ;;  %7321 = vmatprep.subr.mxu1 %v3296_v61  ;;  %v10470_v2 = vand.u32 4294901760, %v424_v17  ;;  %7262 = vmatpush3.msra.mxu0 %v10306_v6  ;;  %v408_v61 = vld [vmem:[%s13262_s2 + $0x118] sm:$0xff]  ;;  %v10480_v24 = vadd.f32 %v8229_v15, %v10246_v51  ;;  %v14156_v10 = vld [vmem:[#allocation59_spill] sm:$0xff]  ;;  %v10488_v6 = vsub.f32 %v425_v3, %v10441_v56  ;;  %v407_v3 = vld [vmem:[%s13262_s2 + $0x110] sm:$0xff] }
 0x113   : > { %14153 = vst [vmem:[#allocation15_spill] sm:$0xff] %v10460_v39  ;;  %v10467_v18 = vsub.f32 %v10376_v43, %v14154_v58  ;;  %7322 = vmatpush3.msra.mxu1 %v3184_v28  ;;  %v10483_v43 = vadd.f32 %v8260_v9, %v10339_v16  ;;  %7263 = vmatprep.subr.mxu0 %v10313_v37  ;;  %v3191_v28 = vand.u32 4294901760, %v3190_v59  ;;  %v10490_v30 = vand.u32 4294901760, %v306_v32  ;;  %v10492_v63 = vpop.f32.mrf.mxu0  ;;  %v10494_v58 = vpop.f32.mrf.mxu1  ;;  %v305_v59 = vld [vmem:[%s9384_s15 + $0x10] sm:$0xff]  ;;  %v14162_v9 = vld [vmem:[#allocation61_spill] sm:$0xff] }
 0x114   : > { %14155 = vst [vmem:[#allocation36_spill] sm:$0xff] %v10470_v2  ;;  %2702 = vmatprep.mubr.f32.mxu0 %v14156_v10  ;;  %14157 = vst [vmem:[#allocation37_spill] sm:$0xff] %v10488_v6  ;;  %2855 = vmatprep.mubr.f32.mxu1 %v14127_v25  ;;  %v3310_v15 = vand.u32 4294901760, %v3309_v62  ;;  %v3198_v51 = vand.u32 4294901760, %v10453_v41  ;;  %v10500_v16 = vsub.f32 %v409_v46, %v10460_v39  ;;  %v14164_v62 = vand.u32 4294901760, %v10411_v27 }
 0x115   : > { %14158 = vst [vmem:[#allocation40_spill] sm:$0xff] %v10490_v30  ;;  %14159 = vst [vmem:[#allocation45_spill] sm:$0xff] %v10492_v63  ;;  %7264 = vmatpush3.msra.mxu0 %v10315_v52  ;;  %7323 = vmatprep.subr.mxu1 %v3303_v12  ;;  %v14163_v63 = vand.u32 4294901760, %v10418_v5  ;;  %v10517_v46 = vand.u32 4294901760, %v408_v61  ;;  %v10523_v12 = vsub.f32 %v424_v17, %v10470_v2  ;;  %v3205_v52 = vand.u32 4294901760, %v10467_v18  ;;  %v10545_v17 = vld [vmem:[%s13262_s2 + $0x188] sm:$0xff] }
 0x116   : > { %14160 = vst [vmem:[#allocation47_spill] sm:$0xff] %v10494_v58  ;;  %14161 = vst [vmem:[#allocation48_spill] sm:$0xff] %v10500_v16  ;;  %2704 = vmatmul.mubr.f32.gmra.mxu0 %v14162_v9  ;;  %v10515_v41 = vsub.f32 %v10411_v27, %v14164_v62  ;;  %v423_v58 = vld [vmem:[%s13262_s2 + $0x190] sm:$0xff]  ;;  %2857 = vmatmul.mubr.f32.gmra.mxu1 %v14135_v23  ;;  %v14167_v62 = vand.u32 4294901760, %v10432_v8  ;;  %v14168_v37 = vand.u32 4294901760, %v10426_v13  ;;  %v10540_v23 = vand.u32 4294901760, %v407_v3 }
 0x117   : > { %v10510_v25 = vsub.f32 %v10418_v5, %v14163_v63  ;;  %14165 = vst [vmem:[#allocation50_spill] sm:$0xff] %v10517_v46  ;;  %14166 = vst [vmem:[#allocation51_spill] sm:$0xff] %v10523_v12  ;;  %7265 = vmatprep.subr.mxu0 %v10317_v45  ;;  %v3317_v63 = vand.u32 4294901760, %v10458_v0  ;;  %7324 = vmatpush3.msra.mxu1 %v3191_v28  ;;  %v10549_v18 = vsub.f32 %v306_v32, %v10490_v30  ;;  %v313_v45 = vld [vmem:[%s9384_s15 + $0x50] sm:$0xff]  ;;  %v8263_v28 = vpop.f32.mrf.mxu1 }
 0x118   : > { %v10532_v27 = vsub.f32 %v10432_v8, %v14167_v62  ;;  %v10537_v5 = vsub.f32 %v10426_v13, %v14168_v37  ;;  %7266 = vmatpush3.msra.mxu0 %v10324_v31  ;;  %14169 = vst [vmem:[#allocation52_spill] sm:$0xff] %v10540_v23  ;;  %v10551_v62 = vand.u32 4294901760, %v305_v59  ;;  %v8232_v37 = vpop.f32.mrf.mxu0  ;;  %7325 = vmatprep.subr.mxu1 %v3310_v15  ;;  %v10555_v31 = vand.u32 4294901760, %v423_v58  ;;  %v14173_v32 = vld [vmem:[#allocation64_spill] sm:$0xff] }
 0x119   : > { %14170 = vst [vmem:[#allocation53_spill] sm:$0xff] %v10549_v18  ;;  %7267 = vmatprep.subr.mxu0 %v10378_v35  ;;  %v10559_v8 = vadd.f32 %v8232_v37, %v10320_v4  ;;  %v10562_v0 = vadd.f32 %v8263_v28, %v10421_v48  ;;  %2709 = vmatprep.mubr.f32.mxu0 %v14173_v32  ;;  %v3324_v53 = vand.u32 4294901760, %v10510_v25  ;;  %v406_v4 = vld [vmem:[%s13262_s2 + $0x108] sm:$0xff]  ;;  %v10578_v13 = vpop.f32.mrf.mxu1  ;;  %v421_v35 = vld [vmem:[%s13262_s2 + $0x180] sm:$0xff]  ;;  %v10589_v37 = vand.u32 4294901760, %v313_v45 }
 0x11a   : > { %14171 = vst [vmem:[#allocation56_spill] sm:$0xff] %v10551_v62  ;;  %14172 = vst [vmem:[#allocation57_spill] sm:$0xff] %v10555_v31  ;;  %2862 = vmatprep.mubr.f32.mxu1 %v14142_v60  ;;  %v10569_v15 = vsub.f32 %v408_v61, %v10517_v46  ;;  %v312_v48 = vld [vmem:[%s9384_s15 + $0x48] sm:$0xff]  ;;  %v10576_v28 = vpop.f32.mrf.mxu0  ;;  %7268 = vmatpush3.msra.mxu0 %v10380_v42  ;;  %v3331_v60 = vand.u32 4294901760, %v10532_v27  ;;  %v10584_v61 = vand.u32 4294901760, %v10545_v17  ;;  %v14180_v27 = vand.u32 4294901760, %v10488_v6 }
 0x11b   : > { %14175 = vst [vmem:[#allocation61_spill] sm:$0xff] %v10576_v28  ;;  %14176 = vst [vmem:[#allocation64_spill] sm:$0xff] %v10578_v13  ;;  %7326 = vmatpush3.msra.mxu1 %v3198_v51  ;;  %v14178_v28 = vld [vmem:[#allocation4_spill] sm:$0xff]  ;;  %v10595_v51 = vsub.f32 %v407_v3, %v10540_v23  ;;  %v405_v13 = vld [vmem:[%s13262_s2 + $0x100] sm:$0xff]  ;;  %v10607_v34 = vsub.f32 %v305_v59, %v10551_v62  ;;  %7269 = vmatprep.subr.mxu0 %v10390_v19  ;;  %v14183_v3 = vand.u32 4294901760, %v10500_v16 }
 0x11c   : > { %14174 = vst [vmem:[#allocation59_spill] sm:$0xff] %v10569_v15  ;;  %14177 = vst [vmem:[#allocation68_spill] sm:$0xff] %v10589_v37  ;;  %2711 = vmatmul.mubr.f32.gmra.mxu0 %v14178_v28  ;;  %2864 = vmatmul.mubr.f32.gmra.mxu1 %v14149_v44  ;;  %v10600_v25 = vsub.f32 %v10488_v6, %v14180_v27  ;;  %v10610_v44 = vand.u32 4294901760, %v406_v4  ;;  %v10618_v6 = vsub.f32 %v423_v58, %v10555_v31 }
 0x11d   : > { %14179 = vst [vmem:[#allocation4_spill] sm:$0xff] %v10595_v51  ;;  %14181 = vst [vmem:[#allocation69_spill] sm:$0xff] %v10607_v34  ;;  %7327 = vmatprep.subr.mxu1 %v3317_v63  ;;  %v10615_v27 = vsub.f32 %v10500_v16, %v14183_v3  ;;  %v10620_v50 = vand.u32 4294901760, %v312_v48  ;;  %7270 = vmatpush3.msra.mxu0 %v10392_v40  ;;  %v10623_v59 = vand.u32 4294901760, %v421_v35  ;;  %v14187_v42 = vand.u32 4294901760, %v10523_v12  ;;  %v319_v3 = vld [vmem:[%s9384_s15 + $0x80] sm:$0xff]  ;;  %v8235_v16 = vpop.f32.mrf.mxu0  ;;  %v8266_v58 = vpop.f32.mrf.mxu1 }
 0x11e   : > { %14182 = vst [vmem:[#allocation70_spill] sm:$0xff] %v10610_v44  ;;  %14184 = vst [vmem:[#allocation71_spill] sm:$0xff] %v10618_v6  ;;  %7328 = vmatpush3.msra.mxu1 %v3205_v52  ;;  %7271 = vmatprep.subr.mxu0 %v10441_v56  ;;  %v10636_v40 = vand.u32 4294901760, %v405_v13  ;;  %v10639_v52 = vsub.f32 %v313_v45, %v10589_v37  ;;  %v10645_v19 = vadd.f32 %v8266_v58, %v10480_v24  ;;  %v14193_v24 = vld [vmem:[#allocation65_spill] sm:$0xff]  ;;  %v327_v45 = vld [vmem:[%s9384_s15 + $0xc0] sm:$0xff] }
 0x11f   : > { %14185 = vst [vmem:[#allocation72_spill] sm:$0xff] %v10620_v50  ;;  %14186 = vst [vmem:[#allocation73_spill] sm:$0xff] %v10623_v59  ;;  %v10628_v63 = vsub.f32 %v10523_v12, %v14187_v42  ;;  %2716 = vmatprep.mubr.f32.mxu0 %v14189_v38  ;;  %v10642_v42 = vadd.f32 %v8235_v16, %v10383_v47  ;;  %2869 = vmatprep.mubr.f32.mxu1 %v14156_v10  ;;  %v3338_v56 = vand.u32 4294901760, %v10600_v25  ;;  %v10660_v16 = vpop.f32.mrf.mxu1 }
 0x120   : > { %14190 = vst [vmem:[#allocation11_spill] sm:$0xff] %v10636_v40  ;;  %7272 = vmatpush3.msra.mxu0 %v10460_v39  ;;  %v14191_v12 = vand.u32 4294901760, %v10549_v18  ;;  %v10658_v47 = vsub.f32 %v10545_v17, %v10584_v61  ;;  %14192 = vst [vmem:[#allocation75_spill] sm:$0xff] %v10660_v16  ;;  %7329 = vmatprep.subr.mxu1 %v3324_v53  ;;  %v10664_v10 = vsub.f32 %v406_v4, %v10610_v44 }
 0x121   : > { %2718 = vmatmul.mubr.f32.gmra.mxu0 %v14193_v24  ;;  %v3226_v25 = vand.u32 4294901760, %v10615_v27  ;;  %v10670_v58 = vand.u32 4294901760, %v319_v3  ;;  %2871 = vmatmul.mubr.f32.gmra.mxu1 %v14162_v9  ;;  %v3345_v53 = vand.u32 4294901760, %v10628_v63  ;;  %v14197_v17 = vand.u32 4294901760, %v10569_v15  ;;  %v10705_v63 = vpop.f32.mrf.mxu0 }
 0x122   : > { %v10653_v21 = vsub.f32 %v10549_v18, %v14191_v12  ;;  %14194 = vst [vmem:[#allocation65_spill] sm:$0xff] %v10664_v10  ;;  %v10668_v12 = vsub.f32 %v312_v48, %v10620_v50  ;;  %7273 = vmatprep.subr.mxu0 %v10470_v2  ;;  %v10683_v16 = vsub.f32 %v320_v7, %v10631_v26  ;;  %v14198_v48 = vand.u32 4294901760, %v10515_v41  ;;  %v326_v2 = vld [vmem:[%s9384_s15 + $0xb8] sm:$0xff]  ;;  %v8269_v18 = vpop.f32.mrf.mxu1 }
 0x123   : > { %14196 = vst [vmem:[#allocation77_spill] sm:$0xff] %v10670_v58  ;;  %v10679_v4 = vsub.f32 %v10569_v15, %v14197_v17  ;;  %7274 = vmatpush3.msra.mxu0 %v10517_v46  ;;  %v10689_v9 = vsub.f32 %v405_v13, %v10636_v40  ;;  %v10694_v17 = vsub.f32 %v421_v35, %v10623_v59  ;;  %v14199_v41 = vand.u32 4294901760, %v10607_v34 }
 0x124   : > { %14195 = vst [vmem:[#allocation76_spill] sm:$0xff] %v10668_v12  ;;  %7330 = vmatpush3.msra.mxu1 %v14198_v48  ;;  %7275 = vmatprep.subr.mxu0 %v10555_v31  ;;  %v2997_v7 = vand.u32 4294901760, %v10653_v21  ;;  %v10703_v27 = vand.u32 4294901760, %v327_v45  ;;  %14201 = vst [vmem:[#allocation79_spill] sm:$0xff] %v10705_v63  ;;  %v14202_v35 = vand.u32 4294901760, %v10537_v5  ;;  %v10713_v46 = vsub.f32 %v319_v3, %v10670_v58  ;;  %v334_v3 = vld [vmem:[%s9384_s15 + $0xf8] sm:$0xff]  ;;  %v10728_v21 = vpop.f32.mrf.mxu1 }
 0x125   : > { %7331 = vmatprep.subr.mxu1 %v3331_v60  ;;  %v3002_v48 = vsub.f32 %v10607_v34, %v14199_v41  ;;  %v14203_v60 = vld [vmem:[#allocation67_spill] sm:$0xff]  ;;  %v10716_v41 = vadd.f32 %v8269_v18, %v10559_v8  ;;  %2876 = vmatprep.mubr.f32.mxu1 %v14173_v32  ;;  %v3233_v13 = vand.u32 4294901760, %v10679_v4  ;;  %v14204_v5 = vand.u32 4294901760, %v10618_v6  ;;  %14206 = vst [vmem:[#allocation80_spill] sm:$0xff] %v10728_v21  ;;  %v8297_v8 = vpop.f32.mrf.mxu0 }
 0x126   : > { %14200 = vst [vmem:[#allocation78_spill] sm:$0xff] %v10703_v27  ;;  %7332 = vmatpush3.msra.mxu1 %v14202_v35  ;;  %2723 = vmatprep.mubr.f32.mxu0 %v14203_v60  ;;  %v10725_v63 = vand.u32 4294901760, %v326_v2  ;;  %v14207_v18 = vand.u32 4294901760, %v10595_v51  ;;  %v14208_v4 = vand.u32 4294901760, %v10639_v52  ;;  %v14209_v34 = vand.u32 4294901760, %v10658_v47 }
 0x127   : > { %7276 = vmatpush3.msra.mxu0 %v10540_v23  ;;  %v3351_v35 = vsub.f32 %v10618_v6, %v14204_v5  ;;  %2878 = vmatmul.mubr.f32.gmra.mxu1 %v14178_v28  ;;  %v10740_v23 = vadd.f32 %v8297_v8, %v10483_v43  ;;  %v3003_v21 = vand.u32 4294901760, %v3002_v48  ;;  %v14210_v43 = vand.u32 4294901760, %v10668_v12  ;;  %v10761_v31 = vpop.f32.mrf.mxu0 }
 0x128   : > { %14205 = vst [vmem:[#allocation67_spill] sm:$0xff] %v10725_v63  ;;  %2725 = vmatmul.mubr.f32.gmra.mxu0 %v9866_v33  ;;  %v3239_v32 = vsub.f32 %v10595_v51, %v14207_v18  ;;  %v3011_v5 = vsub.f32 %v10639_v52, %v14208_v4  ;;  %7277 = vmatprep.subr.mxu0 %v10584_v61  ;;  %v333_v51 = vld [vmem:[%s9384_s15 + $0xf0] sm:$0xff]  ;;  %v8272_v39 = vpop.f32.mrf.mxu1 }
 0x129   : > { %7333 = vmatprep.subr.mxu1 %v3338_v56  ;;  %v3358_v28 = vsub.f32 %v10658_v47, %v14209_v34  ;;  %v10748_v18 = vsub.f32 %v327_v45, %v10703_v27  ;;  %7278 = vmatpush3.msra.mxu0 %v10610_v44  ;;  %v3017_v8 = vsub.f32 %v10668_v12, %v14210_v43  ;;  %v14211_v56 = vand.u32 4294901760, %v10664_v10 }
 0x12a   : > { %7334 = vmatpush3.msra.mxu1 %v3226_v25  ;;  %v10759_v34 = vand.u32 4294901760, %v334_v3  ;;  %7279 = vmatprep.subr.mxu0 %v10623_v59  ;;  %v3352_v45 = vand.u32 4294901760, %v3351_v35  ;;  %v14213_v25 = vand.u32 4294901760, %v10683_v16  ;;  %v10768_v44 = vsub.f32 %v326_v2, %v10725_v63 }
 0x12b   : > { %v3246_v48 = vsub.f32 %v10664_v10, %v14211_v56  ;;  %7335 = vmatprep.subr.mxu1 %v3345_v53  ;;  %v10771_v56 = vadd.f32 %v8272_v39, %v10642_v42  ;;  %2883 = vmatprep.mubr.f32.mxu1 %v14189_v38  ;;  %v3240_v4 = vand.u32 4294901760, %v3239_v32  ;;  %v3012_v12 = vand.u32 4294901760, %v3011_v5  ;;  %v341_v42 = vld [vmem:[%s9384_s15 + $0x130] sm:$0xff] }
 0x12c   : > { %14212 = vst [vmem:[#allocation81_spill] sm:$0xff] %v10759_v34  ;;  %v3026_v43 = vsub.f32 %v10683_v16, %v14213_v25  ;;  %7280 = vmatpush3.msra.mxu0 %v10636_v40  ;;  %v14214_v53 = vand.u32 4294901760, %v10694_v17  ;;  %v10778_v59 = vand.u32 4294901760, %v333_v51  ;;  %2998 = vmatprep.mubr.f32.mxu0 %v2997_v7  ;;  %v3359_v2 = vand.u32 4294901760, %v3358_v28  ;;  %v340_v40 = vld [vmem:[%s9384_s15 + $0x128] sm:$0xff] }
 0x12d   : > { %7336 = vmatpush3.msra.mxu1 %v3233_v13  ;;  %v14216_v25 = vand.u32 4294901760, %v10689_v9  ;;  %3004 = vmatmul.mubr.f32.vlgmr.msra.gmra.mxu0 %v3003_v21  ;;  %v3018_v32 = vand.u32 4294901760, %v3017_v8  ;;  %v14217_v5 = vand.u32 4294901760, %v10713_v46  ;;  %v10790_v7 = vsub.f32 %v334_v3, %v10759_v34  ;;  %v8300_v13 = vpop.f32.mrf.mxu0 }
 0x12e   : > { %v3365_v35 = vsub.f32 %v10694_v17, %v14214_v53  ;;  %14215 = vst [vmem:[#allocation82_spill] sm:$0xff] %v10778_v59  ;;  %2885 = vmatmul.mubr.f32.gmra.mxu1 %v14193_v24  ;;  %7337 = vmatprep.subr.mxu1 %v3352_v45  ;;  %v3247_v28 = vand.u32 4294901760, %v3246_v48  ;;  %v13538_v38 = vand.u32 4294901760, %v10768_v44  ;;  %v1325_v24 = vadd.f32 %v8300_v13, %v10562_v0  ;;  %v10807_v0 = vpop.f32.mrf.mxu1 }
 0x12f   : > { %v3253_v39 = vsub.f32 %v10689_v9, %v14216_v25  ;;  %v3032_v53 = vsub.f32 %v10713_v46, %v14217_v5  ;;  %14218 = vst [vmem:[#allocation83_spill] sm:$0xff] %v10790_v7  ;;  %2890 = vmatprep.mubr.f32.mxu1 %v14203_v60  ;;  %v3027_v25 = vand.u32 4294901760, %v3026_v43  ;;  %7338 = vmatpush3.msra.mxu1 %v3240_v4  ;;  %v10799_v3 = vand.u32 4294901760, %v341_v42  ;;  %v10801_v5 = vpop.f32.mrf.mxu0  ;;  %v348_v43 = vld [vmem:[%s9384_s15 + $0x168] sm:$0xff] }
 0x130   : > { %3013 = vmatprep.mubr.f32.mxu0 %v3012_v12  ;;  %v3366_v21 = vand.u32 4294901760, %v3365_v35  ;;  %v10797_v8 = vsub.f32 %v333_v51, %v10778_v59  ;;  %7339 = vmatprep.subr.mxu1 %v3359_v2  ;;  %v14221_v48 = vand.u32 4294901760, %v10748_v18  ;;  %14222 = vst [vmem:[#allocation86_spill] sm:$0xff] %v10807_v0  ;;  %v13539_v12 = vand.u32 4294901760, %v10790_v7 }
 0x131   : > { %14220 = vst [vmem:[#allocation85_spill] sm:$0xff] %v10799_v3  ;;  %7373 = vmatprep.subr.mxu0 %v10093_v14  ;;  %v3254_v60 = vand.u32 4294901760, %v3253_v39  ;;  %3019 = vmatmul.mubr.f32.gmra.mxu0 %v3018_v32  ;;  %v3033_v51 = vand.u32 4294901760, %v3032_v53  ;;  %v10811_v4 = vand.u32 4294901760, %v340_v40  ;;  %v3047_v35 = vsub.f32 %v10768_v44, %v13538_v38  ;;  %v8303_v2 = vpop.f32.mrf.mxu0  ;;  %v8334_v39 = vpop.f32.mrf.mxu1  ;;  %v347_v53 = vld [vmem:[%s9384_s15 + $0x160] sm:$0xff] }
 0x132   : > { %14219 = vst [vmem:[#allocation84_spill] sm:$0xff] %v10797_v8  ;;  %v3041_v45 = vsub.f32 %v10748_v18, %v14221_v48  ;;  %2892 = vmatmul.mubr.f32.gmra.mxu1 %v9866_v33  ;;  %3028 = vmatprep.mubr.f32.mxu0 %v3027_v25  ;;  %v13544_v33 = vand.u32 4294901760, %v10797_v8  ;;  %v10820_v32 = vsub.f32 %v341_v42, %v10799_v3 }
 0x133   : > { %14223 = vst [vmem:[#allocation87_spill] sm:$0xff] %v10811_v4  ;;  %7340 = vmatpush3.msra.mxu1 %v3247_v28  ;;  %3369 = vmatprep.mubr.f32.mxu1 %v10490_v30  ;;  %v10824_v13 = vadd.f32 %v8303_v2, %v10645_v19  ;;  %v10827_v28 = vadd.f32 %v8334_v39, %v10740_v23  ;;  %v10832_v48 = vpop.f32.mrf.mxu0  ;;  %v10834_v38 = vpop.f32.mrf.mxu1  ;;  %v3048_v42 = vand.u32 4294901760, %v3047_v35  ;;  %v354_v30 = vld [vmem:[%s9384_s15 + $0x198] sm:$0xff] }
 0x134   : > { %7341 = vmatprep.subr.mxu1 %v3366_v21  ;;  %14224 = vst [vmem:[#allocation88_spill] sm:$0xff] %v10820_v32  ;;  %7374 = vmatpush3.msra.mxu0 %v10090_v49  ;;  %v3042_v25 = vand.u32 4294901760, %v3041_v45  ;;  %v10830_v21 = vand.u32 4294901760, %v348_v43  ;;  %v3056_v19 = vsub.f32 %v10790_v7, %v13539_v12  ;;  %v10841_v23 = vsub.f32 %v340_v40, %v10811_v4  ;;  %v355_v40 = vld [vmem:[%s9384_s15 + $0x1a0] sm:$0xff] }
 0x135   : > { %7342 = vmatpush3.msra.mxu1 %v3254_v60  ;;  %3034 = vmatmul.mubr.f32.gmra.mxu0 %v3033_v51  ;;  %v10845_v60 = vand.u32 4294901760, %v347_v53  ;;  %v3062_v45 = vsub.f32 %v10797_v8, %v13544_v33 }
 0x136   : > { %14225 = vst [vmem:[#allocation89_spill] sm:$0xff] %v10830_v21  ;;  %3371 = vmatmul.mubr.f32.vlgmr.msra.gmra.mxu1 %v10551_v62  ;;  %14226 = vst [vmem:[#allocation90_spill] sm:$0xff] %v10841_v23  ;;  %7435 = vmatprep.subr.mxu1 %v10061_v1  ;;  %v10856_v2 = vsub.f32 %v348_v43, %v10830_v21  ;;  %v8306_v35 = vpop.f32.mrf.mxu0  ;;  %v3057_v12 = vand.u32 4294901760, %v3056_v19  ;;  %v14235_v62 = vld [vmem:[#allocation14_spill] sm:$0xff] }
 0x137   : > { %7375 = vmatprep.subr.mxu0 %v10136_v11  ;;  %14227 = vst [vmem:[#allocation91_spill] sm:$0xff] %v10845_v60  ;;  %7436 = vmatpush3.msra.mxu1 %v10063_v20  ;;  %v8337_v39 = vpop.f32.mrf.mxu1  ;;  %v1349_v33 = vadd.f32 %v8306_v35, %v10716_v41  ;;  %v10867_v43 = vsub.f32 %v347_v53, %v10845_v60  ;;  %v3063_v41 = vand.u32 4294901760, %v3062_v45  ;;  %v14233_v53 = vld [vmem:[#allocation34_spill] sm:$0xff]  ;;  %v10883_v35 = vand.u32 4294901760, %v354_v30 }
 0x138   : > { %7376 = vmatpush3.msra.mxu0 %v10142_v57  ;;  %3043 = vmatprep.mubr.f32.mxu0 %v3042_v25  ;;  %14228 = vst [vmem:[#allocation92_spill] sm:$0xff] %v10856_v2  ;;  %v10863_v51 = vadd.f32 %v8337_v39, %v1325_v24  ;;  %v10869_v25 = vand.u32 4294901760, %v355_v40  ;;  %v14232_v24 = vand.u32 4294901760, %v10820_v32  ;;  %v362_v39 = vld [vmem:[%s9384_s15 + $0x1d8] sm:$0xff] }
 0x139   : > { %3376 = vmatprep.mubr.f32.mxu1 %v10589_v37  ;;  %7377 = vmatprep.subr.mxu0 %v10148_v36  ;;  %14229 = vst [vmem:[#allocation93_spill] sm:$0xff] %v10867_v43  ;;  %v10871_v37 = vpop.f32.mrf.mxu0  ;;  %v10873_v0 = vpop.f32.mrf.mxu1  ;;  %14234 = vst [vmem:[#allocation96_spill] sm:$0xff] %v10883_v35 }
 0x13a   : > { %7437 = vmatprep.subr.mxu1 %v10095_v29  ;;  %3049 = vmatmul.mubr.f32.gmra.mxu0 %v3048_v42  ;;  %14230 = vst [vmem:[#allocation94_spill] sm:$0xff] %v10869_v25  ;;  %14231 = vst [vmem:[#allocation95_spill] sm:$0xff] %v10871_v37  ;;  %v3071_v19 = vsub.f32 %v10820_v32, %v14232_v24  ;;  %v14237_v37 = vld [vmem:[#allocation28_spill] sm:$0xff]  ;;  %v10894_v32 = vsub.f32 %v355_v40, %v10869_v25  ;;  %v14241_v24 = vld [vmem:[#allocation33_spill] sm:$0xff]  ;;  %v14242_v40 = vand.u32 4294901760, %v10856_v2 }
 0x13b   : > { %3378 = vmatmul.mubr.f32.gmra.mxu1 %v10620_v50  ;;  %7378 = vmatpush3.msra.mxu0 %v10145_v55  ;;  %v14236_v50 = vand.u32 4294901760, %v10841_v23  ;;  %v361_v42 = vld [vmem:[%s9384_s15 + $0x1d0] sm:$0xff] }
 0x13c   : > { %7438 = vmatpush3.msra.mxu1 %v10103_v22  ;;  %7379 = vmatprep.subr.mxu0 %v14233_v53  ;;  %14238 = vst [vmem:[#allocation97_spill] sm:$0xff] %v10894_v32  ;;  %v14246_v53 = vld [vmem:[#allocation21_spill] sm:$0xff] }
 0x13d   : > { %7439 = vmatprep.subr.mxu1 %v10105_v54  ;;  %3058 = vmatprep.mubr.f32.mxu0 %v3057_v12  ;;  %v3077_v45 = vsub.f32 %v10841_v23, %v14236_v50  ;;  %v8309_v8 = vpop.f32.mrf.mxu0  ;;  %v8340_v7 = vpop.f32.mrf.mxu1  ;;  %v3072_v12 = vand.u32 4294901760, %v3071_v19  ;;  %v14240_v23 = vld [vmem:[#allocation29_spill] sm:$0xff] }
 0x13e   : > { %7440 = vmatpush3.msra.mxu1 %v14235_v62  ;;  %3383 = vmatprep.mubr.f32.mxu1 %v10631_v26  ;;  %v10898_v62 = vand.u32 4294901760, %v362_v39  ;;  %v1361_v50 = vadd.f32 %v8309_v8, %v10771_v56  ;;  %v10902_v26 = vadd.f32 %v8340_v7, %v10824_v13  ;;  %v10916_v7 = vand.u32 4294901760, %v361_v42  ;;  %v14248_v8 = vld [vmem:[#allocation38_spill] sm:$0xff]  ;;  %v14249_v13 = vld [vmem:[#allocation24_spill] sm:$0xff] }
 0x13f   : > { %7380 = vmatpush3.msra.mxu0 %v14237_v37  ;;  %3385 = vmatmul.mubr.f32.gmra.mxu1 %v10670_v58  ;;  %v3086_v37 = vsub.f32 %v10856_v2, %v14242_v40  ;;  %v10912_v19 = vpop.f32.mrf.mxu1  ;;  %v14245_v58 = vld [vmem:[#allocation35_spill] sm:$0xff]  ;;  %v3078_v56 = vand.u32 4294901760, %v3077_v45  ;;  %v369_v2 = vld [vmem:[%s9384_s15 + $0x210] sm:$0xff] }
 0x140   : > { %3064 = vmatmul.mubr.f32.gmra.mxu0 %v3063_v41  ;;  %14239 = vst [vmem:[#allocation98_spill] sm:$0xff] %v10898_v62  ;;  %7381 = vmatprep.subr.mxu0 %v14240_v23  ;;  %v10910_v41 = vsub.f32 %v354_v30, %v10883_v35  ;;  %14244 = vst [vmem:[#allocation100_spill] sm:$0xff] %v10912_v19  ;;  %v14252_v45 = vld [vmem:[#allocation44_spill] sm:$0xff]  ;;  %v368_v23 = vld [vmem:[%s9384_s15 + $0x208] sm:$0xff] }
 0x141   : > { %7441 = vmatprep.subr.mxu1 %v14241_v24  ;;  %7382 = vmatpush3.msra.mxu0 %v14245_v58  ;;  %14247 = vst [vmem:[#allocation101_spill] sm:$0xff] %v10916_v7  ;;  %v14250_v24 = vand.u32 4294901760, %v10867_v43  ;;  %v10927_v58 = vsub.f32 %v362_v39, %v10898_v62  ;;  %v14256_v39 = vld [vmem:[#allocation54_spill] sm:$0xff] }
 0x142   : > { %14243 = vst [vmem:[#allocation99_spill] sm:$0xff] %v10910_v41  ;;  %7442 = vmatpush3.msra.mxu1 %v14246_v53  ;;  %7383 = vmatprep.subr.mxu0 %v14248_v8  ;;  %v14253_v53 = vld [vmem:[#allocation30_spill] sm:$0xff]  ;;  %v3087_v8 = vand.u32 4294901760, %v3086_v37  ;;  %v8343_v19 = vpop.f32.mrf.mxu1  ;;  %v14258_v37 = vand.u32 4294901760, %v10894_v32 }
 0x143   : > { %7443 = vmatprep.subr.mxu1 %v14249_v13  ;;  %v3092_v40 = vsub.f32 %v10867_v43, %v14250_v24  ;;  %3073 = vmatprep.mubr.f32.mxu0 %v3072_v12  ;;  %14251 = vst [vmem:[#allocation102_spill] sm:$0xff] %v10927_v58  ;;  %v10935_v24 = vsub.f32 %v361_v42, %v10916_v7  ;;  %v10937_v12 = vand.u32 4294901760, %v369_v2  ;;  %v14267_v42 = vld [vmem:[#allocation46_spill] sm:$0xff] }
 0x144   : > { %3390 = vmatprep.mubr.f32.mxu1 %v10703_v27  ;;  %7384 = vmatpush3.msra.mxu0 %v14252_v45  ;;  %v10939_v30 = vadd.f32 %v8343_v19, %v1349_v33  ;;  %v14257_v27 = vld [vmem:[#allocation41_spill] sm:$0xff]  ;;  %v3101_v13 = vsub.f32 %v10894_v32, %v14258_v37  ;;  %v10951_v45 = vand.u32 4294901760, %v368_v23  ;;  %v14263_v33 = vld [vmem:[#allocation10_spill] sm:$0xff]  ;;  %v14264_v19 = vand.u32 4294901760, %v10910_v41 }
 0x145   : > { %7444 = vmatpush3.msra.mxu1 %v14253_v53  ;;  %3079 = vmatmul.mubr.f32.gmra.mxu0 %v3078_v56  ;;  %14254 = vst [vmem:[#allocation103_spill] sm:$0xff] %v10935_v24  ;;  %14255 = vst [vmem:[#allocation104_spill] sm:$0xff] %v10937_v12  ;;  %v3093_v43 = vand.u32 4294901760, %v3092_v40  ;;  %v10946_v53 = vpop.f32.mrf.mxu1  ;;  %v14260_v56 = vld [vmem:[#allocation7_spill] sm:$0xff]  ;;  %v14265_v37 = vld [vmem:[#allocation18_spill] sm:$0xff] }
 0x146   : > { %3392 = vmatmul.mubr.f32.gmra.mxu1 %v10725_v63  ;;  %7385 = vmatprep.subr.mxu0 %v14256_v39  ;;  %14259 = vst [vmem:[#allocation54_spill] sm:$0xff] %v10946_v53  ;;  %v14261_v63 = vld [vmem:[#allocation43_spill] sm:$0xff]  ;;  %14262 = vst [vmem:[#allocation41_spill] sm:$0xff] %v10951_v45  ;;  %v3107_v40 = vsub.f32 %v10910_v41, %v14264_v19  ;;  %v10961_v53 = vsub.f32 %v369_v2, %v10937_v12  ;;  %v14270_v19 = vand.u32 4294901760, %v10927_v58  ;;  %v14272_v2 = vld [vmem:[#allocation42_spill] sm:$0xff] }
 0x147   : > { %7445 = vmatprep.subr.mxu1 %v14257_v27  ;;  %7386 = vmatpush3.msra.mxu0 %v14260_v56  ;;  %v3102_v56 = vand.u32 4294901760, %v3101_v13  ;;  %v10972_v32 = vsub.f32 %v368_v23, %v10951_v45  ;;  %v14273_v41 = vld [vmem:[#allocation60_spill] sm:$0xff]  ;;  %v14277_v23 = vld [vmem:[#allocation62_spill] sm:$0xff] }
 0x148   : > { %7446 = vmatpush3.msra.mxu1 %v14261_v63  ;;  %7387 = vmatprep.subr.mxu0 %v14263_v33  ;;  %14266 = vst [vmem:[#allocation18_spill] sm:$0xff] %v10961_v53  ;;  %v8346_v63 = vpop.f32.mrf.mxu1 }
 0x149   : > { %3088 = vmatprep.mubr.f32.mxu0 %v3087_v8  ;;  %3397 = vmatprep.mubr.f32.mxu1 %v10759_v34  ;;  %v10964_v33 = vadd.f32 %v8346_v63, %v1361_v50  ;;  %v14269_v8 = vld [vmem:[#allocation58_spill] sm:$0xff]  ;;  %v3116_v34 = vsub.f32 %v10927_v58, %v14270_v19  ;;  %v14275_v63 = vld [vmem:[#allocation9_spill] sm:$0xff]  ;;  %v14276_v50 = vand.u32 4294901760, %v10935_v24  ;;  %v14278_v19 = vld [vmem:[#allocation55_spill] sm:$0xff] }
 0x14a   : > { %7388 = vmatpush3.msra.mxu0 %v14265_v37  ;;  %7447 = vmatprep.subr.mxu1 %v14267_v42  ;;  %14271 = vst [vmem:[#allocation58_spill] sm:$0xff] %v10972_v32  ;;  %v3108_v42 = vand.u32 4294901760, %v3107_v40  ;;  %v14285_v40 = vld [vmem:[#allocation19_spill] sm:$0xff] }
 0x14b   : > { %3094 = vmatmul.mubr.f32.gmra.mxu0 %v3093_v43  ;;  %14268 = vst [vmem:[#allocation105_spill] sm:$0xff] %v10964_v33  ;;  %3399 = vmatmul.mubr.f32.gmra.mxu1 %v10778_v59  ;;  %v14274_v43 = vld [vmem:[#allocation26_spill] sm:$0xff]  ;;  %v3122_v13 = vsub.f32 %v10935_v24, %v14276_v50  ;;  %v3117_v58 = vand.u32 4294901760, %v3116_v34  ;;  %v10986_v33 = vpop.f32.mrf.mxu0  ;;  %v14281_v50 = vld [vmem:[#allocation17_spill] sm:$0xff] }
 0x14c   : > { %7389 = vmatprep.subr.mxu0 %v14269_v8  ;;  %7448 = vmatpush3.msra.mxu1 %v14272_v2  ;;  %14279 = vst [vmem:[#allocation42_spill] sm:$0xff] %v10986_v33  ;;  %v14284_v34 = vld [vmem:[#allocation2_spill] sm:$0xff] }
 0x14d   : > { %7390 = vmatpush3.msra.mxu0 %v14273_v41  ;;  %7449 = vmatprep.subr.mxu1 %v14275_v63  ;;  %v14280_v63 = vld [vmem:[#allocation31_spill] sm:$0xff]  ;;  %v3123_v59 = vand.u32 4294901760, %v3122_v13 }
 0x14e   : > { %7391 = vmatprep.subr.mxu0 %v14274_v43  ;;  %3103 = vmatprep.mubr.f32.mxu0 %v3102_v56  ;;  %v14282_v56 = vand.u32 4294901760, %v10961_v53 }
 0x14f   : > { %3404 = vmatprep.mubr.f32.mxu1 %v10799_v3  ;;  %7392 = vmatpush3.msra.mxu0 %v14277_v23  ;;  %v14283_v23 = vld [vmem:[#allocation63_spill] sm:$0xff] }
 0x150   : > { %7450 = vmatpush3.msra.mxu1 %v14278_v19  ;;  %3109 = vmatmul.mubr.f32.gmra.mxu0 %v3108_v42  ;;  %v3131_v3 = vsub.f32 %v10961_v53, %v14282_v56  ;;  %v14286_v19 = vld [vmem:[#allocation27_spill] sm:$0xff]  ;;  %v14287_v42 = vld [vmem:[#allocation37_spill] sm:$0xff] }
 0x151   : > { %3406 = vmatmul.mubr.f32.gmra.mxu1 %v10811_v4  ;;  %7393 = vmatprep.subr.mxu0 %v14280_v63  ;;  %v6909_v24 = vpop.f32.mrf.mxu0  ;;  %v836_v33 = vadd.f32 %v14286_v19, %v14285_v40  ;;  %v14288_v4 = vand.u32 4294901760, %v10972_v32  ;;  %v14289_v63 = vld [vmem:[#allocation48_spill] sm:$0xff]  ;;  %v14290_v56 = vld [vmem:[#allocation3_spill] sm:$0xff] }
 0x152   : > { %7451 = vmatprep.subr.mxu1 %v14281_v50  ;;  %7394 = vmatpush3.msra.mxu0 %v14283_v23  ;;  %v14291_v23 = vld [vmem:[#allocation23_spill] sm:$0xff] }
 0x153   : > { %7452 = vmatpush3.msra.mxu1 %v14284_v34  ;;  %7395 = vmatprep.subr.mxu0 %v14287_v42  ;;  %v3137_v50 = vsub.f32 %v10972_v32, %v14288_v4  ;;  %v6910_v13 = vpop.f32.mrf.mxu0  ;;  %v984_v53 = vadd.f32 %v14290_v56, %v836_v33  ;;  %v3132_v34 = vand.u32 4294901760, %v3131_v3  ;;  %v14292_v19 = vld [vmem:[#allocation51_spill] sm:$0xff]  ;;  %v14294_v42 = vld [vmem:[#allocation12_spill] sm:$0xff]  ;;  %v11013_v33 = vpop.f32.mrf.mxu1  ;;  %v14296_v3 = vld [vmem:[#allocation25_spill] sm:$0xff] }
 0x154   : > { %3118 = vmatprep.mubr.f32.mxu0 %v3117_v58  ;;  %3411 = vmatprep.mubr.f32.mxu1 %v10830_v21  ;;  %v14293_v58 = vld [vmem:[#allocation47_spill] sm:$0xff]  ;;  %v14295_v32 = vld [vmem:[#allocation8_spill] sm:$0xff] }
 0x155   : > { %7396 = vmatpush3.msra.mxu0 %v14289_v63  ;;  %7453 = vmatprep.subr.mxu1 %v14291_v23  ;;  %v6912_v43 = vpop.f32.mrf.mxu0  ;;  %v1131_v40 = vadd.f32 %v14293_v58, %v984_v53  ;;  %v3138_v4 = vand.u32 4294901760, %v3137_v50  ;;  %v14297_v58 = vld [vmem:[#allocation4_spill] sm:$0xff] }
 0x156   : > { %3124 = vmatmul.mubr.f32.gmra.mxu0 %v3123_v59  ;;  %3413 = vmatmul.mubr.f32.gmra.mxu1 %v10845_v60  ;;  %v6911_v60 = vadd.f32 %v6910_v13, %v6909_v24  ;;  %v14301_v13 = vld [vmem:[#allocation15_spill] sm:$0xff] }
 0x157   : > { %7397 = vmatprep.subr.mxu0 %v14292_v19  ;;  %7454 = vmatpush3.msra.mxu1 %v14294_v42  ;;  %v6913_v21 = vpop.f32.mrf.mxu0  ;;  %v1307_v56 = vadd.f32 %v10761_v31, %v1131_v40  ;;  %v14300_v31 = vld [vmem:[#allocation6_spill] sm:$0xff] }
 0x158   : > { %7398 = vmatpush3.msra.mxu0 %v10569_v15  ;;  %7455 = vmatprep.subr.mxu1 %v14295_v32  ;;  %v6914_v59 = vadd.f32 %v6913_v21, %v6912_v43  ;;  %v14298_v43 = vld [vmem:[#allocation16_spill] sm:$0xff] }
 0x159   : > { %7399 = vmatprep.subr.mxu0 %v10618_v6  ;;  %7456 = vmatpush3.msra.mxu1 %v14296_v3  ;;  %v6915_v53 = vpop.f32.mrf.mxu0  ;;  %v6971_v15 = vpop.f32.mrf.mxu1  ;;  %v1443_v6 = vadd.f32 %v10834_v38, %v1307_v56  ;;  %v14299_v3 = vld [vmem:[#allocation22_spill] sm:$0xff]  ;;  %v14303_v38 = vld [vmem:[#allocation36_spill] sm:$0xff] }
 0x15a   : > { %3133 = vmatprep.mubr.f32.mxu0 %v3132_v34  ;;  %3418 = vmatprep.mubr.f32.mxu1 %v10869_v25  ;;  %v1655_v50 = vadd.f32 %v6914_v59, %v10827_v28  ;;  %v848_v34 = vadd.f32 %v14299_v3, %v14298_v43  ;;  %v14304_v43 = vld [vmem:[#allocation64_spill] sm:$0xff] }
 0x15b   : > { %7400 = vmatpush3.msra.mxu0 %v14297_v58  ;;  %3420 = vmatmul.mubr.f32.gmra.mxu1 %v10883_v35  ;;  %v6916_v21 = vpop.f32.mrf.mxu0  ;;  %v6972_v24 = vpop.f32.mrf.mxu1  ;;  %v1640_v28 = vadd.f32 %v6911_v60, %v1443_v6  ;;  %v14306_v6 = vld [vmem:[#allocation50_spill] sm:$0xff] }
 0x15c   : > { %3139 = vmatmul.mubr.f32.gmra.mxu0 %v3138_v4  ;;  %7401 = vmatprep.subr.mxu0 %v10658_v47  ;;  %v6973_v40 = vadd.f32 %v6972_v24, %v6971_v15  ;;  %v14302_v4 = vld [vmem:[#allocation5_spill] sm:$0xff] }
 0x15d   : > { %7457 = vmatprep.subr.mxu1 %v14300_v31  ;;  %7402 = vmatpush3.msra.mxu0 %v10664_v10  ;;  %v998_v59 = vadd.f32 %v14302_v4, %v848_v34  ;;  %v6918_v56 = vpop.f32.mrf.mxu0  ;;  %v14305_v10 = vld [vmem:[#allocation53_spill] sm:$0xff] }
 0x15e   : > { %7458 = vmatpush3.msra.mxu1 %v14301_v13  ;;  %7403 = vmatprep.subr.mxu0 %v10694_v17  ;;  %v6974_v35 = vpop.f32.mrf.mxu1  ;;  %v11033_v3 = vadd.f32 %v6973_v40, %v1640_v28  ;;  %v14307_v34 = vld [vmem:[#allocation69_spill] sm:$0xff]  ;;  %v6917_v40 = vadd.f32 %v6916_v21, %v6915_v53  ;;  %v14312_v21 = vld [vmem:[#allocation70_spill] sm:$0xff] }
 0x15f   : > { %7459 = vmatprep.subr.mxu1 %v14303_v38  ;;  %3425 = vmatprep.mubr.f32.mxu1 %v10898_v62  ;;  %v1147_v25 = vadd.f32 %v14304_v43, %v998_v59  ;;  %v6919_v15 = vpop.f32.mrf.mxu0  ;;  %v14308_v38 = vld [vmem:[#allocation57_spill] sm:$0xff]  ;;  %v14309_v59 = vld [vmem:[#allocation52_spill] sm:$0xff] }
 0x160   : > { %7404 = vmatpush3.msra.mxu0 %v10689_v9  ;;  %3569 = vmatprep.mubr.f32.mxu0 %v14305_v10  ;;  %v6975_v60 = vpop.f32.mrf.mxu1  ;;  %v6920_v24 = vadd.f32 %v6919_v15, %v6918_v56  ;;  %v14313_v15 = vld [vmem:[#allocation20_spill] sm:$0xff] }
 0x161   : > { %7460 = vmatpush3.msra.mxu1 %v14306_v6  ;;  %3572 = vmatmul.mubr.f32.vlgmr.msra.gmra.mxu0 %v14307_v34  ;;  %v6976_v4 = vadd.f32 %v6975_v60, %v6974_v35  ;;  %v1319_v28 = vadd.f32 %v10801_v5, %v1147_v25  ;;  %v14310_v35 = vand.u32 4294901760, %v10093_v14  ;;  %v14311_v5 = vld [vmem:[#allocation76_spill] sm:$0xff]  ;;  %v14314_v60 = vld [vmem:[#allocation39_spill] sm:$0xff]  ;;  %v14316_v14 = vand.u32 4294901760, %v14305_v10 }
 0x162   : > { %3427 = vmatmul.mubr.f32.gmra.mxu1 %v10916_v7  ;;  %7461 = vmatprep.subr.mxu1 %v14308_v38  ;;  %v1685_v43 = vadd.f32 %v6920_v24, %v10863_v51  ;;  %v6977_v6 = vpop.f32.mrf.mxu1  ;;  %v860_v24 = vadd.f32 %v14314_v60, %v14313_v15  ;;  %v14321_v10 = vand.u32 4294901760, %v10136_v11  ;;  %v14325_v11 = vand.u32 4294901760, %v10148_v36 }
 0x163   : > { %3432 = vmatprep.mubr.f32.mxu1 %v10937_v12  ;;  %7462 = vmatpush3.msra.mxu1 %v14309_v59  ;;  %v11046_v62 = vadd.f32 %v6976_v4, %v1655_v50  ;;  %v6921_v7 = vpop.f32.mrf.mxu0  ;;  %v1455_v56 = vadd.f32 %v10873_v0, %v1319_v28  ;;  %v14315_v4 = vld [vmem:[#allocation73_spill] sm:$0xff]  ;;  %v14317_v0 = vld [vmem:[#allocation11_spill] sm:$0xff]  ;;  %v14318_v28 = vand.u32 4294901760, %v10090_v49  ;;  %v14323_v49 = vand.u32 4294901760, %v10142_v57 }
 0x164   : > { %3578 = vmatprep.mubr.f32.mxu0 %v10639_v52  ;;  %7463 = vmatprep.subr.mxu1 %v10584_v61  ;;  %v6978_v53 = vpop.f32.mrf.mxu1 }
 0x165   : > { %7497 = vmatprep.subr.mxu0 %v14310_v35  ;;  %3581 = vmatmul.mubr.f32.gmra.mxu0 %v14311_v5  ;;  %v6922_v25 = vpop.f32.mrf.mxu0  ;;  %v1670_v51 = vadd.f32 %v6917_v40, %v1455_v56  ;;  %v6979_v50 = vadd.f32 %v6978_v53, %v6977_v6  ;;  %v14320_v6 = vand.u32 4294901760, %v14307_v34  ;;  %v14322_v53 = vld [vmem:[#allocation75_spill] sm:$0xff]  ;;  %v14324_v34 = vand.u32 4294901760, %v10639_v52 }
 0x166   : > { %3434 = vmatmul.mubr.f32.gmra.mxu1 %v10951_v45  ;;  %3587 = vmatprep.mubr.f32.mxu0 %v10683_v16  ;;  %v14319_v45 = vld [vmem:[#allocation45_spill] sm:$0xff]  ;;  %v6923_v57 = vadd.f32 %v6922_v25, %v6921_v7  ;;  %v14331_v7 = vld [vmem:[#allocation14_spill] sm:$0xff]  ;;  %v14333_v25 = vld [vmem:[#allocation32_spill] sm:$0xff] }
 0x167   : > { %7464 = vmatpush3.msra.mxu1 %v14312_v21  ;;  %3757 = vmatprep.mubr.f32.mxu1 %v14316_v14  ;;  %v11064_v35 = vadd.f32 %v6979_v50, %v1670_v51  ;;  %v1012_v12 = vadd.f32 %v14319_v45, %v860_v24  ;;  %v14327_v14 = vand.u32 4294901760, %v10145_v55 }
 0x168   : > { %7465 = vmatprep.subr.mxu1 %v14315_v4  ;;  %7498 = vmatpush3.msra.mxu0 %v14318_v28  ;;  %v6924_v40 = vpop.f32.mrf.mxu0  ;;  %v14330_v28 = vld [vmem:[#allocation100_spill] sm:$0xff] }
 0x169   : > { %7466 = vmatpush3.msra.mxu1 %v14317_v0  ;;  %3590 = vmatmul.mubr.f32.gmra.mxu0 %v10713_v46  ;;  %v6980_v56 = vpop.f32.mrf.mxu1  ;;  %v1163_v15 = vadd.f32 %v14322_v53, %v1012_v12 }
 0x16a   : > { %3761 = vmatmul.mubr.f32.vlgmr.msra.gmra.mxu1 %v14320_v6  ;;  %7559 = vmatprep.subr.mxu1 %v10061_v1  ;;  %v6925_v45 = vpop.f32.mrf.mxu0 }
 0x16b   : > { %7499 = vmatprep.subr.mxu0 %v14321_v10  ;;  %7560 = vmatpush3.msra.mxu1 %v10063_v20  ;;  %v6981_v51 = vpop.f32.mrf.mxu1  ;;  %v6926_v50 = vadd.f32 %v6925_v45, %v6924_v40  ;;  %v1331_v1 = vadd.f32 %v10832_v48, %v1163_v15  ;;  %v14326_v20 = vand.u32 4294901760, %v14311_v5  ;;  %v14334_v40 = vld [vmem:[#allocation13_spill] sm:$0xff]  ;;  %v14338_v15 = vld [vmem:[#allocation84_spill] sm:$0xff] }
 0x16c   : > { %7500 = vmatpush3.msra.mxu0 %v14323_v49  ;;  %3596 = vmatprep.mubr.f32.mxu0 %v10748_v18  ;;  %v6982_v60 = vadd.f32 %v6981_v51, %v6980_v56  ;;  %v872_v55 = vadd.f32 %v14334_v40, %v14333_v25  ;;  %v14335_v56 = vand.u32 4294901760, %v10683_v16  ;;  %v14339_v49 = vand.u32 4294901760, %v10713_v46  ;;  %v14340_v45 = vld [vmem:[#allocation61_spill] sm:$0xff]  ;;  %v14348_v46 = vld [vmem:[#allocation38_spill] sm:$0xff] }
 0x16d   : > { %3768 = vmatprep.mubr.f32.mxu1 %v14324_v34  ;;  %7501 = vmatprep.subr.mxu0 %v14325_v11  ;;  %v1715_v12 = vadd.f32 %v6926_v50, %v10902_v26  ;;  %v1467_v5 = vadd.f32 %v14330_v28, %v1331_v1  ;;  %v14332_v26 = vld [vmem:[#allocation83_spill] sm:$0xff]  ;;  %v14341_v34 = vld [vmem:[#allocation29_spill] sm:$0xff]  ;;  %v14350_v28 = vld [vmem:[#allocation24_spill] sm:$0xff]  ;;  %v14352_v25 = vand.u32 4294901760, %v10748_v18 }
 0x16e   : > { %7561 = vmatprep.subr.mxu1 %v10095_v29  ;;  %3599 = vmatmul.mubr.f32.gmra.mxu0 %v10768_v44  ;;  %v11088_v24 = vadd.f32 %v6982_v60, %v1685_v43  ;;  %v6927_v52 = vpop.f32.mrf.mxu0  ;;  %v6983_v36 = vpop.f32.mrf.mxu1  ;;  %v14328_v29 = vld [vmem:[#allocation34_spill] sm:$0xff]  ;;  %v1026_v51 = vadd.f32 %v14340_v45, %v872_v55  ;;  %v14342_v50 = vand.u32 4294901760, %v14341_v34  ;;  %v14343_v60 = vld [vmem:[#allocation33_spill] sm:$0xff]  ;;  %v14358_v45 = vand.u32 4294901760, %v10768_v44 }
 0x16f   : > { %3772 = vmatmul.mubr.f32.gmra.mxu1 %v14326_v20  ;;  %7502 = vmatpush3.msra.mxu0 %v14327_v14  ;;  %v14329_v48 = vand.u32 4294901760, %v14328_v29  ;;  %v14344_v20 = vld [vmem:[#allocation35_spill] sm:$0xff] }
 0x170   : > { %7562 = vmatpush3.msra.mxu1 %v10103_v22  ;;  %v6928_v6 = vpop.f32.mrf.mxu0  ;;  %3605 = vmatprep.mubr.f32.mxu0 %v14332_v26  ;;  %v6984_v43 = vpop.f32.mrf.mxu1  ;;  %v14336_v22 = vld [vmem:[#allocation28_spill] sm:$0xff]  ;;  %v14345_v14 = vand.u32 4294901760, %v14344_v20 }
 0x171   : > { %7563 = vmatprep.subr.mxu1 %v10105_v54  ;;  %7503 = vmatprep.subr.mxu0 %v14329_v48  ;;  %v14337_v10 = vand.u32 4294901760, %v14336_v22  ;;  %v1700_v54 = vadd.f32 %v6923_v57, %v1467_v5  ;;  %v6985_v53 = vadd.f32 %v6984_v43, %v6983_v36  ;;  %v14346_v57 = vld [vmem:[#allocation21_spill] sm:$0xff]  ;;  %v14347_v36 = vld [vmem:[#allocation80_spill] sm:$0xff]  ;;  %v14349_v48 = vand.u32 4294901760, %v14348_v46 }
 0x172   : > { %7564 = vmatpush3.msra.mxu1 %v14331_v7  ;;  %3779 = vmatprep.mubr.f32.mxu1 %v14335_v56  ;;  %v1179_v29 = vadd.f32 %v14347_v36, %v1026_v51  ;;  %v14351_v43 = vld [vmem:[#allocation88_spill] sm:$0xff]  ;;  %v14353_v56 = vld [vmem:[#allocation95_spill] sm:$0xff]  ;;  %v6929_v51 = vadd.f32 %v6928_v6, %v6927_v52  ;;  %v14364_v52 = vld [vmem:[#allocation10_spill] sm:$0xff] }
 0x173   : > { %7504 = vmatpush3.msra.mxu0 %v14337_v10  ;;  %3783 = vmatmul.mubr.f32.gmra.mxu1 %v14339_v49  ;;  %v11112_v1 = vadd.f32 %v6985_v53, %v1700_v54  ;;  %v6930_v16 = vpop.f32.mrf.mxu0  ;;  %v14354_v10 = vld [vmem:[#allocation44_spill] sm:$0xff]  ;;  %v14356_v53 = vld [vmem:[#allocation30_spill] sm:$0xff]  ;;  %v14363_v36 = vld [vmem:[#allocation43_spill] sm:$0xff]  ;;  %v14365_v6 = vand.u32 4294901760, %v14364_v52 }
 0x174   : > { %3608 = vmatmul.mubr.f32.gmra.mxu0 %v14338_v15  ;;  %7505 = vmatprep.subr.mxu0 %v14342_v50  ;;  %v6986_v11 = vpop.f32.mrf.mxu1  ;;  %v1343_v22 = vadd.f32 %v14353_v56, %v1179_v29  ;;  %v14355_v54 = vand.u32 4294901760, %v14354_v10  ;;  %v14357_v49 = vld [vmem:[#allocation90_spill] sm:$0xff]  ;;  %v14367_v29 = vld [vmem:[#allocation49_spill] sm:$0xff]  ;;  %v14374_v56 = vand.u32 4294901760, %v14338_v15 }
 0x175   : > { %7565 = vmatprep.subr.mxu1 %v14343_v60  ;;  %7506 = vmatpush3.msra.mxu0 %v14345_v14  ;;  %v6931_v5 = vpop.f32.mrf.mxu0  ;;  %v14359_v60 = vand.u32 4294901760, %v14256_v39  ;;  %v14362_v14 = vld [vmem:[#allocation54_spill] sm:$0xff] }
 0x176   : > { %7566 = vmatpush3.msra.mxu1 %v14346_v57  ;;  %7507 = vmatprep.subr.mxu0 %v14349_v48  ;;  %v6987_v7 = vpop.f32.mrf.mxu1  ;;  %v6932_v40 = vadd.f32 %v6931_v5, %v6930_v16  ;;  %v1479_v57 = vadd.f32 %v14362_v14, %v1343_v22  ;;  %v14368_v39 = vld [vmem:[#allocation66_spill] sm:$0xff]  ;;  %v14370_v48 = vand.u32 4294901760, %v14265_v37  ;;  %v14375_v22 = vand.u32 4294901760, %v14269_v8  ;;  %v14381_v8 = vld [vmem:[#allocation97_spill] sm:$0xff] }
 0x177   : > { %7567 = vmatprep.subr.mxu1 %v14350_v28  ;;  %3614 = vmatprep.mubr.f32.mxu0 %v14351_v43  ;;  %v6988_v55 = vadd.f32 %v6987_v7, %v6986_v11  ;;  %v14360_v11 = vld [vmem:[#allocation7_spill] sm:$0xff]  ;;  %v884_v46 = vadd.f32 %v14368_v39, %v14367_v29  ;;  %v14371_v7 = vld [vmem:[#allocation46_spill] sm:$0xff]  ;;  %v14376_v37 = vand.u32 4294901760, %v14273_v41  ;;  %v14388_v29 = vand.u32 4294901760, %v14357_v49  ;;  %v468_v39 = vld [vmem:[%s13262_s2 + $0x2f8] sm:$0xff] }
 0x178   : > { %3790 = vmatprep.mubr.f32.mxu1 %v14352_v25  ;;  %7508 = vmatpush3.msra.mxu0 %v14355_v54  ;;  %v1745_v34 = vadd.f32 %v6932_v40, %v10939_v30  ;;  %v14361_v20 = vand.u32 4294901760, %v14360_v11  ;;  %v14366_v30 = vld [vmem:[#allocation92_spill] sm:$0xff]  ;;  %v1730_v28 = vadd.f32 %v6929_v51, %v1479_v57  ;;  %v14372_v25 = vld [vmem:[#allocation93_spill] sm:$0xff]  ;;  %v14373_v40 = vld [vmem:[#allocation79_spill] sm:$0xff] }
 0x179   : > { %7568 = vmatpush3.msra.mxu1 %v14356_v53  ;;  %3617 = vmatmul.mubr.f32.gmra.mxu0 %v14357_v49  ;;  %v11132_v50 = vadd.f32 %v6988_v55, %v1715_v12  ;;  %v6933_v18 = vpop.f32.mrf.mxu0  ;;  %v6989_v16 = vpop.f32.mrf.mxu1  ;;  %v1040_v55 = vadd.f32 %v14373_v40, %v884_v46  ;;  %v14377_v53 = vld [vmem:[#allocation86_spill] sm:$0xff]  ;;  %v467_v46 = vld [vmem:[%s13262_s2 + $0x2f0] sm:$0xff]  ;;  %v14392_v40 = vld [vmem:[#allocation17_spill] sm:$0xff] }
 0x17a   : > { %3794 = vmatmul.mubr.f32.gmra.mxu1 %v14358_v45  ;;  %7509 = vmatprep.subr.mxu0 %v14359_v60  ;;  %v14378_v51 = vld [vmem:[#allocation26_spill] sm:$0xff] }
 0x17b   : > { %7569 = vmatprep.subr.mxu1 %v14257_v27  ;;  %7510 = vmatpush3.msra.mxu0 %v14361_v20  ;;  %v6934_v44 = vpop.f32.mrf.mxu0  ;;  %v6990_v12 = vpop.f32.mrf.mxu1  ;;  %v14369_v27 = vand.u32 4294901760, %v14332_v26  ;;  %v1195_v45 = vadd.f32 %v14377_v53, %v1040_v55  ;;  %v14379_v60 = vand.u32 4294901760, %v14378_v51  ;;  %v14382_v20 = vand.u32 4294901760, %v14351_v43  ;;  %v14384_v41 = vld [vmem:[#allocation62_spill] sm:$0xff]  ;;  %v452_v43 = vld [vmem:[%s13262_s2 + $0x278] sm:$0xff]  ;;  %v451_v55 = vld [vmem:[%s13262_s2 + $0x270] sm:$0xff] }
 0x17c   : > { %7570 = vmatpush3.msra.mxu1 %v14363_v36  ;;  %7511 = vmatprep.subr.mxu0 %v14365_v6  ;;  %v6991_v5 = vadd.f32 %v6990_v12, %v6989_v16  ;;  %v14380_v16 = vld [vmem:[#allocation9_spill] sm:$0xff]  ;;  %v14385_v52 = vand.u32 4294901760, %v14384_v41  ;;  %v14386_v6 = vld [vmem:[#allocation55_spill] sm:$0xff]  ;;  %v14398_v53 = vld [vmem:[#allocation102_spill] sm:$0xff]  ;;  %v11203_v51 = vand.u32 4294901760, %v452_v43 }
 0x17d   : > { %3623 = vmatprep.mubr.f32.mxu0 %v14366_v30  ;;  %3801 = vmatprep.mubr.f32.mxu1 %v14369_v27  ;;  %v14387_v12 = vld [vmem:[#allocation99_spill] sm:$0xff]  ;;  %v6935_v27 = vadd.f32 %v6934_v44, %v6933_v18  ;;  %v14395_v18 = vld [vmem:[#allocation2_spill] sm:$0xff] }
 0x17e   : > { %7512 = vmatpush3.msra.mxu0 %v14370_v48  ;;  %7571 = vmatprep.subr.mxu1 %v14371_v7  ;;  %v11157_v10 = vadd.f32 %v6991_v5, %v1730_v28  ;;  %v6992_v54 = vpop.f32.mrf.mxu1  ;;  %v14389_v48 = vld [vmem:[#allocation105_spill] sm:$0xff]  ;;  %v14390_v7 = vld [vmem:[#allocation31_spill] sm:$0xff]  ;;  %14399 = vst [vmem:[#allocation60_spill] sm:$0xff] %v11203_v51 }
 0x17f   : > { %3626 = vmatmul.mubr.f32.gmra.mxu0 %v14372_v25  ;;  %3805 = vmatmul.mubr.f32.gmra.mxu1 %v14374_v56  ;;  %v6936_v26 = vpop.f32.mrf.mxu0  ;;  %v14391_v49 = vand.u32 4294901760, %v14390_v7  ;;  %v466_v41 = vld [vmem:[%s13262_s2 + $0x2e8] sm:$0xff] }
 0x180   : > { %7513 = vmatprep.subr.mxu0 %v14375_v22  ;;  %7572 = vmatpush3.msra.mxu1 %v14272_v2  ;;  %v6993_v11 = vpop.f32.mrf.mxu1  ;;  %v14383_v2 = vld [vmem:[#allocation42_spill] sm:$0xff] }
 0x181   : > { %7514 = vmatpush3.msra.mxu0 %v14376_v37  ;;  %7573 = vmatprep.subr.mxu1 %v14380_v16  ;;  %v6937_v15 = vpop.f32.mrf.mxu0  ;;  %v6994_v57 = vadd.f32 %v6993_v11, %v6992_v54  ;;  %v1355_v36 = vadd.f32 %v14383_v2, %v1195_v45  ;;  %v14393_v54 = vld [vmem:[#allocation63_spill] sm:$0xff]  ;;  %v11201_v45 = vand.u32 4294901760, %v468_v39  ;;  %v14402_v11 = vand.u32 4294901760, %v14289_v63 }
 0x182   : > { %7515 = vmatprep.subr.mxu0 %v14379_v60  ;;  %3632 = vmatprep.mubr.f32.mxu0 %v14381_v8  ;;  %v6938_v14 = vadd.f32 %v6937_v15, %v6936_v26  ;;  %v14394_v37 = vand.u32 4294901760, %v14393_v54  ;;  %v11205_v60 = vand.u32 4294901760, %v467_v46  ;;  %v14406_v63 = vand.u32 4294901760, %v14292_v19 }
 0x183   : > { %3812 = vmatprep.mubr.f32.mxu1 %v14382_v20  ;;  %7516 = vmatpush3.msra.mxu0 %v14385_v52  ;;  %v11186_v5 = vadd.f32 %v6994_v57, %v1745_v34  ;;  %v1491_v26 = vadd.f32 %v11013_v33, %v1355_v36  ;;  %v14396_v34 = vld [vmem:[#allocation37_spill] sm:$0xff]  ;;  %v14401_v33 = vand.u32 4294901760, %v14366_v30  ;;  %v11211_v20 = vand.u32 4294901760, %v451_v55  ;;  %v14404_v36 = vld [vmem:[#allocation103_spill] sm:$0xff] }
 0x184   : > { %7574 = vmatpush3.msra.mxu1 %v14386_v6  ;;  %3635 = vmatmul.mubr.f32.gmra.mxu0 %v14387_v12  ;;  %v1775_v28 = vadd.f32 %v6938_v14, %v14389_v48  ;;  %v7033_v22 = vpop.f32.mrf.mxu0  ;;  %v14397_v44 = vand.u32 4294901760, %v14396_v34  ;;  %14400 = vst [vmem:[#allocation19_spill] sm:$0xff] %v11205_v60  ;;  %v14405_v30 = vand.u32 4294901760, %v14372_v25  ;;  %v14407_v48 = vld [vmem:[#allocation59_spill] sm:$0xff]  ;;  %v11235_v25 = vsub.f32 %v468_v39, %v11201_v45 }
 0x185   : > { %3816 = vmatmul.mubr.f32.gmra.mxu1 %v14388_v29  ;;  %7517 = vmatprep.subr.mxu0 %v14391_v49  ;;  %v6995_v56 = vpop.f32.mrf.mxu1  ;;  %14403 = vst [vmem:[#allocation27_spill] sm:$0xff] %v11211_v20  ;;  %v1760_v14 = vadd.f32 %v6935_v27, %v1491_v26  ;;  %v450_v29 = vld [vmem:[%s13262_s2 + $0x268] sm:$0xff]  ;;  %v14408_v7 = vand.u32 4294901760, %v14407_v48  ;;  %v11232_v49 = vsub.f32 %v452_v43, %v11203_v51  ;;  %v11249_v26 = vand.u32 4294901760, %v466_v41 }
 0x186   : > { %7575 = vmatprep.subr.mxu1 %v14392_v40  ;;  %7518 = vmatpush3.msra.mxu0 %v14394_v37  ;;  %v7034_v15 = vpop.f32.mrf.mxu0  ;;  %v11238_v19 = vsub.f32 %v467_v46, %v11205_v60  ;;  %v465_v40 = vld [vmem:[%s13262_s2 + $0x2e0] sm:$0xff]  ;;  %v11247_v43 = vsub.f32 %v451_v55, %v11211_v20  ;;  %v14413_v46 = vld [vmem:[#allocation25_spill] sm:$0xff] }
 0x187   : > { %7576 = vmatpush3.msra.mxu1 %v14395_v18  ;;  %7519 = vmatprep.subr.mxu0 %v14397_v44  ;;  %v6996_v16 = vpop.f32.mrf.mxu1  ;;  %v7035_v2 = vadd.f32 %v7034_v15, %v7033_v22  ;;  %14412 = vst [vmem:[#allocation3_spill] sm:$0xff] %v11249_v26  ;;  %v14414_v37 = vld [vmem:[#allocation18_spill] sm:$0xff]  ;;  %v11253_v18 = vand.u32 4294901760, %v450_v29  ;;  %v11259_v55 = vand.u32 4294901760, %v465_v40 }
 0x188   : > { %3641 = vmatprep.mubr.f32.mxu0 %v14398_v53  ;;  %3823 = vmatprep.mubr.f32.mxu1 %v14401_v33  ;;  %v6997_v57 = vadd.f32 %v6996_v16, %v6995_v56  ;;  %v7036_v6 = vpop.f32.mrf.mxu0  ;;  %14411 = vst [vmem:[#allocation48_spill] sm:$0xff] %v11247_v43  ;;  %v14417_v16 = vand.u32 4294901760, %v14297_v58  ;;  %v449_v15 = vld [vmem:[%s13262_s2 + $0x260] sm:$0xff]  ;;  %v13612_v58 = vand.u32 4294901760, %v11232_v49 }
 0x189   : > { %7520 = vmatpush3.msra.mxu0 %v14402_v11  ;;  %7577 = vmatprep.subr.mxu1 %v14291_v23  ;;  %v6998_v52 = vpop.f32.mrf.mxu1  ;;  %v2208_v23 = vadd.f32 %v7035_v2, %v11033_v3  ;;  %14415 = vst [vmem:[#allocation23_spill] sm:$0xff] %v11253_v18  ;;  %14418 = vst [vmem:[#allocation51_spill] sm:$0xff] %v11259_v55  ;;  %v13611_v2 = vand.u32 4294901760, %v11238_v19 }
 0x18a   : > { %3644 = vmatmul.mubr.f32.gmra.mxu0 %v14404_v36  ;;  %3827 = vmatmul.mubr.f32.gmra.mxu1 %v14405_v30  ;;  %v11225_v27 = vadd.f32 %v6997_v57, %v1760_v14  ;;  %v7037_v3 = vpop.f32.mrf.mxu0  ;;  %v14419_v14 = vld [vmem:[#allocation58_spill] sm:$0xff]  ;;  %v14420_v57 = vand.u32 4294901760, %v14387_v12  ;;  %v14421_v30 = vand.u32 4294901760, %v10658_v47  ;;  %v11281_v12 = vsub.f32 %v466_v41, %v11249_v26  ;;  %v14428_v41 = vld [vmem:[#allocation36_spill] sm:$0xff] }
 0x18b   : > { %7521 = vmatprep.subr.mxu0 %v14406_v63  ;;  %7578 = vmatpush3.msra.mxu1 %v14294_v42  ;;  %v6999_v56 = vpop.f32.mrf.mxu1  ;;  %v14409_v42 = vld [vmem:[#allocation71_spill] sm:$0xff]  ;;  %v7038_v54 = vadd.f32 %v7037_v3, %v7036_v6  ;;  %v448_v63 = vld [vmem:[%s13262_s2 + $0x258] sm:$0xff]  ;;  %v11290_v47 = vsub.f32 %v450_v29, %v11253_v18 }
 0x18c   : > { %7522 = vmatpush3.msra.mxu0 %v14408_v7  ;;  %7579 = vmatprep.subr.mxu1 %v14295_v32  ;;  %v14410_v22 = vand.u32 4294901760, %v14409_v42  ;;  %v7000_v39 = vadd.f32 %v6999_v56, %v6998_v52  ;;  %v7039_v34 = vpop.f32.mrf.mxu0  ;;  %v14416_v32 = vand.u32 4294901760, %v14381_v8  ;;  %v13613_v8 = vand.u32 4294901760, %v11235_v25  ;;  %v464_v52 = vld [vmem:[%s13262_s2 + $0x2d8] sm:$0xff]  ;;  %14422 = vst [vmem:[#allocation47_spill] sm:$0xff] %v11281_v12 }
 0x18d   : > { %7580 = vmatpush3.msra.mxu1 %v14413_v46  ;;  %3650 = vmatprep.mubr.f32.mxu0 %v14414_v37  ;;  %v7095_v44 = vpop.f32.mrf.mxu1  ;;  %v2217_v11 = vadd.f32 %v7038_v54, %v11046_v62  ;;  %v13608_v62 = vand.u32 4294901760, %v11247_v43  ;;  %v14423_v56 = vld [vmem:[#allocation65_spill] sm:$0xff]  ;;  %14425 = vst [vmem:[#allocation12_spill] sm:$0xff] %v11290_v47  ;;  %v14427_v42 = vand.u32 4294901760, %v10694_v17  ;;  %v14432_v17 = vand.u32 4294901760, %v10689_v9 }
 0x18e   : > { %7523 = vmatprep.subr.mxu0 %v14410_v22  ;;  %3834 = vmatprep.mubr.f32.mxu1 %v14416_v32  ;;  %v11264_v33 = vadd.f32 %v7000_v39, %v1775_v28  ;;  %v7040_v6 = vpop.f32.mrf.mxu0  ;;  %v14424_v3 = vand.u32 4294901760, %v14423_v56  ;;  %v11297_v22 = vand.u32 4294901760, %v464_v52  ;;  %v11300_v39 = vsub.f32 %v465_v40, %v11259_v55  ;;  %v14434_v32 = vld [vmem:[#allocation40_spill] sm:$0xff] }
 0x18f   : > { %7524 = vmatpush3.msra.mxu0 %v14417_v16  ;;  %3838 = vmatmul.mubr.f32.gmra.mxu1 %v14420_v57  ;;  %v7096_v28 = vpop.f32.mrf.mxu1  ;;  %v7041_v48 = vadd.f32 %v7040_v6, %v7039_v34  ;;  %v14431_v34 = vand.u32 4294901760, %v14398_v53  ;;  %v11316_v40 = vand.u32 4294901760, %v448_v63  ;;  %v11328_v9 = vsub.f32 %v11238_v19, %v13611_v2  ;;  %v463_v57 = vld [vmem:[%s13262_s2 + $0x2d0] sm:$0xff]  ;;  %v445_v2 = vld [vmem:[%s13262_s2 + $0x240] sm:$0xff] }
 0x190   : > { %3653 = vmatmul.mubr.f32.gmra.mxu0 %v14419_v14  ;;  %7525 = vmatprep.subr.mxu0 %v14421_v30  ;;  %v7097_v7 = vadd.f32 %v7096_v28, %v7095_v44  ;;  %14429 = vst [vmem:[#allocation4_spill] sm:$0xff] %v11297_v22  ;;  %14430 = vst [vmem:[#allocation16_spill] sm:$0xff] %v11300_v39  ;;  %v11314_v44 = vsub.f32 %v11235_v25, %v13613_v8  ;;  %v13609_v16 = vand.u32 4294901760, %v11281_v12 }
 0x191   : > { %7581 = vmatprep.subr.mxu1 %v14300_v31  ;;  %7526 = vmatpush3.msra.mxu0 %v14424_v3  ;;  %v11292_v31 = vand.u32 4294901760, %v449_v15  ;;  %v11303_v54 = vadd.f32 %v7041_v48, %v11064_v35  ;;  %14433 = vst [vmem:[#allocation22_spill] sm:$0xff] %v11316_v40  ;;  %v14435_v35 = vld [vmem:[#allocation50_spill] sm:$0xff]  ;;  %v11333_v53 = vsub.f32 %v11247_v43, %v13608_v62  ;;  %v14436_v30 = vand.u32 4294901760, %v14404_v36  ;;  %v14437_v48 = vld [vmem:[#allocation56_spill] sm:$0xff]  ;;  %v14468_v43 = vld [vmem:[#allocation67_spill] sm:$0xff] }
 0x192   : > { %7582 = vmatpush3.msra.mxu1 %v14301_v13  ;;  %7527 = vmatprep.subr.mxu0 %v14427_v42  ;;  %v11305_v46 = vadd.f32 %v7097_v7, %v2208_v23  ;;  %v7042_v13 = vpop.f32.mrf.mxu0  ;;  %v7098_v29 = vpop.f32.mrf.mxu1  ;;  %v11323_v23 = vsub.f32 %v11232_v49, %v13612_v58  ;;  %v13610_v7 = vand.u32 4294901760, %v11290_v47  ;;  %v447_v3 = vld [vmem:[%s13262_s2 + $0x250] sm:$0xff]  ;;  %v13614_v36 = vand.u32 4294901760, %v11300_v39  ;;  %v14447_v62 = vld [vmem:[#allocation74_spill] sm:$0xff]  ;;  %v444_v58 = vld [vmem:[%s13262_s2 + $0x238] sm:$0xff] }
 0x193   : > { %14426 = vst [vmem:[#allocation8_spill] sm:$0xff] %v11292_v31  ;;  %7583 = vmatprep.subr.mxu1 %v14428_v41  ;;  %3845 = vmatprep.mubr.f32.mxu1 %v14431_v34  ;;  %v11344_v56 = vsub.f32 %v449_v15, %v11292_v31  ;;  %v14439_v34 = vand.u32 4294901760, %v14414_v37  ;;  %v14441_v15 = vld [vmem:[#allocation68_spill] sm:$0xff] }
 0x194   : > { %7528 = vmatpush3.msra.mxu0 %v14432_v17  ;;  %4026 = vmatprep.mubr.f32.mxu0 %v14434_v32  ;;  %v7043_v6 = vpop.f32.mrf.mxu0  ;;  %v7099_v28 = vpop.f32.mrf.mxu1  ;;  %v11354_v17 = vsub.f32 %v464_v52, %v11297_v22  ;;  %v4515_v52 = vand.u32 4294901760, %v11323_v23  ;;  %v11388_v23 = vsub.f32 %v11281_v12, %v13609_v16  ;;  %v11404_v16 = vsub.f32 %v11300_v39, %v13614_v36  ;;  %v459_v39 = vld [vmem:[%s13262_s2 + $0x2b0] sm:$0xff] }
 0x195   : > { %7584 = vmatpush3.msra.mxu1 %v14435_v35  ;;  %4028 = vmatmul.mubr.f32.vlgmr.msra.gmra.mxu0 %v14437_v48  ;;  %14438 = vst [vmem:[#allocation6_spill] sm:$0xff] %v11344_v56  ;;  %v7044_v42 = vadd.f32 %v7043_v6, %v7042_v13  ;;  %v7100_v41 = vadd.f32 %v7099_v28, %v7098_v29  ;;  %v11373_v6 = vand.u32 4294901760, %v447_v3  ;;  %v14446_v28 = vld [vmem:[#allocation72_spill] sm:$0xff] }
 0x196   : > { %3849 = vmatmul.mubr.f32.gmra.mxu1 %v14436_v30  ;;  %7585 = vmatprep.subr.mxu1 %v14308_v38  ;;  %14440 = vst [vmem:[#allocation15_spill] sm:$0xff] %v11354_v17  ;;  %v11359_v35 = vsub.f32 %v448_v63, %v11316_v40  ;;  %v11361_v30 = vand.u32 4294901760, %v463_v57  ;;  %v7101_v29 = vpop.f32.mrf.mxu1 }
 0x197   : > { %3856 = vmatprep.mubr.f32.mxu1 %v14439_v34  ;;  %7586 = vmatpush3.msra.mxu1 %v14309_v59  ;;  %v11364_v13 = vadd.f32 %v7044_v42, %v11088_v24  ;;  %v11366_v38 = vadd.f32 %v7100_v41, %v2217_v11  ;;  %v7045_v37 = vpop.f32.mrf.mxu0  ;;  %v4627_v59 = vand.u32 4294901760, %v11314_v44  ;;  %14444 = vst [vmem:[#allocation53_spill] sm:$0xff] %v11373_v6  ;;  %v462_v24 = vld [vmem:[%s13262_s2 + $0x2c8] sm:$0xff]  ;;  %v460_v41 = vld [vmem:[%s13262_s2 + $0x2b8] sm:$0xff] }
 0x198   : > { %4033 = vmatprep.mubr.f32.mxu0 %v14441_v15  ;;  %14442 = vst [vmem:[#allocation5_spill] sm:$0xff] %v11359_v35  ;;  %14443 = vst [vmem:[#allocation64_spill] sm:$0xff] %v11361_v30  ;;  %7587 = vmatprep.subr.mxu1 %v10584_v61  ;;  %v446_v11 = vld [vmem:[%s13262_s2 + $0x248] sm:$0xff]  ;;  %v14445_v61 = vand.u32 4294901760, %v14419_v14  ;;  %v11393_v42 = vsub.f32 %v11290_v47, %v13610_v7  ;;  %v461_v14 = vld [vmem:[%s13262_s2 + $0x2c0] sm:$0xff]  ;;  %v11416_v36 = vand.u32 4294901760, %v462_v24 }
 0x199   : > { %7621 = vmatprep.subr.mxu0 %v11201_v45  ;;  %4035 = vmatmul.mubr.f32.gmra.mxu0 %v14446_v28  ;;  %v7046_v34 = vpop.f32.mrf.mxu0  ;;  %v11418_v63 = vand.u32 4294901760, %v446_v11  ;;  %v11421_v7 = vsub.f32 %v463_v57, %v11361_v30  ;;  %v14453_v57 = vld [vmem:[#allocation77_spill] sm:$0xff] }
 0x19a   : > { %3860 = vmatmul.mubr.f32.gmra.mxu1 %v14445_v61  ;;  %v7102_v61 = vpop.f32.mrf.mxu1  ;;  %4040 = vmatprep.mubr.f32.mxu0 %v14447_v62  ;;  %v7047_v8 = vadd.f32 %v7046_v34, %v7045_v37  ;;  %14448 = vst [vmem:[#allocation69_spill] sm:$0xff] %v11416_v36  ;;  %v4641_v34 = vand.u32 4294901760, %v11388_v23 }
 0x19b   : > { %7588 = vmatpush3.msra.mxu1 %v14312_v21  ;;  %v7103_v44 = vadd.f32 %v7102_v61, %v7101_v29  ;;  %4193 = vmatprep.mubr.f32.mxu1 %v14434_v32  ;;  %14449 = vst [vmem:[#allocation57_spill] sm:$0xff] %v11418_v63  ;;  %14450 = vst [vmem:[#allocation52_spill] sm:$0xff] %v11421_v7  ;;  %v11431_v32 = vand.u32 4294901760, %v461_v14  ;;  %v11449_v21 = vand.u32 4294901760, %v444_v58 }
 0x19c   : > { %7589 = vmatprep.subr.mxu1 %v14315_v4  ;;  %7622 = vmatpush3.msra.mxu0 %v11203_v51  ;;  %v11429_v4 = vsub.f32 %v447_v3, %v11373_v6  ;;  %v11434_v37 = vadd.f32 %v7047_v8, %v11112_v1  ;;  %v11447_v3 = vand.u32 4294901760, %v445_v2  ;;  %v7048_v1 = vpop.f32.mrf.mxu0 }
 0x19d   : > { %7590 = vmatpush3.msra.mxu1 %v14317_v0  ;;  %14452 = vst [vmem:[#allocation70_spill] sm:$0xff] %v11431_v32  ;;  %v11437_v29 = vadd.f32 %v7103_v44, %v11303_v54  ;;  %4042 = vmatmul.mubr.f32.gmra.mxu0 %v14453_v57  ;;  %v14454_v0 = vand.u32 4294901760, %v11344_v56  ;;  %14456 = vst [vmem:[#allocation39_spill] sm:$0xff] %v11449_v21  ;;  %v7104_v8 = vpop.f32.mrf.mxu1  ;;  %v4529_v54 = vand.u32 4294901760, %v11393_v42  ;;  %v14457_v44 = vand.u32 4294901760, %v11354_v17 }
 0x19e   : > { %14451 = vst [vmem:[#allocation76_spill] sm:$0xff] %v11429_v4  ;;  %4195 = vmatmul.mubr.f32.vlgmr.msra.gmra.mxu1 %v14437_v48  ;;  %14455 = vst [vmem:[#allocation20_spill] sm:$0xff] %v11447_v3  ;;  %7683 = vmatprep.subr.mxu1 %v4627_v59  ;;  %v14459_v59 = vand.u32 4294901760, %v11359_v35  ;;  %v11471_v48 = vsub.f32 %v446_v11, %v11418_v63  ;;  %v11484_v11 = vsub.f32 %v461_v14, %v11431_v32 }
 0x19f   : > { %v11445_v61 = vsub.f32 %v11344_v56, %v14454_v0  ;;  %7623 = vmatprep.subr.mxu0 %v11205_v60  ;;  %v11457_v23 = vsub.f32 %v11354_v17, %v14457_v44  ;;  %v11459_v0 = vand.u32 4294901760, %v460_v41  ;;  %v443_v56 = vld [vmem:[%s13262_s2 + $0x230] sm:$0xff]  ;;  %7684 = vmatpush3.msra.mxu1 %v4515_v52  ;;  %v11475_v17 = vsub.f32 %v462_v24, %v11416_v36  ;;  %v7049_v52 = vpop.f32.mrf.mxu0  ;;  %v7105_v47 = vpop.f32.mrf.mxu1  ;;  %v442_v24 = vld [vmem:[%s13262_s2 + $0x228] sm:$0xff] }
 0x1a0   : > { %7624 = vmatpush3.msra.mxu0 %v11211_v20  ;;  %v11468_v42 = vsub.f32 %v11359_v35, %v14459_v59  ;;  %14460 = vst [vmem:[#allocation11_spill] sm:$0xff] %v11471_v48  ;;  %v14462_v20 = vld [vmem:[#allocation78_spill] sm:$0xff]  ;;  %4200 = vmatprep.mubr.f32.mxu1 %v14441_v15  ;;  %14463 = vst [vmem:[#allocation75_spill] sm:$0xff] %v11484_v11  ;;  %v7050_v44 = vadd.f32 %v7049_v52, %v7048_v1  ;;  %v14464_v60 = vand.u32 4294901760, %v11328_v9 }
 0x1a1   : > { %14458 = vst [vmem:[#allocation73_spill] sm:$0xff] %v11459_v0  ;;  %14461 = vst [vmem:[#allocation45_spill] sm:$0xff] %v11475_v17  ;;  %4047 = vmatprep.mubr.f32.mxu0 %v14462_v20  ;;  %v7106_v35 = vadd.f32 %v7105_v47, %v7104_v8  ;;  %7625 = vmatprep.subr.mxu0 %v11249_v26  ;;  %v4536_v12 = vand.u32 4294901760, %v11445_v61  ;;  %v11494_v15 = vsub.f32 %v445_v2, %v11447_v3  ;;  %v14514_v26 = vld [vmem:[#allocation94_spill] sm:$0xff] }
 0x1a2   : > { %7685 = vmatprep.subr.mxu1 %v14464_v60  ;;  %v11497_v59 = vsub.f32 %v444_v58, %v11449_v21  ;;  %v11499_v14 = vand.u32 4294901760, %v443_v56  ;;  %4049 = vmatmul.mubr.f32.gmra.mxu0 %v14468_v43  ;;  %v11503_v47 = vand.u32 4294901760, %v459_v39  ;;  %v458_v60 = vld [vmem:[%s13262_s2 + $0x2a8] sm:$0xff]  ;;  %v11509_v9 = vsub.f32 %v460_v41, %v11459_v0  ;;  %v7051_v61 = vpop.f32.mrf.mxu0  ;;  %v14475_v41 = vld [vmem:[#allocation81_spill] sm:$0xff] }
 0x1a3   : > { %14465 = vst [vmem:[#allocation34_spill] sm:$0xff] %v11494_v15  ;;  %4202 = vmatmul.mubr.f32.gmra.mxu1 %v14446_v28  ;;  %v11512_v2 = vadd.f32 %v7050_v44, %v11132_v50  ;;  %v11515_v58 = vadd.f32 %v7106_v35, %v11364_v13  ;;  %7626 = vmatpush3.msra.mxu0 %v11253_v18  ;;  %v14471_v28 = vand.u32 4294901760, %v11333_v53  ;;  %v4655_v1 = vand.u32 4294901760, %v11457_v23  ;;  %v7107_v44 = vpop.f32.mrf.mxu1  ;;  %v14479_v18 = vld [vmem:[#allocation82_spill] sm:$0xff] }
 0x1a4   : > { %14466 = vst [vmem:[#allocation100_spill] sm:$0xff] %v11497_v59  ;;  %14467 = vst [vmem:[#allocation14_spill] sm:$0xff] %v11499_v14  ;;  %v14472_v8 = vand.u32 4294901760, %v11421_v7  ;;  %v11527_v50 = vand.u32 4294901760, %v442_v24  ;;  %7627 = vmatprep.subr.mxu0 %v11259_v55  ;;  %v4543_v35 = vand.u32 4294901760, %v11468_v42  ;;  %v14474_v53 = vand.u32 4294901760, %v11429_v4  ;;  %4054 = vmatprep.mubr.f32.mxu0 %v14475_v41 }
 0x1a5   : > { %14469 = vst [vmem:[#allocation83_spill] sm:$0xff] %v11503_v47  ;;  %14470 = vst [vmem:[#allocation32_spill] sm:$0xff] %v11509_v9  ;;  %7686 = vmatpush3.msra.mxu1 %v14471_v28  ;;  %v11543_v55 = vand.u32 4294901760, %v458_v60  ;;  %v457_v42 = vld [vmem:[%s13262_s2 + $0x2a0] sm:$0xff]  ;;  %4207 = vmatprep.mubr.f32.mxu1 %v14447_v62 }
 0x1a6   : > { %v11524_v52 = vsub.f32 %v11421_v7, %v14472_v8  ;;  %14473 = vst [vmem:[#allocation13_spill] sm:$0xff] %v11527_v50  ;;  %7687 = vmatprep.subr.mxu1 %v4641_v34  ;;  %v11534_v13 = vsub.f32 %v11429_v4, %v14474_v53  ;;  %v7052_v8 = vpop.f32.mrf.mxu0  ;;  %v11540_v7 = vsub.f32 %v443_v56, %v11499_v14  ;;  %v7108_v4 = vpop.f32.mrf.mxu1  ;;  %v441_v56 = vld [vmem:[%s13262_s2 + $0x220] sm:$0xff] }
 0x1a7   : > { %7688 = vmatpush3.msra.mxu1 %v4529_v54  ;;  %14477 = vst [vmem:[#allocation84_spill] sm:$0xff] %v11543_v55  ;;  %v7053_v53 = vadd.f32 %v7052_v8, %v7051_v61  ;;  %7628 = vmatpush3.msra.mxu0 %v11292_v31  ;;  %v11556_v34 = vsub.f32 %v459_v39, %v11503_v47  ;;  %v14480_v61 = vand.u32 4294901760, %v11475_v17  ;;  %v14482_v39 = vand.u32 4294901760, %v11404_v16 }
 0x1a8   : > { %14476 = vst [vmem:[#allocation28_spill] sm:$0xff] %v11540_v7  ;;  %v7109_v23 = vadd.f32 %v7108_v4, %v7107_v44  ;;  %4056 = vmatmul.mubr.f32.gmra.mxu0 %v14479_v18  ;;  %4209 = vmatmul.mubr.f32.gmra.mxu1 %v14453_v57  ;;  %v4662_v62 = vand.u32 4294901760, %v11524_v52  ;;  %v11567_v28 = vsub.f32 %v442_v24, %v11527_v50  ;;  %v4550_v4 = vand.u32 4294901760, %v11534_v13  ;;  %v440_v24 = vld [vmem:[%s13262_s2 + $0x218] sm:$0xff] }
 0x1a9   : > { %14478 = vst [vmem:[#allocation61_spill] sm:$0xff] %v11556_v34  ;;  %v11564_v8 = vsub.f32 %v11475_v17, %v14480_v61  ;;  %v11570_v54 = vadd.f32 %v7053_v53, %v11157_v10  ;;  %7629 = vmatprep.subr.mxu0 %v11297_v22  ;;  %7689 = vmatprep.subr.mxu1 %v14482_v39  ;;  %v14483_v57 = vand.u32 4294901760, %v11471_v48  ;;  %v11581_v44 = vand.u32 4294901760, %v457_v42  ;;  %v7054_v53 = vpop.f32.mrf.mxu0  ;;  %v7110_v61 = vpop.f32.mrf.mxu1  ;;  %v14491_v22 = vld [vmem:[#allocation85_spill] sm:$0xff] }
 0x1aa   : > { %14481 = vst [vmem:[#allocation29_spill] sm:$0xff] %v11567_v28  ;;  %v11587_v10 = vadd.f32 %v7109_v23, %v11434_v37  ;;  %7630 = vmatpush3.msra.mxu0 %v11316_v40  ;;  %7690 = vmatpush3.msra.mxu1 %v4536_v12  ;;  %v14485_v16 = vand.u32 4294901760, %v11484_v11  ;;  %v14486_v39 = vand.u32 4294901760, %v11494_v15  ;;  %v456_v37 = vld [vmem:[%s13262_s2 + $0x298] sm:$0xff]  ;;  %v11606_v23 = vsub.f32 %v458_v60, %v11543_v55 }
 0x1ab   : > { %v11579_v52 = vsub.f32 %v11471_v48, %v14483_v57  ;;  %14484 = vst [vmem:[#allocation33_spill] sm:$0xff] %v11581_v44  ;;  %v11600_v48 = vand.u32 4294901760, %v441_v56  ;;  %7631 = vmatprep.subr.mxu0 %v11361_v30  ;;  %7691 = vmatprep.subr.mxu1 %v4655_v1  ;;  %v14489_v12 = vand.u32 4294901760, %v11509_v9  ;;  %v7055_v40 = vpop.f32.mrf.mxu0  ;;  %v7111_v60 = vpop.f32.mrf.mxu1  ;;  %v11623_v1 = vand.u32 4294901760, %v440_v24 }
 0x1ac   : > { %v11593_v13 = vsub.f32 %v11484_v11, %v14485_v16  ;;  %v11598_v57 = vsub.f32 %v11494_v15, %v14486_v39  ;;  %14488 = vst [vmem:[#allocation21_spill] sm:$0xff] %v11606_v23  ;;  %v14490_v39 = vand.u32 4294901760, %v11497_v59  ;;  %4061 = vmatprep.mubr.f32.mxu0 %v14491_v22  ;;  %4214 = vmatprep.mubr.f32.mxu1 %v14462_v20  ;;  %v11629_v11 = vand.u32 4294901760, %v456_v37  ;;  %v14495_v20 = vld [vmem:[#allocation87_spill] sm:$0xff] }
 0x1ad   : > { %14487 = vst [vmem:[#allocation35_spill] sm:$0xff] %v11600_v48  ;;  %v11612_v16 = vsub.f32 %v11509_v9, %v14489_v12  ;;  %14492 = vst [vmem:[#allocation80_spill] sm:$0xff] %v11623_v1  ;;  %v7056_v9 = vadd.f32 %v7055_v40, %v7054_v53  ;;  %v7112_v30 = vadd.f32 %v7111_v60, %v7110_v61  ;;  %7632 = vmatpush3.msra.mxu0 %v11373_v6  ;;  %v7057_v53 = vpop.f32.mrf.mxu0 }
 0x1ae   : > { %v11617_v15 = vsub.f32 %v11497_v59, %v14490_v39  ;;  %7692 = vmatpush3.msra.mxu1 %v4543_v35  ;;  %v4669_v39 = vand.u32 4294901760, %v11564_v8  ;;  %v4557_v17 = vand.u32 4294901760, %v11579_v52  ;;  %14493 = vst [vmem:[#allocation38_spill] sm:$0xff] %v11629_v11  ;;  %v11632_v59 = vsub.f32 %v457_v42, %v11581_v44  ;;  %4063 = vmatmul.mubr.f32.gmra.mxu0 %v14495_v20  ;;  %v439_v35 = vld [vmem:[%s13262_s2 + $0x210] sm:$0xff]  ;;  %v308_v8 = vld [vmem:[%s9384_s15 + $0x28] sm:$0xff] }
 0x1af   : > { %4216 = vmatmul.mubr.f32.gmra.mxu1 %v14468_v43  ;;  %v11637_v12 = vsub.f32 %v441_v56, %v11600_v48  ;;  %v11645_v52 = vadd.f32 %v7056_v9, %v11186_v5  ;;  %v11648_v42 = vadd.f32 %v7112_v30, %v11512_v2  ;;  %7633 = vmatprep.subr.mxu0 %v11416_v36  ;;  %v4676_v43 = vand.u32 4294901760, %v11593_v13  ;;  %v7113_v5 = vpop.f32.mrf.mxu1  ;;  %v455_v13 = vld [vmem:[%s13262_s2 + $0x290] sm:$0xff]  ;;  %v7058_v56 = vpop.f32.mrf.mxu0  ;;  %v14502_v30 = vld [vmem:[#allocation89_spill] sm:$0xff]  ;;  %v11738_v36 = vld [vmem:[%s13262_s2 + $0x280] sm:$0xff] }
 0x1b0   : > { %14494 = vst [vmem:[#allocation24_spill] sm:$0xff] %v11632_v59  ;;  %7693 = vmatprep.subr.mxu1 %v4662_v62  ;;  %v14498_v60 = vand.u32 4294901760, %v11556_v34  ;;  %7634 = vmatpush3.msra.mxu0 %v11418_v63  ;;  %v14499_v9 = vand.u32 4294901760, %v11540_v7  ;;  %v11667_v62 = vsub.f32 %v440_v24, %v11623_v1  ;;  %v11685_v24 = vld [vmem:[%s13262_s2 + $0x288] sm:$0xff]  ;;  %v7059_v63 = vadd.f32 %v7058_v56, %v7057_v53 }
 0x1b1   : > { %14496 = vst [vmem:[#allocation88_spill] sm:$0xff] %v11637_v12  ;;  %14497 = vst [vmem:[#allocation95_spill] sm:$0xff] %v11648_v42  ;;  %7694 = vmatpush3.msra.mxu1 %v4550_v4  ;;  %v307_v4 = vld [vmem:[%s9384_s15 + $0x20] sm:$0xff]  ;;  %7635 = vmatprep.subr.mxu0 %v11431_v32  ;;  %v11699_v6 = vsub.f32 %v456_v37, %v11629_v11  ;;  %v11703_v56 = vand.u32 4294901760, %v455_v13 }
 0x1b2   : > { %v11657_v40 = vsub.f32 %v11556_v34, %v14498_v60  ;;  %v11664_v2 = vsub.f32 %v11540_v7, %v14499_v9  ;;  %14500 = vst [vmem:[#allocation44_spill] sm:$0xff] %v11667_v62  ;;  %v14501_v60 = vand.u32 4294901760, %v11567_v28  ;;  %4068 = vmatprep.mubr.f32.mxu0 %v14502_v30  ;;  %v11680_v9 = vand.u32 4294901760, %v439_v35  ;;  %4221 = vmatprep.mubr.f32.mxu1 %v14475_v41  ;;  %v14505_v7 = vld [vmem:[#allocation91_spill] sm:$0xff] }
 0x1b3   : > { %v11688_v34 = vand.u32 4294901760, %v308_v8  ;;  %7636 = vmatpush3.msra.mxu0 %v11447_v3  ;;  %7695 = vmatprep.subr.mxu1 %v4669_v39  ;;  %14506 = vst [vmem:[#allocation90_spill] sm:$0xff] %v11703_v56  ;;  %v438_v41 = vld [vmem:[%s13262_s2 + $0x208] sm:$0xff]  ;;  %v11708_v3 = vand.u32 4294901760, %v307_v4  ;;  %v14511_v39 = vand.u32 4294901760, %v11632_v59 }
 0x1b4   : > { %v11675_v61 = vsub.f32 %v11567_v28, %v14501_v60  ;;  %v7114_v60 = vpop.f32.mrf.mxu1  ;;  %v14504_v28 = vand.u32 4294901760, %v11606_v23  ;;  %4070 = vmatmul.mubr.f32.gmra.mxu0 %v14505_v7  ;;  %4223 = vmatmul.mubr.f32.gmra.mxu1 %v14479_v18  ;;  %v11728_v53 = vsub.f32 %v439_v35, %v11680_v9  ;;  %v322_v35 = vld [vmem:[%s9384_s15 + $0x98] sm:$0xff] }
 0x1b5   : > { %14503 = vst [vmem:[#allocation30_spill] sm:$0xff] %v11688_v34  ;;  %v7115_v31 = vadd.f32 %v7114_v60, %v7113_v5  ;;  %14507 = vst [vmem:[#allocation7_spill] sm:$0xff] %v11708_v3  ;;  %7637 = vmatprep.subr.mxu0 %v11459_v0  ;;  %v11718_v5 = vand.u32 4294901760, %v11685_v24  ;;  %v437_v60 = vld [vmem:[%s13262_s2 + $0x200] sm:$0xff]  ;;  %7696 = vmatpush3.msra.mxu1 %v4557_v17  ;;  %v11733_v37 = vsub.f32 %v11632_v59, %v14511_v39 }
 0x1b6   : > { %v11695_v32 = vsub.f32 %v11606_v23, %v14504_v28  ;;  %v11711_v28 = vadd.f32 %v7059_v63, %v11225_v27  ;;  %v7060_v63 = vpop.f32.mrf.mxu0  ;;  %v7116_v18 = vpop.f32.mrf.mxu1  ;;  %7638 = vmatpush3.msra.mxu0 %v11449_v21  ;;  %14510 = vst [vmem:[#allocation10_spill] sm:$0xff] %v11728_v53  ;;  %v314_v21 = vld [vmem:[%s9384_s15 + $0x58] sm:$0xff]  ;;  %7697 = vmatprep.subr.mxu1 %v4676_v43  ;;  %v11748_v39 = vand.u32 4294901760, %v438_v41  ;;  %v14513_v59 = vand.u32 4294901760, %v11637_v12 }
 0x1b7   : > { %14508 = vst [vmem:[#allocation54_spill] sm:$0xff] %v11718_v5  ;;  %v11724_v27 = vadd.f32 %v7115_v31, %v11570_v54  ;;  %v11741_v31 = vsub.f32 %v308_v8, %v11688_v34  ;;  %v315_v54 = vld [vmem:[%s9384_s15 + $0x60] sm:$0xff]  ;;  %7639 = vmatprep.subr.mxu0 %v11503_v47  ;;  %4075 = vmatprep.mubr.f32.mxu0 %v14514_v26  ;;  %v11758_v17 = vand.u32 4294901760, %v437_v60  ;;  %v11768_v8 = vand.u32 4294901760, %v11738_v36 }
 0x1b8   : > { %v11753_v0 = vsub.f32 %v11637_v12, %v14513_v59  ;;  %v7061_v23 = vpop.f32.mrf.mxu0  ;;  %4228 = vmatprep.mubr.f32.mxu1 %v14491_v22  ;;  %v11761_v43 = vsub.f32 %v307_v4, %v11708_v3  ;;  %7640 = vmatpush3.msra.mxu0 %v11499_v14  ;;  %v14517_v59 = vand.u32 4294901760, %v11598_v57  ;;  %v11771_v12 = vsub.f32 %v455_v13, %v11703_v56  ;;  %v14522_v4 = vld [vmem:[#allocation96_spill] sm:$0xff] }
 0x1b9   : > { %14509 = vst [vmem:[#allocation43_spill] sm:$0xff] %v11724_v27  ;;  %14512 = vst [vmem:[#allocation92_spill] sm:$0xff] %v11741_v31  ;;  %v7117_v27 = vpop.f32.mrf.mxu1  ;;  %v7062_v47 = vadd.f32 %v7061_v23, %v7060_v63  ;;  %v11773_v22 = vand.u32 4294901760, %v315_v54  ;;  %v11775_v51 = vand.u32 4294901760, %v314_v21  ;;  %4077 = vmatmul.mubr.f32.gmra.mxu0 %v14522_v4  ;;  %4230 = vmatmul.mubr.f32.gmra.mxu1 %v14495_v20  ;;  %v11799_v23 = vand.u32 4294901760, %v322_v35 }
 0x1ba   : > { %14515 = vst [vmem:[#allocation49_spill] sm:$0xff] %v11758_v17  ;;  %14516 = vst [vmem:[#allocation66_spill] sm:$0xff] %v11761_v43  ;;  %v7118_v42 = vadd.f32 %v7117_v27, %v7116_v18  ;;  %7698 = vmatpush3.msra.mxu1 %v14517_v59  ;;  %v14523_v27 = vand.u32 4294901760, %v11667_v62  ;;  %7641 = vmatprep.subr.mxu0 %v11543_v55  ;;  %v14524_v18 = vand.u32 4294901760, %v11612_v16  ;;  %v14527_v16 = vand.u32 4294901760, %v11699_v6  ;;  %v14529_v55 = vld [vmem:[#allocation98_spill] sm:$0xff] }
 0x1bb   : > { %14518 = vst [vmem:[#allocation46_spill] sm:$0xff] %v11768_v8  ;;  %14519 = vst [vmem:[#allocation93_spill] sm:$0xff] %v11771_v12  ;;  %v11786_v63 = vadd.f32 %v7062_v47, %v11264_v33  ;;  %v11796_v59 = vsub.f32 %v438_v41, %v11748_v39  ;;  %v7119_v33 = vpop.f32.mrf.mxu1  ;;  %v7157_v47 = vpop.f32.mrf.mxu0  ;;  %7642 = vmatpush3.msra.mxu0 %v11527_v50  ;;  %v11811_v41 = vsub.f32 %v437_v60, %v11758_v17 }
 0x1bc   : > { %14520 = vst [vmem:[#allocation79_spill] sm:$0xff] %v11773_v22  ;;  %14521 = vst [vmem:[#allocation86_spill] sm:$0xff] %v11775_v51  ;;  %v11783_v57 = vsub.f32 %v11667_v62, %v14523_v27  ;;  %v11789_v13 = vadd.f32 %v7118_v42, %v11645_v52  ;;  %7699 = vmatprep.subr.mxu1 %v14524_v18  ;;  %v14526_v52 = vand.u32 4294901760, %v11617_v15  ;;  %v321_v27 = vld [vmem:[%s9384_s15 + $0x90] sm:$0xff]  ;;  %7643 = vmatprep.subr.mxu0 %v11581_v44 }
 0x1bd   : > { %14525 = vst [vmem:[#allocation26_spill] sm:$0xff] %v11799_v23  ;;  %v11808_v18 = vsub.f32 %v11699_v6, %v14527_v16  ;;  %14528 = vst [vmem:[#allocation9_spill] sm:$0xff] %v11811_v41  ;;  %4082 = vmatprep.mubr.f32.mxu0 %v14529_v55  ;;  %v11823_v42 = vsub.f32 %v11685_v24, %v11718_v5  ;;  %v11826_v60 = vsub.f32 %v314_v21, %v11775_v51  ;;  %v7120_v16 = vpop.f32.mrf.mxu1  ;;  %v7158_v20 = vpop.f32.mrf.mxu0  ;;  %v14534_v21 = vld [vmem:[#allocation101_spill] sm:$0xff] }
 0x1be   : > { %7700 = vmatpush3.msra.mxu1 %v14526_v52  ;;  %v11819_v52 = vsub.f32 %v315_v54, %v11773_v22  ;;  %4235 = vmatprep.mubr.f32.mxu1 %v14502_v30  ;;  %v14532_v44 = vand.u32 4294901760, %v11741_v31  ;;  %v7121_v50 = vadd.f32 %v7120_v16, %v7119_v33  ;;  %v7159_v24 = vadd.f32 %v7158_v20, %v7157_v47  ;;  %v329_v20 = vld [vmem:[%s9384_s15 + $0xd0] sm:$0xff] }
 0x1bf   : > { %14531 = vst [vmem:[#allocation42_spill] sm:$0xff] %v11826_v60  ;;  %7644 = vmatpush3.msra.mxu0 %v11600_v48  ;;  %v14533_v62 = vand.u32 4294901760, %v11657_v40  ;;  %v14535_v14 = vand.u32 4294901760, %v11728_v53  ;;  %v11846_v48 = vsub.f32 %v11738_v36, %v11768_v8  ;;  %v11851_v54 = vand.u32 4294901760, %v321_v27  ;;  %v7122_v40 = vpop.f32.mrf.mxu1  ;;  %4237 = vmatmul.mubr.f32.gmra.mxu1 %v14505_v7 }
 0x1c0   : > { %14530 = vst [vmem:[#allocation97_spill] sm:$0xff] %v11819_v52  ;;  %v11833_v15 = vsub.f32 %v11741_v31, %v14532_v44  ;;  %4084 = vmatmul.mubr.f32.gmra.mxu0 %v14534_v21  ;;  %v11849_v44 = vsub.f32 %v322_v35, %v11799_v23  ;;  %7645 = vmatprep.subr.mxu0 %v11629_v11  ;;  %v14537_v33 = vand.u32 4294901760, %v11761_v43  ;;  %v14538_v16 = vand.u32 4294901760, %v11664_v2 }
 0x1c1   : > { %7701 = vmatprep.subr.mxu1 %v14533_v62  ;;  %v11842_v30 = vsub.f32 %v11728_v53, %v14535_v14  ;;  %14536 = vst [vmem:[#allocation62_spill] sm:$0xff] %v11851_v54  ;;  %v7160_v62 = vpop.f32.mrf.mxu0  ;;  %v4711_v14 = vand.u32 4294901760, %v11808_v18  ;;  %v11863_v35 = vadd.f32 %v7121_v50, %v11711_v28  ;;  %v2664_v47 = vadd.f32 %v7159_v24, %v11305_v46  ;;  %v328_v50 = vld [vmem:[%s9384_s15 + $0xc8] sm:$0xff]  ;;  %v7123_v28 = vpop.f32.mrf.mxu1 }
 0x1c2   : > { %v11860_v36 = vsub.f32 %v11761_v43, %v14537_v33  ;;  %7702 = vmatpush3.msra.mxu1 %v14538_v16  ;;  %7646 = vmatpush3.msra.mxu0 %v11623_v1  ;;  %v14539_v7 = vand.u32 4294901760, %v11771_v12  ;;  %v14540_v2 = vand.u32 4294901760, %v11695_v32  ;;  %v4363_v24 = vand.u32 4294901760, %v11833_v15  ;;  %v14543_v33 = vld [vmem:[#allocation104_spill] sm:$0xff] }
 0x1c3   : > { %v7161_v46 = vpop.f32.mrf.mxu0  ;;  %7647 = vmatprep.subr.mxu0 %v11703_v56  ;;  %v11882_v16 = vand.u32 4294901760, %v329_v20  ;;  %v14542_v18 = vand.u32 4294901760, %v11675_v61  ;;  %4089 = vmatprep.mubr.f32.mxu0 %v14543_v33  ;;  %v336_v56 = vld [vmem:[%s9384_s15 + $0x108] sm:$0xff]  ;;  %v7219_v53 = vpop.f32.mrf.mxu1  ;;  %v14548_v32 = vand.u32 4294901760, %v11826_v60 }
 0x1c4   : > { %v11872_v31 = vsub.f32 %v11771_v12, %v14539_v7  ;;  %7703 = vmatprep.subr.mxu1 %v14540_v2  ;;  %v7124_v7 = vadd.f32 %v7123_v28, %v7122_v40  ;;  %v7162_v1 = vadd.f32 %v7161_v46, %v7160_v62  ;;  %v11891_v2 = vsub.f32 %v321_v27, %v11851_v54  ;;  %v14545_v28 = vld [vmem:[#allocation41_spill] sm:$0xff] }
 0x1c5   : > { %14541 = vst [vmem:[#allocation55_spill] sm:$0xff] %v11882_v16  ;;  %7704 = vmatpush3.msra.mxu1 %v14542_v18  ;;  %v7163_v15 = vpop.f32.mrf.mxu0  ;;  %4242 = vmatprep.mubr.f32.mxu1 %v14514_v26  ;;  %v4369_v61 = vand.u32 4294901760, %v11860_v36  ;;  %v11897_v40 = vand.u32 4294901760, %v328_v50  ;;  %v14546_v27 = vand.u32 4294901760, %v11819_v52  ;;  %v14547_v46 = vand.u32 4294901760, %v11823_v42 }
 0x1c6   : > { %7648 = vmatpush3.msra.mxu0 %v11680_v9  ;;  %v11900_v62 = vadd.f32 %v7124_v7, %v11786_v63  ;;  %v2671_v18 = vadd.f32 %v7162_v1, %v11366_v38  ;;  %4244 = vmatmul.mubr.f32.gmra.mxu1 %v14522_v4  ;;  %v11914_v11 = vsub.f32 %v11826_v60, %v14548_v32  ;;  %v7220_v1 = vpop.f32.mrf.mxu1  ;;  %v14549_v4 = vand.u32 4294901760, %v11733_v37 }
 0x1c7   : > { %14544 = vst [vmem:[#allocation99_spill] sm:$0xff] %v11897_v40  ;;  %4091 = vmatmul.mubr.f32.gmra.mxu0 %v14545_v28  ;;  %v4377_v26 = vsub.f32 %v11819_v52, %v14546_v27  ;;  %v4724_v36 = vsub.f32 %v11823_v42, %v14547_v46  ;;  %v7164_v38 = vpop.f32.mrf.mxu0  ;;  %7649 = vmatprep.subr.mxu0 %v11718_v5  ;;  %v11923_v27 = vand.u32 4294901760, %v336_v56  ;;  %v335_v46 = vld [vmem:[%s9384_s15 + $0x100] sm:$0xff]  ;;  %v14551_v32 = vand.u32 4294901760, %v11753_v0 }
 0x1c8   : > { %7705 = vmatprep.subr.mxu1 %v14549_v4  ;;  %v11921_v7 = vsub.f32 %v329_v20, %v11882_v16  ;;  %v7165_v43 = vadd.f32 %v7164_v38, %v7163_v15  ;;  %v7221_v52 = vadd.f32 %v7220_v1, %v7219_v53  ;;  %7650 = vmatpush3.msra.mxu0 %v11748_v39  ;;  %v14552_v63 = vand.u32 4294901760, %v11796_v59 }
 0x1c9   : > { %14550 = vst [vmem:[#allocation105_spill] sm:$0xff] %v11923_v27  ;;  %7706 = vmatpush3.msra.mxu1 %v14551_v32  ;;  %v14553_v37 = vand.u32 4294901760, %v11846_v48  ;;  %v14554_v20 = vand.u32 4294901760, %v11849_v44  ;;  %v13730_v53 = vand.u32 4294901760, %v11891_v2  ;;  %7651 = vmatprep.subr.mxu0 %v11768_v8  ;;  %v4718_v0 = vand.u32 4294901760, %v11872_v31  ;;  %v7166_v1 = vpop.f32.mrf.mxu0  ;;  %v7222_v32 = vpop.f32.mrf.mxu1  ;;  %v342_v8 = vld [vmem:[%s9384_s15 + $0x138] sm:$0xff] }
 0x1ca   : > { %v4612_v60 = vsub.f32 %v11796_v59, %v14552_v63  ;;  %7707 = vmatprep.subr.mxu1 %v4711_v14  ;;  %v11944_v15 = vsub.f32 %v328_v50, %v11897_v40  ;;  %v11947_v63 = vadd.f32 %v7165_v43, %v11437_v29  ;;  %v11949_v38 = vadd.f32 %v7221_v52, %v2664_v47  ;;  %v343_v47 = vld [vmem:[%s9384_s15 + $0x140] sm:$0xff] }
 0x1cb   : > { %v11935_v4 = vsub.f32 %v11846_v48, %v14553_v37  ;;  %v4392_v5 = vsub.f32 %v11849_v44, %v14554_v20  ;;  %4249 = vmatprep.mubr.f32.mxu1 %v14529_v55  ;;  %7652 = vmatpush3.msra.mxu0 %v11758_v17  ;;  %v4606_v37 = vand.u32 4294901760, %v11842_v30  ;;  %v4378_v14 = vand.u32 4294901760, %v4377_v26  ;;  %v7167_v30 = vpop.f32.mrf.mxu0  ;;  %v7223_v26 = vpop.f32.mrf.mxu1 }
 0x1cc   : > { %v11954_v20 = vand.u32 4294901760, %v335_v46  ;;  %4364 = vmatprep.mubr.f32.mxu0 %v4363_v24  ;;  %v14556_v31 = vand.u32 4294901760, %v11783_v57  ;;  %v4725_v50 = vand.u32 4294901760, %v4724_v36  ;;  %v14557_v29 = vand.u32 4294901760, %v11811_v41  ;;  %4251 = vmatmul.mubr.f32.gmra.mxu1 %v14534_v21 }
 0x1cd   : > { %v11963_v55 = vsub.f32 %v336_v56, %v11923_v27  ;;  %4370 = vmatmul.mubr.f32.vlgmr.msra.gmra.mxu0 %v4369_v61  ;;  %v4384_v57 = vand.u32 4294901760, %v11914_v11  ;;  %v4398_v24 = vsub.f32 %v11891_v2, %v13730_v53  ;;  %v7168_v36 = vadd.f32 %v7167_v30, %v7166_v1  ;;  %4256 = vmatprep.mubr.f32.mxu1 %v14543_v33  ;;  %v7225_v33 = vpop.f32.mrf.mxu1  ;;  %v356_v53 = vld [vmem:[%s9384_s15 + $0x1a8] sm:$0xff] }
 0x1ce   : > { %14555 = vst [vmem:[#allocation31_spill] sm:$0xff] %v11954_v20  ;;  %7708 = vmatpush3.msra.mxu1 %v14556_v31  ;;  %v4619_v43 = vsub.f32 %v11811_v41, %v14557_v29  ;;  %v7224_v31 = vadd.f32 %v7223_v26, %v7222_v32  ;;  %v4613_v56 = vand.u32 4294901760, %v4612_v60  ;;  %v4732_v29 = vand.u32 4294901760, %v11935_v4  ;;  %4379 = vmatprep.mubr.f32.mxu0 %v4378_v14  ;;  %v7169_v60 = vpop.f32.mrf.mxu0 }
 0x1cf   : > { %14558 = vst [vmem:[#allocation17_spill] sm:$0xff] %v11963_v55  ;;  %7709 = vmatprep.subr.mxu1 %v4718_v0  ;;  %v4393_v52 = vand.u32 4294901760, %v4392_v5  ;;  %v13728_v17 = vand.u32 4294901760, %v11944_v15  ;;  %v11976_v11 = vsub.f32 %v335_v46, %v11954_v20  ;;  %v11978_v21 = vand.u32 4294901760, %v343_v47  ;;  %7745 = vmatprep.subr.mxu0 %v11235_v25  ;;  %v7226_v14 = vpop.f32.mrf.mxu1 }
 0x1d0   : > { %7710 = vmatpush3.msra.mxu1 %v4606_v37  ;;  %v11981_v61 = vadd.f32 %v7168_v36, %v11515_v58  ;;  %v11983_v0 = vadd.f32 %v7224_v31, %v2671_v18  ;;  %v4620_v5 = vand.u32 4294901760, %v4619_v43  ;;  %v14561_v4 = vand.u32 4294901760, %v11921_v7  ;;  %v350_v18 = vld [vmem:[%s9384_s15 + $0x178] sm:$0xff]  ;;  %v7170_v37 = vpop.f32.mrf.mxu0  ;;  %7746 = vmatpush3.msra.mxu0 %v11232_v49 }
 0x1d1   : > { %14559 = vst [vmem:[#allocation63_spill] sm:$0xff] %v11976_v11  ;;  %14560 = vst [vmem:[#allocation2_spill] sm:$0xff] %v11978_v21  ;;  %7711 = vmatprep.subr.mxu1 %v4725_v50  ;;  %4258 = vmatmul.mubr.f32.gmra.mxu1 %v14545_v28  ;;  %v4399_v46 = vand.u32 4294901760, %v4398_v24  ;;  %v13727_v58 = vand.u32 4294901760, %v11963_v55  ;;  %v11991_v32 = vand.u32 4294901760, %v342_v8  ;;  %v4413_v50 = vsub.f32 %v11944_v15, %v13728_v17 }
 0x1d2   : > { %v4407_v1 = vsub.f32 %v11921_v7, %v14561_v4  ;;  %4385 = vmatmul.mubr.f32.gmra.mxu0 %v4384_v57  ;;  %7712 = vmatpush3.msra.mxu1 %v4613_v56  ;;  %v7171_v43 = vadd.f32 %v7170_v37, %v7169_v60  ;;  %v7227_v30 = vadd.f32 %v7226_v14, %v7225_v33  ;;  %v13729_v28 = vand.u32 4294901760, %v11976_v11  ;;  %v349_v57 = vld [vmem:[%s9384_s15 + $0x170] sm:$0xff]  ;;  %v7228_v60 = vpop.f32.mrf.mxu1 }
 0x1d3   : > { %14562 = vst [vmem:[#allocation37_spill] sm:$0xff] %v11991_v32  ;;  %4394 = vmatprep.mubr.f32.mxu0 %v4393_v52  ;;  %7713 = vmatprep.subr.mxu1 %v4732_v29  ;;  %v12000_v26 = vsub.f32 %v343_v47, %v11978_v21  ;;  %v12004_v52 = vand.u32 4294901760, %v350_v18  ;;  %v4422_v47 = vsub.f32 %v11963_v55, %v13727_v58  ;;  %v7172_v29 = vpop.f32.mrf.mxu0  ;;  %v12021_v33 = vand.u32 4294901760, %v349_v57  ;;  %v14571_v58 = vld [vmem:[#allocation19_spill] sm:$0xff]  ;;  %v14583_v55 = vld [vmem:[#allocation6_spill] sm:$0xff] }
 0x1d4   : > { %4735 = vmatprep.mubr.f32.mxu1 %v11688_v34  ;;  %7714 = vmatpush3.msra.mxu1 %v4620_v5  ;;  %v4408_v24 = vand.u32 4294901760, %v4407_v1  ;;  %v12007_v36 = vadd.f32 %v7171_v43, %v11587_v10  ;;  %v12010_v31 = vadd.f32 %v7227_v30, %v11947_v63  ;;  %v12017_v56 = vsub.f32 %v342_v8, %v11991_v32  ;;  %v14567_v63 = vld [vmem:[#allocation60_spill] sm:$0xff]  ;;  %v7229_v37 = vpop.f32.mrf.mxu1  ;;  %v14570_v30 = vld [vmem:[#allocation47_spill] sm:$0xff] }
 0x1d5   : > { %14563 = vst [vmem:[#allocation102_spill] sm:$0xff] %v12000_v26  ;;  %14564 = vst [vmem:[#allocation103_spill] sm:$0xff] %v12004_v52  ;;  %4737 = vmatmul.mubr.f32.vlgmr.msra.gmra.mxu1 %v11708_v3  ;;  %7807 = vmatprep.subr.mxu1 %v11201_v45  ;;  %v4414_v10 = vand.u32 4294901760, %v4413_v50  ;;  %v14568_v5 = vld [vmem:[#allocation48_spill] sm:$0xff]  ;;  %v4428_v4 = vsub.f32 %v11976_v11, %v13729_v28  ;;  %v12032_v14 = vsub.f32 %v350_v18, %v12004_v52  ;;  %v14574_v18 = vld [vmem:[#allocation95_spill] sm:$0xff] }
 0x1d6   : > { %4400 = vmatmul.mubr.f32.gmra.mxu0 %v4399_v46  ;;  %14565 = vst [vmem:[#allocation59_spill] sm:$0xff] %v12017_v56  ;;  %7747 = vmatprep.subr.mxu0 %v11238_v19  ;;  %14566 = vst [vmem:[#allocation71_spill] sm:$0xff] %v12021_v33  ;;  %v357_v1 = vld [vmem:[%s9384_s15 + $0x1b0] sm:$0xff]  ;;  %v7173_v46 = vpop.f32.mrf.mxu0  ;;  %v7230_v43 = vadd.f32 %v7229_v37, %v7228_v60  ;;  %v4423_v17 = vand.u32 4294901760, %v4422_v47  ;;  %v14576_v37 = vld [vmem:[#allocation27_spill] sm:$0xff]  ;;  %v14577_v28 = vand.u32 4294901760, %v12000_v26 }
 0x1d7   : > { %7808 = vmatpush3.msra.mxu1 %v14567_v63  ;;  %7748 = vmatpush3.msra.mxu0 %v14568_v5  ;;  %14569 = vst [vmem:[#allocation25_spill] sm:$0xff] %v12032_v14  ;;  %v7174_v50 = vadd.f32 %v7173_v46, %v7172_v29  ;;  %v12042_v8 = vand.u32 4294901760, %v357_v1  ;;  %v14575_v47 = vld [vmem:[#allocation12_spill] sm:$0xff]  ;;  %v14581_v34 = vld [vmem:[#allocation23_spill] sm:$0xff] }
 0x1d8   : > { %4409 = vmatprep.mubr.f32.mxu0 %v4408_v24  ;;  %4742 = vmatprep.mubr.f32.mxu1 %v11773_v22  ;;  %v12040_v24 = vsub.f32 %v349_v57, %v12021_v33  ;;  %v12048_v60 = vadd.f32 %v7230_v43, %v11981_v61  ;;  %v7175_v46 = vpop.f32.mrf.mxu0  ;;  %v7231_v57 = vpop.f32.mrf.mxu1  ;;  %v14578_v22 = vld [vmem:[#allocation3_spill] sm:$0xff]  ;;  %v14579_v3 = vld [vmem:[#allocation16_spill] sm:$0xff]  ;;  %v12058_v61 = vand.u32 4294901760, %v356_v53 }
 0x1d9   : > { %7749 = vmatprep.subr.mxu0 %v14570_v30  ;;  %7809 = vmatprep.subr.mxu1 %v14571_v58  ;;  %14573 = vst [vmem:[#allocation58_spill] sm:$0xff] %v12042_v8  ;;  %v12045_v29 = vadd.f32 %v7174_v50, %v14574_v18  ;;  %v364_v43 = vld [vmem:[%s9384_s15 + $0x1e8] sm:$0xff]  ;;  %v12069_v50 = vsub.f32 %v357_v1, %v12042_v8 }
 0x1da   : > { %4415 = vmatmul.mubr.f32.gmra.mxu0 %v4414_v10  ;;  %4744 = vmatmul.mubr.f32.gmra.mxu1 %v11775_v51  ;;  %14572 = vst [vmem:[#allocation18_spill] sm:$0xff] %v12040_v24  ;;  %v4429_v10 = vand.u32 4294901760, %v4428_v4  ;;  %v4437_v51 = vsub.f32 %v12000_v26, %v14577_v28  ;;  %14580 = vst [vmem:[#allocation65_spill] sm:$0xff] %v12058_v61  ;;  %v7176_v18 = vpop.f32.mrf.mxu0  ;;  %v14582_v4 = vand.u32 4294901760, %v12017_v56  ;;  %v7232_v26 = vpop.f32.mrf.mxu1 }
 0x1db   : > { %7750 = vmatpush3.msra.mxu0 %v14575_v47  ;;  %7810 = vmatpush3.msra.mxu1 %v14576_v37  ;;  %v7177_v28 = vadd.f32 %v7176_v18, %v7175_v46  ;;  %14584 = vst [vmem:[#allocation36_spill] sm:$0xff] %v12069_v50  ;;  %v7233_v37 = vadd.f32 %v7232_v26, %v7231_v57  ;;  %v14587_v18 = vld [vmem:[#allocation15_spill] sm:$0xff] }
 0x1dc   : > { %7811 = vmatprep.subr.mxu1 %v14578_v22  ;;  %7751 = vmatprep.subr.mxu0 %v14579_v3  ;;  %v4443_v11 = vsub.f32 %v12017_v56, %v14582_v4  ;;  %v363_v22 = vld [vmem:[%s9384_s15 + $0x1e0] sm:$0xff]  ;;  %v14586_v4 = vld [vmem:[#allocation43_spill] sm:$0xff]  ;;  %v14589_v3 = vand.u32 4294901760, %v12032_v14  ;;  %v12084_v26 = vsub.f32 %v356_v53, %v12058_v61  ;;  %v7234_v57 = vpop.f32.mrf.mxu1 }
 0x1dd   : > { %7812 = vmatpush3.msra.mxu1 %v14581_v34  ;;  %4424 = vmatprep.mubr.f32.mxu0 %v4423_v17  ;;  %v4438_v17 = vand.u32 4294901760, %v4437_v51  ;;  %v12073_v34 = vand.u32 4294901760, %v364_v43  ;;  %v12076_v46 = vadd.f32 %v7177_v28, %v14586_v4  ;;  %v7178_v51 = vpop.f32.mrf.mxu0  ;;  %v14592_v28 = vld [vmem:[#allocation8_spill] sm:$0xff]  ;;  %v12091_v56 = vand.u32 4294901760, %v363_v22 }
 0x1de   : > { %4749 = vmatprep.mubr.f32.mxu1 %v11799_v23  ;;  %7752 = vmatpush3.msra.mxu0 %v14583_v55  ;;  %v14588_v23 = vld [vmem:[#allocation51_spill] sm:$0xff]  ;;  %v4452_v1 = vsub.f32 %v12032_v14, %v14589_v3  ;;  %14590 = vst [vmem:[#allocation50_spill] sm:$0xff] %v12084_v26  ;;  %v4444_v4 = vand.u32 4294901760, %v4443_v11  ;;  %v14596_v3 = vand.u32 4294901760, %v12040_v24  ;;  %v7235_v55 = vpop.f32.mrf.mxu1 }
 0x1df   : > { %4430 = vmatmul.mubr.f32.gmra.mxu0 %v4429_v10  ;;  %4751 = vmatmul.mubr.f32.gmra.mxu1 %v11851_v54  ;;  %14585 = vst [vmem:[#allocation40_spill] sm:$0xff] %v12073_v34  ;;  %v12087_v10 = vadd.f32 %v7233_v37, %v12007_v36  ;;  %v14591_v54 = vld [vmem:[#allocation5_spill] sm:$0xff]  ;;  %14593 = vst [vmem:[#allocation56_spill] sm:$0xff] %v12091_v56  ;;  %v371_v37 = vld [vmem:[%s9384_s15 + $0x220] sm:$0xff]  ;;  %v7179_v14 = vpop.f32.mrf.mxu0  ;;  %v12102_v11 = vsub.f32 %v364_v43, %v12073_v34 }
 0x1e0   : > { %7753 = vmatprep.subr.mxu0 %v14587_v18  ;;  %7813 = vmatprep.subr.mxu1 %v14588_v23  ;;  %v14594_v23 = vld [vmem:[#allocation52_spill] sm:$0xff]  ;;  %v4458_v53 = vsub.f32 %v12040_v24, %v14596_v3  ;;  %v4453_v47 = vand.u32 4294901760, %v4452_v1  ;;  %v370_v24 = vld [vmem:[%s9384_s15 + $0x218] sm:$0xff]  ;;  %v12112_v36 = vand.u32 4294901760, %v371_v37 }
 0x1e1   : > { %7754 = vmatpush3.msra.mxu0 %v14591_v54  ;;  %7814 = vmatpush3.msra.mxu1 %v14592_v28  ;;  %v14595_v18 = vld [vmem:[#allocation4_spill] sm:$0xff]  ;;  %14597 = vst [vmem:[#allocation68_spill] sm:$0xff] %v12102_v11  ;;  %v7180_v28 = vadd.f32 %v7179_v14, %v7178_v51  ;;  %v7181_v14 = vpop.f32.mrf.mxu0  ;;  %v14602_v51 = vld [vmem:[#allocation45_spill] sm:$0xff] }
 0x1e2   : > { %7755 = vmatprep.subr.mxu0 %v14594_v23  ;;  %7815 = vmatprep.subr.mxu1 %v14595_v18  ;;  %v7236_v23 = vadd.f32 %v7235_v55, %v7234_v57  ;;  %v14598_v54 = vld [vmem:[#allocation76_spill] sm:$0xff]  ;;  %v14599_v18 = vld [vmem:[#allocation22_spill] sm:$0xff]  ;;  %14601 = vst [vmem:[#allocation74_spill] sm:$0xff] %v12112_v36  ;;  %v4459_v57 = vand.u32 4294901760, %v4458_v53 }
 0x1e3   : > { %4439 = vmatprep.mubr.f32.mxu0 %v4438_v17  ;;  %4756 = vmatprep.mubr.f32.mxu1 %v11882_v16  ;;  %v12110_v17 = vsub.f32 %v363_v22, %v12091_v56  ;;  %v2713_v43 = vadd.f32 %v7180_v28, %v11789_v13  ;;  %v14603_v1 = vld [vmem:[#allocation64_spill] sm:$0xff]  ;;  %v14605_v22 = vld [vmem:[#allocation11_spill] sm:$0xff]  ;;  %v14606_v16 = vld [vmem:[#allocation53_spill] sm:$0xff]  ;;  %v12126_v28 = vand.u32 4294901760, %v370_v24  ;;  %v12136_v13 = vsub.f32 %v371_v37, %v12112_v36 }
 0x1e4   : > { %7756 = vmatpush3.msra.mxu0 %v14598_v54  ;;  %7816 = vmatpush3.msra.mxu1 %v14599_v18  ;;  %v12116_v55 = vadd.f32 %v7236_v23, %v12045_v29  ;;  %v7182_v23 = vpop.f32.mrf.mxu0  ;;  %v14608_v29 = vld [vmem:[#allocation75_spill] sm:$0xff] }
 0x1e5   : > { %4445 = vmatmul.mubr.f32.gmra.mxu0 %v4444_v4  ;;  %4758 = vmatmul.mubr.f32.gmra.mxu1 %v11897_v40  ;;  %14600 = vst [vmem:[#allocation72_spill] sm:$0xff] %v12110_v17  ;;  %v14604_v4 = vand.u32 4294901760, %v12069_v50  ;;  %v7237_v40 = vpop.f32.mrf.mxu1  ;;  %14607 = vst [vmem:[#allocation77_spill] sm:$0xff] %v12126_v28 }
 0x1e6   : > { %7757 = vmatprep.subr.mxu0 %v14602_v51  ;;  %7817 = vmatprep.subr.mxu1 %v14603_v1  ;;  %v14609_v1 = vand.u32 4294901760, %v12084_v26  ;;  %v7183_v51 = vadd.f32 %v7182_v23, %v7181_v14  ;;  %14611 = vst [vmem:[#allocation78_spill] sm:$0xff] %v12136_v13  ;;  %v14613_v14 = vld [vmem:[#allocation32_spill] sm:$0xff] }
 0x1e7   : > { %v4467_v3 = vsub.f32 %v12069_v50, %v14604_v4  ;;  %7758 = vmatpush3.msra.mxu0 %v14605_v22  ;;  %7818 = vmatpush3.msra.mxu1 %v14606_v16  ;;  %v7238_v18 = vpop.f32.mrf.mxu1  ;;  %v14610_v4 = vld [vmem:[#allocation34_spill] sm:$0xff]  ;;  %v14612_v22 = vld [vmem:[#allocation69_spill] sm:$0xff]  ;;  %v12146_v50 = vsub.f32 %v370_v24, %v12126_v28 }
 0x1e8   : > { %7759 = vmatprep.subr.mxu0 %v14608_v29  ;;  %4454 = vmatprep.mubr.f32.mxu0 %v4453_v47  ;;  %v4473_v53 = vsub.f32 %v12084_v26, %v14609_v1  ;;  %v7239_v16 = vadd.f32 %v7238_v18, %v7237_v40  ;;  %v2720_v29 = vadd.f32 %v7183_v51, %v11863_v35  ;;  %v14614_v1 = vand.u32 4294901760, %v12102_v11  ;;  %v7184_v40 = vpop.f32.mrf.mxu0  ;;  %v14618_v51 = vld [vmem:[#allocation61_spill] sm:$0xff] }
 0x1e9   : > { %4763 = vmatprep.mubr.f32.mxu1 %v11923_v27  ;;  %7760 = vmatpush3.msra.mxu0 %v14610_v4  ;;  %v4468_v47 = vand.u32 4294901760, %v4467_v3  ;;  %14615 = vst [vmem:[#allocation67_spill] sm:$0xff] %v12146_v50  ;;  %v7240_v18 = vpop.f32.mrf.mxu1  ;;  %v14617_v3 = vld [vmem:[#allocation100_spill] sm:$0xff]  ;;  %v14620_v27 = vand.u32 4294901760, %v12110_v17 }
 0x1ea   : > { %7819 = vmatprep.subr.mxu1 %v14612_v22  ;;  %4460 = vmatmul.mubr.f32.gmra.mxu0 %v4459_v57  ;;  %v4482_v23 = vsub.f32 %v12102_v11, %v14614_v1  ;;  %v12149_v37 = vadd.f32 %v7239_v16, %v12076_v46  ;;  %v14616_v57 = vld [vmem:[#allocation57_spill] sm:$0xff]  ;;  %v4474_v35 = vand.u32 4294901760, %v4473_v53  ;;  %v7185_v11 = vpop.f32.mrf.mxu0  ;;  %v14622_v53 = vld [vmem:[#allocation20_spill] sm:$0xff] }
 0x1eb   : > { %4765 = vmatmul.mubr.f32.gmra.mxu1 %v11954_v20  ;;  %7761 = vmatprep.subr.mxu0 %v14613_v14  ;;  %v14619_v20 = vld [vmem:[#allocation70_spill] sm:$0xff]  ;;  %v4488_v1 = vsub.f32 %v12110_v17, %v14620_v27  ;;  %v7241_v16 = vpop.f32.mrf.mxu1  ;;  %v7186_v46 = vadd.f32 %v7185_v11, %v7184_v40  ;;  %v14623_v17 = vld [vmem:[#allocation21_spill] sm:$0xff]  ;;  %v14625_v40 = vand.u32 4294901760, %v12136_v13 }
 0x1ec   : > { %7820 = vmatpush3.msra.mxu1 %v14616_v57  ;;  %7762 = vmatpush3.msra.mxu0 %v14617_v3  ;;  %v7242_v26 = vadd.f32 %v7241_v16, %v7240_v18  ;;  %v14621_v57 = vld [vmem:[#allocation28_spill] sm:$0xff] }
 0x1ed   : > { %7763 = vmatprep.subr.mxu0 %v14618_v51  ;;  %7821 = vmatprep.subr.mxu1 %v14619_v20  ;;  %v4483_v51 = vand.u32 4294901760, %v4482_v23  ;;  %v2727_v27 = vadd.f32 %v7186_v46, %v11900_v62  ;;  %v4489_v11 = vand.u32 4294901760, %v4488_v1  ;;  %v4497_v18 = vsub.f32 %v12136_v13, %v14625_v40  ;;  %v7281_v23 = vpop.f32.mrf.mxu0  ;;  %v14628_v20 = vld [vmem:[#allocation24_spill] sm:$0xff]  ;;  %v14631_v13 = vld [vmem:[#allocation83_spill] sm:$0xff] }
 0x1ee   : > { %4469 = vmatprep.mubr.f32.mxu0 %v4468_v47  ;;  %4770 = vmatprep.mubr.f32.mxu1 %v11978_v21  ;;  %v12165_v24 = vadd.f32 %v7242_v26, %v2713_v43  ;;  %v14624_v47 = vld [vmem:[#allocation73_spill] sm:$0xff]  ;;  %v7243_v16 = vpop.f32.mrf.mxu1  ;;  %v14629_v62 = vand.u32 4294901760, %v12146_v50  ;;  %v14630_v1 = vld [vmem:[#allocation88_spill] sm:$0xff] }
 0x1ef   : > { %7764 = vmatpush3.msra.mxu0 %v14621_v57  ;;  %7822 = vmatpush3.msra.mxu1 %v14622_v53  ;;  %v14626_v21 = vld [vmem:[#allocation29_spill] sm:$0xff]  ;;  %v7282_v46 = vpop.f32.mrf.mxu0 }
 0x1f0   : > { %4475 = vmatmul.mubr.f32.gmra.mxu0 %v4474_v35  ;;  %4772 = vmatmul.mubr.f32.gmra.mxu1 %v11991_v32  ;;  %v14627_v35 = vld [vmem:[#allocation39_spill] sm:$0xff]  ;;  %v4503_v26 = vsub.f32 %v12146_v50, %v14629_v62  ;;  %v7244_v43 = vpop.f32.mrf.mxu1  ;;  %v7283_v32 = vadd.f32 %v7282_v46, %v7281_v23  ;;  %v14632_v50 = vld [vmem:[#allocation14_spill] sm:$0xff]  ;;  %v14634_v46 = vld [vmem:[#allocation84_spill] sm:$0xff] }
 0x1f1   : > { %7765 = vmatprep.subr.mxu0 %v14623_v17  ;;  %7823 = vmatprep.subr.mxu1 %v14624_v47  ;;  %v7245_v40 = vadd.f32 %v7244_v43, %v7243_v16  ;;  %v7284_v47 = vpop.f32.mrf.mxu0 }
 0x1f2   : > { %7766 = vmatpush3.msra.mxu0 %v14626_v21  ;;  %7824 = vmatpush3.msra.mxu1 %v14627_v35  ;;  %v4498_v21 = vand.u32 4294901760, %v4497_v18  ;;  %v7246_v35 = vpop.f32.mrf.mxu1  ;;  %v3006_v62 = vadd.f32 %v7283_v32, %v11949_v38  ;;  %v4504_v16 = vand.u32 4294901760, %v4503_v26  ;;  %v14636_v38 = vld [vmem:[#allocation10_spill] sm:$0xff] }
 0x1f3   : > { %7767 = vmatprep.subr.mxu0 %v14628_v20  ;;  %4484 = vmatprep.mubr.f32.mxu0 %v4483_v51  ;;  %v12183_v51 = vadd.f32 %v7245_v40, %v2720_v29  ;;  %v7285_v43 = vpop.f32.mrf.mxu0 }
 0x1f4   : > { %4777 = vmatprep.mubr.f32.mxu1 %v12004_v52  ;;  %7768 = vmatpush3.msra.mxu0 %v14630_v1  ;;  %v14633_v52 = vld [vmem:[#allocation44_spill] sm:$0xff]  ;;  %v7247_v23 = vpop.f32.mrf.mxu1  ;;  %v7286_v18 = vadd.f32 %v7285_v43, %v7284_v47  ;;  %v14637_v47 = vld [vmem:[#allocation33_spill] sm:$0xff] }
 0x1f5   : > { %7825 = vmatprep.subr.mxu1 %v14631_v13  ;;  %4490 = vmatmul.mubr.f32.gmra.mxu0 %v4489_v11  ;;  %v7248_v11 = vadd.f32 %v7247_v23, %v7246_v35  ;;  %v7287_v29 = vpop.f32.mrf.mxu0  ;;  %v14638_v23 = vld [vmem:[#allocation35_spill] sm:$0xff] }
 0x1f6   : > { %4779 = vmatmul.mubr.f32.gmra.mxu1 %v12021_v33  ;;  %7769 = vmatprep.subr.mxu0 %v11699_v6  ;;  %v14635_v33 = vld [vmem:[#allocation13_spill] sm:$0xff]  ;;  %v7343_v40 = vpop.f32.mrf.mxu1  ;;  %v3021_v26 = vadd.f32 %v7286_v18, %v11983_v0 }
 0x1f7   : > { %7826 = vmatpush3.msra.mxu1 %v14632_v50  ;;  %7770 = vmatpush3.msra.mxu0 %v14633_v52  ;;  %v12193_v32 = vadd.f32 %v7248_v11, %v2727_v27  ;;  %v14639_v27 = vld [vmem:[#allocation38_spill] sm:$0xff] }
 0x1f8   : > { %7827 = vmatprep.subr.mxu1 %v14634_v46  ;;  %7771 = vmatprep.subr.mxu0 %v11771_v12  ;;  %v7288_v46 = vpop.f32.mrf.mxu0  ;;  %v7344_v12 = vpop.f32.mrf.mxu1 }
 0x1f9   : > { %7828 = vmatpush3.msra.mxu1 %v14635_v33  ;;  %4499 = vmatprep.mubr.f32.mxu0 %v4498_v21  ;;  %v7289_v21 = vadd.f32 %v7288_v46, %v7287_v29  ;;  %v7345_v35 = vadd.f32 %v7344_v12, %v7343_v40  ;;  %v14640_v46 = vld [vmem:[#allocation92_spill] sm:$0xff]  ;;  %v14642_v40 = vld [vmem:[#allocation66_spill] sm:$0xff] }
 0x1fa   : > { %4784 = vmatprep.mubr.f32.mxu1 %v12042_v8  ;;  %7772 = vmatpush3.msra.mxu0 %v14636_v38  ;;  %v7290_v43 = vpop.f32.mrf.mxu0  ;;  %v14641_v12 = vld [vmem:[#allocation80_spill] sm:$0xff] }
 0x1fb   : > { %4505 = vmatmul.mubr.f32.gmra.mxu0 %v4504_v16  ;;  %4786 = vmatmul.mubr.f32.gmra.mxu1 %v12058_v61  ;;  %v3036_v0 = vadd.f32 %v7289_v21, %v12010_v31  ;;  %v12204_v16 = vadd.f32 %v7345_v35, %v3006_v62  ;;  %v7346_v11 = vpop.f32.mrf.mxu1  ;;  %v14643_v62 = vld [vmem:[#allocation90_spill] sm:$0xff]  ;;  %v14644_v21 = vld [vmem:[#allocation97_spill] sm:$0xff] }
 0x1fc   : > { %7773 = vmatprep.subr.mxu0 %v11823_v42  ;;  %7829 = vmatprep.subr.mxu1 %v14637_v47  ;;  %v7291_v18 = vpop.f32.mrf.mxu0 }
 0x1fd   : > { %7774 = vmatpush3.msra.mxu0 %v11796_v59  ;;  %7830 = vmatpush3.msra.mxu1 %v14638_v23  ;;  %v7347_v29 = vpop.f32.mrf.mxu1  ;;  %v7292_v61 = vadd.f32 %v7291_v18, %v7290_v43  ;;  %v14647_v43 = vld [vmem:[#allocation42_spill] sm:$0xff] }
 0x1fe   : > { %7775 = vmatprep.subr.mxu0 %v11846_v48  ;;  %7831 = vmatprep.subr.mxu1 %v14639_v27  ;;  %v7348_v31 = vadd.f32 %v7347_v29, %v7346_v11  ;;  %v14649_v29 = vand.u32 4294901760, %v14640_v46 }
 0x1ff   : > { %4791 = vmatprep.mubr.f32.mxu1 %v12073_v34  ;;  %7776 = vmatpush3.msra.mxu0 %v11811_v41  ;;  %v3051_v35 = vadd.f32 %v7292_v61, %v12048_v60  ;;  %v14645_v41 = vld [vmem:[#allocation54_spill] sm:$0xff] }
 0x200   : > { %4935 = vmatprep.mubr.f32.mxu0 %v14640_v46  ;;  %7832 = vmatpush3.msra.mxu1 %v14641_v12  ;;  %v12217_v34 = vadd.f32 %v7348_v31, %v3021_v26  ;;  %v7293_v8 = vpop.f32.mrf.mxu0  ;;  %v7349_v12 = vpop.f32.mrf.mxu1  ;;  %v14648_v26 = vld [vmem:[#allocation46_spill] sm:$0xff]  ;;  %v14650_v31 = vld [vmem:[#allocation49_spill] sm:$0xff]  ;;  %v14653_v46 = vand.u32 4294901760, %v11238_v19 }
 0x201   : > { %4793 = vmatmul.mubr.f32.gmra.mxu1 %v12091_v56  ;;  %4938 = vmatmul.mubr.f32.vlgmr.msra.gmra.mxu0 %v14642_v40  ;;  %v14646_v56 = vand.u32 4294901760, %v11235_v25  ;;  %v14651_v25 = vand.u32 4294901760, %v11232_v49  ;;  %v14654_v49 = vand.u32 4294901760, %v14568_v5 }
 0x202   : > { %7833 = vmatprep.subr.mxu1 %v14643_v62  ;;  %4798 = vmatprep.mubr.f32.mxu1 %v12112_v36  ;;  %v7294_v11 = vpop.f32.mrf.mxu0  ;;  %v7350_v18 = vpop.f32.mrf.mxu1  ;;  %v14652_v36 = vand.u32 4294901760, %v14642_v40 }
 0x203   : > { %7834 = vmatpush3.msra.mxu1 %v11680_v9  ;;  %4944 = vmatprep.mubr.f32.mxu0 %v14644_v21  ;;  %v7295_v60 = vadd.f32 %v7294_v11, %v7293_v8  ;;  %v7351_v61 = vadd.f32 %v7350_v18, %v7349_v12  ;;  %v14655_v11 = vand.u32 4294901760, %v14644_v21  ;;  %v14656_v18 = vand.u32 4294901760, %v14570_v30  ;;  %v14661_v30 = vld [vmem:[#allocation3_spill] sm:$0xff] }
 0x204   : > { %7835 = vmatprep.subr.mxu1 %v14645_v41  ;;  %7869 = vmatprep.subr.mxu0 %v14646_v56 }
 0x205   : > { %4800 = vmatmul.mubr.f32.gmra.mxu1 %v12126_v28  ;;  %4947 = vmatmul.mubr.f32.gmra.mxu0 %v14647_v43  ;;  %v3066_v56 = vadd.f32 %v7295_v60, %v12087_v10  ;;  %v12233_v28 = vadd.f32 %v7351_v61, %v3036_v0  ;;  %v7296_v8 = vpop.f32.mrf.mxu0  ;;  %v14658_v60 = vld [vmem:[#allocation12_spill] sm:$0xff]  ;;  %v14660_v61 = vld [vmem:[#allocation27_spill] sm:$0xff] }
 0x206   : > { %7836 = vmatpush3.msra.mxu1 %v11748_v39  ;;  %4953 = vmatprep.mubr.f32.mxu0 %v11849_v44  ;;  %v7352_v12 = vpop.f32.mrf.mxu1  ;;  %v14659_v21 = vand.u32 4294901760, %v14658_v60  ;;  %v14673_v60 = vld [vmem:[#allocation51_spill] sm:$0xff] }
 0x207   : > { %7837 = vmatprep.subr.mxu1 %v14648_v26  ;;  %5123 = vmatprep.mubr.f32.mxu1 %v14649_v29  ;;  %v7297_v10 = vpop.f32.mrf.mxu0 }
 0x208   : > { %7838 = vmatpush3.msra.mxu1 %v14650_v31  ;;  %7870 = vmatpush3.msra.mxu0 %v14651_v25  ;;  %v7353_v0 = vpop.f32.mrf.mxu1  ;;  %v14662_v25 = vld [vmem:[#allocation16_spill] sm:$0xff] }
 0x209   : > { %4956 = vmatmul.mubr.f32.gmra.mxu0 %v11891_v2  ;;  %5127 = vmatmul.mubr.f32.vlgmr.msra.gmra.mxu1 %v14652_v36  ;;  %v7298_v36 = vadd.f32 %v7297_v10, %v7296_v8  ;;  %v7354_v40 = vadd.f32 %v7353_v0, %v7352_v12  ;;  %v14664_v12 = vld [vmem:[#allocation23_spill] sm:$0xff] }
 0x20a   : > { %7931 = vmatprep.subr.mxu1 %v11201_v45  ;;  %7871 = vmatprep.subr.mxu0 %v14653_v46  ;;  %v14657_v45 = vand.u32 4294901760, %v14647_v43  ;;  %v14665_v43 = vld [vmem:[#allocation17_spill] sm:$0xff]  ;;  %v14666_v46 = vand.u32 4294901760, %v11849_v44 }
 0x20b   : > { %7932 = vmatpush3.msra.mxu1 %v14567_v63  ;;  %7872 = vmatpush3.msra.mxu0 %v14654_v49  ;;  %v3081_v19 = vadd.f32 %v7298_v36, %v12116_v55  ;;  %v12254_v63 = vadd.f32 %v7354_v40, %v3051_v35  ;;  %v7299_v5 = vpop.f32.mrf.mxu0  ;;  %v7355_v29 = vpop.f32.mrf.mxu1  ;;  %v14667_v49 = vld [vmem:[#allocation6_spill] sm:$0xff]  ;;  %v14670_v36 = vand.u32 4294901760, %v11891_v2  ;;  %v14679_v2 = vld [vmem:[#allocation4_spill] sm:$0xff] }
 0x20c   : > { %4962 = vmatprep.mubr.f32.mxu0 %v11921_v7  ;;  %5134 = vmatprep.mubr.f32.mxu1 %v14655_v11  ;;  %v14668_v10 = vand.u32 4294901760, %v14667_v49  ;;  %v14669_v11 = vld [vmem:[#allocation63_spill] sm:$0xff]  ;;  %v14683_v49 = vld [vmem:[#allocation22_spill] sm:$0xff] }
 0x20d   : > { %7873 = vmatprep.subr.mxu0 %v14656_v18  ;;  %7933 = vmatprep.subr.mxu1 %v14571_v58  ;;  %v14663_v58 = vand.u32 4294901760, %v14662_v25  ;;  %v7300_v8 = vpop.f32.mrf.mxu0  ;;  %v7356_v35 = vpop.f32.mrf.mxu1  ;;  %v14671_v18 = vld [vmem:[#allocation15_spill] sm:$0xff]  ;;  %v14677_v25 = vld [vmem:[#allocation52_spill] sm:$0xff] }
 0x20e   : > { %4965 = vmatmul.mubr.f32.gmra.mxu0 %v11944_v15  ;;  %5138 = vmatmul.mubr.f32.gmra.mxu1 %v14657_v45  ;;  %v7301_v55 = vadd.f32 %v7300_v8, %v7299_v5  ;;  %v7357_v0 = vadd.f32 %v7356_v35, %v7355_v29  ;;  %v14672_v45 = vand.u32 4294901760, %v14671_v18  ;;  %v14676_v29 = vld [vmem:[#allocation8_spill] sm:$0xff] }
 0x20f   : > { %7874 = vmatpush3.msra.mxu0 %v14659_v21  ;;  %7934 = vmatpush3.msra.mxu1 %v14660_v61  ;;  %v14674_v61 = vld [vmem:[#allocation5_spill] sm:$0xff] }
 0x210   : > { %7935 = vmatprep.subr.mxu1 %v14661_v30  ;;  %7875 = vmatprep.subr.mxu0 %v14663_v58  ;;  %v3096_v40 = vadd.f32 %v7301_v55, %v12149_v37  ;;  %v12275_v5 = vadd.f32 %v7357_v0, %v3066_v56  ;;  %v7302_v44 = vpop.f32.mrf.mxu0  ;;  %v14675_v30 = vand.u32 4294901760, %v14674_v61  ;;  %v14678_v58 = vand.u32 4294901760, %v14677_v25  ;;  %v14692_v25 = vld [vmem:[#allocation75_spill] sm:$0xff] }
 0x211   : > { %7936 = vmatpush3.msra.mxu1 %v14664_v12  ;;  %4971 = vmatprep.mubr.f32.mxu0 %v14665_v43  ;;  %v7358_v21 = vpop.f32.mrf.mxu1  ;;  %v14680_v12 = vld [vmem:[#allocation102_spill] sm:$0xff]  ;;  %v14681_v55 = vand.u32 4294901760, %v11921_v7  ;;  %v14685_v0 = vand.u32 4294901760, %v11944_v15  ;;  %v14693_v15 = vand.u32 4294901760, %v14692_v25  ;;  %v14710_v25 = vand.u32 4294901760, %v14623_v17 }
 0x212   : > { %5145 = vmatprep.mubr.f32.mxu1 %v14666_v46  ;;  %7876 = vmatpush3.msra.mxu0 %v14668_v10  ;;  %v7303_v37 = vpop.f32.mrf.mxu0  ;;  %v14682_v46 = vand.u32 4294901760, %v14598_v54  ;;  %v14684_v10 = vld [vmem:[#allocation59_spill] sm:$0xff] }
 0x213   : > { %4974 = vmatmul.mubr.f32.gmra.mxu0 %v14669_v11  ;;  %5149 = vmatmul.mubr.f32.gmra.mxu1 %v14670_v36  ;;  %v7359_v8 = vpop.f32.mrf.mxu1  ;;  %v7304_v56 = vadd.f32 %v7303_v37, %v7302_v44  ;;  %v14688_v44 = vld [vmem:[#allocation64_spill] sm:$0xff]  ;;  %v14689_v54 = vld [vmem:[#allocation11_spill] sm:$0xff]  ;;  %v14696_v37 = vand.u32 4294901760, %v14610_v4  ;;  %v14701_v4 = vand.u32 4294901760, %v14617_v3  ;;  %v14708_v3 = vld [vmem:[#allocation50_spill] sm:$0xff] }
 0x214   : > { %7877 = vmatprep.subr.mxu0 %v14672_v45  ;;  %7937 = vmatprep.subr.mxu1 %v14673_v60  ;;  %v7360_v35 = vadd.f32 %v7359_v8, %v7358_v21  ;;  %v14686_v60 = vld [vmem:[#allocation45_spill] sm:$0xff]  ;;  %v14690_v61 = vand.u32 4294901760, %v14689_v54  ;;  %v14707_v54 = vand.u32 4294901760, %v14621_v57 }
 0x215   : > { %7878 = vmatpush3.msra.mxu0 %v14675_v30  ;;  %7938 = vmatpush3.msra.mxu1 %v14676_v29  ;;  %v3111_v36 = vadd.f32 %v7304_v56, %v12165_v24  ;;  %v14687_v7 = vand.u32 4294901760, %v14686_v60  ;;  %v14691_v30 = vld [vmem:[#allocation53_spill] sm:$0xff] }
 0x216   : > { %7879 = vmatprep.subr.mxu0 %v14678_v58  ;;  %7939 = vmatprep.subr.mxu1 %v14679_v2  ;;  %v12293_v18 = vadd.f32 %v7360_v35, %v3081_v19  ;;  %v7305_v45 = vpop.f32.mrf.mxu0  ;;  %v7361_v21 = vpop.f32.mrf.mxu1  ;;  %v14694_v58 = vld [vmem:[#allocation25_spill] sm:$0xff]  ;;  %v14695_v2 = vand.u32 4294901760, %v14665_v43  ;;  %v14698_v35 = vand.u32 4294901760, %v14669_v11 }
 0x217   : > { %4980 = vmatprep.mubr.f32.mxu0 %v14680_v12  ;;  %5156 = vmatprep.mubr.f32.mxu1 %v14681_v55  ;;  %v14697_v55 = vld [vmem:[#allocation18_spill] sm:$0xff]  ;;  %v14712_v57 = vld [vmem:[#allocation29_spill] sm:$0xff] }
 0x218   : > { %7880 = vmatpush3.msra.mxu0 %v14682_v46  ;;  %7940 = vmatpush3.msra.mxu1 %v14683_v49  ;;  %v7306_v29 = vpop.f32.mrf.mxu0  ;;  %v7362_v19 = vpop.f32.mrf.mxu1  ;;  %v14699_v46 = vand.u32 4294901760, %v14613_v14  ;;  %v14706_v14 = vand.u32 4294901760, %v14680_v12  ;;  %v14711_v12 = vld [vmem:[#allocation73_spill] sm:$0xff] }
 0x219   : > { %4983 = vmatmul.mubr.f32.gmra.mxu0 %v14684_v10  ;;  %5160 = vmatmul.mubr.f32.gmra.mxu1 %v14685_v0  ;;  %v7307_v24 = vadd.f32 %v7306_v29, %v7305_v45  ;;  %v7363_v8 = vadd.f32 %v7362_v19, %v7361_v21  ;;  %v14700_v45 = vld [vmem:[#allocation57_spill] sm:$0xff]  ;;  %v14713_v19 = vand.u32 4294901760, %v14712_v57  ;;  %v14731_v57 = vand.u32 4294901760, %v11823_v42 }
 0x21a   : > { %7881 = vmatprep.subr.mxu0 %v14687_v7  ;;  %7941 = vmatprep.subr.mxu1 %v14688_v44  ;;  %v14704_v7 = vld [vmem:[#allocation70_spill] sm:$0xff]  ;;  %v14705_v44 = vld [vmem:[#allocation36_spill] sm:$0xff] }
 0x21b   : > { %7882 = vmatpush3.msra.mxu0 %v14690_v61  ;;  %7942 = vmatpush3.msra.mxu1 %v14691_v30  ;;  %v3126_v56 = vadd.f32 %v7307_v24, %v12183_v51  ;;  %v12315_v49 = vadd.f32 %v7363_v8, %v3096_v40  ;;  %v7364_v0 = vpop.f32.mrf.mxu1  ;;  %v14709_v61 = vand.u32 4294901760, %v14684_v10  ;;  %v14716_v10 = vld [vmem:[#allocation68_spill] sm:$0xff]  ;;  %v14718_v8 = vand.u32 4294901760, %v14630_v1 }
 0x21c   : > { %7883 = vmatprep.subr.mxu0 %v14693_v15  ;;  %4989 = vmatprep.mubr.f32.mxu0 %v14694_v58  ;;  %v7308_v43 = vpop.f32.mrf.mxu0 }
 0x21d   : > { %5167 = vmatprep.mubr.f32.mxu1 %v14695_v2  ;;  %7884 = vmatpush3.msra.mxu0 %v14696_v37  ;;  %v7365_v11 = vpop.f32.mrf.mxu1  ;;  %v14715_v2 = vand.u32 4294901760, %v14628_v20  ;;  %v14717_v37 = vand.u32 4294901760, %v14694_v58  ;;  %v14719_v20 = vld [vmem:[#allocation72_spill] sm:$0xff] }
 0x21e   : > { %7943 = vmatprep.subr.mxu1 %v14612_v22  ;;  %4992 = vmatmul.mubr.f32.gmra.mxu0 %v14697_v55  ;;  %v14702_v22 = vld [vmem:[#allocation61_spill] sm:$0xff]  ;;  %v7309_v51 = vpop.f32.mrf.mxu0  ;;  %v7366_v21 = vadd.f32 %v7365_v11, %v7364_v0 }
 0x21f   : > { %5171 = vmatmul.mubr.f32.gmra.mxu1 %v14698_v35  ;;  %7885 = vmatprep.subr.mxu0 %v14699_v46  ;;  %v14703_v60 = vand.u32 4294901760, %v14702_v22  ;;  %v7310_v40 = vadd.f32 %v7309_v51, %v7308_v43  ;;  %v14723_v51 = vld [vmem:[#allocation84_spill] sm:$0xff] }
 0x220   : > { %7944 = vmatpush3.msra.mxu1 %v14700_v45  ;;  %7886 = vmatpush3.msra.mxu0 %v14701_v4  ;;  %v12333_v29 = vadd.f32 %v7366_v21, %v3111_v36  ;;  %v14720_v45 = vand.u32 4294901760, %v14697_v55  ;;  %v14721_v4 = vand.u32 4294901760, %v11699_v6  ;;  %v14724_v6 = vld [vmem:[#allocation93_spill] sm:$0xff]  ;;  %v14728_v21 = vand.u32 4294901760, %v14636_v38 }
 0x221   : > { %7887 = vmatprep.subr.mxu0 %v14703_v60  ;;  %7945 = vmatprep.subr.mxu1 %v14704_v7  ;;  %v3141_v30 = vadd.f32 %v7310_v40, %v12193_v32  ;;  %v7405_v24 = vpop.f32.mrf.mxu0  ;;  %v480_v32 = vld [vmem:[%s13262_s2 + $0x358] sm:$0xff]  ;;  %v479_v60 = vld [vmem:[%s13262_s2 + $0x350] sm:$0xff]  ;;  %v14725_v11 = vand.u32 4294901760, %v14724_v6  ;;  %v14727_v40 = vand.u32 4294901760, %v14705_v44 }
 0x222   : > { %4998 = vmatprep.mubr.f32.mxu0 %v14705_v44  ;;  %5178 = vmatprep.mubr.f32.mxu1 %v14706_v14  ;;  %v7367_v15 = vpop.f32.mrf.mxu1  ;;  %v12357_v22 = vand.u32 4294901760, %v480_v32  ;;  %v14730_v44 = vand.u32 4294901760, %v14708_v3 }
 0x223   : > { %7888 = vmatpush3.msra.mxu0 %v14707_v54  ;;  %7946 = vmatpush3.msra.mxu1 %v14622_v53  ;;  %v14714_v53 = vld [vmem:[#allocation39_spill] sm:$0xff]  ;;  %v7406_v36 = vpop.f32.mrf.mxu0 }
 0x224   : > { %5001 = vmatmul.mubr.f32.gmra.mxu0 %v14708_v3  ;;  %5182 = vmatmul.mubr.f32.gmra.mxu1 %v14709_v61  ;;  %v7368_v17 = vpop.f32.mrf.mxu1  ;;  %v7407_v46 = vadd.f32 %v7406_v36, %v7405_v24  ;;  %v12378_v54 = vsub.f32 %v480_v32, %v12357_v22  ;;  %v12380_v61 = vand.u32 4294901760, %v479_v60 }
 0x225   : > { %7889 = vmatprep.subr.mxu0 %v14710_v25  ;;  %7947 = vmatprep.subr.mxu1 %v14711_v12  ;;  %v7369_v35 = vadd.f32 %v7368_v17, %v7367_v15  ;;  %v7408_v0 = vpop.f32.mrf.mxu0  ;;  %v478_v25 = vld [vmem:[%s13262_s2 + $0x348] sm:$0xff] }
 0x226   : > { %7890 = vmatpush3.msra.mxu0 %v14713_v19  ;;  %7948 = vmatpush3.msra.mxu1 %v14714_v53  ;;  %v7370_v43 = vpop.f32.mrf.mxu1  ;;  %v3574_v1 = vadd.f32 %v7407_v46, %v12204_v16  ;;  %v14726_v16 = vld [vmem:[#allocation78_spill] sm:$0xff]  ;;  %v14729_v15 = vld [vmem:[#allocation67_spill] sm:$0xff]  ;;  %v12400_v3 = vand.u32 4294901760, %v478_v25  ;;  %v12406_v42 = vand.u32 4294901760, %v12378_v54 }
 0x227   : > { %7891 = vmatprep.subr.mxu0 %v14715_v2  ;;  %5007 = vmatprep.mubr.f32.mxu0 %v14716_v10  ;;  %v12359_v58 = vadd.f32 %v7369_v35, %v3126_v56  ;;  %v7409_v7 = vpop.f32.mrf.mxu0  ;;  %v477_v19 = vld [vmem:[%s13262_s2 + $0x340] sm:$0xff]  ;;  %v14733_v2 = vand.u32 4294901760, %v11846_v48  ;;  %v14739_v35 = vld [vmem:[#allocation80_spill] sm:$0xff] }
 0x228   : > { %5189 = vmatprep.mubr.f32.mxu1 %v14717_v37  ;;  %7892 = vmatpush3.msra.mxu0 %v14718_v8  ;;  %v7371_v55 = vpop.f32.mrf.mxu1  ;;  %v7410_v14 = vadd.f32 %v7409_v7, %v7408_v0  ;;  %14734 = vst [vmem:[#allocation81_spill] sm:$0xff] %v12406_v42  ;;  %v14736_v37 = vld [vmem:[#allocation9_spill] sm:$0xff]  ;;  %v12418_v8 = vand.u32 4294901760, %v477_v19  ;;  %v14740_v0 = vand.u32 4294901760, %v14719_v20 }
 0x229   : > { %7949 = vmatprep.subr.mxu1 %v14631_v13  ;;  %5010 = vmatmul.mubr.f32.gmra.mxu0 %v14719_v20  ;;  %v14722_v13 = vand.u32 4294901760, %v14633_v52  ;;  %v7372_v56 = vadd.f32 %v7371_v55, %v7370_v43  ;;  %v14737_v48 = vand.u32 4294901760, %v14736_v37  ;;  %v14744_v20 = vld [vmem:[#allocation79_spill] sm:$0xff] }
 0x22a   : > { %5193 = vmatmul.mubr.f32.gmra.mxu1 %v14720_v45  ;;  %7893 = vmatprep.subr.mxu0 %v14721_v4  ;;  %v7467_v52 = vpop.f32.mrf.mxu1  ;;  %v3583_v12 = vadd.f32 %v7410_v14, %v12217_v34  ;;  %v14732_v34 = vand.u32 4294901760, %v11796_v59  ;;  %v12429_v45 = vsub.f32 %v478_v25, %v12400_v3  ;;  %v12442_v7 = vsub.f32 %v477_v19, %v12418_v8 }
 0x22b   : > { %7950 = vmatpush3.msra.mxu1 %v14632_v50  ;;  %7894 = vmatpush3.msra.mxu0 %v14722_v13  ;;  %v7411_v50 = vpop.f32.mrf.mxu0  ;;  %v14742_v13 = vand.u32 4294901760, %v14726_v16  ;;  %v14745_v14 = vand.u32 4294901760, %v14729_v15 }
 0x22c   : > { %7951 = vmatprep.subr.mxu1 %v14723_v51  ;;  %7895 = vmatprep.subr.mxu0 %v14725_v11  ;;  %v7468_v24 = vpop.f32.mrf.mxu1 }
 0x22d   : > { %7952 = vmatpush3.msra.mxu1 %v14635_v33  ;;  %5016 = vmatprep.mubr.f32.mxu0 %v14726_v16  ;;  %v12385_v33 = vadd.f32 %v7372_v56, %v3141_v30  ;;  %v7412_v38 = vpop.f32.mrf.mxu0  ;;  %v7469_v53 = vadd.f32 %v7468_v24, %v7467_v52  ;;  %v12455_v16 = vand.u32 4294901760, %v12429_v45 }
 0x22e   : > { %5200 = vmatprep.mubr.f32.mxu1 %v14727_v40  ;;  %7896 = vmatpush3.msra.mxu0 %v14728_v21  ;;  %v7413_v30 = vadd.f32 %v7412_v38, %v7411_v50  ;;  %v14748_v40 = vld [vmem:[#allocation26_spill] sm:$0xff]  ;;  %v474_v38 = vld [vmem:[%s13262_s2 + $0x328] sm:$0xff] }
 0x22f   : > { %5019 = vmatmul.mubr.f32.gmra.mxu0 %v14729_v15  ;;  %5204 = vmatmul.mubr.f32.gmra.mxu1 %v14730_v44  ;;  %v12412_v17 = vadd.f32 %v7469_v53, %v3574_v1  ;;  %v7414_v59 = vpop.f32.mrf.mxu0  ;;  %v7470_v36 = vpop.f32.mrf.mxu1  ;;  %14747 = vst [vmem:[#allocation85_spill] sm:$0xff] %v12455_v16  ;;  %v12467_v15 = vand.u32 4294901760, %v12442_v7 }
 0x230   : > { %7897 = vmatprep.subr.mxu0 %v14731_v57  ;;  %7953 = vmatprep.subr.mxu1 %v14637_v47  ;;  %v12409_v47 = vsub.f32 %v479_v60, %v12380_v61  ;;  %v3592_v32 = vadd.f32 %v7413_v30, %v12233_v28  ;;  %v476_v28 = vld [vmem:[%s13262_s2 + $0x338] sm:$0xff]  ;;  %v5818_v60 = vsub.f32 %v12378_v54, %v12406_v42  ;;  %v14751_v57 = vld [vmem:[#allocation62_spill] sm:$0xff] }
 0x231   : > { %7898 = vmatpush3.msra.mxu0 %v14732_v34  ;;  %7954 = vmatpush3.msra.mxu1 %v14638_v23  ;;  %v14735_v23 = vand.u32 4294901760, %v14716_v10  ;;  %v7415_v46 = vpop.f32.mrf.mxu0  ;;  %v7471_v43 = vpop.f32.mrf.mxu1  ;;  %v14741_v10 = vld [vmem:[#allocation7_spill] sm:$0xff]  ;;  %v12444_v51 = vand.u32 4294901760, %v476_v28  ;;  %14749 = vst [vmem:[#allocation87_spill] sm:$0xff] %v12467_v15 }
 0x232   : > { %7899 = vmatprep.subr.mxu0 %v14733_v2  ;;  %7955 = vmatprep.subr.mxu1 %v14639_v27  ;;  %v14738_v27 = vld [vmem:[#allocation30_spill] sm:$0xff]  ;;  %v7416_v4 = vadd.f32 %v7415_v46, %v7414_v59  ;;  %v7472_v1 = vadd.f32 %v7471_v43, %v7470_v36  ;;  %v12437_v55 = vand.u32 4294901760, %v12409_v47  ;;  %v14752_v34 = vld [vmem:[#allocation55_spill] sm:$0xff] }
 0x233   : > { %5211 = vmatprep.mubr.f32.mxu1 %v14735_v23  ;;  %7900 = vmatpush3.msra.mxu0 %v14737_v48  ;;  %v7473_v56 = vpop.f32.mrf.mxu1  ;;  %v12470_v44 = vsub.f32 %v476_v28, %v12444_v51  ;;  %v473_v28 = vld [vmem:[%s13262_s2 + $0x320] sm:$0xff] }
 0x234   : > { %5392 = vmatprep.mubr.f32.mxu0 %v14738_v27  ;;  %7956 = vmatpush3.msra.mxu1 %v14739_v35  ;;  %14743 = vst [vmem:[#allocation82_spill] sm:$0xff] %v12437_v55  ;;  %v12447_v6 = vadd.f32 %v7472_v1, %v3583_v12  ;;  %v7417_v11 = vpop.f32.mrf.mxu0  ;;  %v5825_v21 = vsub.f32 %v12409_v47, %v12437_v55 }
 0x235   : > { %5215 = vmatmul.mubr.f32.gmra.mxu1 %v14740_v0  ;;  %5394 = vmatmul.mubr.f32.vlgmr.msra.gmra.mxu0 %v14741_v10  ;;  %v7474_v52 = vpop.f32.mrf.mxu1  ;;  %v12493_v2 = vand.u32 4294901760, %v12470_v44 }
 0x236   : > { %7957 = vmatprep.subr.mxu1 %v14643_v62  ;;  %5222 = vmatprep.mubr.f32.mxu1 %v14742_v13  ;;  %v3601_v62 = vadd.f32 %v7416_v4, %v12254_v63  ;;  %v475_v63 = vld [vmem:[%s13262_s2 + $0x330] sm:$0xff]  ;;  %v7418_v50 = vpop.f32.mrf.mxu0  ;;  %v7475_v12 = vadd.f32 %v7474_v52, %v7473_v56  ;;  %v5826_v53 = vand.u32 4294901760, %v5825_v21  ;;  %v14756_v13 = vld [vmem:[#allocation105_spill] sm:$0xff]  ;;  %v316_v21 = vld [vmem:[%s9384_s15 + $0x68] sm:$0xff] }
 0x237   : > { %7958 = vmatpush3.msra.mxu1 %v11680_v9  ;;  %5399 = vmatprep.mubr.f32.mxu0 %v14744_v20  ;;  %v14746_v9 = vld [vmem:[#allocation86_spill] sm:$0xff]  ;;  %v7419_v25 = vadd.f32 %v7418_v50, %v7417_v11  ;;  %14753 = vst [vmem:[#allocation91_spill] sm:$0xff] %v12493_v2  ;;  %v14759_v11 = vld [vmem:[#allocation31_spill] sm:$0xff]  ;;  %v472_v56 = vld [vmem:[%s13262_s2 + $0x318] sm:$0xff] }
 0x238   : > { %7959 = vmatprep.subr.mxu1 %v14645_v41  ;;  %8347 = vmatprep.subr.mxu0 %v12357_v22  ;;  %v5819_v41 = vand.u32 4294901760, %v5818_v60  ;;  %v12482_v24 = vadd.f32 %v7475_v12, %v3592_v32  ;;  %v12495_v32 = vand.u32 4294901760, %v474_v38  ;;  %v14761_v12 = vld [vmem:[#allocation2_spill] sm:$0xff] }
 0x239   : > { %5226 = vmatmul.mubr.f32.gmra.mxu1 %v14745_v14  ;;  %5401 = vmatmul.mubr.f32.gmra.mxu0 %v14746_v9  ;;  %v7420_v19 = vpop.f32.mrf.mxu0 }
 0x23a   : > { %7960 = vmatpush3.msra.mxu1 %v11748_v39  ;;  %5406 = vmatprep.mubr.f32.mxu0 %v14748_v40  ;;  %v12474_v39 = vand.u32 4294901760, %v475_v63  ;;  %v7476_v30 = vpop.f32.mrf.mxu1  ;;  %14754 = vst [vmem:[#allocation94_spill] sm:$0xff] %v12495_v32  ;;  %v12517_v4 = vsub.f32 %v474_v38, %v12495_v32 }
 0x23b   : > { %7961 = vmatprep.subr.mxu1 %v14648_v26  ;;  %5559 = vmatprep.mubr.f32.mxu1 %v14738_v27  ;;  %v12480_v26 = vadd.f32 %v7419_v25, %v12275_v5  ;;  %v5839_v5 = vsub.f32 %v12442_v7, %v12467_v15  ;;  %v7421_v59 = vpop.f32.mrf.mxu0  ;;  %v14755_v27 = vld [vmem:[#allocation99_spill] sm:$0xff] }
 0x23c   : > { %7962 = vmatpush3.msra.mxu1 %v14650_v31  ;;  %8348 = vmatpush3.msra.mxu0 %v12357_v22  ;;  %14750 = vst [vmem:[#allocation89_spill] sm:$0xff] %v12474_v39  ;;  %v5832_v31 = vsub.f32 %v12429_v45, %v12455_v16  ;;  %v7477_v36 = vpop.f32.mrf.mxu1  ;;  %v12500_v23 = vsub.f32 %v475_v63, %v12474_v39  ;;  %v12534_v52 = vand.u32 4294901760, %v12517_v4  ;;  %v14777_v16 = vld [vmem:[#allocation40_spill] sm:$0xff] }
 0x23d   : > { %5408 = vmatmul.mubr.f32.gmra.mxu0 %v14751_v57  ;;  %5561 = vmatmul.mubr.f32.vlgmr.msra.gmra.mxu1 %v14741_v10  ;;  %v7422_v37 = vadd.f32 %v7421_v59, %v7420_v19  ;;  %v7478_v48 = vadd.f32 %v7477_v36, %v7476_v30  ;;  %v5846_v10 = vsub.f32 %v12470_v44, %v12493_v2  ;;  %v5840_v60 = vand.u32 4294901760, %v5839_v5 }
 0x23e   : > { %8386 = vmatprep.subr.mxu1 %v5819_v41  ;;  %8349 = vmatprep.subr.mxu0 %v12380_v61  ;;  %v5833_v35 = vand.u32 4294901760, %v5832_v31  ;;  %14760 = vst [vmem:[#allocation101_spill] sm:$0xff] %v12534_v52  ;;  %v1505_v36 = vsel %vm1500_vm2, %v316_v21, 0 }
 0x23f   : > { %8387 = vmatpush3.msra.mxu1 %v5819_v41  ;;  %5413 = vmatprep.mubr.f32.mxu0 %v14752_v34  ;;  %v12509_v46 = vadd.f32 %v7422_v37, %v12293_v18  ;;  %v12511_v43 = vadd.f32 %v7478_v48, %v3601_v62  ;;  %v7423_v0 = vpop.f32.mrf.mxu0  ;;  %v7479_v1 = vpop.f32.mrf.mxu1  ;;  %v12522_v18 = vand.u32 4294901760, %v12500_v23  ;;  %v5847_v50 = vand.u32 4294901760, %v5846_v10  ;;  %v309_v41 = vld [vmem:[%s9384_s15 + $0x30] sm:$0xff] }
 0x240   : > { %5566 = vmatprep.mubr.f32.mxu1 %v14744_v20  ;;  %8350 = vmatpush3.msra.mxu0 %v12380_v61  ;;  %v12524_v20 = vand.u32 4294901760, %v473_v28  ;;  %v1502_v59 = vsel %vm1500_vm2, %v309_v41, 0 }
 0x241   : > { %5415 = vmatmul.mubr.f32.gmra.mxu0 %v14755_v27  ;;  %5568 = vmatmul.mubr.f32.gmra.mxu1 %v14746_v9  ;;  %14757 = vst [vmem:[#allocation96_spill] sm:$0xff] %v12522_v18  ;;  %v7424_v62 = vpop.f32.mrf.mxu0  ;;  %v7480_v9 = vpop.f32.mrf.mxu1  ;;  %v5853_v38 = vsub.f32 %v12500_v23, %v12522_v18 }
 0x242   : > { %8388 = vmatprep.subr.mxu1 %v5826_v53  ;;  %8351 = vmatprep.subr.mxu0 %v12400_v3  ;;  %14758 = vst [vmem:[#allocation98_spill] sm:$0xff] %v12524_v20  ;;  %v7425_v14 = vadd.f32 %v7424_v62, %v7423_v0  ;;  %v7481_v63 = vadd.f32 %v7480_v9, %v7479_v1  ;;  %v470_v1 = vld [vmem:[%s13262_s2 + $0x308] sm:$0xff]  ;;  %v12579_v62 = vand.u32 4294901760, %v1502_v59  ;;  %v330_v9 = vld [vmem:[%s9384_s15 + $0xd8] sm:$0xff] }
 0x243   : > { %8389 = vmatpush3.msra.mxu1 %v5826_v53  ;;  %8352 = vmatpush3.msra.mxu0 %v12400_v3  ;;  %v12550_v31 = vsub.f32 %v473_v28, %v12524_v20  ;;  %v5854_v0 = vand.u32 4294901760, %v5853_v38  ;;  %v14767_v38 = vld [vmem:[#allocation71_spill] sm:$0xff] }
 0x244   : > { %5420 = vmatprep.mubr.f32.mxu0 %v14756_v13  ;;  %5573 = vmatprep.mubr.f32.mxu1 %v14748_v40  ;;  %v471_v40 = vld [vmem:[%s13262_s2 + $0x310] sm:$0xff]  ;;  %v12542_v25 = vadd.f32 %v7425_v14, %v12315_v49  ;;  %v12553_v19 = vadd.f32 %v7481_v63, %v12480_v26  ;;  %v7426_v30 = vpop.f32.mrf.mxu0  ;;  %v14763_v49 = vld [vmem:[#allocation37_spill] sm:$0xff]  ;;  %v5860_v26 = vsub.f32 %v12517_v4, %v12534_v52  ;;  %v12581_v14 = vand.u32 4294901760, %v1505_v36 }
 0x245   : > { %8390 = vmatprep.subr.mxu1 %v5833_v35  ;;  %5422 = vmatmul.mubr.f32.gmra.mxu0 %v14759_v11  ;;  %v7482_v53 = vpop.f32.mrf.mxu1  ;;  %v12558_v5 = vand.u32 4294901760, %v471_v40  ;;  %v12569_v10 = vand.u32 4294901760, %v12550_v31 }
 0x246   : > { %5575 = vmatmul.mubr.f32.gmra.mxu1 %v14751_v57  ;;  %8353 = vmatprep.subr.mxu0 %v12418_v8  ;;  %v12547_v57 = vand.u32 4294901760, %v472_v56  ;;  %v7427_v37 = vpop.f32.mrf.mxu0  ;;  %v12615_v52 = vsub.f32 %v1505_v36, %v12581_v14 }
 0x247   : > { %8391 = vmatpush3.msra.mxu1 %v5833_v35  ;;  %8354 = vmatpush3.msra.mxu0 %v12418_v8  ;;  %14764 = vst [vmem:[#allocation41_spill] sm:$0xff] %v12558_v5  ;;  %v7483_v48 = vpop.f32.mrf.mxu1  ;;  %v7428_v35 = vadd.f32 %v7427_v37, %v7426_v30  ;;  %14766 = vst [vmem:[#allocation60_spill] sm:$0xff] %v12569_v10 }
 0x248   : > { %8392 = vmatprep.subr.mxu1 %v5840_v60  ;;  %5427 = vmatprep.mubr.f32.mxu0 %v14761_v12  ;;  %14762 = vst [vmem:[#allocation104_spill] sm:$0xff] %v12547_v57  ;;  %v7484_v28 = vadd.f32 %v7483_v48, %v7482_v53  ;;  %v12597_v53 = vand.u32 4294901760, %v470_v1  ;;  %v337_v48 = vld [vmem:[%s9384_s15 + $0x110] sm:$0xff]  ;;  %14771 = vst [vmem:[#allocation19_spill] sm:$0xff] %v12615_v52 }
 0x249   : > { %5580 = vmatprep.mubr.f32.mxu1 %v14752_v34  ;;  %8393 = vmatpush3.msra.mxu1 %v5840_v60  ;;  %v323_v34 = vld [vmem:[%s9384_s15 + $0xa0] sm:$0xff]  ;;  %v12575_v60 = vsub.f32 %v472_v56, %v12547_v57  ;;  %v12585_v63 = vadd.f32 %v7428_v35, %v12333_v29  ;;  %v5861_v29 = vand.u32 4294901760, %v5860_v26 }
 0x24a   : > { %5429 = vmatmul.mubr.f32.gmra.mxu0 %v14763_v49  ;;  %5582 = vmatmul.mubr.f32.gmra.mxu1 %v14755_v27  ;;  %v14765_v27 = vld [vmem:[#allocation103_spill] sm:$0xff]  ;;  %v12588_v41 = vadd.f32 %v7484_v28, %v12509_v46  ;;  %v7429_v21 = vpop.f32.mrf.mxu0  ;;  %v1508_v56 = vsel %vm1500_vm2, %v323_v34, 0  ;;  %v7485_v30 = vpop.f32.mrf.mxu1  ;;  %v469_v46 = vld [vmem:[%s13262_s2 + $0x300] sm:$0xff]  ;;  %v12612_v28 = vsub.f32 %v1502_v59, %v12579_v62  ;;  %v14774_v59 = vld [vmem:[#allocation65_spill] sm:$0xff]  ;;  %v12632_v36 = vsub.f32 %v470_v1, %v12597_v53 }
 0x24b   : > { %8355 = vmatprep.subr.mxu0 %v12444_v51  ;;  %8394 = vmatprep.subr.mxu1 %v5847_v50  ;;  %v12606_v37 = vand.u32 4294901760, %v12575_v60  ;;  %v14769_v35 = vld [vmem:[#allocation58_spill] sm:$0xff]  ;;  %v12617_v18 = vand.u32 4294901760, %v1508_v56  ;;  %v14778_v1 = vld [vmem:[#allocation56_spill] sm:$0xff] }
 0x24c   : > { %8356 = vmatpush3.msra.mxu0 %v12444_v51  ;;  %5434 = vmatprep.mubr.f32.mxu0 %v14765_v27  ;;  %v7486_v34 = vpop.f32.mrf.mxu1  ;;  %14770 = vst [vmem:[#allocation47_spill] sm:$0xff] %v12612_v28  ;;  %14775 = vst [vmem:[#allocation76_spill] sm:$0xff] %v12632_v36 }
 0x24d   : > { %5587 = vmatprep.mubr.f32.mxu1 %v14756_v13  ;;  %8357 = vmatprep.subr.mxu0 %v12474_v39  ;;  %v12592_v13 = vsub.f32 %v471_v40, %v12558_v5  ;;  %v5867_v40 = vsub.f32 %v12550_v31, %v12569_v10  ;;  %14768 = vst [vmem:[#allocation48_spill] sm:$0xff] %v12606_v37 }
 0x24e   : > { %8395 = vmatpush3.msra.mxu1 %v5847_v50  ;;  %5436 = vmatmul.mubr.f32.gmra.mxu0 %v14767_v38  ;;  %v7430_v50 = vpop.f32.mrf.mxu0  ;;  %v7487_v10 = vadd.f32 %v7486_v34, %v7485_v30 }
 0x24f   : > { %5589 = vmatmul.mubr.f32.gmra.mxu1 %v14759_v11  ;;  %8358 = vmatpush3.msra.mxu0 %v12474_v39  ;;  %v1511_v11 = vsel %vm1500_vm2, %v330_v9, 0  ;;  %v7431_v26 = vadd.f32 %v7430_v50, %v7429_v21  ;;  %v12621_v9 = vand.u32 4294901760, %v469_v46  ;;  %v344_v50 = vld [vmem:[%s9384_s15 + $0x148] sm:$0xff]  ;;  %v7488_v15 = vpop.f32.mrf.mxu1 }
 0x250   : > { %8396 = vmatprep.subr.mxu1 %v5854_v0  ;;  %8359 = vmatprep.subr.mxu0 %v12495_v32  ;;  %v12634_v30 = vand.u32 4294901760, %v1511_v11  ;;  %v12639_v34 = vadd.f32 %v7487_v10, %v12542_v25  ;;  %v7432_v2 = vpop.f32.mrf.mxu0  ;;  %v12648_v25 = vsub.f32 %v1508_v56, %v12617_v18 }
 0x251   : > { %8397 = vmatpush3.msra.mxu1 %v5854_v0  ;;  %5441 = vmatprep.mubr.f32.mxu0 %v14769_v35  ;;  %14772 = vst [vmem:[#allocation95_spill] sm:$0xff] %v12621_v9  ;;  %v12624_v0 = vand.u32 4294901760, %v12592_v13  ;;  %v12627_v21 = vadd.f32 %v7431_v26, %v12359_v58  ;;  %v5874_v58 = vsub.f32 %v12575_v60, %v12606_v37  ;;  %v7489_v26 = vpop.f32.mrf.mxu1  ;;  %v351_v37 = vld [vmem:[%s9384_s15 + $0x180] sm:$0xff] }
 0x252   : > { %5594 = vmatprep.mubr.f32.mxu1 %v14761_v12  ;;  %8360 = vmatpush3.msra.mxu0 %v12495_v32  ;;  %v1514_v12 = vsel %vm1500_vm2, %v337_v48, 0  ;;  %14776 = vst [vmem:[#allocation34_spill] sm:$0xff] %v12639_v34  ;;  %v7433_v10 = vpop.f32.mrf.mxu0  ;;  %v12661_v48 = vand.u32 4294901760, %v12632_v36 }
 0x253   : > { %14773 = vst [vmem:[#allocation43_spill] sm:$0xff] %v12624_v0  ;;  %5443 = vmatmul.mubr.f32.gmra.mxu0 %v14774_v59  ;;  %5596 = vmatmul.mubr.f32.gmra.mxu1 %v14763_v49  ;;  %v5868_v49 = vand.u32 4294901760, %v5867_v40  ;;  %v12652_v55 = vand.u32 4294901760, %v1514_v12  ;;  %v7434_v42 = vadd.f32 %v7433_v10, %v7432_v2  ;;  %v7490_v40 = vadd.f32 %v7489_v26, %v7488_v15 }
 0x254   : > { %8398 = vmatprep.subr.mxu1 %v5861_v29  ;;  %8361 = vmatprep.subr.mxu0 %v12524_v20  ;;  %v5881_v56 = vsub.f32 %v12592_v13, %v12624_v0  ;;  %14779 = vst [vmem:[#allocation69_spill] sm:$0xff] %v12661_v48  ;;  %v5875_v15 = vand.u32 4294901760, %v5874_v58  ;;  %v358_v58 = vld [vmem:[%s9384_s15 + $0x1b8] sm:$0xff] }
 0x255   : > { %8399 = vmatpush3.msra.mxu1 %v5861_v29  ;;  %8362 = vmatpush3.msra.mxu0 %v12524_v20  ;;  %v1517_v29 = vsel %vm1500_vm2, %v344_v50, 0  ;;  %v12667_v20 = vsub.f32 %v469_v46, %v12621_v9  ;;  %v12672_v2 = vadd.f32 %v7434_v42, %v12385_v33  ;;  %v12675_v50 = vadd.f32 %v7490_v40, %v12585_v63  ;;  %v7529_v33 = vpop.f32.mrf.mxu0 }
 0x256   : > { %5448 = vmatprep.mubr.f32.mxu0 %v14777_v16  ;;  %5601 = vmatprep.mubr.f32.mxu1 %v14765_v27  ;;  %v12664_v27 = vsub.f32 %v1511_v11, %v12634_v30  ;;  %v14782_v11 = vand.u32 4294901760, %v12612_v28  ;;  %v12682_v26 = vand.u32 4294901760, %v1517_v29  ;;  %v7491_v0 = vpop.f32.mrf.mxu1  ;;  %v14783_v42 = vand.u32 4294901760, %v12615_v52 }
 0x257   : > { %8363 = vmatprep.subr.mxu0 %v12547_v57  ;;  %5450 = vmatmul.mubr.f32.gmra.mxu0 %v14778_v1  ;;  %14781 = vst [vmem:[#allocation100_spill] sm:$0xff] %v12675_v50  ;;  %v12691_v40 = vsub.f32 %v1514_v12, %v12652_v55  ;;  %v5882_v46 = vand.u32 4294901760, %v5881_v56  ;;  %v7530_v50 = vpop.f32.mrf.mxu0 }
 0x258   : > { %14780 = vst [vmem:[#allocation32_spill] sm:$0xff] %v12664_v27  ;;  %5603 = vmatmul.mubr.f32.gmra.mxu1 %v14767_v38  ;;  %8364 = vmatpush3.msra.mxu0 %v12547_v57  ;;  %v5709_v10 = vsub.f32 %v12612_v28, %v14782_v11  ;;  %v1520_v38 = vsel %vm1500_vm2, %v351_v37, 0  ;;  %v5719_v63 = vsub.f32 %v12615_v52, %v14783_v42  ;;  %v14784_v11 = vld [vmem:[#allocation74_spill] sm:$0xff]  ;;  %v7492_v57 = vpop.f32.mrf.mxu1  ;;  %v1523_v42 = vsel %vm1500_vm2, %v358_v58, 0  ;;  %v14786_v52 = vld [vmem:[#allocation77_spill] sm:$0xff] }
 0x259   : > { %8400 = vmatprep.subr.mxu1 %v5868_v49  ;;  %8365 = vmatprep.subr.mxu0 %v12558_v5  ;;  %v5888_v37 = vsub.f32 %v12632_v36, %v12661_v48  ;;  %v12702_v12 = vand.u32 4294901760, %v1520_v38  ;;  %v7531_v56 = vadd.f32 %v7530_v50, %v7529_v33  ;;  %v12711_v32 = vsub.f32 %v1517_v29, %v12682_v26  ;;  %v365_v36 = vld [vmem:[%s9384_s15 + $0x1f0] sm:$0xff]  ;;  %v7532_v39 = vpop.f32.mrf.mxu0 }
 0x25a   : > { %8401 = vmatpush3.msra.mxu1 %v5868_v49  ;;  %8366 = vmatpush3.msra.mxu0 %v12558_v5  ;;  %v12699_v5 = vand.u32 4294901760, %v12667_v20  ;;  %v5710_v48 = vand.u32 4294901760, %v5709_v10  ;;  %v14787_v49 = vand.u32 4294901760, %v12648_v25  ;;  %v7494_v34 = vpop.f32.mrf.mxu1  ;;  %v14788_v10 = vand.u32 4294901760, %v12664_v27 }
 0x25b   : > { %5455 = vmatprep.mubr.f32.mxu0 %v14784_v11  ;;  %5608 = vmatprep.mubr.f32.mxu1 %v14769_v35  ;;  %v7493_v35 = vadd.f32 %v7492_v57, %v7491_v0  ;;  %v5720_v57 = vand.u32 4294901760, %v5719_v63  ;;  %v4030_v50 = vadd.f32 %v7531_v56, %v12412_v17  ;;  %v5889_v29 = vand.u32 4294901760, %v5888_v37  ;;  %v372_v63 = vld [vmem:[%s9384_s15 + $0x228] sm:$0xff]  ;;  %v7533_v0 = vpop.f32.mrf.mxu0 }
 0x25c   : > { %14785 = vst [vmem:[#allocation28_spill] sm:$0xff] %v12699_v5  ;;  %8367 = vmatprep.subr.mxu0 %v12597_v53  ;;  %8402 = vmatprep.subr.mxu1 %v5875_v15  ;;  %v5729_v28 = vsub.f32 %v12648_v25, %v14787_v49  ;;  %v5739_v58 = vsub.f32 %v12664_v27, %v14788_v10  ;;  %v7495_v49 = vpop.f32.mrf.mxu1  ;;  %v5758_v10 = vand.u32 4294901760, %v12711_v32 }
 0x25d   : > { %5457 = vmatmul.mubr.f32.gmra.mxu0 %v14786_v52  ;;  %5610 = vmatmul.mubr.f32.gmra.mxu1 %v14774_v59  ;;  %v12717_v59 = vadd.f32 %v7493_v35, %v12627_v21  ;;  %v5895_v33 = vsub.f32 %v12667_v20, %v12699_v5  ;;  %v12732_v17 = vsub.f32 %v1520_v38, %v12702_v12  ;;  %v1526_v21 = vsel %vm1500_vm2, %v365_v36, 0  ;;  %v7535_v5 = vpop.f32.mrf.mxu0 }
 0x25e   : > { %8368 = vmatpush3.msra.mxu0 %v12597_v53  ;;  %8403 = vmatpush3.msra.mxu1 %v5875_v15  ;;  %v12726_v15 = vand.u32 4294901760, %v1523_v42  ;;  %v7496_v37 = vadd.f32 %v7495_v49, %v7494_v34  ;;  %v7534_v35 = vadd.f32 %v7533_v0, %v7532_v39  ;;  %v5730_v56 = vand.u32 4294901760, %v5729_v28  ;;  %v7591_v27 = vpop.f32.mrf.mxu1 }
 0x25f   : > { %8369 = vmatprep.subr.mxu0 %v12621_v9  ;;  %8404 = vmatprep.subr.mxu1 %v5882_v46  ;;  %v5896_v28 = vand.u32 4294901760, %v5895_v33  ;;  %v5740_v0 = vand.u32 4294901760, %v5739_v58 }
 0x260   : > { %8370 = vmatpush3.msra.mxu0 %v12621_v9  ;;  %5615 = vmatprep.mubr.f32.mxu1 %v14777_v16  ;;  %v14789_v16 = vand.u32 4294901760, %v12691_v40  ;;  %v1529_v9 = vsel %vm1500_vm2, %v372_v63, 0  ;;  %v12743_v36 = vadd.f32 %v7496_v37, %v12672_v2  ;;  %v4037_v39 = vadd.f32 %v7534_v35, %v12447_v6 }
 0x261   : > { %8371 = vmatprep.mubr.f32.mxu0 %v5710_v48  ;;  %8405 = vmatpush3.msra.mxu1 %v5882_v46  ;;  %v12747_v34 = vsub.f32 %v1523_v42, %v12726_v15  ;;  %v12749_v48 = vand.u32 4294901760, %v1526_v21  ;;  %v7592_v46 = vpop.f32.mrf.mxu1  ;;  %v5768_v2 = vand.u32 4294901760, %v12732_v17  ;;  %v5759_v6 = vsub.f32 %v12711_v32, %v5758_v10 }
 0x262   : > { %8425 = vmatprep.subr.mxu0 %v12378_v54  ;;  %5617 = vmatmul.mubr.f32.gmra.mxu1 %v14778_v1  ;;  %v5749_v38 = vsub.f32 %v12691_v40, %v14789_v16  ;;  %v7536_v1 = vpop.f32.mrf.mxu0  ;;  %v7593_v49 = vadd.f32 %v7592_v46, %v7591_v27  ;;  %v12758_v42 = vand.u32 4294901760, %v1529_v9 }
 0x263   : > { %8372 = vmatmul.mubr.f32.vlgmr.msra.gmra.mxu0 %v5720_v57  ;;  %8406 = vmatprep.subr.mxu1 %v5889_v29  ;;  %v7537_v63 = vadd.f32 %v7536_v1, %v7535_v5  ;;  %v7594_v5 = vpop.f32.mrf.mxu1  ;;  %v5778_v27 = vand.u32 4294901760, %v12747_v34  ;;  %v12768_v33 = vsub.f32 %v1526_v21, %v12749_v48 }
 0x264   : > { %8426 = vmatpush3.msra.mxu0 %v12378_v54  ;;  %5622 = vmatprep.mubr.f32.mxu1 %v14784_v11  ;;  %v5750_v54 = vand.u32 4294901760, %v5749_v38  ;;  %v12762_v57 = vadd.f32 %v7593_v49, %v4030_v50  ;;  %v7538_v58 = vpop.f32.mrf.mxu0  ;;  %v12775_v37 = vsub.f32 %v1529_v9, %v12758_v42 }
 0x265   : > { %8427 = vmatprep.subr.mxu0 %v12409_v47  ;;  %8374 = vmatprep.mubr.f32.mxu0 %v5730_v56  ;;  %v4044_v11 = vadd.f32 %v7537_v63, %v12482_v24  ;;  %v7595_v50 = vpop.f32.mrf.mxu1  ;;  %v5779_v21 = vsub.f32 %v12747_v34, %v5778_v27 }
 0x266   : > { %8428 = vmatpush3.msra.mxu0 %v12409_v47  ;;  %8407 = vmatpush3.msra.mxu1 %v5889_v29  ;;  %v5769_v47 = vsub.f32 %v12732_v17, %v5768_v2  ;;  %v7539_v24 = vpop.f32.mrf.mxu0  ;;  %v5760_v29 = vand.u32 4294901760, %v5759_v6  ;;  %v7596_v35 = vadd.f32 %v7595_v50, %v7594_v5 }
 0x267   : > { %8429 = vmatprep.subr.mxu0 %v12429_v45  ;;  %5624 = vmatmul.mubr.f32.gmra.mxu1 %v14786_v52  ;;  %v7540_v52 = vadd.f32 %v7539_v24, %v7538_v58 }
 0x268   : > { %8375 = vmatmul.mubr.f32.gmra.mxu0 %v5740_v0  ;;  %8408 = vmatprep.subr.mxu1 %v5896_v28  ;;  %v12785_v16 = vadd.f32 %v7596_v35, %v4037_v39  ;;  %v7541_v9 = vpop.f32.mrf.mxu0  ;;  %v7597_v38 = vpop.f32.mrf.mxu1  ;;  %v5780_v0 = vand.u32 4294901760, %v5779_v21 }
 0x269   : > { %8430 = vmatpush3.msra.mxu0 %v12429_v45  ;;  %8409 = vmatpush3.msra.mxu1 %v5896_v28  ;;  %v5788_v45 = vand.u32 4294901760, %v12768_v33  ;;  %v4051_v56 = vadd.f32 %v7540_v52, %v12511_v43  ;;  %v5798_v28 = vand.u32 4294901760, %v12775_v37 }
 0x26a   : > { %8431 = vmatprep.subr.mxu0 %v12442_v7  ;;  %8377 = vmatprep.mubr.f32.mxu0 %v5750_v54  ;;  %v7542_v1 = vpop.f32.mrf.mxu0  ;;  %v7598_v46 = vpop.f32.mrf.mxu1 }
 0x26b   : > { %8432 = vmatpush3.msra.mxu0 %v12442_v7  ;;  %8410 = vmatprep.mubr.f32.mxu1 %v12579_v62  ;;  %v5770_v7 = vand.u32 4294901760, %v5769_v47  ;;  %v7543_v43 = vadd.f32 %v7542_v1, %v7541_v9  ;;  %v7599_v39 = vadd.f32 %v7598_v46, %v7597_v38  ;;  %v5789_v63 = vsub.f32 %v12768_v33, %v5788_v45  ;;  %v14791_v9 = vld [vmem:[#allocation34_spill] sm:$0xff] }
 0x26c   : > { %8433 = vmatprep.subr.mxu0 %v12470_v44  ;;  %8464 = vmatprep.subr.mxu1 %v12357_v22  ;;  %v5799_v6 = vsub.f32 %v12775_v37, %v5798_v28 }
 0x26d   : > { %8378 = vmatmul.mubr.f32.gmra.mxu0 %v5760_v29  ;;  %8411 = vmatmul.mubr.f32.vlgmr.msra.gmra.mxu1 %v12581_v14  ;;  %v4058_v49 = vadd.f32 %v7543_v43, %v12553_v19  ;;  %v14793_v43 = vld [vmem:[#allocation94_spill] sm:$0xff] }
 0x26e   : > { %8434 = vmatpush3.msra.mxu0 %v12470_v44  ;;  %8465 = vmatpush3.msra.mxu1 %v12357_v22  ;;  %v12801_v44 = vadd.f32 %v7599_v39, %v4044_v11  ;;  %v7544_v54 = vpop.f32.mrf.mxu0  ;;  %v5800_v24 = vand.u32 4294901760, %v5799_v6  ;;  %v14795_v6 = vld [vmem:[#allocation47_spill] sm:$0xff] }
 0x26f   : > { %8435 = vmatprep.subr.mxu0 %v12500_v23  ;;  %8466 = vmatprep.subr.mxu1 %v12380_v61  ;;  %v7600_v58 = vpop.f32.mrf.mxu1 }
 0x270   : > { %8436 = vmatpush3.msra.mxu0 %v12500_v23  ;;  %8467 = vmatpush3.msra.mxu1 %v12380_v61  ;;  %v5790_v23 = vand.u32 4294901760, %v5789_v63  ;;  %v7545_v19 = vpop.f32.mrf.mxu0 }
 0x271   : > { %8380 = vmatprep.mubr.f32.mxu0 %v5770_v7  ;;  %8413 = vmatprep.mubr.f32.mxu1 %v12617_v18  ;;  %v7601_v11 = vpop.f32.mrf.mxu1  ;;  %v7546_v5 = vadd.f32 %v7545_v19, %v7544_v54  ;;  %v14796_v54 = vld [vmem:[#allocation100_spill] sm:$0xff] }
 0x272   : > { %8437 = vmatprep.subr.mxu0 %v12517_v4  ;;  %8468 = vmatprep.subr.mxu1 %v12400_v3  ;;  %v7602_v47 = vadd.f32 %v7601_v11, %v7600_v58 }
 0x273   : > { %8381 = vmatmul.mubr.f32.gmra.mxu0 %v5780_v0  ;;  %8414 = vmatmul.mubr.f32.gmra.mxu1 %v12634_v30  ;;  %v4065_v50 = vadd.f32 %v7546_v5, %v12588_v41  ;;  %v14797_v5 = vld [vmem:[#allocation19_spill] sm:$0xff] }
 0x274   : > { %8438 = vmatpush3.msra.mxu0 %v12517_v4  ;;  %8469 = vmatpush3.msra.mxu1 %v12400_v3  ;;  %v12817_v29 = vadd.f32 %v7602_v47, %v4051_v56  ;;  %v7547_v52 = vpop.f32.mrf.mxu0  ;;  %v7603_v4 = vpop.f32.mrf.mxu1  ;;  %v14790_v56 = vld [vmem:[#allocation89_spill] sm:$0xff]  ;;  %v14798_v47 = vld [vmem:[#allocation104_spill] sm:$0xff] }
 0x275   : > { %8439 = vmatprep.subr.mxu0 %v12550_v31  ;;  %8470 = vmatprep.subr.mxu1 %v12418_v8 }
 0x276   : > { %8440 = vmatpush3.msra.mxu0 %v12550_v31  ;;  %8471 = vmatpush3.msra.mxu1 %v12418_v8  ;;  %v7548_v35 = vpop.f32.mrf.mxu0  ;;  %v7604_v21 = vpop.f32.mrf.mxu1 }
 0x277   : > { %8383 = vmatprep.mubr.f32.mxu0 %v5790_v23  ;;  %8416 = vmatprep.mubr.f32.mxu1 %v12652_v55  ;;  %v7549_v31 = vadd.f32 %v7548_v35, %v7547_v52  ;;  %v7605_v41 = vadd.f32 %v7604_v21, %v7603_v4  ;;  %v14799_v52 = vld [vmem:[#allocation81_spill] sm:$0xff] }
 0x278   : > { %8441 = vmatprep.subr.mxu0 %v12575_v60  ;;  %8472 = vmatprep.subr.mxu1 %v12444_v51  ;;  %v14800_v35 = vld [vmem:[#allocation41_spill] sm:$0xff] }
 0x279   : > { %8384 = vmatmul.mubr.f32.gmra.mxu0 %v5800_v24  ;;  %8417 = vmatmul.mubr.f32.gmra.mxu1 %v12682_v26  ;;  %v4072_v38 = vadd.f32 %v7549_v31, %v14791_v9  ;;  %v12830_v7 = vadd.f32 %v7605_v41, %v4058_v49  ;;  %v7550_v1 = vpop.f32.mrf.mxu0  ;;  %v7606_v46 = vpop.f32.mrf.mxu1  ;;  %v14794_v49 = vld [vmem:[#allocation98_spill] sm:$0xff] }
 0x27a   : > { %8442 = vmatpush3.msra.mxu0 %v12575_v60  ;;  %8473 = vmatpush3.msra.mxu1 %v12444_v51  ;;  %v14792_v60 = vld [vmem:[#allocation76_spill] sm:$0xff]  ;;  %v14801_v31 = vld [vmem:[#allocation82_spill] sm:$0xff] }
 0x27b   : > { %8443 = vmatprep.subr.mxu0 %v12592_v13  ;;  %8474 = vmatprep.subr.mxu1 %v14790_v56  ;;  %v7551_v39 = vpop.f32.mrf.mxu0  ;;  %v7607_v0 = vpop.f32.mrf.mxu1 }
 0x27c   : > { %8444 = vmatpush3.msra.mxu0 %v12592_v13  ;;  %8475 = vmatpush3.msra.mxu1 %v14790_v56  ;;  %v7552_v13 = vadd.f32 %v7551_v39, %v7550_v1  ;;  %v7608_v63 = vadd.f32 %v7607_v0, %v7606_v46  ;;  %v14802_v46 = vld [vmem:[#allocation32_spill] sm:$0xff] }
 0x27d   : > { %8419 = vmatprep.mubr.f32.mxu1 %v12702_v12  ;;  %8445 = vmatprep.subr.mxu0 %v14792_v60 }
 0x27e   : > { %8476 = vmatprep.subr.mxu1 %v14793_v43  ;;  %8420 = vmatmul.mubr.f32.gmra.mxu1 %v12726_v15  ;;  %v4079_v58 = vadd.f32 %v7552_v13, %v14796_v54  ;;  %v12843_v23 = vadd.f32 %v7608_v63, %v4065_v50  ;;  %v14805_v63 = vld [vmem:[#allocation87_spill] sm:$0xff] }
 0x27f   : > { %8446 = vmatpush3.msra.mxu0 %v14792_v60  ;;  %8477 = vmatpush3.msra.mxu1 %v14793_v43  ;;  %v7609_v11 = vpop.f32.mrf.mxu1  ;;  %v14803_v60 = vld [vmem:[#allocation85_spill] sm:$0xff] }
 0x280   : > { %8447 = vmatprep.subr.mxu0 %v12667_v20  ;;  %8478 = vmatprep.subr.mxu1 %v14794_v49  ;;  %v7553_v19 = vpop.f32.mrf.mxu0 }
 0x281   : > { %8448 = vmatpush3.msra.mxu0 %v12667_v20  ;;  %8449 = vmatprep.mubr.f32.mxu0 %v14795_v6  ;;  %v7610_v4 = vpop.f32.mrf.mxu1 }
 0x282   : > { %8479 = vmatpush3.msra.mxu1 %v14794_v49  ;;  %8422 = vmatprep.mubr.f32.mxu1 %v12749_v48  ;;  %v7554_v24 = vpop.f32.mrf.mxu0  ;;  %v7611_v50 = vadd.f32 %v7610_v4, %v7609_v11  ;;  %v14806_v11 = vand.u32 4294901760, %v14795_v6  ;;  %v14808_v4 = vld [vmem:[#allocation91_spill] sm:$0xff] }
 0x283   : > { %8450 = vmatmul.mubr.f32.vlgmr.msra.gmra.mxu0 %v14797_v5  ;;  %8480 = vmatprep.subr.mxu1 %v14798_v47  ;;  %v7555_v20 = vadd.f32 %v7554_v24, %v7553_v19 }
 0x284   : > { %8503 = vmatprep.subr.mxu0 %v14799_v52  ;;  %8423 = vmatmul.mubr.f32.gmra.mxu1 %v12758_v42  ;;  %v12858_v41 = vadd.f32 %v7611_v50, %v4072_v38  ;;  %v14804_v38 = vld [vmem:[#allocation95_spill] sm:$0xff] }
 0x285   : > { %8481 = vmatpush3.msra.mxu1 %v14798_v47  ;;  %8504 = vmatpush3.msra.mxu0 %v14799_v52  ;;  %v4086_v21 = vadd.f32 %v7555_v20, %v12717_v59  ;;  %v14807_v20 = vand.u32 4294901760, %v14797_v5  ;;  %v14810_v5 = vand.u32 4294901760, %v12648_v25 }
 0x286   : > { %8482 = vmatprep.subr.mxu1 %v14800_v35  ;;  %8505 = vmatprep.subr.mxu0 %v14801_v31  ;;  %v7612_v1 = vpop.f32.mrf.mxu1 }
 0x287   : > { %8452 = vmatprep.mubr.f32.mxu0 %v12648_v25  ;;  %8483 = vmatpush3.msra.mxu1 %v14800_v35  ;;  %v7556_v9 = vpop.f32.mrf.mxu0 }
 0x288   : > { %8506 = vmatpush3.msra.mxu0 %v14801_v31  ;;  %8484 = vmatprep.subr.mxu1 %v12597_v53  ;;  %v7613_v0 = vpop.f32.mrf.mxu1  ;;  %v14809_v31 = vld [vmem:[#allocation96_spill] sm:$0xff] }
 0x289   : > { %8453 = vmatmul.mubr.f32.gmra.mxu0 %v14802_v46  ;;  %8507 = vmatprep.subr.mxu0 %v14803_v60  ;;  %v7557_v39 = vpop.f32.mrf.mxu0  ;;  %v7614_v13 = vadd.f32 %v7613_v0, %v7612_v1 }
 0x28a   : > { %8485 = vmatpush3.msra.mxu1 %v12597_v53  ;;  %8508 = vmatpush3.msra.mxu0 %v14803_v60  ;;  %v7558_v59 = vadd.f32 %v7557_v39, %v7556_v9 }
 0x28b   : > { %8486 = vmatprep.subr.mxu1 %v14804_v38  ;;  %8509 = vmatprep.subr.mxu0 %v14805_v63  ;;  %v12871_v19 = vadd.f32 %v7614_v13, %v4079_v58 }
 0x28c   : > { %8455 = vmatprep.mubr.f32.mxu0 %v12691_v40  ;;  %8487 = vmatpush3.msra.mxu1 %v14804_v38  ;;  %v4093_v54 = vadd.f32 %v7558_v59, %v12743_v36  ;;  %v7615_v24 = vpop.f32.mrf.mxu1  ;;  %v14811_v59 = vand.u32 4294901760, %v14802_v46 }
 0x28d   : > { %8488 = vmatprep.mubr.f32.mxu1 %v14806_v11  ;;  %8510 = vmatpush3.msra.mxu0 %v14805_v63  ;;  %v7653_v52 = vpop.f32.mrf.mxu0  ;;  %v14812_v11 = vld [vmem:[#allocation101_spill] sm:$0xff] }
 0x28e   : > { %8456 = vmatmul.mubr.f32.gmra.mxu0 %v12711_v32  ;;  %8489 = vmatmul.mubr.f32.vlgmr.msra.gmra.mxu1 %v14807_v20  ;;  %v7616_v50 = vpop.f32.mrf.mxu1  ;;  %v14814_v20 = vand.u32 4294901760, %v12691_v40 }
 0x28f   : > { %8511 = vmatprep.subr.mxu0 %v14808_v4  ;;  %8542 = vmatprep.subr.mxu1 %v12357_v22  ;;  %v7654_v36 = vpop.f32.mrf.mxu0  ;;  %v7617_v6 = vadd.f32 %v7616_v50, %v7615_v24  ;;  %v14813_v24 = vld [vmem:[#allocation60_spill] sm:$0xff] }
 0x290   : > { %8512 = vmatpush3.msra.mxu0 %v14808_v4  ;;  %8543 = vmatpush3.msra.mxu1 %v12357_v22  ;;  %v7655_v58 = vadd.f32 %v7654_v36, %v7653_v52 }
 0x291   : > { %8513 = vmatprep.subr.mxu0 %v14809_v31  ;;  %8544 = vmatprep.subr.mxu1 %v12380_v61  ;;  %v7618_v9 = vpop.f32.mrf.mxu1  ;;  %v12888_v60 = vadd.f32 %v7617_v6, %v4086_v21  ;;  %v14815_v6 = vld [vmem:[#allocation48_spill] sm:$0xff] }
 0x292   : > { %v7656_v1 = vpop.f32.mrf.mxu0  ;;  %8458 = vmatprep.mubr.f32.mxu0 %v12732_v17  ;;  %8491 = vmatprep.mubr.f32.mxu1 %v14810_v5  ;;  %v4372_v39 = vadd.f32 %v7655_v58, %v12762_v57  ;;  %v14816_v58 = vld [vmem:[#allocation43_spill] sm:$0xff] }
 0x293   : > { %8514 = vmatpush3.msra.mxu0 %v14809_v31  ;;  %8545 = vmatpush3.msra.mxu1 %v12380_v61  ;;  %v7619_v22 = vpop.f32.mrf.mxu1 }
 0x294   : > { %v7657_v0 = vpop.f32.mrf.mxu0  ;;  %8459 = vmatmul.mubr.f32.gmra.mxu0 %v12747_v34  ;;  %8492 = vmatmul.mubr.f32.gmra.mxu1 %v14811_v59  ;;  %v7620_v13 = vadd.f32 %v7619_v22, %v7618_v9 }
 0x295   : > { %v7658_v63 = vadd.f32 %v7657_v0, %v7656_v1  ;;  %8515 = vmatprep.subr.mxu0 %v14812_v11  ;;  %8546 = vmatprep.subr.mxu1 %v12400_v3  ;;  %v7715_v21 = vpop.f32.mrf.mxu1 }
 0x296   : > { %v7659_v25 = vpop.f32.mrf.mxu0  ;;  %8516 = vmatpush3.msra.mxu0 %v14812_v11  ;;  %8547 = vmatpush3.msra.mxu1 %v12400_v3  ;;  %v12900_v61 = vadd.f32 %v7620_v13, %v4093_v54 }
 0x297   : > { %v4387_v57 = vadd.f32 %v7658_v63, %v12785_v16  ;;  %8517 = vmatprep.subr.mxu0 %v14813_v24  ;;  %8548 = vmatprep.subr.mxu1 %v12418_v8  ;;  %v7716_v52 = vpop.f32.mrf.mxu1 }
 0x298   : > { %v7660_v46 = vpop.f32.mrf.mxu0  ;;  %8461 = vmatprep.mubr.f32.mxu0 %v12768_v33  ;;  %8494 = vmatprep.mubr.f32.mxu1 %v14814_v20  ;;  %v7717_v50 = vadd.f32 %v7716_v52, %v7715_v21 }
 0x299   : > { %v7661_v4 = vadd.f32 %v7660_v46, %v7659_v25  ;;  %8518 = vmatpush3.msra.mxu0 %v14813_v24  ;;  %8549 = vmatpush3.msra.mxu1 %v12418_v8 }
 0x29a   : > { %8462 = vmatmul.mubr.f32.gmra.mxu0 %v12775_v37  ;;  %8495 = vmatmul.mubr.f32.gmra.mxu1 %v5758_v10  ;;  %v12914_v16 = vadd.f32 %v7717_v50, %v4372_v39  ;;  %v7662_v54 = vpop.f32.mrf.mxu0  ;;  %v7718_v36 = vpop.f32.mrf.mxu1 }
 0x29b   : > { %v4402_v3 = vadd.f32 %v7661_v4, %v12801_v44  ;;  %8519 = vmatprep.subr.mxu0 %v14815_v6  ;;  %8550 = vmatprep.subr.mxu1 %v12444_v51  ;;  %v14817_v44 = vld [vmem:[#allocation69_spill] sm:$0xff] }
 0x29c   : > { %8520 = vmatpush3.msra.mxu0 %v14815_v6  ;;  %8551 = vmatpush3.msra.mxu1 %v12444_v51  ;;  %v7663_v8 = vpop.f32.mrf.mxu0  ;;  %v7719_v40 = vpop.f32.mrf.mxu1 }
 0x29d   : > { %8521 = vmatprep.subr.mxu0 %v14816_v58  ;;  %8552 = vmatprep.subr.mxu1 %v14790_v56  ;;  %v7664_v32 = vadd.f32 %v7663_v8, %v7662_v54  ;;  %v7720_v10 = vadd.f32 %v7719_v40, %v7718_v36 }
 0x29e   : > { %8497 = vmatprep.mubr.f32.mxu1 %v5768_v2  ;;  %8522 = vmatpush3.msra.mxu0 %v14816_v58 }
 0x29f   : > { %8553 = vmatpush3.msra.mxu1 %v14790_v56  ;;  %8523 = vmatprep.subr.mxu0 %v14817_v44  ;;  %v4417_v31 = vadd.f32 %v7664_v32, %v12817_v29  ;;  %v12928_v51 = vadd.f32 %v7720_v10, %v4387_v57  ;;  %v7665_v9 = vpop.f32.mrf.mxu0  ;;  %v7721_v1 = vpop.f32.mrf.mxu1  ;;  %v14818_v56 = vld [vmem:[#allocation28_spill] sm:$0xff] }
 0x2a0   : > { %8498 = vmatmul.mubr.f32.gmra.mxu1 %v5778_v27  ;;  %8554 = vmatprep.subr.mxu1 %v14793_v43 }
 0x2a1   : > { %8524 = vmatpush3.msra.mxu0 %v14817_v44  ;;  %8555 = vmatpush3.msra.mxu1 %v14793_v43  ;;  %v7666_v17 = vpop.f32.mrf.mxu0  ;;  %v7722_v2 = vpop.f32.mrf.mxu1 }
 0x2a2   : > { %8525 = vmatprep.subr.mxu0 %v14818_v56  ;;  %8556 = vmatprep.subr.mxu1 %v14794_v49  ;;  %v7667_v29 = vadd.f32 %v7666_v17, %v7665_v9  ;;  %v7723_v5 = vadd.f32 %v7722_v2, %v7721_v1 }
 0x2a3   : > { %8500 = vmatprep.mubr.f32.mxu1 %v5788_v45  ;;  %8526 = vmatpush3.msra.mxu0 %v14818_v56 }
 0x2a4   : > { %8527 = vmatprep.mubr.f32.mxu0 %v12579_v62  ;;  %8557 = vmatpush3.msra.mxu1 %v14794_v49  ;;  %v4432_v34 = vadd.f32 %v7667_v29, %v12830_v7  ;;  %v12943_v27 = vadd.f32 %v7723_v5, %v4402_v3 }
 0x2a5   : > { %8501 = vmatmul.mubr.f32.gmra.mxu1 %v5798_v28  ;;  %8528 = vmatmul.mubr.f32.vlgmr.msra.gmra.mxu0 %v12581_v14  ;;  %v7668_v43 = vpop.f32.mrf.mxu0  ;;  %v7724_v39 = vpop.f32.mrf.mxu1 }
 0x2a6   : > { %8558 = vmatprep.subr.mxu1 %v14798_v47  ;;  %8530 = vmatprep.mubr.f32.mxu0 %v12617_v18 }
 0x2a7   : > { %8559 = vmatpush3.msra.mxu1 %v14798_v47  ;;  %8566 = vmatprep.mubr.f32.mxu1 %v12579_v62  ;;  %v7669_v33 = vpop.f32.mrf.mxu0  ;;  %v7725_v45 = vpop.f32.mrf.mxu1 }
 0x2a8   : > { %8560 = vmatprep.subr.mxu1 %v14800_v35  ;;  %v7670_v7 = vadd.f32 %v7669_v33, %v7668_v43  ;;  %v7726_v49 = vadd.f32 %v7725_v45, %v7724_v39 }
 0x2a9   : > { %8561 = vmatpush3.msra.mxu1 %v14800_v35  ;;  %8531 = vmatmul.mubr.f32.gmra.mxu0 %v12634_v30 }
 0x2aa   : > { %8562 = vmatprep.subr.mxu1 %v12597_v53  ;;  %8533 = vmatprep.mubr.f32.mxu0 %v12652_v55  ;;  %v4447_v37 = vadd.f32 %v7670_v7, %v12843_v23  ;;  %v12958_v28 = vadd.f32 %v7726_v49, %v4417_v31  ;;  %v7671_v47 = vpop.f32.mrf.mxu0 }
 0x2ab   : > { %8563 = vmatpush3.msra.mxu1 %v12597_v53  ;;  %v7727_v62 = vpop.f32.mrf.mxu1 }
 0x2ac   : > { %8564 = vmatprep.subr.mxu1 %v14804_v38  ;;  %v7672_v22 = vpop.f32.mrf.mxu0 }
 0x2ad   : > { %8565 = vmatpush3.msra.mxu1 %v14804_v38  ;;  %8534 = vmatmul.mubr.f32.gmra.mxu0 %v12682_v26  ;;  %v7673_v35 = vadd.f32 %v7672_v22, %v7671_v47  ;;  %v7728_v0 = vpop.f32.mrf.mxu1 }
 0x2ae   : > { %8567 = vmatmul.mubr.f32.vlgmr.msra.gmra.mxu1 %v12581_v14  ;;  %8536 = vmatprep.mubr.f32.mxu0 %v12702_v12  ;;  %v7729_v23 = vadd.f32 %v7728_v0, %v7727_v62 }
 0x2af   : > { %8569 = vmatprep.mubr.f32.mxu1 %v12617_v18  ;;  %v4462_v59 = vadd.f32 %v7673_v35, %v12858_v41 }
 0x2b0   : > { %v12968_v53 = vadd.f32 %v7729_v23, %v4432_v34  ;;  %v7674_v13 = vpop.f32.mrf.mxu0  ;;  %v7730_v63 = vpop.f32.mrf.mxu1 }
 0x2b1   : > { %8537 = vmatmul.mubr.f32.gmra.mxu0 %v12726_v15 }
 0x2b2   : > { %8570 = vmatmul.mubr.f32.gmra.mxu1 %v12634_v30  ;;  %8539 = vmatprep.mubr.f32.mxu0 %v12749_v48  ;;  %v7675_v38 = vpop.f32.mrf.mxu0  ;;  %v7731_v11 = vpop.f32.mrf.mxu1 }
 0x2b3   : > { %8572 = vmatprep.mubr.f32.mxu1 %v12652_v55  ;;  %v7676_v14 = vadd.f32 %v7675_v38, %v7674_v13  ;;  %v7732_v25 = vadd.f32 %v7731_v11, %v7730_v63 }
 0x2b5   : > { %8540 = vmatmul.mubr.f32.gmra.mxu0 %v12758_v42  ;;  %v4477_v18 = vadd.f32 %v7676_v14, %v12871_v19  ;;  %v12976_v41 = vadd.f32 %v7732_v25, %v4447_v37  ;;  %v7677_v21 = vpop.f32.mrf.mxu0 }
 0x2b6   : > { %8573 = vmatmul.mubr.f32.gmra.mxu1 %v12682_v26  ;;  %v7733_v57 = vpop.f32.mrf.mxu1 }
 0x2b7   : > { %8575 = vmatprep.mubr.f32.mxu1 %v12702_v12  ;;  %v7678_v30 = vpop.f32.mrf.mxu0 }
 0x2b8   : > { %v7679_v24 = vadd.f32 %v7678_v30, %v7677_v21  ;;  %v7734_v46 = vpop.f32.mrf.mxu1 }
 0x2b9   : > { %v7735_v52 = vadd.f32 %v7734_v46, %v7733_v57 }
 0x2ba   : > { %8576 = vmatmul.mubr.f32.gmra.mxu1 %v12726_v15  ;;  %v4492_v55 = vadd.f32 %v7679_v24, %v12888_v60 }
 0x2bb   : > { %8578 = vmatprep.mubr.f32.mxu1 %v12749_v48  ;;  %v12983_v20 = vadd.f32 %v7735_v52, %v4462_v59  ;;  %v7680_v19 = vpop.f32.mrf.mxu0  ;;  %v7736_v4 = vpop.f32.mrf.mxu1 }
 0x2bd   : > { %v7681_v50 = vpop.f32.mrf.mxu0  ;;  %v7737_v3 = vpop.f32.mrf.mxu1 }
 0x2be   : > { %8579 = vmatmul.mubr.f32.gmra.mxu1 %v12758_v42  ;;  %v7682_v26 = vadd.f32 %v7681_v50, %v7680_v19  ;;  %v7738_v12 = vadd.f32 %v7737_v3, %v7736_v4 }
 0x2c0   : > { %v4507_v54 = vadd.f32 %v7682_v26, %v12900_v61  ;;  %v12987_v36 = vadd.f32 %v7738_v12, %v4477_v18 }
 0x2c1   : > { %v7739_v6 = vpop.f32.mrf.mxu1  ;;  %v7777_v15 = vpop.f32.mrf.mxu0 }
 0x2c3   : > { %v7740_v8 = vpop.f32.mrf.mxu1  ;;  %v7778_v60 = vpop.f32.mrf.mxu0 }
 0x2c4   : > { %v7741_v40 = vadd.f32 %v7740_v8, %v7739_v6  ;;  %v7779_v48 = vadd.f32 %v7778_v60, %v7777_v15 }
 0x2c5   : > { %v7742_v58 = vpop.f32.mrf.mxu1  ;;  %v7780_v32 = vpop.f32.mrf.mxu0 }
 0x2c6   : > { %v4795_v10 = vadd.f32 %v7741_v40, %v4492_v55  ;;  %v4940_v44 = vadd.f32 %v7779_v48, %v12914_v16 }
 0x2c7   : > { %v7743_v31 = vpop.f32.mrf.mxu1  ;;  %v7781_v9 = vpop.f32.mrf.mxu0 }
 0x2c8   : > { %v7744_v42 = vadd.f32 %v7743_v31, %v7742_v58  ;;  %v7782_v1 = vadd.f32 %v7781_v9, %v7780_v32 }
 0x2c9   : > { %v7783_v17 = vpop.f32.mrf.mxu0  ;;  %v7839_v2 = vpop.f32.mrf.mxu1 }
 0x2ca   : > { %v4802_v61 = vadd.f32 %v7744_v42, %v4507_v54  ;;  %v4949_v56 = vadd.f32 %v7782_v1, %v12928_v51 }
 0x2cb   : > { %v7784_v29 = vpop.f32.mrf.mxu0  ;;  %v7840_v5 = vpop.f32.mrf.mxu1 }
 0x2cc   : > { %v7785_v34 = vadd.f32 %v7784_v29, %v7783_v17  ;;  %v7841_v43 = vadd.f32 %v7840_v5, %v7839_v2 }
 0x2ce   : > { %v4958_v39 = vadd.f32 %v7785_v34, %v12943_v27  ;;  %v12992_v33 = vadd.f32 %v7841_v43, %v4940_v44  ;;  %v7786_v45 = vpop.f32.mrf.mxu0  ;;  %v7842_v7 = vpop.f32.mrf.mxu1 }
 0x2d0   : > { %v7787_v16 = vpop.f32.mrf.mxu0  ;;  %v7843_v49 = vpop.f32.mrf.mxu1 }
 0x2d1   : > { %v7788_v37 = vadd.f32 %v7787_v16, %v7786_v45  ;;  %v7844_v47 = vadd.f32 %v7843_v49, %v7842_v7 }
 0x2d3   : > { %v4967_v62 = vadd.f32 %v7788_v37, %v12958_v28  ;;  %v12995_v22 = vadd.f32 %v7844_v47, %v4949_v56  ;;  %v7789_v35 = vpop.f32.mrf.mxu0  ;;  %v7845_v51 = vpop.f32.mrf.mxu1 }
 0x2d5   : > { %v7790_v0 = vpop.f32.mrf.mxu0  ;;  %v7846_v23 = vpop.f32.mrf.mxu1 }
 0x2d6   : > { %v7791_v59 = vadd.f32 %v7790_v0, %v7789_v35  ;;  %v7847_v13 = vadd.f32 %v7846_v23, %v7845_v51 }
 0x2d8   : > { %v4976_v27 = vadd.f32 %v7791_v59, %v12968_v53  ;;  %v12998_v63 = vadd.f32 %v7847_v13, %v4958_v39 }
 0x2d9   : > { %v7792_v38 = vpop.f32.mrf.mxu0  ;;  %v7848_v11 = vpop.f32.mrf.mxu1 }
 0x2db   : > { %v7793_v14 = vpop.f32.mrf.mxu0  ;;  %v7849_v25 = vpop.f32.mrf.mxu1 }
 0x2dc   : > { %v7794_v18 = vadd.f32 %v7793_v14, %v7792_v38  ;;  %v7850_v21 = vadd.f32 %v7849_v25, %v7848_v11 }
 0x2de   : > { %v4985_v28 = vadd.f32 %v7794_v18, %v12976_v41  ;;  %v13001_v57 = vadd.f32 %v7850_v21, %v4967_v62  ;;  %v7795_v30 = vpop.f32.mrf.mxu0 }
 0x2df   : > { %v7851_v24 = vpop.f32.mrf.mxu1 }
 0x2e0   : > { %v7796_v46 = vpop.f32.mrf.mxu0 }
 0x2e1   : > { %v7797_v52 = vadd.f32 %v7796_v46, %v7795_v30  ;;  %v7852_v55 = vpop.f32.mrf.mxu1 }
 0x2e2   : > { %v7853_v19 = vadd.f32 %v7852_v55, %v7851_v24 }
 0x2e3   : > { %v4994_v53 = vadd.f32 %v7797_v52, %v12983_v20 }
 0x2e4   : > { %v13004_v4 = vadd.f32 %v7853_v19, %v4976_v27  ;;  %v7798_v50 = vpop.f32.mrf.mxu0  ;;  %v7854_v3 = vpop.f32.mrf.mxu1 }
 0x2e6   : > { %v7799_v26 = vpop.f32.mrf.mxu0  ;;  %v7855_v12 = vpop.f32.mrf.mxu1 }
 0x2e7   : > { %v7800_v54 = vadd.f32 %v7799_v26, %v7798_v50  ;;  %v7856_v6 = vadd.f32 %v7855_v12, %v7854_v3 }
 0x2e9   : > { %v5003_v41 = vadd.f32 %v7800_v54, %v12987_v36  ;;  %v13007_v15 = vadd.f32 %v7856_v6, %v4985_v28  ;;  %v7801_v8 = vpop.f32.mrf.mxu0 }
 0x2ea   : > { %v7857_v60 = vpop.f32.mrf.mxu1 }
 0x2eb   : > { %v7802_v40 = vpop.f32.mrf.mxu0 }
 0x2ec   : > { %v7803_v48 = vadd.f32 %v7802_v40, %v7801_v8  ;;  %v7858_v58 = vpop.f32.mrf.mxu1 }
 0x2ed   : > { %v7859_v32 = vadd.f32 %v7858_v58, %v7857_v60 }
 0x2ee   : > { %v5012_v44 = vadd.f32 %v7803_v48, %v4795_v10 }
 0x2ef   : > { %v13009_v20 = vadd.f32 %v7859_v32, %v4994_v53  ;;  %v7804_v31 = vpop.f32.mrf.mxu0  ;;  %v7860_v9 = vpop.f32.mrf.mxu1 }
 0x2f1   : > { %v7805_v42 = vpop.f32.mrf.mxu0  ;;  %v7861_v1 = vpop.f32.mrf.mxu1 }
 0x2f2   : > { %v7806_v17 = vadd.f32 %v7805_v42, %v7804_v31  ;;  %v7862_v2 = vadd.f32 %v7861_v1, %v7860_v9 }
 0x2f4   : > { %v5021_v56 = vadd.f32 %v7806_v17, %v4802_v61  ;;  %v13011_v29 = vadd.f32 %v7862_v2, %v5003_v41 }
 0x2f5   : > { %v7863_v36 = vpop.f32.mrf.mxu1  ;;  %v7901_v5 = vpop.f32.mrf.mxu0 }
 0x2f7   : > { %v7864_v34 = vpop.f32.mrf.mxu1  ;;  %v7902_v43 = vpop.f32.mrf.mxu0 }
 0x2f8   : > { %v7865_v39 = vadd.f32 %v7864_v34, %v7863_v36  ;;  %v7903_v45 = vadd.f32 %v7902_v43, %v7901_v5 }
 0x2f9   : > { %v7866_v7 = vpop.f32.mrf.mxu1  ;;  %v13013_v16 = vpop.f32.mrf.mxu0 }
 0x2fa   : > { %v13015_v10 = vadd.f32 %v7865_v39, %v5012_v44  ;;  %v5396_v49 = vadd.f32 %v7903_v45, %v12992_v33 }
 0x2fb   : > { %v7867_v37 = vpop.f32.mrf.mxu1  ;;  %v13018_v47 = vpop.f32.mrf.mxu0 }
 0x2fc   : > { %v7868_v62 = vadd.f32 %v7867_v37, %v7866_v7 }
 0x2fd   : > { %v7907_v61 = vpop.f32.mrf.mxu0  ;;  %v7963_v35 = vpop.f32.mrf.mxu1 }
 0x2fe   : > { %v13020_v51 = vadd.f32 %v7868_v62, %v5021_v56 }
 0x2ff   : > { %v7908_v0 = vpop.f32.mrf.mxu0  ;;  %v7964_v23 = vpop.f32.mrf.mxu1 }
 0x300   : > { %v7909_v59 = vadd.f32 %v7908_v0, %v7907_v61  ;;  %v7965_v13 = vadd.f32 %v7964_v23, %v7963_v35 }
 0x301   : > { %v13022_v27 = vpop.f32.mrf.mxu0  ;;  %v13024_v38 = vpop.f32.mrf.mxu1 }
 0x302   : > { %v5410_v11 = vadd.f32 %v7909_v59, %v12998_v63  ;;  %v13027_v14 = vadd.f32 %v7965_v13, %v5396_v49 }
 0x303   : > { %v13029_v33 = vpop.f32.mrf.mxu0  ;;  %v13031_v25 = vpop.f32.mrf.mxu1 }
 0x305   : > { %v13033_v18 = vpop.f32.mrf.mxu0 }
 0x306   : > { %v7969_v21 = vpop.f32.mrf.mxu1 }
 0x307   : > { %v13035_v28 = vpop.f32.mrf.mxu0 }
 0x308   : > { %v7970_v30 = vpop.f32.mrf.mxu1 }
 0x309   : > { %v7971_v24 = vadd.f32 %v7970_v30, %v7969_v21 }
 0x30a   : > { %v13037_v46 = vpop.f32.mrf.mxu0  ;;  %v13039_v52 = vpop.f32.mrf.mxu1 }
 0x30b   : > { %v13041_v55 = vadd.f32 %v7971_v24, %v5410_v11 }
 0x30c   : > { %v13043_v63 = vpop.f32.mrf.mxu0  ;;  %v7973_v19 = vpop.f32.mrf.mxu1 }
 0x30e   : > { %v13045_v53 = vpop.f32.mrf.mxu0 }
 0x30f   : > { %v13047_v50 = vpop.f32.mrf.mxu1 }
 0x310   : > { %v13049_v3 = vpop.f32.mrf.mxu0 }
 0x311   : > { %v13051_v26 = vpop.f32.mrf.mxu1 }
 0x313   : > { %v13053_v12 = vpop.f32.mrf.mxu0  ;;  %v13055_v54 = vpop.f32.mrf.mxu1 }
 0x315   : > { %v13057_v6 = vpop.f32.mrf.mxu0  ;;  %v13059_v41 = vpop.f32.mrf.mxu1 }
 0x317   : > { %v13061_v8 = vpop.f32.mrf.mxu0 }
 0x318   : > { %v13063_v60 = vpop.f32.mrf.mxu1 }
 0x319   : > { %v13065_v40 = vpop.f32.mrf.mxu0 }
 0x31a   : > { %v13067_v48 = vpop.f32.mrf.mxu1 }
 0x31d   : > { %v13069_v58 = vpop.f32.mrf.mxu0  ;;  %v13071_v32 = vpop.f32.mrf.mxu1 }
 0x31f   : > { %v13073_v44 = vpop.f32.mrf.mxu0  ;;  %v13075_v31 = vpop.f32.mrf.mxu1 }
 0x322   : > { %v13077_v9 = vpop.f32.mrf.mxu1 }
 0x323   : > { %14819 = vst [vmem:[#allocation20_spill] sm:$0xff] %v13077_v9  ;;  %v8373_v42 = vpop.f32.mrf.mxu0 }
 0x324   : > { %v13079_v1 = vpop.f32.mrf.mxu1 }
 0x325   : > { %14820 = vst [vmem:[#allocation21_spill] sm:$0xff] %v13079_v1  ;;  %v5712_v17 = vpop.f32.mrf.mxu0 }
 0x327   : > { %v13081_v2 = vpop.f32.mrf.mxu1 }
 0x328   : > { %v13083_v56 = vpop.f32.mrf.mxu0 }
 0x329   : > { %v13085_v36 = vpop.f32.mrf.mxu1 }
 0x32a   : > { %v13087_v5 = vpop.f32.mrf.mxu0 }
 0x32d   : > { %v13089_v34 = vpop.f32.mrf.mxu0  ;;  %v8412_v43 = vpop.f32.mrf.mxu1 }
 0x32f   : > { %v5933_v39 = vpop.f32.mrf.mxu1  ;;  %v13091_v45 = vpop.f32.mrf.mxu0 }
 0x330   : > { %14821 = vst [vmem:[#allocation24_spill] sm:$0xff] %v13091_v45 }
 0x333   : > { %v13093_v7 = vpop.f32.mrf.mxu1  ;;  %v13095_v49 = vpop.f32.mrf.mxu0 }
 0x334   : > { %14822 = vst [vmem:[#allocation88_spill] sm:$0xff] %v13095_v49 }
 0x335   : > { %v13097_v37 = vpop.f32.mrf.mxu1  ;;  %v13099_v62 = vpop.f32.mrf.mxu0 }
 0x336   : > { %14823 = vst [vmem:[#allocation83_spill] sm:$0xff] %v13099_v62 }
 0x339   : > { %v13101_v61 = vpop.f32.mrf.mxu1  ;;  %v13105_v0 = vpop.f32.mrf.mxu0 }
 0x33a   : > { %14824 = vst [vmem:[#allocation14_spill] sm:$0xff] %v13101_v61  ;;  %14826 = vst [vmem:[#allocation13_spill] sm:$0xff] %v13105_v0 }
 0x33b   : > { %v13103_v35 = vpop.f32.mrf.mxu1  ;;  %v13109_v59 = vpop.f32.mrf.mxu0 }
 0x33c   : > { %14825 = vst [vmem:[#allocation44_spill] sm:$0xff] %v13103_v35  ;;  %14828 = vst [vmem:[#allocation33_spill] sm:$0xff] %v13109_v59 }
 0x33e   : > { %v13107_v23 = vpop.f32.mrf.mxu1 }
 0x33f   : > { %14827 = vst [vmem:[#allocation10_spill] sm:$0xff] %v13107_v23 }
 0x340   : > { %v13111_v11 = vpop.f32.mrf.mxu1 }
 0x341   : > { %14829 = vst [vmem:[#allocation35_spill] sm:$0xff] %v13111_v11 }
 0x343   : > { %v8451_v13 = vpop.f32.mrf.mxu0 }
 0x344   : > { %v13113_v30 = vpop.f32.mrf.mxu1 }
 0x345   : > { %v6083_v21 = vpop.f32.mrf.mxu0  ;;  %14830 = vst [vmem:[#allocation38_spill] sm:$0xff] %v13113_v30 }
 0x346   : > { %v13117_v62 = vpop.f32.mrf.mxu1 }
 0x347   : > { %14832 = vst [vmem:[#allocation66_spill] sm:$0xff] %v13117_v62  ;;  %v7906_v62 = vadd.f32 %v13018_v47, %v13013_v16  ;;  %v7918_v16 = vadd.f32 %v13043_v63, %v13037_v46 }
 0x349   : > { %v8454_v24 = vpop.f32.mrf.mxu0 }
 0x34b   : > { %v13115_v49 = vpop.f32.mrf.mxu0 }
 0x34c   : > { %14831 = vst [vmem:[#allocation92_spill] sm:$0xff] %v13115_v49 }
 0x34e   : > { %v8490_v1 = vpop.f32.mrf.mxu1  ;;  %v13119_v9 = vpop.f32.mrf.mxu0 }
 0x34f   : > { %14833 = vst [vmem:[#allocation90_spill] sm:$0xff] %v13119_v9  ;;  %v7968_v9 = vadd.f32 %v13031_v25, %v13024_v38 }
 0x350   : > { %v6231_v35 = vpop.f32.mrf.mxu1  ;;  %v13121_v0 = vpop.f32.mrf.mxu0 }
 0x351   : > { %14834 = vst [vmem:[#allocation97_spill] sm:$0xff] %v13121_v0 }
 0x354   : > { %v13123_v23 = vpop.f32.mrf.mxu1  ;;  %v13127_v61 = vpop.f32.mrf.mxu0 }
 0x355   : > { %14835 = vst [vmem:[#allocation54_spill] sm:$0xff] %v13123_v23  ;;  %14837 = vst [vmem:[#allocation46_spill] sm:$0xff] %v13127_v61  ;;  %v7912_v61 = vadd.f32 %v13029_v33, %v13022_v27  ;;  %v7977_v33 = vadd.f32 %v13051_v26, %v13047_v50  ;;  %v7983_v50 = vadd.f32 %v13067_v48, %v13063_v60 }
 0x356   : > { %v13125_v59 = vpop.f32.mrf.mxu1  ;;  %v13131_v30 = vpop.f32.mrf.mxu0  ;;  %v7930_v26 = vadd.f32 %v13073_v44, %v13069_v58  ;;  %v5733_v60 = vadd.f32 %v13087_v5, %v13041_v55  ;;  %v14841_v5 = vld [vmem:[#allocation24_spill] sm:$0xff] }
 0x357   : > { %14836 = vst [vmem:[#allocation42_spill] sm:$0xff] %v13125_v59  ;;  %14839 = vst [vmem:[#allocation12_spill] sm:$0xff] %v13131_v30  ;;  %v5403_v59 = vadd.f32 %v7906_v62, %v12995_v22  ;;  %v7915_v30 = vadd.f32 %v13035_v28, %v13033_v18  ;;  %v5417_v38 = vadd.f32 %v7912_v61, %v13001_v57  ;;  %v14842_v62 = vld [vmem:[#allocation14_spill] sm:$0xff] }
 0x358   : > { %v7921_v22 = vadd.f32 %v13049_v3, %v13045_v53  ;;  %v7924_v18 = vadd.f32 %v13057_v6, %v13053_v12  ;;  %v7980_v28 = vadd.f32 %v13059_v41, %v13055_v54  ;;  %v5431_v53 = vadd.f32 %v7918_v16, %v13007_v15  ;;  %v14847_v16 = vld [vmem:[#allocation88_spill] sm:$0xff] }
 0x359   : > { %v5424_v46 = vadd.f32 %v7915_v30, %v13004_v4  ;;  %v7927_v3 = vadd.f32 %v13065_v40, %v13061_v8  ;;  %v7986_v8 = vadd.f32 %v13075_v31, %v13071_v32  ;;  %v5946_v32 = vadd.f32 %v13097_v37, %v5733_v60  ;;  %v14843_v37 = vld [vmem:[#allocation92_spill] sm:$0xff]  ;;  %v14855_v60 = vld [vmem:[#allocation13_spill] sm:$0xff] }
 0x35a   : > { %v13129_v11 = vpop.f32.mrf.mxu1  ;;  %v13139_v49 = vpop.f32.mrf.mxu0  ;;  %v5438_v4 = vadd.f32 %v7921_v22, %v13009_v20  ;;  %v5445_v15 = vadd.f32 %v7924_v18, %v13011_v29  ;;  %v5598_v40 = vadd.f32 %v7980_v28, %v5431_v53  ;;  %v14848_v22 = vld [vmem:[#allocation44_spill] sm:$0xff]  ;;  %v14851_v53 = vld [vmem:[#allocation83_spill] sm:$0xff] }
 0x35b   : > { %14838 = vst [vmem:[#allocation49_spill] sm:$0xff] %v13129_v11  ;;  %v5570_v11 = vadd.f32 %v7968_v9, %v5403_v59  ;;  %v5591_v9 = vadd.f32 %v7977_v33, %v5424_v46  ;;  %v6098_v59 = vadd.f32 %v14843_v37, %v5946_v32 }
 0x35c   : > { %v13133_v45 = vpop.f32.mrf.mxu1  ;;  %v13149_v23 = vpop.f32.mrf.mxu0  ;;  %v5605_v29 = vadd.f32 %v7983_v50, %v5438_v4 }
 0x35d   : > { %14840 = vst [vmem:[#allocation27_spill] sm:$0xff] %v13133_v45  ;;  %v7974_v45 = vadd.f32 %v7973_v19, %v13039_v52  ;;  %v5723_v25 = vadd.f32 %v8373_v42, %v5570_v11  ;;  %v5713_v52 = vadd.f32 %v5712_v17, %v13027_v14  ;;  %v5452_v42 = vadd.f32 %v7927_v3, %v13015_v10 }
 0x35e   : > { %v5459_v17 = vadd.f32 %v7930_v26, %v13020_v51  ;;  %v5612_v10 = vadd.f32 %v7986_v8, %v5445_v15  ;;  %v14850_v28 = vld [vmem:[#allocation42_spill] sm:$0xff]  ;;  %v5773_v3 = vadd.f32 %v14851_v53, %v5605_v29 }
 0x35f   : > { %v5584_v63 = vadd.f32 %v7974_v45, %v5417_v38  ;;  %v5940_v57 = vadd.f32 %v8412_v43, %v5723_v25  ;;  %v5934_v54 = vadd.f32 %v5933_v39, %v5713_v52  ;;  %v6248_v46 = vadd.f32 %v14850_v28, %v6098_v59  ;;  %v14852_v26 = vld [vmem:[#allocation10_spill] sm:$0xff] }
 0x360   : > { %v13141_v0 = vpop.f32.mrf.mxu1  ;;  %v5783_v38 = vadd.f32 %v14847_v16, %v5612_v10 }
 0x361   : > { %v5743_v14 = vadd.f32 %v13083_v56, %v5584_v63  ;;  %v6091_v6 = vadd.f32 %v8451_v13, %v5940_v57  ;;  %v6084_v58 = vadd.f32 %v6083_v21, %v5934_v54  ;;  %v5763_v56 = vadd.f32 %v13089_v34, %v5598_v40  ;;  %v13196_v34 = vld [vmem:[%s13264_s4] ss:$0 sm:$0xff] }
 0x362   : > { %v13153_v47 = vpop.f32.mrf.mxu1  ;;  %v5976_v4 = vadd.f32 %v14852_v26, %v5783_v38  ;;  %v14854_v15 = vld [vmem:[#allocation49_spill] sm:$0xff] }
 0x363   : > { %v5952_v48 = vadd.f32 %v13093_v7, %v5743_v14  ;;  %v6240_v44 = vadd.f32 %v8490_v1, %v6091_v6  ;;  %v6232_v39 = vadd.f32 %v6231_v35, %v6084_v58  ;;  %v7992_v1 = vadd.f32 %v13085_v36, %v13081_v2  ;;  %v14844_v35 = vld [vmem:[#allocation54_spill] sm:$0xff]  ;;  %v14846_v2 = vld [vmem:[#allocation21_spill] sm:$0xff] }
 0x364   : > { %v5753_v7 = vadd.f32 %v14841_v5, %v5591_v9  ;;  %v5964_v51 = vadd.f32 %v14842_v62, %v5763_v56  ;;  %v14853_v14 = vld [vmem:[#allocation97_spill] sm:$0xff]  ;;  %v14860_v62 = vld [vmem:[#allocation38_spill] sm:$0xff] }
 0x365   : > { %v8529_v27 = vpop.f32.mrf.mxu0  ;;  %v13173_v12 = vpop.f32.mrf.mxu1  ;;  %v6105_v31 = vadd.f32 %v8454_v24, %v5952_v48  ;;  %v14845_v24 = vld [vmem:[#allocation20_spill] sm:$0xff]  ;;  %v5626_v50 = vadd.f32 %v7992_v1, %v5459_v17  ;;  %v14857_v17 = vld [vmem:[#allocation46_spill] sm:$0xff] }
 0x366   : > { %v6417_v45 = vadd.f32 %v8529_v27, %v6240_v44  ;;  %v7989_v36 = vadd.f32 %v14846_v2, %v14845_v24  ;;  %v5958_v25 = vadd.f32 %v14848_v22, %v5753_v7  ;;  %v14849_v27 = vld [vmem:[#allocation90_spill] sm:$0xff]  ;;  %v14856_v44 = vld [vmem:[#allocation35_spill] sm:$0xff]  ;;  %v6133_v29 = vadd.f32 %v14857_v17, %v5976_v4  ;;  %v14859_v7 = vld [vmem:[#allocation33_spill] sm:$0xff] }
 0x367   : > { %v6410_v19 = vpop.f32.mrf.mxu0  ;;  %v13186_v43 = vpop.f32.mrf.mxu1  ;;  %v6256_v13 = vadd.f32 %v14844_v35, %v6105_v31  ;;  %v6119_v33 = vadd.f32 %v14849_v27, %v5964_v51  ;;  %v5803_v48 = vadd.f32 %v14855_v60, %v5626_v50  ;;  %v5970_v56 = vadd.f32 %v14856_v44, %v5773_v3 }
 0x368   : > { %v6411_v11 = vadd.f32 %v6410_v19, %v6232_v39  ;;  %v6112_v54 = vadd.f32 %v14853_v14, %v5958_v25  ;;  %v5619_v58 = vadd.f32 %v7989_v36, %v5452_v42  ;;  %v14858_v39 = vld [vmem:[#allocation27_spill] sm:$0xff]  ;;  %v14861_v42 = vld [vmem:[#allocation12_spill] sm:$0xff]  ;;  %v6288_v59 = vadd.f32 %v13141_v0, %v6133_v29 }
 0x369   : > { %v8532_v41 = vpop.f32.mrf.mxu0  ;;  %v6272_v8 = vadd.f32 %v14854_v15, %v6119_v33  ;;  %v5988_v51 = vadd.f32 %v14860_v62, %v5803_v48 }
 0x36a   : > { %v6429_v52 = vadd.f32 %v8532_v41, %v6256_v13  ;;  %v5793_v10 = vadd.f32 %v14859_v7, %v5619_v58 }
 0x36b   : > { %v6422_v20 = vpop.f32.mrf.mxu0  ;;  %v6147_v24 = vadd.f32 %v13139_v49, %v5988_v51 }
 0x36c   : > { %v6423_v40 = vadd.f32 %v6422_v20, %v6248_v46 }
 0x36d   : > { %v8535_v55 = vpop.f32.mrf.mxu0  ;;  %v6304_v27 = vadd.f32 %v13173_v12, %v6147_v24 }
 0x36e   : > { %v8568_v61 = vpop.f32.mrf.mxu1  ;;  %v6441_v1 = vadd.f32 %v8535_v55, %v6272_v8 }
 0x36f   : > { %v6554_v21 = vadd.f32 %v8568_v61, %v6417_v45  ;;  %v6434_v30 = vpop.f32.mrf.mxu0  ;;  %v6264_v45 = vadd.f32 %v14858_v39, %v6112_v54  ;;  %v6126_v61 = vadd.f32 %v14861_v42, %v5970_v56 }
 0x370   : > { %v6547_v18 = vpop.f32.mrf.mxu1 }
 0x371   : > { %v6613_v63 = vadd.f32 %v13196_v34, %v6554_v21  ;;  %v6548_v57 = vadd.f32 %v6547_v18, %v6411_v11  ;;  %v8538_v19 = vpop.f32.mrf.mxu0  ;;  %v6435_v35 = vadd.f32 %v6434_v30, %v6264_v45  ;;  %v14862_v11 = vld [vmem:[#allocation66_spill] sm:$0xff]  ;;  %v6280_v16 = vadd.f32 %v13153_v47, %v6126_v61 }
 0x372   : > { %v8571_v6 = vpop.f32.mrf.mxu1  ;;  %v5982_v21 = vadd.f32 %v14862_v11, %v5793_v10  ;;  %v6453_v38 = vadd.f32 %v8538_v19, %v6288_v59 }
 0x373   : > { %6623 = vst [vmem:[%s13210_s13 + $0x8] sm:$0xff] %v6613_v63  ;;  %v6612_v9 = vadd.f32 %v13196_v34, %v6548_v57  ;;  %v6566_v41 = vadd.f32 %v8571_v6, %v6429_v52  ;;  %v6446_v32 = vpop.f32.mrf.mxu0 }
 0x374   : > { %v6559_v31 = vpop.f32.mrf.mxu1  ;;  %v6140_v30 = vadd.f32 %v13149_v23, %v5982_v21  ;;  %v6447_v33 = vadd.f32 %v6446_v32, %v6280_v16 }
 0x375   : > { %6622 = vst [vmem:[%s13210_s13] sm:$0xff] %v6612_v9  ;;  %v6615_v20 = vadd.f32 %v13196_v34, %v6566_v41  ;;  %v6560_v5 = vadd.f32 %v6559_v31, %v6423_v40  ;;  %v8541_v2 = vpop.f32.mrf.mxu0 }
 0x376   : > { %v8574_v37 = vpop.f32.mrf.mxu1  ;;  %v6296_v46 = vadd.f32 %v13186_v43, %v6140_v30  ;;  %v6465_v52 = vadd.f32 %v8541_v2, %v6304_v27 }
 0x377   : > { %6625 = vst [vmem:[%s13210_s13 + $0x18] sm:$0xff] %v6615_v20  ;;  %v6614_v13 = vadd.f32 %v13196_v34, %v6560_v5  ;;  %v6578_v55 = vadd.f32 %v8574_v37, %v6441_v1  ;;  %v6458_v28 = vpop.f32.mrf.mxu0 }
 0x378   : > { %v6571_v36 = vpop.f32.mrf.mxu1  ;;  %v6459_v19 = vadd.f32 %v6458_v28, %v6296_v46 }
 0x379   : > { %6624 = vst [vmem:[%s13210_s13 + $0x10] sm:$0xff] %v6614_v13  ;;  %v6617_v22 = vadd.f32 %v13196_v34, %v6578_v55  ;;  %v6572_v0 = vadd.f32 %v6571_v36, %v6435_v35 }
 0x37a   : > { %v8577_v25 = vpop.f32.mrf.mxu1 }
 0x37b   : > { %6627 = vst [vmem:[%s13210_s13 + $0x28] sm:$0xff] %v6617_v22  ;;  %v6616_v49 = vadd.f32 %v13196_v34, %v6572_v0  ;;  %v6590_v18 = vadd.f32 %v8577_v25, %v6453_v38 }
 0x37c   : > { %v6583_v47 = vpop.f32.mrf.mxu1 }
 0x37d   : > { %6626 = vst [vmem:[%s13210_s13 + $0x20] sm:$0xff] %v6616_v49  ;;  %v6619_v23 = vadd.f32 %v13196_v34, %v6590_v18  ;;  %v6584_v63 = vadd.f32 %v6583_v47, %v6447_v33 }
 0x37e   : > { %v8580_v57 = vpop.f32.mrf.mxu1 }
 0x37f   : > { %6629 = vst [vmem:[%s13210_s13 + $0x38] sm:$0xff] %v6619_v23  ;;  %v6618_v12 = vadd.f32 %v13196_v34, %v6584_v63  ;;  %v6602_v53 = vadd.f32 %v8580_v57, %v6465_v52 }
 0x380   : > { %v6595_v3 = vpop.f32.mrf.mxu1 }
 0x381   : > { %6628 = vst [vmem:[%s13210_s13 + $0x30] sm:$0xff] %v6618_v12  ;;  %v6621_v50 = vadd.f32 %v13196_v34, %v6602_v53  ;;  %v6596_v26 = vadd.f32 %v6595_v3, %v6459_v19 }
 0x383   : > { %6631 = vst [vmem:[%s13210_s13 + $0x48] sm:$0xff] %v6621_v50  ;;  %v6620_v43 = vadd.f32 %v13196_v34, %v6596_v26 }
 0x385   : > { %6630 = vst [vmem:[%s13210_s13 + $0x40] sm:$0xff] %v6620_v43 }
 0x386 PF: > { %s15_s20 = sadd.s32 1, %s8629_s20   ;;  %s14863_s18 = smov %s8625_s19 }
 0x387   : > { %p12_p5 = scmp.ge.s32.totalorder %s15_s20, 4   ;;  %s14864_s19 = smov %s14866_s21 }
 0x389   :  { %14 = sbr.rel (!%p12_p5) target bundleno = 2 (0x2), region = 73 }

</bundles_post_ra>
